<compile_context>
chip_gen: v7x
topology: tpu7x:2x2x1
jax: 0.10.0
libtpu: 0.0.40
codegen_flags: <defaults>
</compile_context>

<pallas_src>
import jax
import jax.numpy as jnp
from jax.experimental import pallas as pl
from jax.experimental.pallas import tpu as pltpu

NEG_SLOPE = 0.01      # nn.LeakyReLU() default negative_slope
BN_EPS = 1e-5         # nn.BatchNorm2d default eps
USE_BF16_MXU = True   # bf16 matmul operands (MXU-native), f32 accumulate/epilogue
MXU_DTYPE = jnp.bfloat16 if USE_BF16_MXU else jnp.float32


# ---------------------------------------------------------------------------
# In-kernel helpers (operate on jnp values + VMEM scratch refs)
# ---------------------------------------------------------------------------
def _zero_borders(pad_ref, h, w, c):
    """Zero the 1-pixel halo border of pad_ref[:, :h+2, :w+2, :c] (once per stage)."""
    zrow = jnp.zeros((1, 1, w + 2, c), jnp.float32)
    zcol = jnp.zeros((1, h, 1, c), jnp.float32)
    pad_ref[:, 0:1, 0:w + 2, 0:c] = zrow                       # top border
    pad_ref[:, h + 1:h + 2, 0:w + 2, 0:c] = zrow               # bottom border
    pad_ref[:, 1:h + 1, 0:1, 0:c] = zcol                       # left border
    pad_ref[:, 1:h + 1, w + 1:w + 2, 0:c] = zcol               # right border


def _conv3x3_bn_lrelu(x, w_ref, b_ref, pad_ref):
    """Fused 3x3 conv (pad=1) + folded BatchNorm + LeakyReLU.

    x:       (1, H, W, Cin)  f32 activation (channels on lanes)
    w_ref:   (9, Cin, Cout)  BN-folded, tap-major weights (MXU_DTYPE, no K pad)
    b_ref:   (1, Cout)       BN-folded bias (f32)
    pad_ref: VMEM halo scratch; borders are pre-zeroed by _zero_borders.

    Uses 9 per-tap MXU matmuls accumulated in f32 (no im2col scratch, no
    zero-padded K columns).
    """
    _, h, w, cin = x.shape
    cout = w_ref.shape[-1]
    m = h * w

    # interior of the halo-padded activation (borders already zero)
    pad_ref[:, 1:h + 1, 1:w + 1, 0:cin] = x

    acc = None
    for dy in range(3):
        for dx in range(3):
            t = dy * 3 + dx
            patch = pad_ref[:, dy:dy + h, dx:dx + w, 0:cin].reshape(m, cin)
            d = jnp.dot(patch.astype(MXU_DTYPE), w_ref[t],
                        preferred_element_type=jnp.float32)     # (m, cout) f32
            acc = d if acc is None else acc + d

    acc = acc + b_ref[...]
    acc = jnp.where(acc > 0, acc, NEG_SLOPE * acc)              # LeakyReLU(0.01)
    return acc.reshape(1, h, w, cout)


def _maxpool2x2(y):
    """MaxPool2d(kernel=2, stride=2) on an (1, H, W, C) value, fully in-kernel."""
    n, h, w, c = y.shape
    ho, wo = h // 2, w // 2
    # pool along W: pairs become the reduced axis (lane dim C unchanged)
    yw = jnp.max(y.reshape(n * h * wo, 2, c), axis=1)           # (n*h*wo, c)
    # pool along H: split row pairs into a leading dim, elementwise max
    m = yw.reshape(n, ho, 2, wo, c)
    return jnp.maximum(m[:, :, 0], m[:, :, 1])                  # (n, ho, wo, c)


# ---------------------------------------------------------------------------
# Fused encoder kernel: 5 stages (ConvBlock / DownBlock) per batch element
# ---------------------------------------------------------------------------
def _encoder_kernel(*refs):
    x_ref = refs[0]
    wb = refs[1:21]                 # (w1, b1, w2, b2) for each of the 5 stages
    out_refs = refs[21:26]          # x0 .. x4 feature maps (per-sample blocks)
    pad_ref = refs[26]              # halo-padded activation scratch

    x = x_ref[...]                                              # (1, H, W, Cin0)
    for s in range(5):
        if s > 0:
            x = _maxpool2x2(x)                  # DownBlock: MaxPool2d(2) then ConvBlock
        w1, b1, w2, b2 = wb[4 * s:4 * s + 4]
        h, w = x.shape[1], x.shape[2]
        # Zero the halo borders once per stage, wide enough for both convs
        # (conv2's Cin == stage Cout >= conv1's Cin); conv2 reuses them since
        # the convs only rewrite the interior.
        _zero_borders(pad_ref, h, w, max(x.shape[3], w2.shape[-1]))
        x = _conv3x3_bn_lrelu(x, w1, b1, pad_ref)
        # TODO(synk): nn.Dropout is identity in eval mode; training-mode RNG
        # dropout is intentionally not reproduced.
        x = _conv3x3_bn_lrelu(x, w2, b2, pad_ref)
        out_refs[s][...] = x.astype(out_refs[s].dtype)


# ---------------------------------------------------------------------------
# Wrapper: single pallas_call, NCHW <-> NHWC glue only
# ---------------------------------------------------------------------------
def _shared_block(arr):
    """Full-array block, same for every grid step (used for weights/biases)."""
    nd = arr.ndim
    return pl.BlockSpec(tuple(arr.shape), lambda b, _nd=nd: (0,) * _nd)


def encoder_forward(x_nchw, params):
    """params: dict name -> ((w1, b1), (w2, b2)); w* of shape (9, Cin, Cout)."""
    names = ('in_conv', 'down1', 'down2', 'down3', 'down4')
    flat, couts = [], []
    for name in names:
        (w1, b1), (w2, b2) = params[name]
        flat += [w1, b1, w2, b2]
        couts.append(w2.shape[-1])

    x = jnp.transpose(x_nchw, (0, 2, 3, 1))                     # NCHW -> NHWC
    n, h, w, cin = x.shape
    assert h % 16 == 0 and w % 16 == 0, "4 maxpool levels need H, W % 16 == 0"
    cmax = max([cin] + couts)

    # ---- static VMEM working-set check (per core / per grid step) ----
    pad_bytes = (h + 2) * (w + 2) * cmax * 4
    act_bytes = sum((h >> s) * (w >> s) * couts[s] * 4 for s in range(5))
    wgt_bytes = sum(int(a.size) * a.dtype.itemsize for a in flat)
    io_bytes = 2 * (h * w * cin * 4 + act_bytes)                # double-buffered blocks
    vmem_est = pad_bytes + 2 * act_bytes + wgt_bytes + io_bytes
    assert vmem_est < 24 * 1024 * 1024, (
        f"per-core VMEM working set ~{vmem_est / 2**20:.1f} MiB; add spatial "
        "row-block tiling (TODO(synk)) before running at this resolution")

    out_shapes = tuple(
        jax.ShapeDtypeStruct((n, h >> s, w >> s, couts[s]), x.dtype)
        for s in range(5))

    in_specs = [pl.BlockSpec((1, h, w, cin), lambda b: (b, 0, 0, 0))]
    in_specs += [_shared_block(a) for a in flat]
    out_specs = [pl.BlockSpec((1,) + shp.shape[1:], lambda b: (b, 0, 0, 0))
                 for shp in out_shapes]

    outs = pl.pallas_call(
        _encoder_kernel,
        out_shape=out_shapes,
        grid=(n,),                                              # batch -> megacore on v7x
        in_specs=in_specs,
        out_specs=out_specs,
        scratch_shapes=[
            pltpu.VMEM((1, h + 2, w + 2, cmax), jnp.float32),   # halo-padded activation
        ],
        compiler_params=pltpu.CompilerParams(
            dimension_semantics=("parallel",),
            vmem_limit_bytes=32 * 1024 * 1024),
    )(x, *flat)

    # back to NCHW to mirror the PyTorch module's outputs (tiny XLA transposes)
    return [jnp.transpose(o, (0, 3, 1, 2)) for o in outs]


# ---------------------------------------------------------------------------
# Parameter setup (deterministic; eval-mode BN folded into the conv)
# ---------------------------------------------------------------------------
def init_conv_bn(key, cin, cout):
    k1, k2, k3, k4 = jax.random.split(key, 4)
    fan_in = cin * 9
    w = jax.random.normal(k1, (3, 3, cin, cout), jnp.float32) / jnp.sqrt(fan_in)
    bias = 0.01 * jax.random.normal(k2, (cout,), jnp.float32)
    gamma = 1.0 + 0.1 * jax.random.normal(k3, (cout,), jnp.float32)
    beta = 0.1 * jax.random.normal(k4, (cout,), jnp.float32)
    # Eval-mode BN with freshly initialized running stats: mean=0, var=1.
    scale = gamma / jnp.sqrt(1.0 + BN_EPS)
    w_eff = (w * scale).reshape(9, cin, cout).astype(MXU_DTYPE)  # tap-major, no K pad
    b_eff = (bias * scale + beta).reshape(1, cout)               # f32 epilogue bias
    return w_eff, b_eff


# ---------------------------------------------------------------------------
if __name__ == "__main__":
    cfg = {
        'nb_channels': 4,
        'feature_chns': [8, 16, 32, 64, 64],
        'nb_classes': 2,
        'bilinear': True,
        'dropout': [0.05, 0.1, 0.2, 0.3, 0.5],
    }
    assert len(cfg['feature_chns']) == 5

    key = jax.random.PRNGKey(0)
    key, xk = jax.random.split(key)
    x = jax.random.normal(xk, (2, cfg['nb_channels'], 16, 16), jnp.float32)

    ft = cfg['feature_chns']
    stage_chans = [(cfg['nb_channels'], ft[0]), (ft[0], ft[1]), (ft[1], ft[2]),
                   (ft[2], ft[3]), (ft[3], ft[4])]
    names = ['in_conv', 'down1', 'down2', 'down3', 'down4']
    params = {}
    for name, (cin, cout) in zip(names, stage_chans):
        key, k1, k2 = jax.random.split(key, 3)
        params[name] = (init_conv_bn(k1, cin, cout),   # conv1 + bn1 (folded)
                        init_conv_bn(k2, cout, cout))  # conv2 + bn2 (folded)

    fwd = jax.jit(encoder_forward)
    outs = jax.block_until_ready(fwd(x, params))

    expected = [(2, ft[0], 16, 16), (2, ft[1], 8, 8), (2, ft[2], 4, 4),
                (2, ft[3], 2, 2), (2, ft[4], 1, 1)]
    got = [tuple(o.shape) for o in outs]
    assert got == expected, f"shape mismatch: {got} vs {expected}"
    assert all(bool(jnp.all(jnp.isfinite(o))) for o in outs)
    print("KERNEL_OK")
</pallas_src>

<mosaic_0001>
module attributes {stable_mosaic.version = 11 : i64} {
  func.func @_encoder_kernel(%arg0: i32, %arg1: memref<1x16x16x4xf32, #tpu.memory_space<vmem>>, %arg2: memref<9x4x8xbf16, #tpu.memory_space<vmem>>, %arg3: memref<1x8xf32, #tpu.memory_space<vmem>>, %arg4: memref<9x8x8xbf16, #tpu.memory_space<vmem>>, %arg5: memref<1x8xf32, #tpu.memory_space<vmem>>, %arg6: memref<9x8x16xbf16, #tpu.memory_space<vmem>>, %arg7: memref<1x16xf32, #tpu.memory_space<vmem>>, %arg8: memref<9x16x16xbf16, #tpu.memory_space<vmem>>, %arg9: memref<1x16xf32, #tpu.memory_space<vmem>>, %arg10: memref<9x16x32xbf16, #tpu.memory_space<vmem>>, %arg11: memref<1x32xf32, #tpu.memory_space<vmem>>, %arg12: memref<9x32x32xbf16, #tpu.memory_space<vmem>>, %arg13: memref<1x32xf32, #tpu.memory_space<vmem>>, %arg14: memref<9x32x64xbf16, #tpu.memory_space<vmem>>, %arg15: memref<1x64xf32, #tpu.memory_space<vmem>>, %arg16: memref<9x64x64xbf16, #tpu.memory_space<vmem>>, %arg17: memref<1x64xf32, #tpu.memory_space<vmem>>, %arg18: memref<9x64x64xbf16, #tpu.memory_space<vmem>>, %arg19: memref<1x64xf32, #tpu.memory_space<vmem>>, %arg20: memref<9x64x64xbf16, #tpu.memory_space<vmem>>, %arg21: memref<1x64xf32, #tpu.memory_space<vmem>>, %arg22: memref<1x16x16x8xf32, #tpu.memory_space<vmem>>, %arg23: memref<1x8x8x16xf32, #tpu.memory_space<vmem>>, %arg24: memref<1x4x4x32xf32, #tpu.memory_space<vmem>>, %arg25: memref<1x2x2x64xf32, #tpu.memory_space<vmem>>, %arg26: memref<1x1x1x64xf32, #tpu.memory_space<vmem>>, %arg27: memref<1x18x18x64xf32, #tpu.memory_space<vmem>>) attributes {dimension_semantics = [#tpu.dimension_semantics<parallel>], iteration_bounds = array<i64: 2>, scalar_prefetch = 0 : i64, scratch_operands = 1 : i64, tpu.core_type = #tpu.core_type<tc>, window_params = [{transform_indices = @transform_0, window_bounds = array<i64: 1, 16, 16, 4>}, {pipeline_mode = #tpu.pipeline_mode<synchronous>, transform_indices = @transform_1, window_bounds = array<i64: 9, 4, 8>}, {pipeline_mode = #tpu.pipeline_mode<synchronous>, transform_indices = @transform_2, window_bounds = array<i64: 1, 8>}, {pipeline_mode = #tpu.pipeline_mode<synchronous>, transform_indices = @transform_3, window_bounds = array<i64: 9, 8, 8>}, {pipeline_mode = #tpu.pipeline_mode<synchronous>, transform_indices = @transform_4, window_bounds = array<i64: 1, 8>}, {pipeline_mode = #tpu.pipeline_mode<synchronous>, transform_indices = @transform_5, window_bounds = array<i64: 9, 8, 16>}, {pipeline_mode = #tpu.pipeline_mode<synchronous>, transform_indices = @transform_6, window_bounds = array<i64: 1, 16>}, {pipeline_mode = #tpu.pipeline_mode<synchronous>, transform_indices = @transform_7, window_bounds = array<i64: 9, 16, 16>}, {pipeline_mode = #tpu.pipeline_mode<synchronous>, transform_indices = @transform_8, window_bounds = array<i64: 1, 16>}, {pipeline_mode = #tpu.pipeline_mode<synchronous>, transform_indices = @transform_9, window_bounds = array<i64: 9, 16, 32>}, {pipeline_mode = #tpu.pipeline_mode<synchronous>, transform_indices = @transform_10, window_bounds = array<i64: 1, 32>}, {pipeline_mode = #tpu.pipeline_mode<synchronous>, transform_indices = @transform_11, window_bounds = array<i64: 9, 32, 32>}, {pipeline_mode = #tpu.pipeline_mode<synchronous>, transform_indices = @transform_12, window_bounds = array<i64: 1, 32>}, {pipeline_mode = #tpu.pipeline_mode<synchronous>, transform_indices = @transform_13, window_bounds = array<i64: 9, 32, 64>}, {pipeline_mode = #tpu.pipeline_mode<synchronous>, transform_indices = @transform_14, window_bounds = array<i64: 1, 64>}, {pipeline_mode = #tpu.pipeline_mode<synchronous>, transform_indices = @transform_15, window_bounds = array<i64: 9, 64, 64>}, {pipeline_mode = #tpu.pipeline_mode<synchronous>, transform_indices = @transform_16, window_bounds = array<i64: 1, 64>}, {pipeline_mode = #tpu.pipeline_mode<synchronous>, transform_indices = @transform_17, window_bounds = array<i64: 9, 64, 64>}, {pipeline_mode = #tpu.pipeline_mode<synchronous>, transform_indices = @transform_18, window_bounds = array<i64: 1, 64>}, {pipeline_mode = #tpu.pipeline_mode<synchronous>, transform_indices = @transform_19, window_bounds = array<i64: 9, 64, 64>}, {pipeline_mode = #tpu.pipeline_mode<synchronous>, transform_indices = @transform_20, window_bounds = array<i64: 1, 64>}, {transform_indices = @transform_21, window_bounds = array<i64: 1, 16, 16, 8>}, {transform_indices = @transform_22, window_bounds = array<i64: 1, 8, 8, 16>}, {transform_indices = @transform_23, window_bounds = array<i64: 1, 4, 4, 32>}, {transform_indices = @transform_24, window_bounds = array<i64: 1, 2, 2, 64>}, {transform_indices = @transform_25, window_bounds = array<i64: 1, 1, 1, 64>}]} {
    %c0 = arith.constant 0 : index
    %c0_0 = arith.constant 0 : index
    %c0_1 = arith.constant 0 : index
    %c0_2 = arith.constant 0 : index
    %0 = vector.load %arg1[%c0, %c0_0, %c0_1, %c0_2] : memref<1x16x16x4xf32, #tpu.memory_space<vmem>>, vector<1x16x16x4xf32>
    %cst = arith.constant 0.000000e+00 : f32
    %1 = vector.broadcast %cst : f32 to vector<1x1x18x8xf32>
    %cst_3 = arith.constant 0.000000e+00 : f32
    %2 = vector.broadcast %cst_3 : f32 to vector<1x16x1x8xf32>
    %c0_4 = arith.constant 0 : index
    %c0_5 = arith.constant 0 : index
    %c0_6 = arith.constant 0 : index
    %c0_7 = arith.constant 0 : index
    %3 = vector.load %arg27[%c0_4, %c0_5, %c0_6, %c0_7] : memref<1x18x18x64xf32, #tpu.memory_space<vmem>>, vector<1x1x18x8xf32>
    tpu.vector_store %arg27[%c0_4, %c0_5, %c0_6, %c0_7], %1 {strides = array<i32>} : memref<1x18x18x64xf32, #tpu.memory_space<vmem>>, vector<1x1x18x8xf32>,
    %c0_8 = arith.constant 0 : index
    %c17 = arith.constant 17 : index
    %c0_9 = arith.constant 0 : index
    %c0_10 = arith.constant 0 : index
    %4 = vector.load %arg27[%c0_8, %c17, %c0_9, %c0_10] : memref<1x18x18x64xf32, #tpu.memory_space<vmem>>, vector<1x1x18x8xf32>
    tpu.vector_store %arg27[%c0_8, %c17, %c0_9, %c0_10], %1 {strides = array<i32>} : memref<1x18x18x64xf32, #tpu.memory_space<vmem>>, vector<1x1x18x8xf32>,
    %c0_11 = arith.constant 0 : index
    %c1 = arith.constant 1 : index
    %c0_12 = arith.constant 0 : index
    %c0_13 = arith.constant 0 : index
    %5 = vector.load %arg27[%c0_11, %c1, %c0_12, %c0_13] : memref<1x18x18x64xf32, #tpu.memory_space<vmem>>, vector<1x16x1x8xf32>
    tpu.vector_store %arg27[%c0_11, %c1, %c0_12, %c0_13], %2 {strides = array<i32>} : memref<1x18x18x64xf32, #tpu.memory_space<vmem>>, vector<1x16x1x8xf32>,
    %c0_14 = arith.constant 0 : index
    %c1_15 = arith.constant 1 : index
    %c17_16 = arith.constant 17 : index
    %c0_17 = arith.constant 0 : index
    %6 = vector.load %arg27[%c0_14, %c1_15, %c17_16, %c0_17] : memref<1x18x18x64xf32, #tpu.memory_space<vmem>>, vector<1x16x1x8xf32>
    tpu.vector_store %arg27[%c0_14, %c1_15, %c17_16, %c0_17], %2 {strides = array<i32>} : memref<1x18x18x64xf32, #tpu.memory_space<vmem>>, vector<1x16x1x8xf32>,
    %c0_18 = arith.constant 0 : index
    %c1_19 = arith.constant 1 : index
    %c1_20 = arith.constant 1 : index
    %c0_21 = arith.constant 0 : index
    %7 = vector.load %arg27[%c0_18, %c1_19, %c1_20, %c0_21] : memref<1x18x18x64xf32, #tpu.memory_space<vmem>>, vector<1x16x16x4xf32>
    tpu.vector_store %arg27[%c0_18, %c1_19, %c1_20, %c0_21], %0 {strides = array<i32>} : memref<1x18x18x64xf32, #tpu.memory_space<vmem>>, vector<1x16x16x4xf32>,
    %c0_22 = arith.constant 0 : index
    %c0_23 = arith.constant 0 : index
    %c0_24 = arith.constant 0 : index
    %c0_25 = arith.constant 0 : index
    %8 = vector.load %arg27[%c0_22, %c0_23, %c0_24, %c0_25] : memref<1x18x18x64xf32, #tpu.memory_space<vmem>>, vector<1x16x16x4xf32>
    %9 = vector.shape_cast %8 : vector<1x16x16x4xf32> to vector<256x4xf32>
    %10 = arith.truncf %9 : vector<256x4xf32> to vector<256x4xbf16>
    %c0_26 = arith.constant 0 : index
    %c0_27 = arith.constant 0 : index
    %c0_28 = arith.constant 0 : index
    %11 = vector.load %arg2[%c0_26, %c0_27, %c0_28] : memref<9x4x8xbf16, #tpu.memory_space<vmem>>, vector<1x4x8xbf16>
    %12 = vector.shape_cast %11 : vector<1x4x8xbf16> to vector<4x8xbf16>
    %cst_29 = arith.constant dense<0.000000e+00> : vector<256x8xf32>
    %13 = tpu.matmul %10, %12, %cst_29 {dimension_numbers = #tpu.dot_dimension_numbers<[1], [0], [0], [1], [0, 0, 1, 1], [], []>} : vector<256x4xbf16>, vector<4x8xbf16>, vector<256x8xf32> -> vector<256x8xf32>
    %c0_30 = arith.constant 0 : index
    %c0_31 = arith.constant 0 : index
    %c1_32 = arith.constant 1 : index
    %c0_33 = arith.constant 0 : index
    %14 = vector.load %arg27[%c0_30, %c0_31, %c1_32, %c0_33] : memref<1x18x18x64xf32, #tpu.memory_space<vmem>>, vector<1x16x16x4xf32>
    %15 = vector.shape_cast %14 : vector<1x16x16x4xf32> to vector<256x4xf32>
    %16 = arith.truncf %15 : vector<256x4xf32> to vector<256x4xbf16>
    %c1_34 = arith.constant 1 : index
    %c0_35 = arith.constant 0 : index
    %c0_36 = arith.constant 0 : index
    %17 = vector.load %arg2[%c1_34, %c0_35, %c0_36] : memref<9x4x8xbf16, #tpu.memory_space<vmem>>, vector<1x4x8xbf16>
    %18 = vector.shape_cast %17 : vector<1x4x8xbf16> to vector<4x8xbf16>
    %cst_37 = arith.constant dense<0.000000e+00> : vector<256x8xf32>
    %19 = tpu.matmul %16, %18, %cst_37 {dimension_numbers = #tpu.dot_dimension_numbers<[1], [0], [0], [1], [0, 0, 1, 1], [], []>} : vector<256x4xbf16>, vector<4x8xbf16>, vector<256x8xf32> -> vector<256x8xf32>
    %20 = arith.addf %13, %19 : vector<256x8xf32>
    %c0_38 = arith.constant 0 : index
    %c0_39 = arith.constant 0 : index
    %c2 = arith.constant 2 : index
    %c0_40 = arith.constant 0 : index
    %21 = vector.load %arg27[%c0_38, %c0_39, %c2, %c0_40] : memref<1x18x18x64xf32, #tpu.memory_space<vmem>>, vector<1x16x16x4xf32>
    %22 = vector.shape_cast %21 : vector<1x16x16x4xf32> to vector<256x4xf32>
    %23 = arith.truncf %22 : vector<256x4xf32> to vector<256x4xbf16>
    %c2_41 = arith.constant 2 : index
    %c0_42 = arith.constant 0 : index
    %c0_43 = arith.constant 0 : index
    %24 = vector.load %arg2[%c2_41, %c0_42, %c0_43] : memref<9x4x8xbf16, #tpu.memory_space<vmem>>, vector<1x4x8xbf16>
    %25 = vector.shape_cast %24 : vector<1x4x8xbf16> to vector<4x8xbf16>
    %cst_44 = arith.constant dense<0.000000e+00> : vector<256x8xf32>
    %26 = tpu.matmul %23, %25, %cst_44 {dimension_numbers = #tpu.dot_dimension_numbers<[1], [0], [0], [1], [0, 0, 1, 1], [], []>} : vector<256x4xbf16>, vector<4x8xbf16>, vector<256x8xf32> -> vector<256x8xf32>
    %27 = arith.addf %20, %26 : vector<256x8xf32>
    %c0_45 = arith.constant 0 : index
    %c1_46 = arith.constant 1 : index
    %c0_47 = arith.constant 0 : index
    %c0_48 = arith.constant 0 : index
    %28 = vector.load %arg27[%c0_45, %c1_46, %c0_47, %c0_48] : memref<1x18x18x64xf32, #tpu.memory_space<vmem>>, vector<1x16x16x4xf32>
    %29 = vector.shape_cast %28 : vector<1x16x16x4xf32> to vector<256x4xf32>
    %30 = arith.truncf %29 : vector<256x4xf32> to vector<256x4xbf16>
    %c3 = arith.constant 3 : index
    %c0_49 = arith.constant 0 : index
    %c0_50 = arith.constant 0 : index
    %31 = vector.load %arg2[%c3, %c0_49, %c0_50] : memref<9x4x8xbf16, #tpu.memory_space<vmem>>, vector<1x4x8xbf16>
    %32 = vector.shape_cast %31 : vector<1x4x8xbf16> to vector<4x8xbf16>
    %cst_51 = arith.constant dense<0.000000e+00> : vector<256x8xf32>
    %33 = tpu.matmul %30, %32, %cst_51 {dimension_numbers = #tpu.dot_dimension_numbers<[1], [0], [0], [1], [0, 0, 1, 1], [], []>} : vector<256x4xbf16>, vector<4x8xbf16>, vector<256x8xf32> -> vector<256x8xf32>
    %34 = arith.addf %27, %33 : vector<256x8xf32>
    %c0_52 = arith.constant 0 : index
    %c1_53 = arith.constant 1 : index
    %c1_54 = arith.constant 1 : index
    %c0_55 = arith.constant 0 : index
    %35 = vector.load %arg27[%c0_52, %c1_53, %c1_54, %c0_55] : memref<1x18x18x64xf32, #tpu.memory_space<vmem>>, vector<1x16x16x4xf32>
    %36 = vector.shape_cast %35 : vector<1x16x16x4xf32> to vector<256x4xf32>
    %37 = arith.truncf %36 : vector<256x4xf32> to vector<256x4xbf16>
    %c4 = arith.constant 4 : index
    %c0_56 = arith.constant 0 : index
    %c0_57 = arith.constant 0 : index
    %38 = vector.load %arg2[%c4, %c0_56, %c0_57] : memref<9x4x8xbf16, #tpu.memory_space<vmem>>, vector<1x4x8xbf16>
    %39 = vector.shape_cast %38 : vector<1x4x8xbf16> to vector<4x8xbf16>
    %cst_58 = arith.constant dense<0.000000e+00> : vector<256x8xf32>
    %40 = tpu.matmul %37, %39, %cst_58 {dimension_numbers = #tpu.dot_dimension_numbers<[1], [0], [0], [1], [0, 0, 1, 1], [], []>} : vector<256x4xbf16>, vector<4x8xbf16>, vector<256x8xf32> -> vector<256x8xf32>
    %41 = arith.addf %34, %40 : vector<256x8xf32>
    %c0_59 = arith.constant 0 : index
    %c1_60 = arith.constant 1 : index
    %c2_61 = arith.constant 2 : index
    %c0_62 = arith.constant 0 : index
    %42 = vector.load %arg27[%c0_59, %c1_60, %c2_61, %c0_62] : memref<1x18x18x64xf32, #tpu.memory_space<vmem>>, vector<1x16x16x4xf32>
    %43 = vector.shape_cast %42 : vector<1x16x16x4xf32> to vector<256x4xf32>
    %44 = arith.truncf %43 : vector<256x4xf32> to vector<256x4xbf16>
    %c5 = arith.constant 5 : index
    %c0_63 = arith.constant 0 : index
    %c0_64 = arith.constant 0 : index
    %45 = vector.load %arg2[%c5, %c0_63, %c0_64] : memref<9x4x8xbf16, #tpu.memory_space<vmem>>, vector<1x4x8xbf16>
    %46 = vector.shape_cast %45 : vector<1x4x8xbf16> to vector<4x8xbf16>
    %cst_65 = arith.constant dense<0.000000e+00> : vector<256x8xf32>
    %47 = tpu.matmul %44, %46, %cst_65 {dimension_numbers = #tpu.dot_dimension_numbers<[1], [0], [0], [1], [0, 0, 1, 1], [], []>} : vector<256x4xbf16>, vector<4x8xbf16>, vector<256x8xf32> -> vector<256x8xf32>
    %48 = arith.addf %41, %47 : vector<256x8xf32>
    %c0_66 = arith.constant 0 : index
    %c2_67 = arith.constant 2 : index
    %c0_68 = arith.constant 0 : index
    %c0_69 = arith.constant 0 : index
    %49 = vector.load %arg27[%c0_66, %c2_67, %c0_68, %c0_69] : memref<1x18x18x64xf32, #tpu.memory_space<vmem>>, vector<1x16x16x4xf32>
    %50 = vector.shape_cast %49 : vector<1x16x16x4xf32> to vector<256x4xf32>
    %51 = arith.truncf %50 : vector<256x4xf32> to vector<256x4xbf16>
    %c6 = arith.constant 6 : index
    %c0_70 = arith.constant 0 : index
    %c0_71 = arith.constant 0 : index
    %52 = vector.load %arg2[%c6, %c0_70, %c0_71] : memref<9x4x8xbf16, #tpu.memory_space<vmem>>, vector<1x4x8xbf16>
    %53 = vector.shape_cast %52 : vector<1x4x8xbf16> to vector<4x8xbf16>
    %cst_72 = arith.constant dense<0.000000e+00> : vector<256x8xf32>
    %54 = tpu.matmul %51, %53, %cst_72 {dimension_numbers = #tpu.dot_dimension_numbers<[1], [0], [0], [1], [0, 0, 1, 1], [], []>} : vector<256x4xbf16>, vector<4x8xbf16>, vector<256x8xf32> -> vector<256x8xf32>
    %55 = arith.addf %48, %54 : vector<256x8xf32>
    %c0_73 = arith.constant 0 : index
    %c2_74 = arith.constant 2 : index
    %c1_75 = arith.constant 1 : index
    %c0_76 = arith.constant 0 : index
    %56 = vector.load %arg27[%c0_73, %c2_74, %c1_75, %c0_76] : memref<1x18x18x64xf32, #tpu.memory_space<vmem>>, vector<1x16x16x4xf32>
    %57 = vector.shape_cast %56 : vector<1x16x16x4xf32> to vector<256x4xf32>
    %58 = arith.truncf %57 : vector<256x4xf32> to vector<256x4xbf16>
    %c7 = arith.constant 7 : index
    %c0_77 = arith.constant 0 : index
    %c0_78 = arith.constant 0 : index
    %59 = vector.load %arg2[%c7, %c0_77, %c0_78] : memref<9x4x8xbf16, #tpu.memory_space<vmem>>, vector<1x4x8xbf16>
    %60 = vector.shape_cast %59 : vector<1x4x8xbf16> to vector<4x8xbf16>
    %cst_79 = arith.constant dense<0.000000e+00> : vector<256x8xf32>
    %61 = tpu.matmul %58, %60, %cst_79 {dimension_numbers = #tpu.dot_dimension_numbers<[1], [0], [0], [1], [0, 0, 1, 1], [], []>} : vector<256x4xbf16>, vector<4x8xbf16>, vector<256x8xf32> -> vector<256x8xf32>
    %62 = arith.addf %55, %61 : vector<256x8xf32>
    %c0_80 = arith.constant 0 : index
    %c2_81 = arith.constant 2 : index
    %c2_82 = arith.constant 2 : index
    %c0_83 = arith.constant 0 : index
    %63 = vector.load %arg27[%c0_80, %c2_81, %c2_82, %c0_83] : memref<1x18x18x64xf32, #tpu.memory_space<vmem>>, vector<1x16x16x4xf32>
    %64 = vector.shape_cast %63 : vector<1x16x16x4xf32> to vector<256x4xf32>
    %65 = arith.truncf %64 : vector<256x4xf32> to vector<256x4xbf16>
    %c8 = arith.constant 8 : index
    %c0_84 = arith.constant 0 : index
    %c0_85 = arith.constant 0 : index
    %66 = vector.load %arg2[%c8, %c0_84, %c0_85] : memref<9x4x8xbf16, #tpu.memory_space<vmem>>, vector<1x4x8xbf16>
    %67 = vector.shape_cast %66 : vector<1x4x8xbf16> to vector<4x8xbf16>
    %cst_86 = arith.constant dense<0.000000e+00> : vector<256x8xf32>
    %68 = tpu.matmul %65, %67, %cst_86 {dimension_numbers = #tpu.dot_dimension_numbers<[1], [0], [0], [1], [0, 0, 1, 1], [], []>} : vector<256x4xbf16>, vector<4x8xbf16>, vector<256x8xf32> -> vector<256x8xf32>
    %69 = arith.addf %62, %68 : vector<256x8xf32>
    %c0_87 = arith.constant 0 : index
    %c0_88 = arith.constant 0 : index
    %70 = vector.load %arg3[%c0_87, %c0_88] : memref<1x8xf32, #tpu.memory_space<vmem>>, vector<1x8xf32>
    %71 = vector.broadcast %70 : vector<1x8xf32> to vector<256x8xf32>
    %72 = arith.addf %69, %71 : vector<256x8xf32>
    %cst_89 = arith.constant 0.000000e+00 : f32
    %73 = vector.broadcast %cst_89 : f32 to vector<256x8xf32>
    %74 = arith.cmpf ogt, %72, %73 : vector<256x8xf32>
    %cst_90 = arith.constant 0.00999999977 : f32
    %75 = vector.broadcast %cst_90 : f32 to vector<256x8xf32>
    %76 = arith.mulf %75, %72 : vector<256x8xf32>
    %77 = arith.select %74, %72, %76 : vector<256x8xi1>, vector<256x8xf32>
    %78 = vector.shape_cast %77 : vector<256x8xf32> to vector<1x16x16x8xf32>
    %c0_91 = arith.constant 0 : index
    %c1_92 = arith.constant 1 : index
    %c1_93 = arith.constant 1 : index
    %c0_94 = arith.constant 0 : index
    %79 = vector.load %arg27[%c0_91, %c1_92, %c1_93, %c0_94] : memref<1x18x18x64xf32, #tpu.memory_space<vmem>>, vector<1x16x16x8xf32>
    tpu.vector_store %arg27[%c0_91, %c1_92, %c1_93, %c0_94], %78 {strides = array<i32>} : memref<1x18x18x64xf32, #tpu.memory_space<vmem>>, vector<1x16x16x8xf32>,
    %c0_95 = arith.constant 0 : index
    %c0_96 = arith.constant 0 : index
    %c0_97 = arith.constant 0 : index
    %c0_98 = arith.constant 0 : index
    %80 = vector.load %arg27[%c0_95, %c0_96, %c0_97, %c0_98] : memref<1x18x18x64xf32, #tpu.memory_space<vmem>>, vector<1x16x16x8xf32>
    %81 = vector.shape_cast %80 : vector<1x16x16x8xf32> to vector<256x8xf32>
    %82 = arith.truncf %81 : vector<256x8xf32> to vector<256x8xbf16>
    %c0_99 = arith.constant 0 : index
    %c0_100 = arith.constant 0 : index
    %c0_101 = arith.constant 0 : index
    %83 = vector.load %arg4[%c0_99, %c0_100, %c0_101] : memref<9x8x8xbf16, #tpu.memory_space<vmem>>, vector<1x8x8xbf16>
    %84 = vector.shape_cast %83 : vector<1x8x8xbf16> to vector<8x8xbf16>
    %cst_102 = arith.constant dense<0.000000e+00> : vector<256x8xf32>
    %85 = tpu.matmul %82, %84, %cst_102 {dimension_numbers = #tpu.dot_dimension_numbers<[1], [0], [0], [1], [0, 0, 1, 1], [], []>} : vector<256x8xbf16>, vector<8x8xbf16>, vector<256x8xf32> -> vector<256x8xf32>
    %c0_103 = arith.constant 0 : index
    %c0_104 = arith.constant 0 : index
    %c1_105 = arith.constant 1 : index
    %c0_106 = arith.constant 0 : index
    %86 = vector.load %arg27[%c0_103, %c0_104, %c1_105, %c0_106] : memref<1x18x18x64xf32, #tpu.memory_space<vmem>>, vector<1x16x16x8xf32>
    %87 = vector.shape_cast %86 : vector<1x16x16x8xf32> to vector<256x8xf32>
    %88 = arith.truncf %87 : vector<256x8xf32> to vector<256x8xbf16>
    %c1_107 = arith.constant 1 : index
    %c0_108 = arith.constant 0 : index
    %c0_109 = arith.constant 0 : index
    %89 = vector.load %arg4[%c1_107, %c0_108, %c0_109] : memref<9x8x8xbf16, #tpu.memory_space<vmem>>, vector<1x8x8xbf16>
    %90 = vector.shape_cast %89 : vector<1x8x8xbf16> to vector<8x8xbf16>
    %cst_110 = arith.constant dense<0.000000e+00> : vector<256x8xf32>
    %91 = tpu.matmul %88, %90, %cst_110 {dimension_numbers = #tpu.dot_dimension_numbers<[1], [0], [0], [1], [0, 0, 1, 1], [], []>} : vector<256x8xbf16>, vector<8x8xbf16>, vector<256x8xf32> -> vector<256x8xf32>
    %92 = arith.addf %85, %91 : vector<256x8xf32>
    %c0_111 = arith.constant 0 : index
    %c0_112 = arith.constant 0 : index
    %c2_113 = arith.constant 2 : index
    %c0_114 = arith.constant 0 : index
    %93 = vector.load %arg27[%c0_111, %c0_112, %c2_113, %c0_114] : memref<1x18x18x64xf32, #tpu.memory_space<vmem>>, vector<1x16x16x8xf32>
    %94 = vector.shape_cast %93 : vector<1x16x16x8xf32> to vector<256x8xf32>
    %95 = arith.truncf %94 : vector<256x8xf32> to vector<256x8xbf16>
    %c2_115 = arith.constant 2 : index
    %c0_116 = arith.constant 0 : index
    %c0_117 = arith.constant 0 : index
    %96 = vector.load %arg4[%c2_115, %c0_116, %c0_117] : memref<9x8x8xbf16, #tpu.memory_space<vmem>>, vector<1x8x8xbf16>
    %97 = vector.shape_cast %96 : vector<1x8x8xbf16> to vector<8x8xbf16>
    %cst_118 = arith.constant dense<0.000000e+00> : vector<256x8xf32>
    %98 = tpu.matmul %95, %97, %cst_118 {dimension_numbers = #tpu.dot_dimension_numbers<[1], [0], [0], [1], [0, 0, 1, 1], [], []>} : vector<256x8xbf16>, vector<8x8xbf16>, vector<256x8xf32> -> vector<256x8xf32>
    %99 = arith.addf %92, %98 : vector<256x8xf32>
    %c0_119 = arith.constant 0 : index
    %c1_120 = arith.constant 1 : index
    %c0_121 = arith.constant 0 : index
    %c0_122 = arith.constant 0 : index
    %100 = vector.load %arg27[%c0_119, %c1_120, %c0_121, %c0_122] : memref<1x18x18x64xf32, #tpu.memory_space<vmem>>, vector<1x16x16x8xf32>
    %101 = vector.shape_cast %100 : vector<1x16x16x8xf32> to vector<256x8xf32>
    %102 = arith.truncf %101 : vector<256x8xf32> to vector<256x8xbf16>
    %c3_123 = arith.constant 3 : index
    %c0_124 = arith.constant 0 : index
    %c0_125 = arith.constant 0 : index
    %103 = vector.load %arg4[%c3_123, %c0_124, %c0_125] : memref<9x8x8xbf16, #tpu.memory_space<vmem>>, vector<1x8x8xbf16>
    %104 = vector.shape_cast %103 : vector<1x8x8xbf16> to vector<8x8xbf16>
    %cst_126 = arith.constant dense<0.000000e+00> : vector<256x8xf32>
    %105 = tpu.matmul %102, %104, %cst_126 {dimension_numbers = #tpu.dot_dimension_numbers<[1], [0], [0], [1], [0, 0, 1, 1], [], []>} : vector<256x8xbf16>, vector<8x8xbf16>, vector<256x8xf32> -> vector<256x8xf32>
    %106 = arith.addf %99, %105 : vector<256x8xf32>
    %c0_127 = arith.constant 0 : index
    %c1_128 = arith.constant 1 : index
    %c1_129 = arith.constant 1 : index
    %c0_130 = arith.constant 0 : index
    %107 = vector.load %arg27[%c0_127, %c1_128, %c1_129, %c0_130] : memref<1x18x18x64xf32, #tpu.memory_space<vmem>>, vector<1x16x16x8xf32>
    %108 = vector.shape_cast %107 : vector<1x16x16x8xf32> to vector<256x8xf32>
    %109 = arith.truncf %108 : vector<256x8xf32> to vector<256x8xbf16>
    %c4_131 = arith.constant 4 : index
    %c0_132 = arith.constant 0 : index
    %c0_133 = arith.constant 0 : index
    %110 = vector.load %arg4[%c4_131, %c0_132, %c0_133] : memref<9x8x8xbf16, #tpu.memory_space<vmem>>, vector<1x8x8xbf16>
    %111 = vector.shape_cast %110 : vector<1x8x8xbf16> to vector<8x8xbf16>
    %cst_134 = arith.constant dense<0.000000e+00> : vector<256x8xf32>
    %112 = tpu.matmul %109, %111, %cst_134 {dimension_numbers = #tpu.dot_dimension_numbers<[1], [0], [0], [1], [0, 0, 1, 1], [], []>} : vector<256x8xbf16>, vector<8x8xbf16>, vector<256x8xf32> -> vector<256x8xf32>
    %113 = arith.addf %106, %112 : vector<256x8xf32>
    %c0_135 = arith.constant 0 : index
    %c1_136 = arith.constant 1 : index
    %c2_137 = arith.constant 2 : index
    %c0_138 = arith.constant 0 : index
    %114 = vector.load %arg27[%c0_135, %c1_136, %c2_137, %c0_138] : memref<1x18x18x64xf32, #tpu.memory_space<vmem>>, vector<1x16x16x8xf32>
    %115 = vector.shape_cast %114 : vector<1x16x16x8xf32> to vector<256x8xf32>
    %116 = arith.truncf %115 : vector<256x8xf32> to vector<256x8xbf16>
    %c5_139 = arith.constant 5 : index
    %c0_140 = arith.constant 0 : index
    %c0_141 = arith.constant 0 : index
    %117 = vector.load %arg4[%c5_139, %c0_140, %c0_141] : memref<9x8x8xbf16, #tpu.memory_space<vmem>>, vector<1x8x8xbf16>
    %118 = vector.shape_cast %117 : vector<1x8x8xbf16> to vector<8x8xbf16>
    %cst_142 = arith.constant dense<0.000000e+00> : vector<256x8xf32>
    %119 = tpu.matmul %116, %118, %cst_142 {dimension_numbers = #tpu.dot_dimension_numbers<[1], [0], [0], [1], [0, 0, 1, 1], [], []>} : vector<256x8xbf16>, vector<8x8xbf16>, vector<256x8xf32> -> vector<256x8xf32>
    %120 = arith.addf %113, %119 : vector<256x8xf32>
    %c0_143 = arith.constant 0 : index
    %c2_144 = arith.constant 2 : index
    %c0_145 = arith.constant 0 : index
    %c0_146 = arith.constant 0 : index
    %121 = vector.load %arg27[%c0_143, %c2_144, %c0_145, %c0_146] : memref<1x18x18x64xf32, #tpu.memory_space<vmem>>, vector<1x16x16x8xf32>
    %122 = vector.shape_cast %121 : vector<1x16x16x8xf32> to vector<256x8xf32>
    %123 = arith.truncf %122 : vector<256x8xf32> to vector<256x8xbf16>
    %c6_147 = arith.constant 6 : index
    %c0_148 = arith.constant 0 : index
    %c0_149 = arith.constant 0 : index
    %124 = vector.load %arg4[%c6_147, %c0_148, %c0_149] : memref<9x8x8xbf16, #tpu.memory_space<vmem>>, vector<1x8x8xbf16>
    %125 = vector.shape_cast %124 : vector<1x8x8xbf16> to vector<8x8xbf16>
    %cst_150 = arith.constant dense<0.000000e+00> : vector<256x8xf32>
    %126 = tpu.matmul %123, %125, %cst_150 {dimension_numbers = #tpu.dot_dimension_numbers<[1], [0], [0], [1], [0, 0, 1, 1], [], []>} : vector<256x8xbf16>, vector<8x8xbf16>, vector<256x8xf32> -> vector<256x8xf32>
    %127 = arith.addf %120, %126 : vector<256x8xf32>
    %c0_151 = arith.constant 0 : index
    %c2_152 = arith.constant 2 : index
    %c1_153 = arith.constant 1 : index
    %c0_154 = arith.constant 0 : index
    %128 = vector.load %arg27[%c0_151, %c2_152, %c1_153, %c0_154] : memref<1x18x18x64xf32, #tpu.memory_space<vmem>>, vector<1x16x16x8xf32>
    %129 = vector.shape_cast %128 : vector<1x16x16x8xf32> to vector<256x8xf32>
    %130 = arith.truncf %129 : vector<256x8xf32> to vector<256x8xbf16>
    %c7_155 = arith.constant 7 : index
    %c0_156 = arith.constant 0 : index
    %c0_157 = arith.constant 0 : index
    %131 = vector.load %arg4[%c7_155, %c0_156, %c0_157] : memref<9x8x8xbf16, #tpu.memory_space<vmem>>, vector<1x8x8xbf16>
    %132 = vector.shape_cast %131 : vector<1x8x8xbf16> to vector<8x8xbf16>
    %cst_158 = arith.constant dense<0.000000e+00> : vector<256x8xf32>
    %133 = tpu.matmul %130, %132, %cst_158 {dimension_numbers = #tpu.dot_dimension_numbers<[1], [0], [0], [1], [0, 0, 1, 1], [], []>} : vector<256x8xbf16>, vector<8x8xbf16>, vector<256x8xf32> -> vector<256x8xf32>
    %134 = arith.addf %127, %133 : vector<256x8xf32>
    %c0_159 = arith.constant 0 : index
    %c2_160 = arith.constant 2 : index
    %c2_161 = arith.constant 2 : index
    %c0_162 = arith.constant 0 : index
    %135 = vector.load %arg27[%c0_159, %c2_160, %c2_161, %c0_162] : memref<1x18x18x64xf32, #tpu.memory_space<vmem>>, vector<1x16x16x8xf32>
    %136 = vector.shape_cast %135 : vector<1x16x16x8xf32> to vector<256x8xf32>
    %137 = arith.truncf %136 : vector<256x8xf32> to vector<256x8xbf16>
    %c8_163 = arith.constant 8 : index
    %c0_164 = arith.constant 0 : index
    %c0_165 = arith.constant 0 : index
    %138 = vector.load %arg4[%c8_163, %c0_164, %c0_165] : memref<9x8x8xbf16, #tpu.memory_space<vmem>>, vector<1x8x8xbf16>
    %139 = vector.shape_cast %138 : vector<1x8x8xbf16> to vector<8x8xbf16>
    %cst_166 = arith.constant dense<0.000000e+00> : vector<256x8xf32>
    %140 = tpu.matmul %137, %139, %cst_166 {dimension_numbers = #tpu.dot_dimension_numbers<[1], [0], [0], [1], [0, 0, 1, 1], [], []>} : vector<256x8xbf16>, vector<8x8xbf16>, vector<256x8xf32> -> vector<256x8xf32>
    %141 = arith.addf %134, %140 : vector<256x8xf32>
    %c0_167 = arith.constant 0 : index
    %c0_168 = arith.constant 0 : index
    %142 = vector.load %arg5[%c0_167, %c0_168] : memref<1x8xf32, #tpu.memory_space<vmem>>, vector<1x8xf32>
    %143 = vector.broadcast %142 : vector<1x8xf32> to vector<256x8xf32>
    %144 = arith.addf %141, %143 : vector<256x8xf32>
    %cst_169 = arith.constant 0.000000e+00 : f32
    %145 = vector.broadcast %cst_169 : f32 to vector<256x8xf32>
    %146 = arith.cmpf ogt, %144, %145 : vector<256x8xf32>
    %cst_170 = arith.constant 0.00999999977 : f32
    %147 = vector.broadcast %cst_170 : f32 to vector<256x8xf32>
    %148 = arith.mulf %147, %144 : vector<256x8xf32>
    %149 = arith.select %146, %144, %148 : vector<256x8xi1>, vector<256x8xf32>
    %150 = vector.shape_cast %149 : vector<256x8xf32> to vector<1x16x16x8xf32>
    %c0_171 = arith.constant 0 : index
    %c0_172 = arith.constant 0 : index
    %c0_173 = arith.constant 0 : index
    %c0_174 = arith.constant 0 : index
    %151 = vector.load %arg22[%c0_171, %c0_172, %c0_173, %c0_174] : memref<1x16x16x8xf32, #tpu.memory_space<vmem>>, vector<1x16x16x8xf32>
    tpu.vector_store %arg22[%c0_171, %c0_172, %c0_173, %c0_174], %150 {strides = array<i32>} : memref<1x16x16x8xf32, #tpu.memory_space<vmem>>, vector<1x16x16x8xf32>,
    %152 = vector.shape_cast %150 : vector<1x16x16x8xf32> to vector<128x2x8xf32>
    %cst_175 = arith.constant dense<0xFF800000> : vector<128x8xf32>
    %153 = vector.multi_reduction <maximumf>, %152, %cst_175 [1] : vector<128x2x8xf32> to vector<128x8xf32>
    %154 = vector.shape_cast %153 : vector<128x8xf32> to vector<1x8x2x8x8xf32>
    %155 = vector.extract_strided_slice %154 {offsets = [0, 0, 0, 0, 0], sizes = [1, 8, 1, 8, 8], strides = [1, 1, 1, 1, 1]} : vector<1x8x2x8x8xf32> to vector<1x8x1x8x8xf32>
    %156 = vector.shape_cast %155 : vector<1x8x1x8x8xf32> to vector<1x8x8x8xf32>
    %157 = vector.extract_strided_slice %154 {offsets = [0, 0, 1, 0, 0], sizes = [1, 8, 1, 8, 8], strides = [1, 1, 1, 1, 1]} : vector<1x8x2x8x8xf32> to vector<1x8x1x8x8xf32>
    %158 = vector.shape_cast %157 : vector<1x8x1x8x8xf32> to vector<1x8x8x8xf32>
    %159 = arith.maximumf %156, %158 : vector<1x8x8x8xf32>
    %cst_176 = arith.constant 0.000000e+00 : f32
    %160 = vector.broadcast %cst_176 : f32 to vector<1x1x10x16xf32>
    %cst_177 = arith.constant 0.000000e+00 : f32
    %161 = vector.broadcast %cst_177 : f32 to vector<1x8x1x16xf32>
    %c0_178 = arith.constant 0 : index
    %c0_179 = arith.constant 0 : index
    %c0_180 = arith.constant 0 : index
    %c0_181 = arith.constant 0 : index
    %162 = vector.load %arg27[%c0_178, %c0_179, %c0_180, %c0_181] : memref<1x18x18x64xf32, #tpu.memory_space<vmem>>, vector<1x1x10x16xf32>
    tpu.vector_store %arg27[%c0_178, %c0_179, %c0_180, %c0_181], %160 {strides = array<i32>} : memref<1x18x18x64xf32, #tpu.memory_space<vmem>>, vector<1x1x10x16xf32>,
    %c0_182 = arith.constant 0 : index
    %c9 = arith.constant 9 : index
    %c0_183 = arith.constant 0 : index
    %c0_184 = arith.constant 0 : index
    %163 = vector.load %arg27[%c0_182, %c9, %c0_183, %c0_184] : memref<1x18x18x64xf32, #tpu.memory_space<vmem>>, vector<1x1x10x16xf32>
    tpu.vector_store %arg27[%c0_182, %c9, %c0_183, %c0_184], %160 {strides = array<i32>} : memref<1x18x18x64xf32, #tpu.memory_space<vmem>>, vector<1x1x10x16xf32>,
    %c0_185 = arith.constant 0 : index
    %c1_186 = arith.constant 1 : index
    %c0_187 = arith.constant 0 : index
    %c0_188 = arith.constant 0 : index
    %164 = vector.load %arg27[%c0_185, %c1_186, %c0_187, %c0_188] : memref<1x18x18x64xf32, #tpu.memory_space<vmem>>, vector<1x8x1x16xf32>
    tpu.vector_store %arg27[%c0_185, %c1_186, %c0_187, %c0_188], %161 {strides = array<i32>} : memref<1x18x18x64xf32, #tpu.memory_space<vmem>>, vector<1x8x1x16xf32>,
    %c0_189 = arith.constant 0 : index
    %c1_190 = arith.constant 1 : index
    %c9_191 = arith.constant 9 : index
    %c0_192 = arith.constant 0 : index
    %165 = vector.load %arg27[%c0_189, %c1_190, %c9_191, %c0_192] : memref<1x18x18x64xf32, #tpu.memory_space<vmem>>, vector<1x8x1x16xf32>
    tpu.vector_store %arg27[%c0_189, %c1_190, %c9_191, %c0_192], %161 {strides = array<i32>} : memref<1x18x18x64xf32, #tpu.memory_space<vmem>>, vector<1x8x1x16xf32>,
    %c0_193 = arith.constant 0 : index
    %c1_194 = arith.constant 1 : index
    %c1_195 = arith.constant 1 : index
    %c0_196 = arith.constant 0 : index
    %166 = vector.load %arg27[%c0_193, %c1_194, %c1_195, %c0_196] : memref<1x18x18x64xf32, #tpu.memory_space<vmem>>, vector<1x8x8x8xf32>
    tpu.vector_store %arg27[%c0_193, %c1_194, %c1_195, %c0_196], %159 {strides = array<i32>} : memref<1x18x18x64xf32, #tpu.memory_space<vmem>>, vector<1x8x8x8xf32>,
    %c0_197 = arith.constant 0 : index
    %c0_198 = arith.constant 0 : index
    %c0_199 = arith.constant 0 : index
    %c0_200 = arith.constant 0 : index
    %167 = vector.load %arg27[%c0_197, %c0_198, %c0_199, %c0_200] : memref<1x18x18x64xf32, #tpu.memory_space<vmem>>, vector<1x8x8x8xf32>
    %168 = vector.shape_cast %167 : vector<1x8x8x8xf32> to vector<64x8xf32>
    %169 = arith.truncf %168 : vector<64x8xf32> to vector<64x8xbf16>
    %c0_201 = arith.constant 0 : index
    %c0_202 = arith.constant 0 : index
    %c0_203 = arith.constant 0 : index
    %170 = vector.load %arg6[%c0_201, %c0_202, %c0_203] : memref<9x8x16xbf16, #tpu.memory_space<vmem>>, vector<1x8x16xbf16>
    %171 = vector.shape_cast %170 : vector<1x8x16xbf16> to vector<8x16xbf16>
    %cst_204 = arith.constant dense<0.000000e+00> : vector<64x16xf32>
    %172 = tpu.matmul %169, %171, %cst_204 {dimension_numbers = #tpu.dot_dimension_numbers<[1], [0], [0], [1], [0, 0, 1, 1], [], []>} : vector<64x8xbf16>, vector<8x16xbf16>, vector<64x16xf32> -> vector<64x16xf32>
    %c0_205 = arith.constant 0 : index
    %c0_206 = arith.constant 0 : index
    %c1_207 = arith.constant 1 : index
    %c0_208 = arith.constant 0 : index
    %173 = vector.load %arg27[%c0_205, %c0_206, %c1_207, %c0_208] : memref<1x18x18x64xf32, #tpu.memory_space<vmem>>, vector<1x8x8x8xf32>
    %174 = vector.shape_cast %173 : vector<1x8x8x8xf32> to vector<64x8xf32>
    %175 = arith.truncf %174 : vector<64x8xf32> to vector<64x8xbf16>
    %c1_209 = arith.constant 1 : index
    %c0_210 = arith.constant 0 : index
    %c0_211 = arith.constant 0 : index
    %176 = vector.load %arg6[%c1_209, %c0_210, %c0_211] : memref<9x8x16xbf16, #tpu.memory_space<vmem>>, vector<1x8x16xbf16>
    %177 = vector.shape_cast %176 : vector<1x8x16xbf16> to vector<8x16xbf16>
    %cst_212 = arith.constant dense<0.000000e+00> : vector<64x16xf32>
    %178 = tpu.matmul %175, %177, %cst_212 {dimension_numbers = #tpu.dot_dimension_numbers<[1], [0], [0], [1], [0, 0, 1, 1], [], []>} : vector<64x8xbf16>, vector<8x16xbf16>, vector<64x16xf32> -> vector<64x16xf32>
    %179 = arith.addf %172, %178 : vector<64x16xf32>
    %c0_213 = arith.constant 0 : index
    %c0_214 = arith.constant 0 : index
    %c2_215 = arith.constant 2 : index
    %c0_216 = arith.constant 0 : index
    %180 = vector.load %arg27[%c0_213, %c0_214, %c2_215, %c0_216] : memref<1x18x18x64xf32, #tpu.memory_space<vmem>>, vector<1x8x8x8xf32>
    %181 = vector.shape_cast %180 : vector<1x8x8x8xf32> to vector<64x8xf32>
    %182 = arith.truncf %181 : vector<64x8xf32> to vector<64x8xbf16>
    %c2_217 = arith.constant 2 : index
    %c0_218 = arith.constant 0 : index
    %c0_219 = arith.constant 0 : index
    %183 = vector.load %arg6[%c2_217, %c0_218, %c0_219] : memref<9x8x16xbf16, #tpu.memory_space<vmem>>, vector<1x8x16xbf16>
    %184 = vector.shape_cast %183 : vector<1x8x16xbf16> to vector<8x16xbf16>
    %cst_220 = arith.constant dense<0.000000e+00> : vector<64x16xf32>
    %185 = tpu.matmul %182, %184, %cst_220 {dimension_numbers = #tpu.dot_dimension_numbers<[1], [0], [0], [1], [0, 0, 1, 1], [], []>} : vector<64x8xbf16>, vector<8x16xbf16>, vector<64x16xf32> -> vector<64x16xf32>
    %186 = arith.addf %179, %185 : vector<64x16xf32>
    %c0_221 = arith.constant 0 : index
    %c1_222 = arith.constant 1 : index
    %c0_223 = arith.constant 0 : index
    %c0_224 = arith.constant 0 : index
    %187 = vector.load %arg27[%c0_221, %c1_222, %c0_223, %c0_224] : memref<1x18x18x64xf32, #tpu.memory_space<vmem>>, vector<1x8x8x8xf32>
    %188 = vector.shape_cast %187 : vector<1x8x8x8xf32> to vector<64x8xf32>
    %189 = arith.truncf %188 : vector<64x8xf32> to vector<64x8xbf16>
    %c3_225 = arith.constant 3 : index
    %c0_226 = arith.constant 0 : index
    %c0_227 = arith.constant 0 : index
    %190 = vector.load %arg6[%c3_225, %c0_226, %c0_227] : memref<9x8x16xbf16, #tpu.memory_space<vmem>>, vector<1x8x16xbf16>
    %191 = vector.shape_cast %190 : vector<1x8x16xbf16> to vector<8x16xbf16>
    %cst_228 = arith.constant dense<0.000000e+00> : vector<64x16xf32>
    %192 = tpu.matmul %189, %191, %cst_228 {dimension_numbers = #tpu.dot_dimension_numbers<[1], [0], [0], [1], [0, 0, 1, 1], [], []>} : vector<64x8xbf16>, vector<8x16xbf16>, vector<64x16xf32> -> vector<64x16xf32>
    %193 = arith.addf %186, %192 : vector<64x16xf32>
    %c0_229 = arith.constant 0 : index
    %c1_230 = arith.constant 1 : index
    %c1_231 = arith.constant 1 : index
    %c0_232 = arith.constant 0 : index
    %194 = vector.load %arg27[%c0_229, %c1_230, %c1_231, %c0_232] : memref<1x18x18x64xf32, #tpu.memory_space<vmem>>, vector<1x8x8x8xf32>
    %195 = vector.shape_cast %194 : vector<1x8x8x8xf32> to vector<64x8xf32>
    %196 = arith.truncf %195 : vector<64x8xf32> to vector<64x8xbf16>
    %c4_233 = arith.constant 4 : index
    %c0_234 = arith.constant 0 : index
    %c0_235 = arith.constant 0 : index
    %197 = vector.load %arg6[%c4_233, %c0_234, %c0_235] : memref<9x8x16xbf16, #tpu.memory_space<vmem>>, vector<1x8x16xbf16>
    %198 = vector.shape_cast %197 : vector<1x8x16xbf16> to vector<8x16xbf16>
    %cst_236 = arith.constant dense<0.000000e+00> : vector<64x16xf32>
    %199 = tpu.matmul %196, %198, %cst_236 {dimension_numbers = #tpu.dot_dimension_numbers<[1], [0], [0], [1], [0, 0, 1, 1], [], []>} : vector<64x8xbf16>, vector<8x16xbf16>, vector<64x16xf32> -> vector<64x16xf32>
    %200 = arith.addf %193, %199 : vector<64x16xf32>
    %c0_237 = arith.constant 0 : index
    %c1_238 = arith.constant 1 : index
    %c2_239 = arith.constant 2 : index
    %c0_240 = arith.constant 0 : index
    %201 = vector.load %arg27[%c0_237, %c1_238, %c2_239, %c0_240] : memref<1x18x18x64xf32, #tpu.memory_space<vmem>>, vector<1x8x8x8xf32>
    %202 = vector.shape_cast %201 : vector<1x8x8x8xf32> to vector<64x8xf32>
    %203 = arith.truncf %202 : vector<64x8xf32> to vector<64x8xbf16>
    %c5_241 = arith.constant 5 : index
    %c0_242 = arith.constant 0 : index
    %c0_243 = arith.constant 0 : index
    %204 = vector.load %arg6[%c5_241, %c0_242, %c0_243] : memref<9x8x16xbf16, #tpu.memory_space<vmem>>, vector<1x8x16xbf16>
    %205 = vector.shape_cast %204 : vector<1x8x16xbf16> to vector<8x16xbf16>
    %cst_244 = arith.constant dense<0.000000e+00> : vector<64x16xf32>
    %206 = tpu.matmul %203, %205, %cst_244 {dimension_numbers = #tpu.dot_dimension_numbers<[1], [0], [0], [1], [0, 0, 1, 1], [], []>} : vector<64x8xbf16>, vector<8x16xbf16>, vector<64x16xf32> -> vector<64x16xf32>
    %207 = arith.addf %200, %206 : vector<64x16xf32>
    %c0_245 = arith.constant 0 : index
    %c2_246 = arith.constant 2 : index
    %c0_247 = arith.constant 0 : index
    %c0_248 = arith.constant 0 : index
    %208 = vector.load %arg27[%c0_245, %c2_246, %c0_247, %c0_248] : memref<1x18x18x64xf32, #tpu.memory_space<vmem>>, vector<1x8x8x8xf32>
    %209 = vector.shape_cast %208 : vector<1x8x8x8xf32> to vector<64x8xf32>
    %210 = arith.truncf %209 : vector<64x8xf32> to vector<64x8xbf16>
    %c6_249 = arith.constant 6 : index
    %c0_250 = arith.constant 0 : index
    %c0_251 = arith.constant 0 : index
    %211 = vector.load %arg6[%c6_249, %c0_250, %c0_251] : memref<9x8x16xbf16, #tpu.memory_space<vmem>>, vector<1x8x16xbf16>
    %212 = vector.shape_cast %211 : vector<1x8x16xbf16> to vector<8x16xbf16>
    %cst_252 = arith.constant dense<0.000000e+00> : vector<64x16xf32>
    %213 = tpu.matmul %210, %212, %cst_252 {dimension_numbers = #tpu.dot_dimension_numbers<[1], [0], [0], [1], [0, 0, 1, 1], [], []>} : vector<64x8xbf16>, vector<8x16xbf16>, vector<64x16xf32> -> vector<64x16xf32>
    %214 = arith.addf %207, %213 : vector<64x16xf32>
    %c0_253 = arith.constant 0 : index
    %c2_254 = arith.constant 2 : index
    %c1_255 = arith.constant 1 : index
    %c0_256 = arith.constant 0 : index
    %215 = vector.load %arg27[%c0_253, %c2_254, %c1_255, %c0_256] : memref<1x18x18x64xf32, #tpu.memory_space<vmem>>, vector<1x8x8x8xf32>
    %216 = vector.shape_cast %215 : vector<1x8x8x8xf32> to vector<64x8xf32>
    %217 = arith.truncf %216 : vector<64x8xf32> to vector<64x8xbf16>
    %c7_257 = arith.constant 7 : index
    %c0_258 = arith.constant 0 : index
    %c0_259 = arith.constant 0 : index
    %218 = vector.load %arg6[%c7_257, %c0_258, %c0_259] : memref<9x8x16xbf16, #tpu.memory_space<vmem>>, vector<1x8x16xbf16>
    %219 = vector.shape_cast %218 : vector<1x8x16xbf16> to vector<8x16xbf16>
    %cst_260 = arith.constant dense<0.000000e+00> : vector<64x16xf32>
    %220 = tpu.matmul %217, %219, %cst_260 {dimension_numbers = #tpu.dot_dimension_numbers<[1], [0], [0], [1], [0, 0, 1, 1], [], []>} : vector<64x8xbf16>, vector<8x16xbf16>, vector<64x16xf32> -> vector<64x16xf32>
    %221 = arith.addf %214, %220 : vector<64x16xf32>
    %c0_261 = arith.constant 0 : index
    %c2_262 = arith.constant 2 : index
    %c2_263 = arith.constant 2 : index
    %c0_264 = arith.constant 0 : index
    %222 = vector.load %arg27[%c0_261, %c2_262, %c2_263, %c0_264] : memref<1x18x18x64xf32, #tpu.memory_space<vmem>>, vector<1x8x8x8xf32>
    %223 = vector.shape_cast %222 : vector<1x8x8x8xf32> to vector<64x8xf32>
    %224 = arith.truncf %223 : vector<64x8xf32> to vector<64x8xbf16>
    %c8_265 = arith.constant 8 : index
    %c0_266 = arith.constant 0 : index
    %c0_267 = arith.constant 0 : index
    %225 = vector.load %arg6[%c8_265, %c0_266, %c0_267] : memref<9x8x16xbf16, #tpu.memory_space<vmem>>, vector<1x8x16xbf16>
    %226 = vector.shape_cast %225 : vector<1x8x16xbf16> to vector<8x16xbf16>
    %cst_268 = arith.constant dense<0.000000e+00> : vector<64x16xf32>
    %227 = tpu.matmul %224, %226, %cst_268 {dimension_numbers = #tpu.dot_dimension_numbers<[1], [0], [0], [1], [0, 0, 1, 1], [], []>} : vector<64x8xbf16>, vector<8x16xbf16>, vector<64x16xf32> -> vector<64x16xf32>
    %228 = arith.addf %221, %227 : vector<64x16xf32>
    %c0_269 = arith.constant 0 : index
    %c0_270 = arith.constant 0 : index
    %229 = vector.load %arg7[%c0_269, %c0_270] : memref<1x16xf32, #tpu.memory_space<vmem>>, vector<1x16xf32>
    %230 = vector.broadcast %229 : vector<1x16xf32> to vector<64x16xf32>
    %231 = arith.addf %228, %230 : vector<64x16xf32>
    %cst_271 = arith.constant 0.000000e+00 : f32
    %232 = vector.broadcast %cst_271 : f32 to vector<64x16xf32>
    %233 = arith.cmpf ogt, %231, %232 : vector<64x16xf32>
    %cst_272 = arith.constant 0.00999999977 : f32
    %234 = vector.broadcast %cst_272 : f32 to vector<64x16xf32>
    %235 = arith.mulf %234, %231 : vector<64x16xf32>
    %236 = arith.select %233, %231, %235 : vector<64x16xi1>, vector<64x16xf32>
    %237 = vector.shape_cast %236 : vector<64x16xf32> to vector<1x8x8x16xf32>
    %c0_273 = arith.constant 0 : index
    %c1_274 = arith.constant 1 : index
    %c1_275 = arith.constant 1 : index
    %c0_276 = arith.constant 0 : index
    %238 = vector.load %arg27[%c0_273, %c1_274, %c1_275, %c0_276] : memref<1x18x18x64xf32, #tpu.memory_space<vmem>>, vector<1x8x8x16xf32>
    tpu.vector_store %arg27[%c0_273, %c1_274, %c1_275, %c0_276], %237 {strides = array<i32>} : memref<1x18x18x64xf32, #tpu.memory_space<vmem>>, vector<1x8x8x16xf32>,
    %c0_277 = arith.constant 0 : index
    %c0_278 = arith.constant 0 : index
    %c0_279 = arith.constant 0 : index
    %c0_280 = arith.constant 0 : index
    %239 = vector.load %arg27[%c0_277, %c0_278, %c0_279, %c0_280] : memref<1x18x18x64xf32, #tpu.memory_space<vmem>>, vector<1x8x8x16xf32>
    %240 = vector.shape_cast %239 : vector<1x8x8x16xf32> to vector<64x16xf32>
    %241 = arith.truncf %240 : vector<64x16xf32> to vector<64x16xbf16>
    %c0_281 = arith.constant 0 : index
    %c0_282 = arith.constant 0 : index
    %c0_283 = arith.constant 0 : index
    %242 = vector.load %arg8[%c0_281, %c0_282, %c0_283] : memref<9x16x16xbf16, #tpu.memory_space<vmem>>, vector<1x16x16xbf16>
    %243 = vector.shape_cast %242 : vector<1x16x16xbf16> to vector<16x16xbf16>
    %cst_284 = arith.constant dense<0.000000e+00> : vector<64x16xf32>
    %244 = tpu.matmul %241, %243, %cst_284 {dimension_numbers = #tpu.dot_dimension_numbers<[1], [0], [0], [1], [0, 0, 1, 1], [], []>} : vector<64x16xbf16>, vector<16x16xbf16>, vector<64x16xf32> -> vector<64x16xf32>
    %c0_285 = arith.constant 0 : index
    %c0_286 = arith.constant 0 : index
    %c1_287 = arith.constant 1 : index
    %c0_288 = arith.constant 0 : index
    %245 = vector.load %arg27[%c0_285, %c0_286, %c1_287, %c0_288] : memref<1x18x18x64xf32, #tpu.memory_space<vmem>>, vector<1x8x8x16xf32>
    %246 = vector.shape_cast %245 : vector<1x8x8x16xf32> to vector<64x16xf32>
    %247 = arith.truncf %246 : vector<64x16xf32> to vector<64x16xbf16>
    %c1_289 = arith.constant 1 : index
    %c0_290 = arith.constant 0 : index
    %c0_291 = arith.constant 0 : index
    %248 = vector.load %arg8[%c1_289, %c0_290, %c0_291] : memref<9x16x16xbf16, #tpu.memory_space<vmem>>, vector<1x16x16xbf16>
    %249 = vector.shape_cast %248 : vector<1x16x16xbf16> to vector<16x16xbf16>
    %cst_292 = arith.constant dense<0.000000e+00> : vector<64x16xf32>
    %250 = tpu.matmul %247, %249, %cst_292 {dimension_numbers = #tpu.dot_dimension_numbers<[1], [0], [0], [1], [0, 0, 1, 1], [], []>} : vector<64x16xbf16>, vector<16x16xbf16>, vector<64x16xf32> -> vector<64x16xf32>
    %251 = arith.addf %244, %250 : vector<64x16xf32>
    %c0_293 = arith.constant 0 : index
    %c0_294 = arith.constant 0 : index
    %c2_295 = arith.constant 2 : index
    %c0_296 = arith.constant 0 : index
    %252 = vector.load %arg27[%c0_293, %c0_294, %c2_295, %c0_296] : memref<1x18x18x64xf32, #tpu.memory_space<vmem>>, vector<1x8x8x16xf32>
    %253 = vector.shape_cast %252 : vector<1x8x8x16xf32> to vector<64x16xf32>
    %254 = arith.truncf %253 : vector<64x16xf32> to vector<64x16xbf16>
    %c2_297 = arith.constant 2 : index
    %c0_298 = arith.constant 0 : index
    %c0_299 = arith.constant 0 : index
    %255 = vector.load %arg8[%c2_297, %c0_298, %c0_299] : memref<9x16x16xbf16, #tpu.memory_space<vmem>>, vector<1x16x16xbf16>
    %256 = vector.shape_cast %255 : vector<1x16x16xbf16> to vector<16x16xbf16>
    %cst_300 = arith.constant dense<0.000000e+00> : vector<64x16xf32>
    %257 = tpu.matmul %254, %256, %cst_300 {dimension_numbers = #tpu.dot_dimension_numbers<[1], [0], [0], [1], [0, 0, 1, 1], [], []>} : vector<64x16xbf16>, vector<16x16xbf16>, vector<64x16xf32> -> vector<64x16xf32>
    %258 = arith.addf %251, %257 : vector<64x16xf32>
    %c0_301 = arith.constant 0 : index
    %c1_302 = arith.constant 1 : index
    %c0_303 = arith.constant 0 : index
    %c0_304 = arith.constant 0 : index
    %259 = vector.load %arg27[%c0_301, %c1_302, %c0_303, %c0_304] : memref<1x18x18x64xf32, #tpu.memory_space<vmem>>, vector<1x8x8x16xf32>
    %260 = vector.shape_cast %259 : vector<1x8x8x16xf32> to vector<64x16xf32>
    %261 = arith.truncf %260 : vector<64x16xf32> to vector<64x16xbf16>
    %c3_305 = arith.constant 3 : index
    %c0_306 = arith.constant 0 : index
    %c0_307 = arith.constant 0 : index
    %262 = vector.load %arg8[%c3_305, %c0_306, %c0_307] : memref<9x16x16xbf16, #tpu.memory_space<vmem>>, vector<1x16x16xbf16>
    %263 = vector.shape_cast %262 : vector<1x16x16xbf16> to vector<16x16xbf16>
    %cst_308 = arith.constant dense<0.000000e+00> : vector<64x16xf32>
    %264 = tpu.matmul %261, %263, %cst_308 {dimension_numbers = #tpu.dot_dimension_numbers<[1], [0], [0], [1], [0, 0, 1, 1], [], []>} : vector<64x16xbf16>, vector<16x16xbf16>, vector<64x16xf32> -> vector<64x16xf32>
    %265 = arith.addf %258, %264 : vector<64x16xf32>
    %c0_309 = arith.constant 0 : index
    %c1_310 = arith.constant 1 : index
    %c1_311 = arith.constant 1 : index
    %c0_312 = arith.constant 0 : index
    %266 = vector.load %arg27[%c0_309, %c1_310, %c1_311, %c0_312] : memref<1x18x18x64xf32, #tpu.memory_space<vmem>>, vector<1x8x8x16xf32>
    %267 = vector.shape_cast %266 : vector<1x8x8x16xf32> to vector<64x16xf32>
    %268 = arith.truncf %267 : vector<64x16xf32> to vector<64x16xbf16>
    %c4_313 = arith.constant 4 : index
    %c0_314 = arith.constant 0 : index
    %c0_315 = arith.constant 0 : index
    %269 = vector.load %arg8[%c4_313, %c0_314, %c0_315] : memref<9x16x16xbf16, #tpu.memory_space<vmem>>, vector<1x16x16xbf16>
    %270 = vector.shape_cast %269 : vector<1x16x16xbf16> to vector<16x16xbf16>
    %cst_316 = arith.constant dense<0.000000e+00> : vector<64x16xf32>
    %271 = tpu.matmul %268, %270, %cst_316 {dimension_numbers = #tpu.dot_dimension_numbers<[1], [0], [0], [1], [0, 0, 1, 1], [], []>} : vector<64x16xbf16>, vector<16x16xbf16>, vector<64x16xf32> -> vector<64x16xf32>
    %272 = arith.addf %265, %271 : vector<64x16xf32>
    %c0_317 = arith.constant 0 : index
    %c1_318 = arith.constant 1 : index
    %c2_319 = arith.constant 2 : index
    %c0_320 = arith.constant 0 : index
    %273 = vector.load %arg27[%c0_317, %c1_318, %c2_319, %c0_320] : memref<1x18x18x64xf32, #tpu.memory_space<vmem>>, vector<1x8x8x16xf32>
    %274 = vector.shape_cast %273 : vector<1x8x8x16xf32> to vector<64x16xf32>
    %275 = arith.truncf %274 : vector<64x16xf32> to vector<64x16xbf16>
    %c5_321 = arith.constant 5 : index
    %c0_322 = arith.constant 0 : index
    %c0_323 = arith.constant 0 : index
    %276 = vector.load %arg8[%c5_321, %c0_322, %c0_323] : memref<9x16x16xbf16, #tpu.memory_space<vmem>>, vector<1x16x16xbf16>
    %277 = vector.shape_cast %276 : vector<1x16x16xbf16> to vector<16x16xbf16>
    %cst_324 = arith.constant dense<0.000000e+00> : vector<64x16xf32>
    %278 = tpu.matmul %275, %277, %cst_324 {dimension_numbers = #tpu.dot_dimension_numbers<[1], [0], [0], [1], [0, 0, 1, 1], [], []>} : vector<64x16xbf16>, vector<16x16xbf16>, vector<64x16xf32> -> vector<64x16xf32>
    %279 = arith.addf %272, %278 : vector<64x16xf32>
    %c0_325 = arith.constant 0 : index
    %c2_326 = arith.constant 2 : index
    %c0_327 = arith.constant 0 : index
    %c0_328 = arith.constant 0 : index
    %280 = vector.load %arg27[%c0_325, %c2_326, %c0_327, %c0_328] : memref<1x18x18x64xf32, #tpu.memory_space<vmem>>, vector<1x8x8x16xf32>
    %281 = vector.shape_cast %280 : vector<1x8x8x16xf32> to vector<64x16xf32>
    %282 = arith.truncf %281 : vector<64x16xf32> to vector<64x16xbf16>
    %c6_329 = arith.constant 6 : index
    %c0_330 = arith.constant 0 : index
    %c0_331 = arith.constant 0 : index
    %283 = vector.load %arg8[%c6_329, %c0_330, %c0_331] : memref<9x16x16xbf16, #tpu.memory_space<vmem>>, vector<1x16x16xbf16>
    %284 = vector.shape_cast %283 : vector<1x16x16xbf16> to vector<16x16xbf16>
    %cst_332 = arith.constant dense<0.000000e+00> : vector<64x16xf32>
    %285 = tpu.matmul %282, %284, %cst_332 {dimension_numbers = #tpu.dot_dimension_numbers<[1], [0], [0], [1], [0, 0, 1, 1], [], []>} : vector<64x16xbf16>, vector<16x16xbf16>, vector<64x16xf32> -> vector<64x16xf32>
    %286 = arith.addf %279, %285 : vector<64x16xf32>
    %c0_333 = arith.constant 0 : index
    %c2_334 = arith.constant 2 : index
    %c1_335 = arith.constant 1 : index
    %c0_336 = arith.constant 0 : index
    %287 = vector.load %arg27[%c0_333, %c2_334, %c1_335, %c0_336] : memref<1x18x18x64xf32, #tpu.memory_space<vmem>>, vector<1x8x8x16xf32>
    %288 = vector.shape_cast %287 : vector<1x8x8x16xf32> to vector<64x16xf32>
    %289 = arith.truncf %288 : vector<64x16xf32> to vector<64x16xbf16>
    %c7_337 = arith.constant 7 : index
    %c0_338 = arith.constant 0 : index
    %c0_339 = arith.constant 0 : index
    %290 = vector.load %arg8[%c7_337, %c0_338, %c0_339] : memref<9x16x16xbf16, #tpu.memory_space<vmem>>, vector<1x16x16xbf16>
    %291 = vector.shape_cast %290 : vector<1x16x16xbf16> to vector<16x16xbf16>
    %cst_340 = arith.constant dense<0.000000e+00> : vector<64x16xf32>
    %292 = tpu.matmul %289, %291, %cst_340 {dimension_numbers = #tpu.dot_dimension_numbers<[1], [0], [0], [1], [0, 0, 1, 1], [], []>} : vector<64x16xbf16>, vector<16x16xbf16>, vector<64x16xf32> -> vector<64x16xf32>
    %293 = arith.addf %286, %292 : vector<64x16xf32>
    %c0_341 = arith.constant 0 : index
    %c2_342 = arith.constant 2 : index
    %c2_343 = arith.constant 2 : index
    %c0_344 = arith.constant 0 : index
    %294 = vector.load %arg27[%c0_341, %c2_342, %c2_343, %c0_344] : memref<1x18x18x64xf32, #tpu.memory_space<vmem>>, vector<1x8x8x16xf32>
    %295 = vector.shape_cast %294 : vector<1x8x8x16xf32> to vector<64x16xf32>
    %296 = arith.truncf %295 : vector<64x16xf32> to vector<64x16xbf16>
    %c8_345 = arith.constant 8 : index
    %c0_346 = arith.constant 0 : index
    %c0_347 = arith.constant 0 : index
    %297 = vector.load %arg8[%c8_345, %c0_346, %c0_347] : memref<9x16x16xbf16, #tpu.memory_space<vmem>>, vector<1x16x16xbf16>
    %298 = vector.shape_cast %297 : vector<1x16x16xbf16> to vector<16x16xbf16>
    %cst_348 = arith.constant dense<0.000000e+00> : vector<64x16xf32>
    %299 = tpu.matmul %296, %298, %cst_348 {dimension_numbers = #tpu.dot_dimension_numbers<[1], [0], [0], [1], [0, 0, 1, 1], [], []>} : vector<64x16xbf16>, vector<16x16xbf16>, vector<64x16xf32> -> vector<64x16xf32>
    %300 = arith.addf %293, %299 : vector<64x16xf32>
    %c0_349 = arith.constant 0 : index
    %c0_350 = arith.constant 0 : index
    %301 = vector.load %arg9[%c0_349, %c0_350] : memref<1x16xf32, #tpu.memory_space<vmem>>, vector<1x16xf32>
    %302 = vector.broadcast %301 : vector<1x16xf32> to vector<64x16xf32>
    %303 = arith.addf %300, %302 : vector<64x16xf32>
    %cst_351 = arith.constant 0.000000e+00 : f32
    %304 = vector.broadcast %cst_351 : f32 to vector<64x16xf32>
    %305 = arith.cmpf ogt, %303, %304 : vector<64x16xf32>
    %cst_352 = arith.constant 0.00999999977 : f32
    %306 = vector.broadcast %cst_352 : f32 to vector<64x16xf32>
    %307 = arith.mulf %306, %303 : vector<64x16xf32>
    %308 = arith.select %305, %303, %307 : vector<64x16xi1>, vector<64x16xf32>
    %309 = vector.shape_cast %308 : vector<64x16xf32> to vector<1x8x8x16xf32>
    %c0_353 = arith.constant 0 : index
    %c0_354 = arith.constant 0 : index
    %c0_355 = arith.constant 0 : index
    %c0_356 = arith.constant 0 : index
    %310 = vector.load %arg23[%c0_353, %c0_354, %c0_355, %c0_356] : memref<1x8x8x16xf32, #tpu.memory_space<vmem>>, vector<1x8x8x16xf32>
    tpu.vector_store %arg23[%c0_353, %c0_354, %c0_355, %c0_356], %309 {strides = array<i32>} : memref<1x8x8x16xf32, #tpu.memory_space<vmem>>, vector<1x8x8x16xf32>,
    %311 = vector.shape_cast %309 : vector<1x8x8x16xf32> to vector<32x2x16xf32>
    %cst_357 = arith.constant dense<0xFF800000> : vector<32x16xf32>
    %312 = vector.multi_reduction <maximumf>, %311, %cst_357 [1] : vector<32x2x16xf32> to vector<32x16xf32>
    %313 = vector.shape_cast %312 : vector<32x16xf32> to vector<1x4x2x4x16xf32>
    %314 = vector.extract_strided_slice %313 {offsets = [0, 0, 0, 0, 0], sizes = [1, 4, 1, 4, 16], strides = [1, 1, 1, 1, 1]} : vector<1x4x2x4x16xf32> to vector<1x4x1x4x16xf32>
    %315 = vector.shape_cast %314 : vector<1x4x1x4x16xf32> to vector<1x4x4x16xf32>
    %316 = vector.extract_strided_slice %313 {offsets = [0, 0, 1, 0, 0], sizes = [1, 4, 1, 4, 16], strides = [1, 1, 1, 1, 1]} : vector<1x4x2x4x16xf32> to vector<1x4x1x4x16xf32>
    %317 = vector.shape_cast %316 : vector<1x4x1x4x16xf32> to vector<1x4x4x16xf32>
    %318 = arith.maximumf %315, %317 : vector<1x4x4x16xf32>
    %cst_358 = arith.constant 0.000000e+00 : f32
    %319 = vector.broadcast %cst_358 : f32 to vector<1x1x6x32xf32>
    %cst_359 = arith.constant 0.000000e+00 : f32
    %320 = vector.broadcast %cst_359 : f32 to vector<1x4x1x32xf32>
    %c0_360 = arith.constant 0 : index
    %c0_361 = arith.constant 0 : index
    %c0_362 = arith.constant 0 : index
    %c0_363 = arith.constant 0 : index
    %321 = vector.load %arg27[%c0_360, %c0_361, %c0_362, %c0_363] : memref<1x18x18x64xf32, #tpu.memory_space<vmem>>, vector<1x1x6x32xf32>
    tpu.vector_store %arg27[%c0_360, %c0_361, %c0_362, %c0_363], %319 {strides = array<i32>} : memref<1x18x18x64xf32, #tpu.memory_space<vmem>>, vector<1x1x6x32xf32>,
    %c0_364 = arith.constant 0 : index
    %c5_365 = arith.constant 5 : index
    %c0_366 = arith.constant 0 : index
    %c0_367 = arith.constant 0 : index
    %322 = vector.load %arg27[%c0_364, %c5_365, %c0_366, %c0_367] : memref<1x18x18x64xf32, #tpu.memory_space<vmem>>, vector<1x1x6x32xf32>
    tpu.vector_store %arg27[%c0_364, %c5_365, %c0_366, %c0_367], %319 {strides = array<i32>} : memref<1x18x18x64xf32, #tpu.memory_space<vmem>>, vector<1x1x6x32xf32>,
    %c0_368 = arith.constant 0 : index
    %c1_369 = arith.constant 1 : index
    %c0_370 = arith.constant 0 : index
    %c0_371 = arith.constant 0 : index
    %323 = vector.load %arg27[%c0_368, %c1_369, %c0_370, %c0_371] : memref<1x18x18x64xf32, #tpu.memory_space<vmem>>, vector<1x4x1x32xf32>
    tpu.vector_store %arg27[%c0_368, %c1_369, %c0_370, %c0_371], %320 {strides = array<i32>} : memref<1x18x18x64xf32, #tpu.memory_space<vmem>>, vector<1x4x1x32xf32>,
    %c0_372 = arith.constant 0 : index
    %c1_373 = arith.constant 1 : index
    %c5_374 = arith.constant 5 : index
    %c0_375 = arith.constant 0 : index
    %324 = vector.load %arg27[%c0_372, %c1_373, %c5_374, %c0_375] : memref<1x18x18x64xf32, #tpu.memory_space<vmem>>, vector<1x4x1x32xf32>
    tpu.vector_store %arg27[%c0_372, %c1_373, %c5_374, %c0_375], %320 {strides = array<i32>} : memref<1x18x18x64xf32, #tpu.memory_space<vmem>>, vector<1x4x1x32xf32>,
    %c0_376 = arith.constant 0 : index
    %c1_377 = arith.constant 1 : index
    %c1_378 = arith.constant 1 : index
    %c0_379 = arith.constant 0 : index
    %325 = vector.load %arg27[%c0_376, %c1_377, %c1_378, %c0_379] : memref<1x18x18x64xf32, #tpu.memory_space<vmem>>, vector<1x4x4x16xf32>
    tpu.vector_store %arg27[%c0_376, %c1_377, %c1_378, %c0_379], %318 {strides = array<i32>} : memref<1x18x18x64xf32, #tpu.memory_space<vmem>>, vector<1x4x4x16xf32>,
    %c0_380 = arith.constant 0 : index
    %c0_381 = arith.constant 0 : index
    %c0_382 = arith.constant 0 : index
    %c0_383 = arith.constant 0 : index
    %326 = vector.load %arg27[%c0_380, %c0_381, %c0_382, %c0_383] : memref<1x18x18x64xf32, #tpu.memory_space<vmem>>, vector<1x4x4x16xf32>
    %327 = vector.shape_cast %326 : vector<1x4x4x16xf32> to vector<16x16xf32>
    %328 = arith.truncf %327 : vector<16x16xf32> to vector<16x16xbf16>
    %c0_384 = arith.constant 0 : index
    %c0_385 = arith.constant 0 : index
    %c0_386 = arith.constant 0 : index
    %329 = vector.load %arg10[%c0_384, %c0_385, %c0_386] : memref<9x16x32xbf16, #tpu.memory_space<vmem>>, vector<1x16x32xbf16>
    %330 = vector.shape_cast %329 : vector<1x16x32xbf16> to vector<16x32xbf16>
    %cst_387 = arith.constant dense<0.000000e+00> : vector<16x32xf32>
    %331 = tpu.matmul %328, %330, %cst_387 {dimension_numbers = #tpu.dot_dimension_numbers<[1], [0], [0], [1], [0, 0, 1, 1], [], []>} : vector<16x16xbf16>, vector<16x32xbf16>, vector<16x32xf32> -> vector<16x32xf32>
    %c0_388 = arith.constant 0 : index
    %c0_389 = arith.constant 0 : index
    %c1_390 = arith.constant 1 : index
    %c0_391 = arith.constant 0 : index
    %332 = vector.load %arg27[%c0_388, %c0_389, %c1_390, %c0_391] : memref<1x18x18x64xf32, #tpu.memory_space<vmem>>, vector<1x4x4x16xf32>
    %333 = vector.shape_cast %332 : vector<1x4x4x16xf32> to vector<16x16xf32>
    %334 = arith.truncf %333 : vector<16x16xf32> to vector<16x16xbf16>
    %c1_392 = arith.constant 1 : index
    %c0_393 = arith.constant 0 : index
    %c0_394 = arith.constant 0 : index
    %335 = vector.load %arg10[%c1_392, %c0_393, %c0_394] : memref<9x16x32xbf16, #tpu.memory_space<vmem>>, vector<1x16x32xbf16>
    %336 = vector.shape_cast %335 : vector<1x16x32xbf16> to vector<16x32xbf16>
    %cst_395 = arith.constant dense<0.000000e+00> : vector<16x32xf32>
    %337 = tpu.matmul %334, %336, %cst_395 {dimension_numbers = #tpu.dot_dimension_numbers<[1], [0], [0], [1], [0, 0, 1, 1], [], []>} : vector<16x16xbf16>, vector<16x32xbf16>, vector<16x32xf32> -> vector<16x32xf32>
    %338 = arith.addf %331, %337 : vector<16x32xf32>
    %c0_396 = arith.constant 0 : index
    %c0_397 = arith.constant 0 : index
    %c2_398 = arith.constant 2 : index
    %c0_399 = arith.constant 0 : index
    %339 = vector.load %arg27[%c0_396, %c0_397, %c2_398, %c0_399] : memref<1x18x18x64xf32, #tpu.memory_space<vmem>>, vector<1x4x4x16xf32>
    %340 = vector.shape_cast %339 : vector<1x4x4x16xf32> to vector<16x16xf32>
    %341 = arith.truncf %340 : vector<16x16xf32> to vector<16x16xbf16>
    %c2_400 = arith.constant 2 : index
    %c0_401 = arith.constant 0 : index
    %c0_402 = arith.constant 0 : index
    %342 = vector.load %arg10[%c2_400, %c0_401, %c0_402] : memref<9x16x32xbf16, #tpu.memory_space<vmem>>, vector<1x16x32xbf16>
    %343 = vector.shape_cast %342 : vector<1x16x32xbf16> to vector<16x32xbf16>
    %cst_403 = arith.constant dense<0.000000e+00> : vector<16x32xf32>
    %344 = tpu.matmul %341, %343, %cst_403 {dimension_numbers = #tpu.dot_dimension_numbers<[1], [0], [0], [1], [0, 0, 1, 1], [], []>} : vector<16x16xbf16>, vector<16x32xbf16>, vector<16x32xf32> -> vector<16x32xf32>
    %345 = arith.addf %338, %344 : vector<16x32xf32>
    %c0_404 = arith.constant 0 : index
    %c1_405 = arith.constant 1 : index
    %c0_406 = arith.constant 0 : index
    %c0_407 = arith.constant 0 : index
    %346 = vector.load %arg27[%c0_404, %c1_405, %c0_406, %c0_407] : memref<1x18x18x64xf32, #tpu.memory_space<vmem>>, vector<1x4x4x16xf32>
    %347 = vector.shape_cast %346 : vector<1x4x4x16xf32> to vector<16x16xf32>
    %348 = arith.truncf %347 : vector<16x16xf32> to vector<16x16xbf16>
    %c3_408 = arith.constant 3 : index
    %c0_409 = arith.constant 0 : index
    %c0_410 = arith.constant 0 : index
    %349 = vector.load %arg10[%c3_408, %c0_409, %c0_410] : memref<9x16x32xbf16, #tpu.memory_space<vmem>>, vector<1x16x32xbf16>
    %350 = vector.shape_cast %349 : vector<1x16x32xbf16> to vector<16x32xbf16>
    %cst_411 = arith.constant dense<0.000000e+00> : vector<16x32xf32>
    %351 = tpu.matmul %348, %350, %cst_411 {dimension_numbers = #tpu.dot_dimension_numbers<[1], [0], [0], [1], [0, 0, 1, 1], [], []>} : vector<16x16xbf16>, vector<16x32xbf16>, vector<16x32xf32> -> vector<16x32xf32>
    %352 = arith.addf %345, %351 : vector<16x32xf32>
    %c0_412 = arith.constant 0 : index
    %c1_413 = arith.constant 1 : index
    %c1_414 = arith.constant 1 : index
    %c0_415 = arith.constant 0 : index
    %353 = vector.load %arg27[%c0_412, %c1_413, %c1_414, %c0_415] : memref<1x18x18x64xf32, #tpu.memory_space<vmem>>, vector<1x4x4x16xf32>
    %354 = vector.shape_cast %353 : vector<1x4x4x16xf32> to vector<16x16xf32>
    %355 = arith.truncf %354 : vector<16x16xf32> to vector<16x16xbf16>
    %c4_416 = arith.constant 4 : index
    %c0_417 = arith.constant 0 : index
    %c0_418 = arith.constant 0 : index
    %356 = vector.load %arg10[%c4_416, %c0_417, %c0_418] : memref<9x16x32xbf16, #tpu.memory_space<vmem>>, vector<1x16x32xbf16>
    %357 = vector.shape_cast %356 : vector<1x16x32xbf16> to vector<16x32xbf16>
    %cst_419 = arith.constant dense<0.000000e+00> : vector<16x32xf32>
    %358 = tpu.matmul %355, %357, %cst_419 {dimension_numbers = #tpu.dot_dimension_numbers<[1], [0], [0], [1], [0, 0, 1, 1], [], []>} : vector<16x16xbf16>, vector<16x32xbf16>, vector<16x32xf32> -> vector<16x32xf32>
    %359 = arith.addf %352, %358 : vector<16x32xf32>
    %c0_420 = arith.constant 0 : index
    %c1_421 = arith.constant 1 : index
    %c2_422 = arith.constant 2 : index
    %c0_423 = arith.constant 0 : index
    %360 = vector.load %arg27[%c0_420, %c1_421, %c2_422, %c0_423] : memref<1x18x18x64xf32, #tpu.memory_space<vmem>>, vector<1x4x4x16xf32>
    %361 = vector.shape_cast %360 : vector<1x4x4x16xf32> to vector<16x16xf32>
    %362 = arith.truncf %361 : vector<16x16xf32> to vector<16x16xbf16>
    %c5_424 = arith.constant 5 : index
    %c0_425 = arith.constant 0 : index
    %c0_426 = arith.constant 0 : index
    %363 = vector.load %arg10[%c5_424, %c0_425, %c0_426] : memref<9x16x32xbf16, #tpu.memory_space<vmem>>, vector<1x16x32xbf16>
    %364 = vector.shape_cast %363 : vector<1x16x32xbf16> to vector<16x32xbf16>
    %cst_427 = arith.constant dense<0.000000e+00> : vector<16x32xf32>
    %365 = tpu.matmul %362, %364, %cst_427 {dimension_numbers = #tpu.dot_dimension_numbers<[1], [0], [0], [1], [0, 0, 1, 1], [], []>} : vector<16x16xbf16>, vector<16x32xbf16>, vector<16x32xf32> -> vector<16x32xf32>
    %366 = arith.addf %359, %365 : vector<16x32xf32>
    %c0_428 = arith.constant 0 : index
    %c2_429 = arith.constant 2 : index
    %c0_430 = arith.constant 0 : index
    %c0_431 = arith.constant 0 : index
    %367 = vector.load %arg27[%c0_428, %c2_429, %c0_430, %c0_431] : memref<1x18x18x64xf32, #tpu.memory_space<vmem>>, vector<1x4x4x16xf32>
    %368 = vector.shape_cast %367 : vector<1x4x4x16xf32> to vector<16x16xf32>
    %369 = arith.truncf %368 : vector<16x16xf32> to vector<16x16xbf16>
    %c6_432 = arith.constant 6 : index
    %c0_433 = arith.constant 0 : index
    %c0_434 = arith.constant 0 : index
    %370 = vector.load %arg10[%c6_432, %c0_433, %c0_434] : memref<9x16x32xbf16, #tpu.memory_space<vmem>>, vector<1x16x32xbf16>
    %371 = vector.shape_cast %370 : vector<1x16x32xbf16> to vector<16x32xbf16>
    %cst_435 = arith.constant dense<0.000000e+00> : vector<16x32xf32>
    %372 = tpu.matmul %369, %371, %cst_435 {dimension_numbers = #tpu.dot_dimension_numbers<[1], [0], [0], [1], [0, 0, 1, 1], [], []>} : vector<16x16xbf16>, vector<16x32xbf16>, vector<16x32xf32> -> vector<16x32xf32>
    %373 = arith.addf %366, %372 : vector<16x32xf32>
    %c0_436 = arith.constant 0 : index
    %c2_437 = arith.constant 2 : index
    %c1_438 = arith.constant 1 : index
    %c0_439 = arith.constant 0 : index
    %374 = vector.load %arg27[%c0_436, %c2_437, %c1_438, %c0_439] : memref<1x18x18x64xf32, #tpu.memory_space<vmem>>, vector<1x4x4x16xf32>
    %375 = vector.shape_cast %374 : vector<1x4x4x16xf32> to vector<16x16xf32>
    %376 = arith.truncf %375 : vector<16x16xf32> to vector<16x16xbf16>
    %c7_440 = arith.constant 7 : index
    %c0_441 = arith.constant 0 : index
    %c0_442 = arith.constant 0 : index
    %377 = vector.load %arg10[%c7_440, %c0_441, %c0_442] : memref<9x16x32xbf16, #tpu.memory_space<vmem>>, vector<1x16x32xbf16>
    %378 = vector.shape_cast %377 : vector<1x16x32xbf16> to vector<16x32xbf16>
    %cst_443 = arith.constant dense<0.000000e+00> : vector<16x32xf32>
    %379 = tpu.matmul %376, %378, %cst_443 {dimension_numbers = #tpu.dot_dimension_numbers<[1], [0], [0], [1], [0, 0, 1, 1], [], []>} : vector<16x16xbf16>, vector<16x32xbf16>, vector<16x32xf32> -> vector<16x32xf32>
    %380 = arith.addf %373, %379 : vector<16x32xf32>
    %c0_444 = arith.constant 0 : index
    %c2_445 = arith.constant 2 : index
    %c2_446 = arith.constant 2 : index
    %c0_447 = arith.constant 0 : index
    %381 = vector.load %arg27[%c0_444, %c2_445, %c2_446, %c0_447] : memref<1x18x18x64xf32, #tpu.memory_space<vmem>>, vector<1x4x4x16xf32>
    %382 = vector.shape_cast %381 : vector<1x4x4x16xf32> to vector<16x16xf32>
    %383 = arith.truncf %382 : vector<16x16xf32> to vector<16x16xbf16>
    %c8_448 = arith.constant 8 : index
    %c0_449 = arith.constant 0 : index
    %c0_450 = arith.constant 0 : index
    %384 = vector.load %arg10[%c8_448, %c0_449, %c0_450] : memref<9x16x32xbf16, #tpu.memory_space<vmem>>, vector<1x16x32xbf16>
    %385 = vector.shape_cast %384 : vector<1x16x32xbf16> to vector<16x32xbf16>
    %cst_451 = arith.constant dense<0.000000e+00> : vector<16x32xf32>
    %386 = tpu.matmul %383, %385, %cst_451 {dimension_numbers = #tpu.dot_dimension_numbers<[1], [0], [0], [1], [0, 0, 1, 1], [], []>} : vector<16x16xbf16>, vector<16x32xbf16>, vector<16x32xf32> -> vector<16x32xf32>
    %387 = arith.addf %380, %386 : vector<16x32xf32>
    %c0_452 = arith.constant 0 : index
    %c0_453 = arith.constant 0 : index
    %388 = vector.load %arg11[%c0_452, %c0_453] : memref<1x32xf32, #tpu.memory_space<vmem>>, vector<1x32xf32>
    %389 = vector.broadcast %388 : vector<1x32xf32> to vector<16x32xf32>
    %390 = arith.addf %387, %389 : vector<16x32xf32>
    %cst_454 = arith.constant 0.000000e+00 : f32
    %391 = vector.broadcast %cst_454 : f32 to vector<16x32xf32>
    %392 = arith.cmpf ogt, %390, %391 : vector<16x32xf32>
    %cst_455 = arith.constant 0.00999999977 : f32
    %393 = vector.broadcast %cst_455 : f32 to vector<16x32xf32>
    %394 = arith.mulf %393, %390 : vector<16x32xf32>
    %395 = arith.select %392, %390, %394 : vector<16x32xi1>, vector<16x32xf32>
    %396 = vector.shape_cast %395 : vector<16x32xf32> to vector<1x4x4x32xf32>
    %c0_456 = arith.constant 0 : index
    %c1_457 = arith.constant 1 : index
    %c1_458 = arith.constant 1 : index
    %c0_459 = arith.constant 0 : index
    %397 = vector.load %arg27[%c0_456, %c1_457, %c1_458, %c0_459] : memref<1x18x18x64xf32, #tpu.memory_space<vmem>>, vector<1x4x4x32xf32>
    tpu.vector_store %arg27[%c0_456, %c1_457, %c1_458, %c0_459], %396 {strides = array<i32>} : memref<1x18x18x64xf32, #tpu.memory_space<vmem>>, vector<1x4x4x32xf32>,
    %c0_460 = arith.constant 0 : index
    %c0_461 = arith.constant 0 : index
    %c0_462 = arith.constant 0 : index
    %c0_463 = arith.constant 0 : index
    %398 = vector.load %arg27[%c0_460, %c0_461, %c0_462, %c0_463] : memref<1x18x18x64xf32, #tpu.memory_space<vmem>>, vector<1x4x4x32xf32>
    %399 = vector.shape_cast %398 : vector<1x4x4x32xf32> to vector<16x32xf32>
    %400 = arith.truncf %399 : vector<16x32xf32> to vector<16x32xbf16>
    %c0_464 = arith.constant 0 : index
    %c0_465 = arith.constant 0 : index
    %c0_466 = arith.constant 0 : index
    %401 = vector.load %arg12[%c0_464, %c0_465, %c0_466] : memref<9x32x32xbf16, #tpu.memory_space<vmem>>, vector<1x32x32xbf16>
    %402 = vector.shape_cast %401 : vector<1x32x32xbf16> to vector<32x32xbf16>
    %cst_467 = arith.constant dense<0.000000e+00> : vector<16x32xf32>
    %403 = tpu.matmul %400, %402, %cst_467 {dimension_numbers = #tpu.dot_dimension_numbers<[1], [0], [0], [1], [0, 0, 1, 1], [], []>} : vector<16x32xbf16>, vector<32x32xbf16>, vector<16x32xf32> -> vector<16x32xf32>
    %c0_468 = arith.constant 0 : index
    %c0_469 = arith.constant 0 : index
    %c1_470 = arith.constant 1 : index
    %c0_471 = arith.constant 0 : index
    %404 = vector.load %arg27[%c0_468, %c0_469, %c1_470, %c0_471] : memref<1x18x18x64xf32, #tpu.memory_space<vmem>>, vector<1x4x4x32xf32>
    %405 = vector.shape_cast %404 : vector<1x4x4x32xf32> to vector<16x32xf32>
    %406 = arith.truncf %405 : vector<16x32xf32> to vector<16x32xbf16>
    %c1_472 = arith.constant 1 : index
    %c0_473 = arith.constant 0 : index
    %c0_474 = arith.constant 0 : index
    %407 = vector.load %arg12[%c1_472, %c0_473, %c0_474] : memref<9x32x32xbf16, #tpu.memory_space<vmem>>, vector<1x32x32xbf16>
    %408 = vector.shape_cast %407 : vector<1x32x32xbf16> to vector<32x32xbf16>
    %cst_475 = arith.constant dense<0.000000e+00> : vector<16x32xf32>
    %409 = tpu.matmul %406, %408, %cst_475 {dimension_numbers = #tpu.dot_dimension_numbers<[1], [0], [0], [1], [0, 0, 1, 1], [], []>} : vector<16x32xbf16>, vector<32x32xbf16>, vector<16x32xf32> -> vector<16x32xf32>
    %410 = arith.addf %403, %409 : vector<16x32xf32>
    %c0_476 = arith.constant 0 : index
    %c0_477 = arith.constant 0 : index
    %c2_478 = arith.constant 2 : index
    %c0_479 = arith.constant 0 : index
    %411 = vector.load %arg27[%c0_476, %c0_477, %c2_478, %c0_479] : memref<1x18x18x64xf32, #tpu.memory_space<vmem>>, vector<1x4x4x32xf32>
    %412 = vector.shape_cast %411 : vector<1x4x4x32xf32> to vector<16x32xf32>
    %413 = arith.truncf %412 : vector<16x32xf32> to vector<16x32xbf16>
    %c2_480 = arith.constant 2 : index
    %c0_481 = arith.constant 0 : index
    %c0_482 = arith.constant 0 : index
    %414 = vector.load %arg12[%c2_480, %c0_481, %c0_482] : memref<9x32x32xbf16, #tpu.memory_space<vmem>>, vector<1x32x32xbf16>
    %415 = vector.shape_cast %414 : vector<1x32x32xbf16> to vector<32x32xbf16>
    %cst_483 = arith.constant dense<0.000000e+00> : vector<16x32xf32>
    %416 = tpu.matmul %413, %415, %cst_483 {dimension_numbers = #tpu.dot_dimension_numbers<[1], [0], [0], [1], [0, 0, 1, 1], [], []>} : vector<16x32xbf16>, vector<32x32xbf16>, vector<16x32xf32> -> vector<16x32xf32>
    %417 = arith.addf %410, %416 : vector<16x32xf32>
    %c0_484 = arith.constant 0 : index
    %c1_485 = arith.constant 1 : index
    %c0_486 = arith.constant 0 : index
    %c0_487 = arith.constant 0 : index
    %418 = vector.load %arg27[%c0_484, %c1_485, %c0_486, %c0_487] : memref<1x18x18x64xf32, #tpu.memory_space<vmem>>, vector<1x4x4x32xf32>
    %419 = vector.shape_cast %418 : vector<1x4x4x32xf32> to vector<16x32xf32>
    %420 = arith.truncf %419 : vector<16x32xf32> to vector<16x32xbf16>
    %c3_488 = arith.constant 3 : index
    %c0_489 = arith.constant 0 : index
    %c0_490 = arith.constant 0 : index
    %421 = vector.load %arg12[%c3_488, %c0_489, %c0_490] : memref<9x32x32xbf16, #tpu.memory_space<vmem>>, vector<1x32x32xbf16>
    %422 = vector.shape_cast %421 : vector<1x32x32xbf16> to vector<32x32xbf16>
    %cst_491 = arith.constant dense<0.000000e+00> : vector<16x32xf32>
    %423 = tpu.matmul %420, %422, %cst_491 {dimension_numbers = #tpu.dot_dimension_numbers<[1], [0], [0], [1], [0, 0, 1, 1], [], []>} : vector<16x32xbf16>, vector<32x32xbf16>, vector<16x32xf32> -> vector<16x32xf32>
    %424 = arith.addf %417, %423 : vector<16x32xf32>
    %c0_492 = arith.constant 0 : index
    %c1_493 = arith.constant 1 : index
    %c1_494 = arith.constant 1 : index
    %c0_495 = arith.constant 0 : index
    %425 = vector.load %arg27[%c0_492, %c1_493, %c1_494, %c0_495] : memref<1x18x18x64xf32, #tpu.memory_space<vmem>>, vector<1x4x4x32xf32>
    %426 = vector.shape_cast %425 : vector<1x4x4x32xf32> to vector<16x32xf32>
    %427 = arith.truncf %426 : vector<16x32xf32> to vector<16x32xbf16>
    %c4_496 = arith.constant 4 : index
    %c0_497 = arith.constant 0 : index
    %c0_498 = arith.constant 0 : index
    %428 = vector.load %arg12[%c4_496, %c0_497, %c0_498] : memref<9x32x32xbf16, #tpu.memory_space<vmem>>, vector<1x32x32xbf16>
    %429 = vector.shape_cast %428 : vector<1x32x32xbf16> to vector<32x32xbf16>
    %cst_499 = arith.constant dense<0.000000e+00> : vector<16x32xf32>
    %430 = tpu.matmul %427, %429, %cst_499 {dimension_numbers = #tpu.dot_dimension_numbers<[1], [0], [0], [1], [0, 0, 1, 1], [], []>} : vector<16x32xbf16>, vector<32x32xbf16>, vector<16x32xf32> -> vector<16x32xf32>
    %431 = arith.addf %424, %430 : vector<16x32xf32>
    %c0_500 = arith.constant 0 : index
    %c1_501 = arith.constant 1 : index
    %c2_502 = arith.constant 2 : index
    %c0_503 = arith.constant 0 : index
    %432 = vector.load %arg27[%c0_500, %c1_501, %c2_502, %c0_503] : memref<1x18x18x64xf32, #tpu.memory_space<vmem>>, vector<1x4x4x32xf32>
    %433 = vector.shape_cast %432 : vector<1x4x4x32xf32> to vector<16x32xf32>
    %434 = arith.truncf %433 : vector<16x32xf32> to vector<16x32xbf16>
    %c5_504 = arith.constant 5 : index
    %c0_505 = arith.constant 0 : index
    %c0_506 = arith.constant 0 : index
    %435 = vector.load %arg12[%c5_504, %c0_505, %c0_506] : memref<9x32x32xbf16, #tpu.memory_space<vmem>>, vector<1x32x32xbf16>
    %436 = vector.shape_cast %435 : vector<1x32x32xbf16> to vector<32x32xbf16>
    %cst_507 = arith.constant dense<0.000000e+00> : vector<16x32xf32>
    %437 = tpu.matmul %434, %436, %cst_507 {dimension_numbers = #tpu.dot_dimension_numbers<[1], [0], [0], [1], [0, 0, 1, 1], [], []>} : vector<16x32xbf16>, vector<32x32xbf16>, vector<16x32xf32> -> vector<16x32xf32>
    %438 = arith.addf %431, %437 : vector<16x32xf32>
    %c0_508 = arith.constant 0 : index
    %c2_509 = arith.constant 2 : index
    %c0_510 = arith.constant 0 : index
    %c0_511 = arith.constant 0 : index
    %439 = vector.load %arg27[%c0_508, %c2_509, %c0_510, %c0_511] : memref<1x18x18x64xf32, #tpu.memory_space<vmem>>, vector<1x4x4x32xf32>
    %440 = vector.shape_cast %439 : vector<1x4x4x32xf32> to vector<16x32xf32>
    %441 = arith.truncf %440 : vector<16x32xf32> to vector<16x32xbf16>
    %c6_512 = arith.constant 6 : index
    %c0_513 = arith.constant 0 : index
    %c0_514 = arith.constant 0 : index
    %442 = vector.load %arg12[%c6_512, %c0_513, %c0_514] : memref<9x32x32xbf16, #tpu.memory_space<vmem>>, vector<1x32x32xbf16>
    %443 = vector.shape_cast %442 : vector<1x32x32xbf16> to vector<32x32xbf16>
    %cst_515 = arith.constant dense<0.000000e+00> : vector<16x32xf32>
    %444 = tpu.matmul %441, %443, %cst_515 {dimension_numbers = #tpu.dot_dimension_numbers<[1], [0], [0], [1], [0, 0, 1, 1], [], []>} : vector<16x32xbf16>, vector<32x32xbf16>, vector<16x32xf32> -> vector<16x32xf32>
    %445 = arith.addf %438, %444 : vector<16x32xf32>
    %c0_516 = arith.constant 0 : index
    %c2_517 = arith.constant 2 : index
    %c1_518 = arith.constant 1 : index
    %c0_519 = arith.constant 0 : index
    %446 = vector.load %arg27[%c0_516, %c2_517, %c1_518, %c0_519] : memref<1x18x18x64xf32, #tpu.memory_space<vmem>>, vector<1x4x4x32xf32>
    %447 = vector.shape_cast %446 : vector<1x4x4x32xf32> to vector<16x32xf32>
    %448 = arith.truncf %447 : vector<16x32xf32> to vector<16x32xbf16>
    %c7_520 = arith.constant 7 : index
    %c0_521 = arith.constant 0 : index
    %c0_522 = arith.constant 0 : index
    %449 = vector.load %arg12[%c7_520, %c0_521, %c0_522] : memref<9x32x32xbf16, #tpu.memory_space<vmem>>, vector<1x32x32xbf16>
    %450 = vector.shape_cast %449 : vector<1x32x32xbf16> to vector<32x32xbf16>
    %cst_523 = arith.constant dense<0.000000e+00> : vector<16x32xf32>
    %451 = tpu.matmul %448, %450, %cst_523 {dimension_numbers = #tpu.dot_dimension_numbers<[1], [0], [0], [1], [0, 0, 1, 1], [], []>} : vector<16x32xbf16>, vector<32x32xbf16>, vector<16x32xf32> -> vector<16x32xf32>
    %452 = arith.addf %445, %451 : vector<16x32xf32>
    %c0_524 = arith.constant 0 : index
    %c2_525 = arith.constant 2 : index
    %c2_526 = arith.constant 2 : index
    %c0_527 = arith.constant 0 : index
    %453 = vector.load %arg27[%c0_524, %c2_525, %c2_526, %c0_527] : memref<1x18x18x64xf32, #tpu.memory_space<vmem>>, vector<1x4x4x32xf32>
    %454 = vector.shape_cast %453 : vector<1x4x4x32xf32> to vector<16x32xf32>
    %455 = arith.truncf %454 : vector<16x32xf32> to vector<16x32xbf16>
    %c8_528 = arith.constant 8 : index
    %c0_529 = arith.constant 0 : index
    %c0_530 = arith.constant 0 : index
    %456 = vector.load %arg12[%c8_528, %c0_529, %c0_530] : memref<9x32x32xbf16, #tpu.memory_space<vmem>>, vector<1x32x32xbf16>
    %457 = vector.shape_cast %456 : vector<1x32x32xbf16> to vector<32x32xbf16>
    %cst_531 = arith.constant dense<0.000000e+00> : vector<16x32xf32>
    %458 = tpu.matmul %455, %457, %cst_531 {dimension_numbers = #tpu.dot_dimension_numbers<[1], [0], [0], [1], [0, 0, 1, 1], [], []>} : vector<16x32xbf16>, vector<32x32xbf16>, vector<16x32xf32> -> vector<16x32xf32>
    %459 = arith.addf %452, %458 : vector<16x32xf32>
    %c0_532 = arith.constant 0 : index
    %c0_533 = arith.constant 0 : index
    %460 = vector.load %arg13[%c0_532, %c0_533] : memref<1x32xf32, #tpu.memory_space<vmem>>, vector<1x32xf32>
    %461 = vector.broadcast %460 : vector<1x32xf32> to vector<16x32xf32>
    %462 = arith.addf %459, %461 : vector<16x32xf32>
    %cst_534 = arith.constant 0.000000e+00 : f32
    %463 = vector.broadcast %cst_534 : f32 to vector<16x32xf32>
    %464 = arith.cmpf ogt, %462, %463 : vector<16x32xf32>
    %cst_535 = arith.constant 0.00999999977 : f32
    %465 = vector.broadcast %cst_535 : f32 to vector<16x32xf32>
    %466 = arith.mulf %465, %462 : vector<16x32xf32>
    %467 = arith.select %464, %462, %466 : vector<16x32xi1>, vector<16x32xf32>
    %468 = vector.shape_cast %467 : vector<16x32xf32> to vector<1x4x4x32xf32>
    %c0_536 = arith.constant 0 : index
    %c0_537 = arith.constant 0 : index
    %c0_538 = arith.constant 0 : index
    %c0_539 = arith.constant 0 : index
    %469 = vector.load %arg24[%c0_536, %c0_537, %c0_538, %c0_539] : memref<1x4x4x32xf32, #tpu.memory_space<vmem>>, vector<1x4x4x32xf32>
    tpu.vector_store %arg24[%c0_536, %c0_537, %c0_538, %c0_539], %468 {strides = array<i32>} : memref<1x4x4x32xf32, #tpu.memory_space<vmem>>, vector<1x4x4x32xf32>,
    %470 = vector.shape_cast %468 : vector<1x4x4x32xf32> to vector<8x2x32xf32>
    %cst_540 = arith.constant dense<0xFF800000> : vector<8x32xf32>
    %471 = vector.multi_reduction <maximumf>, %470, %cst_540 [1] : vector<8x2x32xf32> to vector<8x32xf32>
    %472 = vector.shape_cast %471 : vector<8x32xf32> to vector<1x2x2x2x32xf32>
    %473 = vector.extract_strided_slice %472 {offsets = [0, 0, 0, 0, 0], sizes = [1, 2, 1, 2, 32], strides = [1, 1, 1, 1, 1]} : vector<1x2x2x2x32xf32> to vector<1x2x1x2x32xf32>
    %474 = vector.shape_cast %473 : vector<1x2x1x2x32xf32> to vector<1x2x2x32xf32>
    %475 = vector.extract_strided_slice %472 {offsets = [0, 0, 1, 0, 0], sizes = [1, 2, 1, 2, 32], strides = [1, 1, 1, 1, 1]} : vector<1x2x2x2x32xf32> to vector<1x2x1x2x32xf32>
    %476 = vector.shape_cast %475 : vector<1x2x1x2x32xf32> to vector<1x2x2x32xf32>
    %477 = arith.maximumf %474, %476 : vector<1x2x2x32xf32>
    %cst_541 = arith.constant 0.000000e+00 : f32
    %478 = vector.broadcast %cst_541 : f32 to vector<1x1x4x64xf32>
    %cst_542 = arith.constant 0.000000e+00 : f32
    %479 = vector.broadcast %cst_542 : f32 to vector<1x2x1x64xf32>
    %c0_543 = arith.constant 0 : index
    %c0_544 = arith.constant 0 : index
    %c0_545 = arith.constant 0 : index
    %c0_546 = arith.constant 0 : index
    %480 = vector.load %arg27[%c0_543, %c0_544, %c0_545, %c0_546] : memref<1x18x18x64xf32, #tpu.memory_space<vmem>>, vector<1x1x4x64xf32>
    tpu.vector_store %arg27[%c0_543, %c0_544, %c0_545, %c0_546], %478 {strides = array<i32>} : memref<1x18x18x64xf32, #tpu.memory_space<vmem>>, vector<1x1x4x64xf32>,
    %c0_547 = arith.constant 0 : index
    %c3_548 = arith.constant 3 : index
    %c0_549 = arith.constant 0 : index
    %c0_550 = arith.constant 0 : index
    %481 = vector.load %arg27[%c0_547, %c3_548, %c0_549, %c0_550] : memref<1x18x18x64xf32, #tpu.memory_space<vmem>>, vector<1x1x4x64xf32>
    tpu.vector_store %arg27[%c0_547, %c3_548, %c0_549, %c0_550], %478 {strides = array<i32>} : memref<1x18x18x64xf32, #tpu.memory_space<vmem>>, vector<1x1x4x64xf32>,
    %c0_551 = arith.constant 0 : index
    %c1_552 = arith.constant 1 : index
    %c0_553 = arith.constant 0 : index
    %c0_554 = arith.constant 0 : index
    %482 = vector.load %arg27[%c0_551, %c1_552, %c0_553, %c0_554] : memref<1x18x18x64xf32, #tpu.memory_space<vmem>>, vector<1x2x1x64xf32>
    tpu.vector_store %arg27[%c0_551, %c1_552, %c0_553, %c0_554], %479 {strides = array<i32>} : memref<1x18x18x64xf32, #tpu.memory_space<vmem>>, vector<1x2x1x64xf32>,
    %c0_555 = arith.constant 0 : index
    %c1_556 = arith.constant 1 : index
    %c3_557 = arith.constant 3 : index
    %c0_558 = arith.constant 0 : index
    %483 = vector.load %arg27[%c0_555, %c1_556, %c3_557, %c0_558] : memref<1x18x18x64xf32, #tpu.memory_space<vmem>>, vector<1x2x1x64xf32>
    tpu.vector_store %arg27[%c0_555, %c1_556, %c3_557, %c0_558], %479 {strides = array<i32>} : memref<1x18x18x64xf32, #tpu.memory_space<vmem>>, vector<1x2x1x64xf32>,
    %c0_559 = arith.constant 0 : index
    %c1_560 = arith.constant 1 : index
    %c1_561 = arith.constant 1 : index
    %c0_562 = arith.constant 0 : index
    %484 = vector.load %arg27[%c0_559, %c1_560, %c1_561, %c0_562] : memref<1x18x18x64xf32, #tpu.memory_space<vmem>>, vector<1x2x2x32xf32>
    tpu.vector_store %arg27[%c0_559, %c1_560, %c1_561, %c0_562], %477 {strides = array<i32>} : memref<1x18x18x64xf32, #tpu.memory_space<vmem>>, vector<1x2x2x32xf32>,
    %c0_563 = arith.constant 0 : index
    %c0_564 = arith.constant 0 : index
    %c0_565 = arith.constant 0 : index
    %c0_566 = arith.constant 0 : index
    %485 = vector.load %arg27[%c0_563, %c0_564, %c0_565, %c0_566] : memref<1x18x18x64xf32, #tpu.memory_space<vmem>>, vector<1x2x2x32xf32>
    %486 = vector.shape_cast %485 : vector<1x2x2x32xf32> to vector<4x32xf32>
    %487 = arith.truncf %486 : vector<4x32xf32> to vector<4x32xbf16>
    %c0_567 = arith.constant 0 : index
    %c0_568 = arith.constant 0 : index
    %c0_569 = arith.constant 0 : index
    %488 = vector.load %arg14[%c0_567, %c0_568, %c0_569] : memref<9x32x64xbf16, #tpu.memory_space<vmem>>, vector<1x32x64xbf16>
    %489 = vector.shape_cast %488 : vector<1x32x64xbf16> to vector<32x64xbf16>
    %cst_570 = arith.constant dense<0.000000e+00> : vector<4x64xf32>
    %490 = tpu.matmul %487, %489, %cst_570 {dimension_numbers = #tpu.dot_dimension_numbers<[1], [0], [0], [1], [0, 0, 1, 1], [], []>} : vector<4x32xbf16>, vector<32x64xbf16>, vector<4x64xf32> -> vector<4x64xf32>
    %c0_571 = arith.constant 0 : index
    %c0_572 = arith.constant 0 : index
    %c1_573 = arith.constant 1 : index
    %c0_574 = arith.constant 0 : index
    %491 = vector.load %arg27[%c0_571, %c0_572, %c1_573, %c0_574] : memref<1x18x18x64xf32, #tpu.memory_space<vmem>>, vector<1x2x2x32xf32>
    %492 = vector.shape_cast %491 : vector<1x2x2x32xf32> to vector<4x32xf32>
    %493 = arith.truncf %492 : vector<4x32xf32> to vector<4x32xbf16>
    %c1_575 = arith.constant 1 : index
    %c0_576 = arith.constant 0 : index
    %c0_577 = arith.constant 0 : index
    %494 = vector.load %arg14[%c1_575, %c0_576, %c0_577] : memref<9x32x64xbf16, #tpu.memory_space<vmem>>, vector<1x32x64xbf16>
    %495 = vector.shape_cast %494 : vector<1x32x64xbf16> to vector<32x64xbf16>
    %cst_578 = arith.constant dense<0.000000e+00> : vector<4x64xf32>
    %496 = tpu.matmul %493, %495, %cst_578 {dimension_numbers = #tpu.dot_dimension_numbers<[1], [0], [0], [1], [0, 0, 1, 1], [], []>} : vector<4x32xbf16>, vector<32x64xbf16>, vector<4x64xf32> -> vector<4x64xf32>
    %497 = arith.addf %490, %496 : vector<4x64xf32>
    %c0_579 = arith.constant 0 : index
    %c0_580 = arith.constant 0 : index
    %c2_581 = arith.constant 2 : index
    %c0_582 = arith.constant 0 : index
    %498 = vector.load %arg27[%c0_579, %c0_580, %c2_581, %c0_582] : memref<1x18x18x64xf32, #tpu.memory_space<vmem>>, vector<1x2x2x32xf32>
    %499 = vector.shape_cast %498 : vector<1x2x2x32xf32> to vector<4x32xf32>
    %500 = arith.truncf %499 : vector<4x32xf32> to vector<4x32xbf16>
    %c2_583 = arith.constant 2 : index
    %c0_584 = arith.constant 0 : index
    %c0_585 = arith.constant 0 : index
    %501 = vector.load %arg14[%c2_583, %c0_584, %c0_585] : memref<9x32x64xbf16, #tpu.memory_space<vmem>>, vector<1x32x64xbf16>
    %502 = vector.shape_cast %501 : vector<1x32x64xbf16> to vector<32x64xbf16>
    %cst_586 = arith.constant dense<0.000000e+00> : vector<4x64xf32>
    %503 = tpu.matmul %500, %502, %cst_586 {dimension_numbers = #tpu.dot_dimension_numbers<[1], [0], [0], [1], [0, 0, 1, 1], [], []>} : vector<4x32xbf16>, vector<32x64xbf16>, vector<4x64xf32> -> vector<4x64xf32>
    %504 = arith.addf %497, %503 : vector<4x64xf32>
    %c0_587 = arith.constant 0 : index
    %c1_588 = arith.constant 1 : index
    %c0_589 = arith.constant 0 : index
    %c0_590 = arith.constant 0 : index
    %505 = vector.load %arg27[%c0_587, %c1_588, %c0_589, %c0_590] : memref<1x18x18x64xf32, #tpu.memory_space<vmem>>, vector<1x2x2x32xf32>
    %506 = vector.shape_cast %505 : vector<1x2x2x32xf32> to vector<4x32xf32>
    %507 = arith.truncf %506 : vector<4x32xf32> to vector<4x32xbf16>
    %c3_591 = arith.constant 3 : index
    %c0_592 = arith.constant 0 : index
    %c0_593 = arith.constant 0 : index
    %508 = vector.load %arg14[%c3_591, %c0_592, %c0_593] : memref<9x32x64xbf16, #tpu.memory_space<vmem>>, vector<1x32x64xbf16>
    %509 = vector.shape_cast %508 : vector<1x32x64xbf16> to vector<32x64xbf16>
    %cst_594 = arith.constant dense<0.000000e+00> : vector<4x64xf32>
    %510 = tpu.matmul %507, %509, %cst_594 {dimension_numbers = #tpu.dot_dimension_numbers<[1], [0], [0], [1], [0, 0, 1, 1], [], []>} : vector<4x32xbf16>, vector<32x64xbf16>, vector<4x64xf32> -> vector<4x64xf32>
    %511 = arith.addf %504, %510 : vector<4x64xf32>
    %c0_595 = arith.constant 0 : index
    %c1_596 = arith.constant 1 : index
    %c1_597 = arith.constant 1 : index
    %c0_598 = arith.constant 0 : index
    %512 = vector.load %arg27[%c0_595, %c1_596, %c1_597, %c0_598] : memref<1x18x18x64xf32, #tpu.memory_space<vmem>>, vector<1x2x2x32xf32>
    %513 = vector.shape_cast %512 : vector<1x2x2x32xf32> to vector<4x32xf32>
    %514 = arith.truncf %513 : vector<4x32xf32> to vector<4x32xbf16>
    %c4_599 = arith.constant 4 : index
    %c0_600 = arith.constant 0 : index
    %c0_601 = arith.constant 0 : index
    %515 = vector.load %arg14[%c4_599, %c0_600, %c0_601] : memref<9x32x64xbf16, #tpu.memory_space<vmem>>, vector<1x32x64xbf16>
    %516 = vector.shape_cast %515 : vector<1x32x64xbf16> to vector<32x64xbf16>
    %cst_602 = arith.constant dense<0.000000e+00> : vector<4x64xf32>
    %517 = tpu.matmul %514, %516, %cst_602 {dimension_numbers = #tpu.dot_dimension_numbers<[1], [0], [0], [1], [0, 0, 1, 1], [], []>} : vector<4x32xbf16>, vector<32x64xbf16>, vector<4x64xf32> -> vector<4x64xf32>
    %518 = arith.addf %511, %517 : vector<4x64xf32>
    %c0_603 = arith.constant 0 : index
    %c1_604 = arith.constant 1 : index
    %c2_605 = arith.constant 2 : index
    %c0_606 = arith.constant 0 : index
    %519 = vector.load %arg27[%c0_603, %c1_604, %c2_605, %c0_606] : memref<1x18x18x64xf32, #tpu.memory_space<vmem>>, vector<1x2x2x32xf32>
    %520 = vector.shape_cast %519 : vector<1x2x2x32xf32> to vector<4x32xf32>
    %521 = arith.truncf %520 : vector<4x32xf32> to vector<4x32xbf16>
    %c5_607 = arith.constant 5 : index
    %c0_608 = arith.constant 0 : index
    %c0_609 = arith.constant 0 : index
    %522 = vector.load %arg14[%c5_607, %c0_608, %c0_609] : memref<9x32x64xbf16, #tpu.memory_space<vmem>>, vector<1x32x64xbf16>
    %523 = vector.shape_cast %522 : vector<1x32x64xbf16> to vector<32x64xbf16>
    %cst_610 = arith.constant dense<0.000000e+00> : vector<4x64xf32>
    %524 = tpu.matmul %521, %523, %cst_610 {dimension_numbers = #tpu.dot_dimension_numbers<[1], [0], [0], [1], [0, 0, 1, 1], [], []>} : vector<4x32xbf16>, vector<32x64xbf16>, vector<4x64xf32> -> vector<4x64xf32>
    %525 = arith.addf %518, %524 : vector<4x64xf32>
    %c0_611 = arith.constant 0 : index
    %c2_612 = arith.constant 2 : index
    %c0_613 = arith.constant 0 : index
    %c0_614 = arith.constant 0 : index
    %526 = vector.load %arg27[%c0_611, %c2_612, %c0_613, %c0_614] : memref<1x18x18x64xf32, #tpu.memory_space<vmem>>, vector<1x2x2x32xf32>
    %527 = vector.shape_cast %526 : vector<1x2x2x32xf32> to vector<4x32xf32>
    %528 = arith.truncf %527 : vector<4x32xf32> to vector<4x32xbf16>
    %c6_615 = arith.constant 6 : index
    %c0_616 = arith.constant 0 : index
    %c0_617 = arith.constant 0 : index
    %529 = vector.load %arg14[%c6_615, %c0_616, %c0_617] : memref<9x32x64xbf16, #tpu.memory_space<vmem>>, vector<1x32x64xbf16>
    %530 = vector.shape_cast %529 : vector<1x32x64xbf16> to vector<32x64xbf16>
    %cst_618 = arith.constant dense<0.000000e+00> : vector<4x64xf32>
    %531 = tpu.matmul %528, %530, %cst_618 {dimension_numbers = #tpu.dot_dimension_numbers<[1], [0], [0], [1], [0, 0, 1, 1], [], []>} : vector<4x32xbf16>, vector<32x64xbf16>, vector<4x64xf32> -> vector<4x64xf32>
    %532 = arith.addf %525, %531 : vector<4x64xf32>
    %c0_619 = arith.constant 0 : index
    %c2_620 = arith.constant 2 : index
    %c1_621 = arith.constant 1 : index
    %c0_622 = arith.constant 0 : index
    %533 = vector.load %arg27[%c0_619, %c2_620, %c1_621, %c0_622] : memref<1x18x18x64xf32, #tpu.memory_space<vmem>>, vector<1x2x2x32xf32>
    %534 = vector.shape_cast %533 : vector<1x2x2x32xf32> to vector<4x32xf32>
    %535 = arith.truncf %534 : vector<4x32xf32> to vector<4x32xbf16>
    %c7_623 = arith.constant 7 : index
    %c0_624 = arith.constant 0 : index
    %c0_625 = arith.constant 0 : index
    %536 = vector.load %arg14[%c7_623, %c0_624, %c0_625] : memref<9x32x64xbf16, #tpu.memory_space<vmem>>, vector<1x32x64xbf16>
    %537 = vector.shape_cast %536 : vector<1x32x64xbf16> to vector<32x64xbf16>
    %cst_626 = arith.constant dense<0.000000e+00> : vector<4x64xf32>
    %538 = tpu.matmul %535, %537, %cst_626 {dimension_numbers = #tpu.dot_dimension_numbers<[1], [0], [0], [1], [0, 0, 1, 1], [], []>} : vector<4x32xbf16>, vector<32x64xbf16>, vector<4x64xf32> -> vector<4x64xf32>
    %539 = arith.addf %532, %538 : vector<4x64xf32>
    %c0_627 = arith.constant 0 : index
    %c2_628 = arith.constant 2 : index
    %c2_629 = arith.constant 2 : index
    %c0_630 = arith.constant 0 : index
    %540 = vector.load %arg27[%c0_627, %c2_628, %c2_629, %c0_630] : memref<1x18x18x64xf32, #tpu.memory_space<vmem>>, vector<1x2x2x32xf32>
    %541 = vector.shape_cast %540 : vector<1x2x2x32xf32> to vector<4x32xf32>
    %542 = arith.truncf %541 : vector<4x32xf32> to vector<4x32xbf16>
    %c8_631 = arith.constant 8 : index
    %c0_632 = arith.constant 0 : index
    %c0_633 = arith.constant 0 : index
    %543 = vector.load %arg14[%c8_631, %c0_632, %c0_633] : memref<9x32x64xbf16, #tpu.memory_space<vmem>>, vector<1x32x64xbf16>
    %544 = vector.shape_cast %543 : vector<1x32x64xbf16> to vector<32x64xbf16>
    %cst_634 = arith.constant dense<0.000000e+00> : vector<4x64xf32>
    %545 = tpu.matmul %542, %544, %cst_634 {dimension_numbers = #tpu.dot_dimension_numbers<[1], [0], [0], [1], [0, 0, 1, 1], [], []>} : vector<4x32xbf16>, vector<32x64xbf16>, vector<4x64xf32> -> vector<4x64xf32>
    %546 = arith.addf %539, %545 : vector<4x64xf32>
    %c0_635 = arith.constant 0 : index
    %c0_636 = arith.constant 0 : index
    %547 = vector.load %arg15[%c0_635, %c0_636] : memref<1x64xf32, #tpu.memory_space<vmem>>, vector<1x64xf32>
    %548 = vector.broadcast %547 : vector<1x64xf32> to vector<4x64xf32>
    %549 = arith.addf %546, %548 : vector<4x64xf32>
    %cst_637 = arith.constant 0.000000e+00 : f32
    %550 = vector.broadcast %cst_637 : f32 to vector<4x64xf32>
    %551 = arith.cmpf ogt, %549, %550 : vector<4x64xf32>
    %cst_638 = arith.constant 0.00999999977 : f32
    %552 = vector.broadcast %cst_638 : f32 to vector<4x64xf32>
    %553 = arith.mulf %552, %549 : vector<4x64xf32>
    %554 = arith.select %551, %549, %553 : vector<4x64xi1>, vector<4x64xf32>
    %555 = vector.shape_cast %554 : vector<4x64xf32> to vector<1x2x2x64xf32>
    %c0_639 = arith.constant 0 : index
    %c1_640 = arith.constant 1 : index
    %c1_641 = arith.constant 1 : index
    %c0_642 = arith.constant 0 : index
    %556 = vector.load %arg27[%c0_639, %c1_640, %c1_641, %c0_642] : memref<1x18x18x64xf32, #tpu.memory_space<vmem>>, vector<1x2x2x64xf32>
    tpu.vector_store %arg27[%c0_639, %c1_640, %c1_641, %c0_642], %555 {strides = array<i32>} : memref<1x18x18x64xf32, #tpu.memory_space<vmem>>, vector<1x2x2x64xf32>,
    %c0_643 = arith.constant 0 : index
    %c0_644 = arith.constant 0 : index
    %c0_645 = arith.constant 0 : index
    %c0_646 = arith.constant 0 : index
    %557 = vector.load %arg27[%c0_643, %c0_644, %c0_645, %c0_646] : memref<1x18x18x64xf32, #tpu.memory_space<vmem>>, vector<1x2x2x64xf32>
    %558 = vector.shape_cast %557 : vector<1x2x2x64xf32> to vector<4x64xf32>
    %559 = arith.truncf %558 : vector<4x64xf32> to vector<4x64xbf16>
    %c0_647 = arith.constant 0 : index
    %c0_648 = arith.constant 0 : index
    %c0_649 = arith.constant 0 : index
    %560 = vector.load %arg16[%c0_647, %c0_648, %c0_649] : memref<9x64x64xbf16, #tpu.memory_space<vmem>>, vector<1x64x64xbf16>
    %561 = vector.shape_cast %560 : vector<1x64x64xbf16> to vector<64x64xbf16>
    %cst_650 = arith.constant dense<0.000000e+00> : vector<4x64xf32>
    %562 = tpu.matmul %559, %561, %cst_650 {dimension_numbers = #tpu.dot_dimension_numbers<[1], [0], [0], [1], [0, 0, 1, 1], [], []>} : vector<4x64xbf16>, vector<64x64xbf16>, vector<4x64xf32> -> vector<4x64xf32>
    %c0_651 = arith.constant 0 : index
    %c0_652 = arith.constant 0 : index
    %c1_653 = arith.constant 1 : index
    %c0_654 = arith.constant 0 : index
    %563 = vector.load %arg27[%c0_651, %c0_652, %c1_653, %c0_654] : memref<1x18x18x64xf32, #tpu.memory_space<vmem>>, vector<1x2x2x64xf32>
    %564 = vector.shape_cast %563 : vector<1x2x2x64xf32> to vector<4x64xf32>
    %565 = arith.truncf %564 : vector<4x64xf32> to vector<4x64xbf16>
    %c1_655 = arith.constant 1 : index
    %c0_656 = arith.constant 0 : index
    %c0_657 = arith.constant 0 : index
    %566 = vector.load %arg16[%c1_655, %c0_656, %c0_657] : memref<9x64x64xbf16, #tpu.memory_space<vmem>>, vector<1x64x64xbf16>
    %567 = vector.shape_cast %566 : vector<1x64x64xbf16> to vector<64x64xbf16>
    %cst_658 = arith.constant dense<0.000000e+00> : vector<4x64xf32>
    %568 = tpu.matmul %565, %567, %cst_658 {dimension_numbers = #tpu.dot_dimension_numbers<[1], [0], [0], [1], [0, 0, 1, 1], [], []>} : vector<4x64xbf16>, vector<64x64xbf16>, vector<4x64xf32> -> vector<4x64xf32>
    %569 = arith.addf %562, %568 : vector<4x64xf32>
    %c0_659 = arith.constant 0 : index
    %c0_660 = arith.constant 0 : index
    %c2_661 = arith.constant 2 : index
    %c0_662 = arith.constant 0 : index
    %570 = vector.load %arg27[%c0_659, %c0_660, %c2_661, %c0_662] : memref<1x18x18x64xf32, #tpu.memory_space<vmem>>, vector<1x2x2x64xf32>
    %571 = vector.shape_cast %570 : vector<1x2x2x64xf32> to vector<4x64xf32>
    %572 = arith.truncf %571 : vector<4x64xf32> to vector<4x64xbf16>
    %c2_663 = arith.constant 2 : index
    %c0_664 = arith.constant 0 : index
    %c0_665 = arith.constant 0 : index
    %573 = vector.load %arg16[%c2_663, %c0_664, %c0_665] : memref<9x64x64xbf16, #tpu.memory_space<vmem>>, vector<1x64x64xbf16>
    %574 = vector.shape_cast %573 : vector<1x64x64xbf16> to vector<64x64xbf16>
    %cst_666 = arith.constant dense<0.000000e+00> : vector<4x64xf32>
    %575 = tpu.matmul %572, %574, %cst_666 {dimension_numbers = #tpu.dot_dimension_numbers<[1], [0], [0], [1], [0, 0, 1, 1], [], []>} : vector<4x64xbf16>, vector<64x64xbf16>, vector<4x64xf32> -> vector<4x64xf32>
    %576 = arith.addf %569, %575 : vector<4x64xf32>
    %c0_667 = arith.constant 0 : index
    %c1_668 = arith.constant 1 : index
    %c0_669 = arith.constant 0 : index
    %c0_670 = arith.constant 0 : index
    %577 = vector.load %arg27[%c0_667, %c1_668, %c0_669, %c0_670] : memref<1x18x18x64xf32, #tpu.memory_space<vmem>>, vector<1x2x2x64xf32>
    %578 = vector.shape_cast %577 : vector<1x2x2x64xf32> to vector<4x64xf32>
    %579 = arith.truncf %578 : vector<4x64xf32> to vector<4x64xbf16>
    %c3_671 = arith.constant 3 : index
    %c0_672 = arith.constant 0 : index
    %c0_673 = arith.constant 0 : index
    %580 = vector.load %arg16[%c3_671, %c0_672, %c0_673] : memref<9x64x64xbf16, #tpu.memory_space<vmem>>, vector<1x64x64xbf16>
    %581 = vector.shape_cast %580 : vector<1x64x64xbf16> to vector<64x64xbf16>
    %cst_674 = arith.constant dense<0.000000e+00> : vector<4x64xf32>
    %582 = tpu.matmul %579, %581, %cst_674 {dimension_numbers = #tpu.dot_dimension_numbers<[1], [0], [0], [1], [0, 0, 1, 1], [], []>} : vector<4x64xbf16>, vector<64x64xbf16>, vector<4x64xf32> -> vector<4x64xf32>
    %583 = arith.addf %576, %582 : vector<4x64xf32>
    %c0_675 = arith.constant 0 : index
    %c1_676 = arith.constant 1 : index
    %c1_677 = arith.constant 1 : index
    %c0_678 = arith.constant 0 : index
    %584 = vector.load %arg27[%c0_675, %c1_676, %c1_677, %c0_678] : memref<1x18x18x64xf32, #tpu.memory_space<vmem>>, vector<1x2x2x64xf32>
    %585 = vector.shape_cast %584 : vector<1x2x2x64xf32> to vector<4x64xf32>
    %586 = arith.truncf %585 : vector<4x64xf32> to vector<4x64xbf16>
    %c4_679 = arith.constant 4 : index
    %c0_680 = arith.constant 0 : index
    %c0_681 = arith.constant 0 : index
    %587 = vector.load %arg16[%c4_679, %c0_680, %c0_681] : memref<9x64x64xbf16, #tpu.memory_space<vmem>>, vector<1x64x64xbf16>
    %588 = vector.shape_cast %587 : vector<1x64x64xbf16> to vector<64x64xbf16>
    %cst_682 = arith.constant dense<0.000000e+00> : vector<4x64xf32>
    %589 = tpu.matmul %586, %588, %cst_682 {dimension_numbers = #tpu.dot_dimension_numbers<[1], [0], [0], [1], [0, 0, 1, 1], [], []>} : vector<4x64xbf16>, vector<64x64xbf16>, vector<4x64xf32> -> vector<4x64xf32>
    %590 = arith.addf %583, %589 : vector<4x64xf32>
    %c0_683 = arith.constant 0 : index
    %c1_684 = arith.constant 1 : index
    %c2_685 = arith.constant 2 : index
    %c0_686 = arith.constant 0 : index
    %591 = vector.load %arg27[%c0_683, %c1_684, %c2_685, %c0_686] : memref<1x18x18x64xf32, #tpu.memory_space<vmem>>, vector<1x2x2x64xf32>
    %592 = vector.shape_cast %591 : vector<1x2x2x64xf32> to vector<4x64xf32>
    %593 = arith.truncf %592 : vector<4x64xf32> to vector<4x64xbf16>
    %c5_687 = arith.constant 5 : index
    %c0_688 = arith.constant 0 : index
    %c0_689 = arith.constant 0 : index
    %594 = vector.load %arg16[%c5_687, %c0_688, %c0_689] : memref<9x64x64xbf16, #tpu.memory_space<vmem>>, vector<1x64x64xbf16>
    %595 = vector.shape_cast %594 : vector<1x64x64xbf16> to vector<64x64xbf16>
    %cst_690 = arith.constant dense<0.000000e+00> : vector<4x64xf32>
    %596 = tpu.matmul %593, %595, %cst_690 {dimension_numbers = #tpu.dot_dimension_numbers<[1], [0], [0], [1], [0, 0, 1, 1], [], []>} : vector<4x64xbf16>, vector<64x64xbf16>, vector<4x64xf32> -> vector<4x64xf32>
    %597 = arith.addf %590, %596 : vector<4x64xf32>
    %c0_691 = arith.constant 0 : index
    %c2_692 = arith.constant 2 : index
    %c0_693 = arith.constant 0 : index
    %c0_694 = arith.constant 0 : index
    %598 = vector.load %arg27[%c0_691, %c2_692, %c0_693, %c0_694] : memref<1x18x18x64xf32, #tpu.memory_space<vmem>>, vector<1x2x2x64xf32>
    %599 = vector.shape_cast %598 : vector<1x2x2x64xf32> to vector<4x64xf32>
    %600 = arith.truncf %599 : vector<4x64xf32> to vector<4x64xbf16>
    %c6_695 = arith.constant 6 : index
    %c0_696 = arith.constant 0 : index
    %c0_697 = arith.constant 0 : index
    %601 = vector.load %arg16[%c6_695, %c0_696, %c0_697] : memref<9x64x64xbf16, #tpu.memory_space<vmem>>, vector<1x64x64xbf16>
    %602 = vector.shape_cast %601 : vector<1x64x64xbf16> to vector<64x64xbf16>
    %cst_698 = arith.constant dense<0.000000e+00> : vector<4x64xf32>
    %603 = tpu.matmul %600, %602, %cst_698 {dimension_numbers = #tpu.dot_dimension_numbers<[1], [0], [0], [1], [0, 0, 1, 1], [], []>} : vector<4x64xbf16>, vector<64x64xbf16>, vector<4x64xf32> -> vector<4x64xf32>
    %604 = arith.addf %597, %603 : vector<4x64xf32>
    %c0_699 = arith.constant 0 : index
    %c2_700 = arith.constant 2 : index
    %c1_701 = arith.constant 1 : index
    %c0_702 = arith.constant 0 : index
    %605 = vector.load %arg27[%c0_699, %c2_700, %c1_701, %c0_702] : memref<1x18x18x64xf32, #tpu.memory_space<vmem>>, vector<1x2x2x64xf32>
    %606 = vector.shape_cast %605 : vector<1x2x2x64xf32> to vector<4x64xf32>
    %607 = arith.truncf %606 : vector<4x64xf32> to vector<4x64xbf16>
    %c7_703 = arith.constant 7 : index
    %c0_704 = arith.constant 0 : index
    %c0_705 = arith.constant 0 : index
    %608 = vector.load %arg16[%c7_703, %c0_704, %c0_705] : memref<9x64x64xbf16, #tpu.memory_space<vmem>>, vector<1x64x64xbf16>
    %609 = vector.shape_cast %608 : vector<1x64x64xbf16> to vector<64x64xbf16>
    %cst_706 = arith.constant dense<0.000000e+00> : vector<4x64xf32>
    %610 = tpu.matmul %607, %609, %cst_706 {dimension_numbers = #tpu.dot_dimension_numbers<[1], [0], [0], [1], [0, 0, 1, 1], [], []>} : vector<4x64xbf16>, vector<64x64xbf16>, vector<4x64xf32> -> vector<4x64xf32>
    %611 = arith.addf %604, %610 : vector<4x64xf32>
    %c0_707 = arith.constant 0 : index
    %c2_708 = arith.constant 2 : index
    %c2_709 = arith.constant 2 : index
    %c0_710 = arith.constant 0 : index
    %612 = vector.load %arg27[%c0_707, %c2_708, %c2_709, %c0_710] : memref<1x18x18x64xf32, #tpu.memory_space<vmem>>, vector<1x2x2x64xf32>
    %613 = vector.shape_cast %612 : vector<1x2x2x64xf32> to vector<4x64xf32>
    %614 = arith.truncf %613 : vector<4x64xf32> to vector<4x64xbf16>
    %c8_711 = arith.constant 8 : index
    %c0_712 = arith.constant 0 : index
    %c0_713 = arith.constant 0 : index
    %615 = vector.load %arg16[%c8_711, %c0_712, %c0_713] : memref<9x64x64xbf16, #tpu.memory_space<vmem>>, vector<1x64x64xbf16>
    %616 = vector.shape_cast %615 : vector<1x64x64xbf16> to vector<64x64xbf16>
    %cst_714 = arith.constant dense<0.000000e+00> : vector<4x64xf32>
    %617 = tpu.matmul %614, %616, %cst_714 {dimension_numbers = #tpu.dot_dimension_numbers<[1], [0], [0], [1], [0, 0, 1, 1], [], []>} : vector<4x64xbf16>, vector<64x64xbf16>, vector<4x64xf32> -> vector<4x64xf32>
    %618 = arith.addf %611, %617 : vector<4x64xf32>
    %c0_715 = arith.constant 0 : index
    %c0_716 = arith.constant 0 : index
    %619 = vector.load %arg17[%c0_715, %c0_716] : memref<1x64xf32, #tpu.memory_space<vmem>>, vector<1x64xf32>
    %620 = vector.broadcast %619 : vector<1x64xf32> to vector<4x64xf32>
    %621 = arith.addf %618, %620 : vector<4x64xf32>
    %cst_717 = arith.constant 0.000000e+00 : f32
    %622 = vector.broadcast %cst_717 : f32 to vector<4x64xf32>
    %623 = arith.cmpf ogt, %621, %622 : vector<4x64xf32>
    %cst_718 = arith.constant 0.00999999977 : f32
    %624 = vector.broadcast %cst_718 : f32 to vector<4x64xf32>
    %625 = arith.mulf %624, %621 : vector<4x64xf32>
    %626 = arith.select %623, %621, %625 : vector<4x64xi1>, vector<4x64xf32>
    %627 = vector.shape_cast %626 : vector<4x64xf32> to vector<1x2x2x64xf32>
    %c0_719 = arith.constant 0 : index
    %c0_720 = arith.constant 0 : index
    %c0_721 = arith.constant 0 : index
    %c0_722 = arith.constant 0 : index
    %628 = vector.load %arg25[%c0_719, %c0_720, %c0_721, %c0_722] : memref<1x2x2x64xf32, #tpu.memory_space<vmem>>, vector<1x2x2x64xf32>
    tpu.vector_store %arg25[%c0_719, %c0_720, %c0_721, %c0_722], %627 {strides = array<i32>} : memref<1x2x2x64xf32, #tpu.memory_space<vmem>>, vector<1x2x2x64xf32>,
    %629 = vector.shape_cast %627 : vector<1x2x2x64xf32> to vector<2x2x64xf32>
    %cst_723 = arith.constant dense<0xFF800000> : vector<2x64xf32>
    %630 = vector.multi_reduction <maximumf>, %629, %cst_723 [1] : vector<2x2x64xf32> to vector<2x64xf32>
    %631 = vector.shape_cast %630 : vector<2x64xf32> to vector<1x1x2x1x64xf32>
    %632 = vector.extract_strided_slice %631 {offsets = [0, 0, 0, 0, 0], sizes = [1, 1, 1, 1, 64], strides = [1, 1, 1, 1, 1]} : vector<1x1x2x1x64xf32> to vector<1x1x1x1x64xf32>
    %633 = vector.shape_cast %632 : vector<1x1x1x1x64xf32> to vector<1x1x1x64xf32>
    %634 = vector.extract_strided_slice %631 {offsets = [0, 0, 1, 0, 0], sizes = [1, 1, 1, 1, 64], strides = [1, 1, 1, 1, 1]} : vector<1x1x2x1x64xf32> to vector<1x1x1x1x64xf32>
    %635 = vector.shape_cast %634 : vector<1x1x1x1x64xf32> to vector<1x1x1x64xf32>
    %636 = arith.maximumf %633, %635 : vector<1x1x1x64xf32>
    %cst_724 = arith.constant 0.000000e+00 : f32
    %637 = vector.broadcast %cst_724 : f32 to vector<1x1x3x64xf32>
    %cst_725 = arith.constant 0.000000e+00 : f32
    %638 = vector.broadcast %cst_725 : f32 to vector<1x1x1x64xf32>
    %c0_726 = arith.constant 0 : index
    %c0_727 = arith.constant 0 : index
    %c0_728 = arith.constant 0 : index
    %c0_729 = arith.constant 0 : index
    %639 = vector.load %arg27[%c0_726, %c0_727, %c0_728, %c0_729] : memref<1x18x18x64xf32, #tpu.memory_space<vmem>>, vector<1x1x3x64xf32>
    tpu.vector_store %arg27[%c0_726, %c0_727, %c0_728, %c0_729], %637 {strides = array<i32>} : memref<1x18x18x64xf32, #tpu.memory_space<vmem>>, vector<1x1x3x64xf32>,
    %c0_730 = arith.constant 0 : index
    %c2_731 = arith.constant 2 : index
    %c0_732 = arith.constant 0 : index
    %c0_733 = arith.constant 0 : index
    %640 = vector.load %arg27[%c0_730, %c2_731, %c0_732, %c0_733] : memref<1x18x18x64xf32, #tpu.memory_space<vmem>>, vector<1x1x3x64xf32>
    tpu.vector_store %arg27[%c0_730, %c2_731, %c0_732, %c0_733], %637 {strides = array<i32>} : memref<1x18x18x64xf32, #tpu.memory_space<vmem>>, vector<1x1x3x64xf32>,
    %c0_734 = arith.constant 0 : index
    %c1_735 = arith.constant 1 : index
    %c0_736 = arith.constant 0 : index
    %c0_737 = arith.constant 0 : index
    %641 = vector.load %arg27[%c0_734, %c1_735, %c0_736, %c0_737] : memref<1x18x18x64xf32, #tpu.memory_space<vmem>>, vector<1x1x1x64xf32>
    tpu.vector_store %arg27[%c0_734, %c1_735, %c0_736, %c0_737], %638 {strides = array<i32>} : memref<1x18x18x64xf32, #tpu.memory_space<vmem>>, vector<1x1x1x64xf32>,
    %c0_738 = arith.constant 0 : index
    %c1_739 = arith.constant 1 : index
    %c2_740 = arith.constant 2 : index
    %c0_741 = arith.constant 0 : index
    %642 = vector.load %arg27[%c0_738, %c1_739, %c2_740, %c0_741] : memref<1x18x18x64xf32, #tpu.memory_space<vmem>>, vector<1x1x1x64xf32>
    tpu.vector_store %arg27[%c0_738, %c1_739, %c2_740, %c0_741], %638 {strides = array<i32>} : memref<1x18x18x64xf32, #tpu.memory_space<vmem>>, vector<1x1x1x64xf32>,
    %c0_742 = arith.constant 0 : index
    %c1_743 = arith.constant 1 : index
    %c1_744 = arith.constant 1 : index
    %c0_745 = arith.constant 0 : index
    %643 = vector.load %arg27[%c0_742, %c1_743, %c1_744, %c0_745] : memref<1x18x18x64xf32, #tpu.memory_space<vmem>>, vector<1x1x1x64xf32>
    tpu.vector_store %arg27[%c0_742, %c1_743, %c1_744, %c0_745], %636 {strides = array<i32>} : memref<1x18x18x64xf32, #tpu.memory_space<vmem>>, vector<1x1x1x64xf32>,
    %c0_746 = arith.constant 0 : index
    %c0_747 = arith.constant 0 : index
    %c0_748 = arith.constant 0 : index
    %c0_749 = arith.constant 0 : index
    %644 = vector.load %arg27[%c0_746, %c0_747, %c0_748, %c0_749] : memref<1x18x18x64xf32, #tpu.memory_space<vmem>>, vector<1x1x1x64xf32>
    %645 = vector.shape_cast %644 : vector<1x1x1x64xf32> to vector<1x64xf32>
    %646 = arith.truncf %645 : vector<1x64xf32> to vector<1x64xbf16>
    %c0_750 = arith.constant 0 : index
    %c0_751 = arith.constant 0 : index
    %c0_752 = arith.constant 0 : index
    %647 = vector.load %arg18[%c0_750, %c0_751, %c0_752] : memref<9x64x64xbf16, #tpu.memory_space<vmem>>, vector<1x64x64xbf16>
    %648 = vector.shape_cast %647 : vector<1x64x64xbf16> to vector<64x64xbf16>
    %cst_753 = arith.constant dense<0.000000e+00> : vector<1x64xf32>
    %649 = tpu.matmul %646, %648, %cst_753 {dimension_numbers = #tpu.dot_dimension_numbers<[1], [0], [0], [1], [0, 0, 1, 1], [], []>} : vector<1x64xbf16>, vector<64x64xbf16>, vector<1x64xf32> -> vector<1x64xf32>
    %c0_754 = arith.constant 0 : index
    %c0_755 = arith.constant 0 : index
    %c1_756 = arith.constant 1 : index
    %c0_757 = arith.constant 0 : index
    %650 = vector.load %arg27[%c0_754, %c0_755, %c1_756, %c0_757] : memref<1x18x18x64xf32, #tpu.memory_space<vmem>>, vector<1x1x1x64xf32>
    %651 = vector.shape_cast %650 : vector<1x1x1x64xf32> to vector<1x64xf32>
    %652 = arith.truncf %651 : vector<1x64xf32> to vector<1x64xbf16>
    %c1_758 = arith.constant 1 : index
    %c0_759 = arith.constant 0 : index
    %c0_760 = arith.constant 0 : index
    %653 = vector.load %arg18[%c1_758, %c0_759, %c0_760] : memref<9x64x64xbf16, #tpu.memory_space<vmem>>, vector<1x64x64xbf16>
    %654 = vector.shape_cast %653 : vector<1x64x64xbf16> to vector<64x64xbf16>
    %cst_761 = arith.constant dense<0.000000e+00> : vector<1x64xf32>
    %655 = tpu.matmul %652, %654, %cst_761 {dimension_numbers = #tpu.dot_dimension_numbers<[1], [0], [0], [1], [0, 0, 1, 1], [], []>} : vector<1x64xbf16>, vector<64x64xbf16>, vector<1x64xf32> -> vector<1x64xf32>
    %656 = arith.addf %649, %655 : vector<1x64xf32>
    %c0_762 = arith.constant 0 : index
    %c0_763 = arith.constant 0 : index
    %c2_764 = arith.constant 2 : index
    %c0_765 = arith.constant 0 : index
    %657 = vector.load %arg27[%c0_762, %c0_763, %c2_764, %c0_765] : memref<1x18x18x64xf32, #tpu.memory_space<vmem>>, vector<1x1x1x64xf32>
    %658 = vector.shape_cast %657 : vector<1x1x1x64xf32> to vector<1x64xf32>
    %659 = arith.truncf %658 : vector<1x64xf32> to vector<1x64xbf16>
    %c2_766 = arith.constant 2 : index
    %c0_767 = arith.constant 0 : index
    %c0_768 = arith.constant 0 : index
    %660 = vector.load %arg18[%c2_766, %c0_767, %c0_768] : memref<9x64x64xbf16, #tpu.memory_space<vmem>>, vector<1x64x64xbf16>
    %661 = vector.shape_cast %660 : vector<1x64x64xbf16> to vector<64x64xbf16>
    %cst_769 = arith.constant dense<0.000000e+00> : vector<1x64xf32>
    %662 = tpu.matmul %659, %661, %cst_769 {dimension_numbers = #tpu.dot_dimension_numbers<[1], [0], [0], [1], [0, 0, 1, 1], [], []>} : vector<1x64xbf16>, vector<64x64xbf16>, vector<1x64xf32> -> vector<1x64xf32>
    %663 = arith.addf %656, %662 : vector<1x64xf32>
    %c0_770 = arith.constant 0 : index
    %c1_771 = arith.constant 1 : index
    %c0_772 = arith.constant 0 : index
    %c0_773 = arith.constant 0 : index
    %664 = vector.load %arg27[%c0_770, %c1_771, %c0_772, %c0_773] : memref<1x18x18x64xf32, #tpu.memory_space<vmem>>, vector<1x1x1x64xf32>
    %665 = vector.shape_cast %664 : vector<1x1x1x64xf32> to vector<1x64xf32>
    %666 = arith.truncf %665 : vector<1x64xf32> to vector<1x64xbf16>
    %c3_774 = arith.constant 3 : index
    %c0_775 = arith.constant 0 : index
    %c0_776 = arith.constant 0 : index
    %667 = vector.load %arg18[%c3_774, %c0_775, %c0_776] : memref<9x64x64xbf16, #tpu.memory_space<vmem>>, vector<1x64x64xbf16>
    %668 = vector.shape_cast %667 : vector<1x64x64xbf16> to vector<64x64xbf16>
    %cst_777 = arith.constant dense<0.000000e+00> : vector<1x64xf32>
    %669 = tpu.matmul %666, %668, %cst_777 {dimension_numbers = #tpu.dot_dimension_numbers<[1], [0], [0], [1], [0, 0, 1, 1], [], []>} : vector<1x64xbf16>, vector<64x64xbf16>, vector<1x64xf32> -> vector<1x64xf32>
    %670 = arith.addf %663, %669 : vector<1x64xf32>
    %c0_778 = arith.constant 0 : index
    %c1_779 = arith.constant 1 : index
    %c1_780 = arith.constant 1 : index
    %c0_781 = arith.constant 0 : index
    %671 = vector.load %arg27[%c0_778, %c1_779, %c1_780, %c0_781] : memref<1x18x18x64xf32, #tpu.memory_space<vmem>>, vector<1x1x1x64xf32>
    %672 = vector.shape_cast %671 : vector<1x1x1x64xf32> to vector<1x64xf32>
    %673 = arith.truncf %672 : vector<1x64xf32> to vector<1x64xbf16>
    %c4_782 = arith.constant 4 : index
    %c0_783 = arith.constant 0 : index
    %c0_784 = arith.constant 0 : index
    %674 = vector.load %arg18[%c4_782, %c0_783, %c0_784] : memref<9x64x64xbf16, #tpu.memory_space<vmem>>, vector<1x64x64xbf16>
    %675 = vector.shape_cast %674 : vector<1x64x64xbf16> to vector<64x64xbf16>
    %cst_785 = arith.constant dense<0.000000e+00> : vector<1x64xf32>
    %676 = tpu.matmul %673, %675, %cst_785 {dimension_numbers = #tpu.dot_dimension_numbers<[1], [0], [0], [1], [0, 0, 1, 1], [], []>} : vector<1x64xbf16>, vector<64x64xbf16>, vector<1x64xf32> -> vector<1x64xf32>
    %677 = arith.addf %670, %676 : vector<1x64xf32>
    %c0_786 = arith.constant 0 : index
    %c1_787 = arith.constant 1 : index
    %c2_788 = arith.constant 2 : index
    %c0_789 = arith.constant 0 : index
    %678 = vector.load %arg27[%c0_786, %c1_787, %c2_788, %c0_789] : memref<1x18x18x64xf32, #tpu.memory_space<vmem>>, vector<1x1x1x64xf32>
    %679 = vector.shape_cast %678 : vector<1x1x1x64xf32> to vector<1x64xf32>
    %680 = arith.truncf %679 : vector<1x64xf32> to vector<1x64xbf16>
    %c5_790 = arith.constant 5 : index
    %c0_791 = arith.constant 0 : index
    %c0_792 = arith.constant 0 : index
    %681 = vector.load %arg18[%c5_790, %c0_791, %c0_792] : memref<9x64x64xbf16, #tpu.memory_space<vmem>>, vector<1x64x64xbf16>
    %682 = vector.shape_cast %681 : vector<1x64x64xbf16> to vector<64x64xbf16>
    %cst_793 = arith.constant dense<0.000000e+00> : vector<1x64xf32>
    %683 = tpu.matmul %680, %682, %cst_793 {dimension_numbers = #tpu.dot_dimension_numbers<[1], [0], [0], [1], [0, 0, 1, 1], [], []>} : vector<1x64xbf16>, vector<64x64xbf16>, vector<1x64xf32> -> vector<1x64xf32>
    %684 = arith.addf %677, %683 : vector<1x64xf32>
    %c0_794 = arith.constant 0 : index
    %c2_795 = arith.constant 2 : index
    %c0_796 = arith.constant 0 : index
    %c0_797 = arith.constant 0 : index
    %685 = vector.load %arg27[%c0_794, %c2_795, %c0_796, %c0_797] : memref<1x18x18x64xf32, #tpu.memory_space<vmem>>, vector<1x1x1x64xf32>
    %686 = vector.shape_cast %685 : vector<1x1x1x64xf32> to vector<1x64xf32>
    %687 = arith.truncf %686 : vector<1x64xf32> to vector<1x64xbf16>
    %c6_798 = arith.constant 6 : index
    %c0_799 = arith.constant 0 : index
    %c0_800 = arith.constant 0 : index
    %688 = vector.load %arg18[%c6_798, %c0_799, %c0_800] : memref<9x64x64xbf16, #tpu.memory_space<vmem>>, vector<1x64x64xbf16>
    %689 = vector.shape_cast %688 : vector<1x64x64xbf16> to vector<64x64xbf16>
    %cst_801 = arith.constant dense<0.000000e+00> : vector<1x64xf32>
    %690 = tpu.matmul %687, %689, %cst_801 {dimension_numbers = #tpu.dot_dimension_numbers<[1], [0], [0], [1], [0, 0, 1, 1], [], []>} : vector<1x64xbf16>, vector<64x64xbf16>, vector<1x64xf32> -> vector<1x64xf32>
    %691 = arith.addf %684, %690 : vector<1x64xf32>
    %c0_802 = arith.constant 0 : index
    %c2_803 = arith.constant 2 : index
    %c1_804 = arith.constant 1 : index
    %c0_805 = arith.constant 0 : index
    %692 = vector.load %arg27[%c0_802, %c2_803, %c1_804, %c0_805] : memref<1x18x18x64xf32, #tpu.memory_space<vmem>>, vector<1x1x1x64xf32>
    %693 = vector.shape_cast %692 : vector<1x1x1x64xf32> to vector<1x64xf32>
    %694 = arith.truncf %693 : vector<1x64xf32> to vector<1x64xbf16>
    %c7_806 = arith.constant 7 : index
    %c0_807 = arith.constant 0 : index
    %c0_808 = arith.constant 0 : index
    %695 = vector.load %arg18[%c7_806, %c0_807, %c0_808] : memref<9x64x64xbf16, #tpu.memory_space<vmem>>, vector<1x64x64xbf16>
    %696 = vector.shape_cast %695 : vector<1x64x64xbf16> to vector<64x64xbf16>
    %cst_809 = arith.constant dense<0.000000e+00> : vector<1x64xf32>
    %697 = tpu.matmul %694, %696, %cst_809 {dimension_numbers = #tpu.dot_dimension_numbers<[1], [0], [0], [1], [0, 0, 1, 1], [], []>} : vector<1x64xbf16>, vector<64x64xbf16>, vector<1x64xf32> -> vector<1x64xf32>
    %698 = arith.addf %691, %697 : vector<1x64xf32>
    %c0_810 = arith.constant 0 : index
    %c2_811 = arith.constant 2 : index
    %c2_812 = arith.constant 2 : index
    %c0_813 = arith.constant 0 : index
    %699 = vector.load %arg27[%c0_810, %c2_811, %c2_812, %c0_813] : memref<1x18x18x64xf32, #tpu.memory_space<vmem>>, vector<1x1x1x64xf32>
    %700 = vector.shape_cast %699 : vector<1x1x1x64xf32> to vector<1x64xf32>
    %701 = arith.truncf %700 : vector<1x64xf32> to vector<1x64xbf16>
    %c8_814 = arith.constant 8 : index
    %c0_815 = arith.constant 0 : index
    %c0_816 = arith.constant 0 : index
    %702 = vector.load %arg18[%c8_814, %c0_815, %c0_816] : memref<9x64x64xbf16, #tpu.memory_space<vmem>>, vector<1x64x64xbf16>
    %703 = vector.shape_cast %702 : vector<1x64x64xbf16> to vector<64x64xbf16>
    %cst_817 = arith.constant dense<0.000000e+00> : vector<1x64xf32>
    %704 = tpu.matmul %701, %703, %cst_817 {dimension_numbers = #tpu.dot_dimension_numbers<[1], [0], [0], [1], [0, 0, 1, 1], [], []>} : vector<1x64xbf16>, vector<64x64xbf16>, vector<1x64xf32> -> vector<1x64xf32>
    %705 = arith.addf %698, %704 : vector<1x64xf32>
    %c0_818 = arith.constant 0 : index
    %c0_819 = arith.constant 0 : index
    %706 = vector.load %arg19[%c0_818, %c0_819] : memref<1x64xf32, #tpu.memory_space<vmem>>, vector<1x64xf32>
    %707 = arith.addf %705, %706 : vector<1x64xf32>
    %cst_820 = arith.constant 0.000000e+00 : f32
    %708 = vector.broadcast %cst_820 : f32 to vector<1x64xf32>
    %709 = arith.cmpf ogt, %707, %708 : vector<1x64xf32>
    %cst_821 = arith.constant 0.00999999977 : f32
    %710 = vector.broadcast %cst_821 : f32 to vector<1x64xf32>
    %711 = arith.mulf %710, %707 : vector<1x64xf32>
    %712 = arith.select %709, %707, %711 : vector<1x64xi1>, vector<1x64xf32>
    %713 = vector.shape_cast %712 : vector<1x64xf32> to vector<1x1x1x64xf32>
    %c0_822 = arith.constant 0 : index
    %c1_823 = arith.constant 1 : index
    %c1_824 = arith.constant 1 : index
    %c0_825 = arith.constant 0 : index
    %714 = vector.load %arg27[%c0_822, %c1_823, %c1_824, %c0_825] : memref<1x18x18x64xf32, #tpu.memory_space<vmem>>, vector<1x1x1x64xf32>
    tpu.vector_store %arg27[%c0_822, %c1_823, %c1_824, %c0_825], %713 {strides = array<i32>} : memref<1x18x18x64xf32, #tpu.memory_space<vmem>>, vector<1x1x1x64xf32>,
    %c0_826 = arith.constant 0 : index
    %c0_827 = arith.constant 0 : index
    %c0_828 = arith.constant 0 : index
    %c0_829 = arith.constant 0 : index
    %715 = vector.load %arg27[%c0_826, %c0_827, %c0_828, %c0_829] : memref<1x18x18x64xf32, #tpu.memory_space<vmem>>, vector<1x1x1x64xf32>
    %716 = vector.shape_cast %715 : vector<1x1x1x64xf32> to vector<1x64xf32>
    %717 = arith.truncf %716 : vector<1x64xf32> to vector<1x64xbf16>
    %c0_830 = arith.constant 0 : index
    %c0_831 = arith.constant 0 : index
    %c0_832 = arith.constant 0 : index
    %718 = vector.load %arg20[%c0_830, %c0_831, %c0_832] : memref<9x64x64xbf16, #tpu.memory_space<vmem>>, vector<1x64x64xbf16>
    %719 = vector.shape_cast %718 : vector<1x64x64xbf16> to vector<64x64xbf16>
    %cst_833 = arith.constant dense<0.000000e+00> : vector<1x64xf32>
    %720 = tpu.matmul %717, %719, %cst_833 {dimension_numbers = #tpu.dot_dimension_numbers<[1], [0], [0], [1], [0, 0, 1, 1], [], []>} : vector<1x64xbf16>, vector<64x64xbf16>, vector<1x64xf32> -> vector<1x64xf32>
    %c0_834 = arith.constant 0 : index
    %c0_835 = arith.constant 0 : index
    %c1_836 = arith.constant 1 : index
    %c0_837 = arith.constant 0 : index
    %721 = vector.load %arg27[%c0_834, %c0_835, %c1_836, %c0_837] : memref<1x18x18x64xf32, #tpu.memory_space<vmem>>, vector<1x1x1x64xf32>
    %722 = vector.shape_cast %721 : vector<1x1x1x64xf32> to vector<1x64xf32>
    %723 = arith.truncf %722 : vector<1x64xf32> to vector<1x64xbf16>
    %c1_838 = arith.constant 1 : index
    %c0_839 = arith.constant 0 : index
    %c0_840 = arith.constant 0 : index
    %724 = vector.load %arg20[%c1_838, %c0_839, %c0_840] : memref<9x64x64xbf16, #tpu.memory_space<vmem>>, vector<1x64x64xbf16>
    %725 = vector.shape_cast %724 : vector<1x64x64xbf16> to vector<64x64xbf16>
    %cst_841 = arith.constant dense<0.000000e+00> : vector<1x64xf32>
    %726 = tpu.matmul %723, %725, %cst_841 {dimension_numbers = #tpu.dot_dimension_numbers<[1], [0], [0], [1], [0, 0, 1, 1], [], []>} : vector<1x64xbf16>, vector<64x64xbf16>, vector<1x64xf32> -> vector<1x64xf32>
    %727 = arith.addf %720, %726 : vector<1x64xf32>
    %c0_842 = arith.constant 0 : index
    %c0_843 = arith.constant 0 : index
    %c2_844 = arith.constant 2 : index
    %c0_845 = arith.constant 0 : index
    %728 = vector.load %arg27[%c0_842, %c0_843, %c2_844, %c0_845] : memref<1x18x18x64xf32, #tpu.memory_space<vmem>>, vector<1x1x1x64xf32>
    %729 = vector.shape_cast %728 : vector<1x1x1x64xf32> to vector<1x64xf32>
    %730 = arith.truncf %729 : vector<1x64xf32> to vector<1x64xbf16>
    %c2_846 = arith.constant 2 : index
    %c0_847 = arith.constant 0 : index
    %c0_848 = arith.constant 0 : index
    %731 = vector.load %arg20[%c2_846, %c0_847, %c0_848] : memref<9x64x64xbf16, #tpu.memory_space<vmem>>, vector<1x64x64xbf16>
    %732 = vector.shape_cast %731 : vector<1x64x64xbf16> to vector<64x64xbf16>
    %cst_849 = arith.constant dense<0.000000e+00> : vector<1x64xf32>
    %733 = tpu.matmul %730, %732, %cst_849 {dimension_numbers = #tpu.dot_dimension_numbers<[1], [0], [0], [1], [0, 0, 1, 1], [], []>} : vector<1x64xbf16>, vector<64x64xbf16>, vector<1x64xf32> -> vector<1x64xf32>
    %734 = arith.addf %727, %733 : vector<1x64xf32>
    %c0_850 = arith.constant 0 : index
    %c1_851 = arith.constant 1 : index
    %c0_852 = arith.constant 0 : index
    %c0_853 = arith.constant 0 : index
    %735 = vector.load %arg27[%c0_850, %c1_851, %c0_852, %c0_853] : memref<1x18x18x64xf32, #tpu.memory_space<vmem>>, vector<1x1x1x64xf32>
    %736 = vector.shape_cast %735 : vector<1x1x1x64xf32> to vector<1x64xf32>
    %737 = arith.truncf %736 : vector<1x64xf32> to vector<1x64xbf16>
    %c3_854 = arith.constant 3 : index
    %c0_855 = arith.constant 0 : index
    %c0_856 = arith.constant 0 : index
    %738 = vector.load %arg20[%c3_854, %c0_855, %c0_856] : memref<9x64x64xbf16, #tpu.memory_space<vmem>>, vector<1x64x64xbf16>
    %739 = vector.shape_cast %738 : vector<1x64x64xbf16> to vector<64x64xbf16>
    %cst_857 = arith.constant dense<0.000000e+00> : vector<1x64xf32>
    %740 = tpu.matmul %737, %739, %cst_857 {dimension_numbers = #tpu.dot_dimension_numbers<[1], [0], [0], [1], [0, 0, 1, 1], [], []>} : vector<1x64xbf16>, vector<64x64xbf16>, vector<1x64xf32> -> vector<1x64xf32>
    %741 = arith.addf %734, %740 : vector<1x64xf32>
    %c0_858 = arith.constant 0 : index
    %c1_859 = arith.constant 1 : index
    %c1_860 = arith.constant 1 : index
    %c0_861 = arith.constant 0 : index
    %742 = vector.load %arg27[%c0_858, %c1_859, %c1_860, %c0_861] : memref<1x18x18x64xf32, #tpu.memory_space<vmem>>, vector<1x1x1x64xf32>
    %743 = vector.shape_cast %742 : vector<1x1x1x64xf32> to vector<1x64xf32>
    %744 = arith.truncf %743 : vector<1x64xf32> to vector<1x64xbf16>
    %c4_862 = arith.constant 4 : index
    %c0_863 = arith.constant 0 : index
    %c0_864 = arith.constant 0 : index
    %745 = vector.load %arg20[%c4_862, %c0_863, %c0_864] : memref<9x64x64xbf16, #tpu.memory_space<vmem>>, vector<1x64x64xbf16>
    %746 = vector.shape_cast %745 : vector<1x64x64xbf16> to vector<64x64xbf16>
    %cst_865 = arith.constant dense<0.000000e+00> : vector<1x64xf32>
    %747 = tpu.matmul %744, %746, %cst_865 {dimension_numbers = #tpu.dot_dimension_numbers<[1], [0], [0], [1], [0, 0, 1, 1], [], []>} : vector<1x64xbf16>, vector<64x64xbf16>, vector<1x64xf32> -> vector<1x64xf32>
    %748 = arith.addf %741, %747 : vector<1x64xf32>
    %c0_866 = arith.constant 0 : index
    %c1_867 = arith.constant 1 : index
    %c2_868 = arith.constant 2 : index
    %c0_869 = arith.constant 0 : index
    %749 = vector.load %arg27[%c0_866, %c1_867, %c2_868, %c0_869] : memref<1x18x18x64xf32, #tpu.memory_space<vmem>>, vector<1x1x1x64xf32>
    %750 = vector.shape_cast %749 : vector<1x1x1x64xf32> to vector<1x64xf32>
    %751 = arith.truncf %750 : vector<1x64xf32> to vector<1x64xbf16>
    %c5_870 = arith.constant 5 : index
    %c0_871 = arith.constant 0 : index
    %c0_872 = arith.constant 0 : index
    %752 = vector.load %arg20[%c5_870, %c0_871, %c0_872] : memref<9x64x64xbf16, #tpu.memory_space<vmem>>, vector<1x64x64xbf16>
    %753 = vector.shape_cast %752 : vector<1x64x64xbf16> to vector<64x64xbf16>
    %cst_873 = arith.constant dense<0.000000e+00> : vector<1x64xf32>
    %754 = tpu.matmul %751, %753, %cst_873 {dimension_numbers = #tpu.dot_dimension_numbers<[1], [0], [0], [1], [0, 0, 1, 1], [], []>} : vector<1x64xbf16>, vector<64x64xbf16>, vector<1x64xf32> -> vector<1x64xf32>
    %755 = arith.addf %748, %754 : vector<1x64xf32>
    %c0_874 = arith.constant 0 : index
    %c2_875 = arith.constant 2 : index
    %c0_876 = arith.constant 0 : index
    %c0_877 = arith.constant 0 : index
    %756 = vector.load %arg27[%c0_874, %c2_875, %c0_876, %c0_877] : memref<1x18x18x64xf32, #tpu.memory_space<vmem>>, vector<1x1x1x64xf32>
    %757 = vector.shape_cast %756 : vector<1x1x1x64xf32> to vector<1x64xf32>
    %758 = arith.truncf %757 : vector<1x64xf32> to vector<1x64xbf16>
    %c6_878 = arith.constant 6 : index
    %c0_879 = arith.constant 0 : index
    %c0_880 = arith.constant 0 : index
    %759 = vector.load %arg20[%c6_878, %c0_879, %c0_880] : memref<9x64x64xbf16, #tpu.memory_space<vmem>>, vector<1x64x64xbf16>
    %760 = vector.shape_cast %759 : vector<1x64x64xbf16> to vector<64x64xbf16>
    %cst_881 = arith.constant dense<0.000000e+00> : vector<1x64xf32>
    %761 = tpu.matmul %758, %760, %cst_881 {dimension_numbers = #tpu.dot_dimension_numbers<[1], [0], [0], [1], [0, 0, 1, 1], [], []>} : vector<1x64xbf16>, vector<64x64xbf16>, vector<1x64xf32> -> vector<1x64xf32>
    %762 = arith.addf %755, %761 : vector<1x64xf32>
    %c0_882 = arith.constant 0 : index
    %c2_883 = arith.constant 2 : index
    %c1_884 = arith.constant 1 : index
    %c0_885 = arith.constant 0 : index
    %763 = vector.load %arg27[%c0_882, %c2_883, %c1_884, %c0_885] : memref<1x18x18x64xf32, #tpu.memory_space<vmem>>, vector<1x1x1x64xf32>
    %764 = vector.shape_cast %763 : vector<1x1x1x64xf32> to vector<1x64xf32>
    %765 = arith.truncf %764 : vector<1x64xf32> to vector<1x64xbf16>
    %c7_886 = arith.constant 7 : index
    %c0_887 = arith.constant 0 : index
    %c0_888 = arith.constant 0 : index
    %766 = vector.load %arg20[%c7_886, %c0_887, %c0_888] : memref<9x64x64xbf16, #tpu.memory_space<vmem>>, vector<1x64x64xbf16>
    %767 = vector.shape_cast %766 : vector<1x64x64xbf16> to vector<64x64xbf16>
    %cst_889 = arith.constant dense<0.000000e+00> : vector<1x64xf32>
    %768 = tpu.matmul %765, %767, %cst_889 {dimension_numbers = #tpu.dot_dimension_numbers<[1], [0], [0], [1], [0, 0, 1, 1], [], []>} : vector<1x64xbf16>, vector<64x64xbf16>, vector<1x64xf32> -> vector<1x64xf32>
    %769 = arith.addf %762, %768 : vector<1x64xf32>
    %c0_890 = arith.constant 0 : index
    %c2_891 = arith.constant 2 : index
    %c2_892 = arith.constant 2 : index
    %c0_893 = arith.constant 0 : index
    %770 = vector.load %arg27[%c0_890, %c2_891, %c2_892, %c0_893] : memref<1x18x18x64xf32, #tpu.memory_space<vmem>>, vector<1x1x1x64xf32>
    %771 = vector.shape_cast %770 : vector<1x1x1x64xf32> to vector<1x64xf32>
    %772 = arith.truncf %771 : vector<1x64xf32> to vector<1x64xbf16>
    %c8_894 = arith.constant 8 : index
    %c0_895 = arith.constant 0 : index
    %c0_896 = arith.constant 0 : index
    %773 = vector.load %arg20[%c8_894, %c0_895, %c0_896] : memref<9x64x64xbf16, #tpu.memory_space<vmem>>, vector<1x64x64xbf16>
    %774 = vector.shape_cast %773 : vector<1x64x64xbf16> to vector<64x64xbf16>
    %cst_897 = arith.constant dense<0.000000e+00> : vector<1x64xf32>
    %775 = tpu.matmul %772, %774, %cst_897 {dimension_numbers = #tpu.dot_dimension_numbers<[1], [0], [0], [1], [0, 0, 1, 1], [], []>} : vector<1x64xbf16>, vector<64x64xbf16>, vector<1x64xf32> -> vector<1x64xf32>
    %776 = arith.addf %769, %775 : vector<1x64xf32>
    %c0_898 = arith.constant 0 : index
    %c0_899 = arith.constant 0 : index
    %777 = vector.load %arg21[%c0_898, %c0_899] : memref<1x64xf32, #tpu.memory_space<vmem>>, vector<1x64xf32>
    %778 = arith.addf %776, %777 : vector<1x64xf32>
    %cst_900 = arith.constant 0.000000e+00 : f32
    %779 = vector.broadcast %cst_900 : f32 to vector<1x64xf32>
    %780 = arith.cmpf ogt, %778, %779 : vector<1x64xf32>
    %cst_901 = arith.constant 0.00999999977 : f32
    %781 = vector.broadcast %cst_901 : f32 to vector<1x64xf32>
    %782 = arith.mulf %781, %778 : vector<1x64xf32>
    %783 = arith.select %780, %778, %782 : vector<1x64xi1>, vector<1x64xf32>
    %784 = vector.shape_cast %783 : vector<1x64xf32> to vector<1x1x1x64xf32>
    %c0_902 = arith.constant 0 : index
    %c0_903 = arith.constant 0 : index
    %c0_904 = arith.constant 0 : index
    %c0_905 = arith.constant 0 : index
    %785 = vector.load %arg26[%c0_902, %c0_903, %c0_904, %c0_905] : memref<1x1x1x64xf32, #tpu.memory_space<vmem>>, vector<1x1x1x64xf32>
    tpu.vector_store %arg26[%c0_902, %c0_903, %c0_904, %c0_905], %784 {strides = array<i32>} : memref<1x1x1x64xf32, #tpu.memory_space<vmem>>, vector<1x1x1x64xf32>,
    return
  }
  func.func @transform_0(%arg0: i32) -> (i32, i32, i32, i32) {
    %c0_i32 = arith.constant 0 : i32
    %c0_i32_0 = arith.constant 0 : i32
    %c0_i32_1 = arith.constant 0 : i32
    %c0_i32_2 = arith.constant 0 : i32
    return %arg0, %c0_i32, %c0_i32_0, %c0_i32_1 : i32, i32, i32, i32
  }
  func.func @transform_1(%arg0: i32) -> (i32, i32, i32) {
    %c0_i32 = arith.constant 0 : i32
    %c0_i32_0 = arith.constant 0 : i32
    %c0_i32_1 = arith.constant 0 : i32
    %c0_i32_2 = arith.constant 0 : i32
    return %c0_i32, %c0_i32_0, %c0_i32_1 : i32, i32, i32
  }
  func.func @transform_2(%arg0: i32) -> (i32, i32) {
    %c0_i32 = arith.constant 0 : i32
    %c0_i32_0 = arith.constant 0 : i32
    %c0_i32_1 = arith.constant 0 : i32
    return %c0_i32, %c0_i32_0 : i32, i32
  }
  func.func @transform_3(%arg0: i32) -> (i32, i32, i32) {
    %c0_i32 = arith.constant 0 : i32
    %c0_i32_0 = arith.constant 0 : i32
    %c0_i32_1 = arith.constant 0 : i32
    %c0_i32_2 = arith.constant 0 : i32
    return %c0_i32, %c0_i32_0, %c0_i32_1 : i32, i32, i32
  }
  func.func @transform_4(%arg0: i32) -> (i32, i32) {
    %c0_i32 = arith.constant 0 : i32
    %c0_i32_0 = arith.constant 0 : i32
    %c0_i32_1 = arith.constant 0 : i32
    return %c0_i32, %c0_i32_0 : i32, i32
  }
  func.func @transform_5(%arg0: i32) -> (i32, i32, i32) {
    %c0_i32 = arith.constant 0 : i32
    %c0_i32_0 = arith.constant 0 : i32
    %c0_i32_1 = arith.constant 0 : i32
    %c0_i32_2 = arith.constant 0 : i32
    return %c0_i32, %c0_i32_0, %c0_i32_1 : i32, i32, i32
  }
  func.func @transform_6(%arg0: i32) -> (i32, i32) {
    %c0_i32 = arith.constant 0 : i32
    %c0_i32_0 = arith.constant 0 : i32
    %c0_i32_1 = arith.constant 0 : i32
    return %c0_i32, %c0_i32_0 : i32, i32
  }
  func.func @transform_7(%arg0: i32) -> (i32, i32, i32) {
    %c0_i32 = arith.constant 0 : i32
    %c0_i32_0 = arith.constant 0 : i32
    %c0_i32_1 = arith.constant 0 : i32
    %c0_i32_2 = arith.constant 0 : i32
    return %c0_i32, %c0_i32_0, %c0_i32_1 : i32, i32, i32
  }
  func.func @transform_8(%arg0: i32) -> (i32, i32) {
    %c0_i32 = arith.constant 0 : i32
    %c0_i32_0 = arith.constant 0 : i32
    %c0_i32_1 = arith.constant 0 : i32
    return %c0_i32, %c0_i32_0 : i32, i32
  }
  func.func @transform_9(%arg0: i32) -> (i32, i32, i32) {
    %c0_i32 = arith.constant 0 : i32
    %c0_i32_0 = arith.constant 0 : i32
    %c0_i32_1 = arith.constant 0 : i32
    %c0_i32_2 = arith.constant 0 : i32
    return %c0_i32, %c0_i32_0, %c0_i32_1 : i32, i32, i32
  }
  func.func @transform_10(%arg0: i32) -> (i32, i32) {
    %c0_i32 = arith.constant 0 : i32
    %c0_i32_0 = arith.constant 0 : i32
    %c0_i32_1 = arith.constant 0 : i32
    return %c0_i32, %c0_i32_0 : i32, i32
  }
  func.func @transform_11(%arg0: i32) -> (i32, i32, i32) {
    %c0_i32 = arith.constant 0 : i32
    %c0_i32_0 = arith.constant 0 : i32
    %c0_i32_1 = arith.constant 0 : i32
    %c0_i32_2 = arith.constant 0 : i32
    return %c0_i32, %c0_i32_0, %c0_i32_1 : i32, i32, i32
  }
  func.func @transform_12(%arg0: i32) -> (i32, i32) {
    %c0_i32 = arith.constant 0 : i32
    %c0_i32_0 = arith.constant 0 : i32
    %c0_i32_1 = arith.constant 0 : i32
    return %c0_i32, %c0_i32_0 : i32, i32
  }
  func.func @transform_13(%arg0: i32) -> (i32, i32, i32) {
    %c0_i32 = arith.constant 0 : i32
    %c0_i32_0 = arith.constant 0 : i32
    %c0_i32_1 = arith.constant 0 : i32
    %c0_i32_2 = arith.constant 0 : i32
    return %c0_i32, %c0_i32_0, %c0_i32_1 : i32, i32, i32
  }
  func.func @transform_14(%arg0: i32) -> (i32, i32) {
    %c0_i32 = arith.constant 0 : i32
    %c0_i32_0 = arith.constant 0 : i32
    %c0_i32_1 = arith.constant 0 : i32
    return %c0_i32, %c0_i32_0 : i32, i32
  }
  func.func @transform_15(%arg0: i32) -> (i32, i32, i32) {
    %c0_i32 = arith.constant 0 : i32
    %c0_i32_0 = arith.constant 0 : i32
    %c0_i32_1 = arith.constant 0 : i32
    %c0_i32_2 = arith.constant 0 : i32
    return %c0_i32, %c0_i32_0, %c0_i32_1 : i32, i32, i32
  }
  func.func @transform_16(%arg0: i32) -> (i32, i32) {
    %c0_i32 = arith.constant 0 : i32
    %c0_i32_0 = arith.constant 0 : i32
    %c0_i32_1 = arith.constant 0 : i32
    return %c0_i32, %c0_i32_0 : i32, i32
  }
  func.func @transform_17(%arg0: i32) -> (i32, i32, i32) {
    %c0_i32 = arith.constant 0 : i32
    %c0_i32_0 = arith.constant 0 : i32
    %c0_i32_1 = arith.constant 0 : i32
    %c0_i32_2 = arith.constant 0 : i32
    return %c0_i32, %c0_i32_0, %c0_i32_1 : i32, i32, i32
  }
  func.func @transform_18(%arg0: i32) -> (i32, i32) {
    %c0_i32 = arith.constant 0 : i32
    %c0_i32_0 = arith.constant 0 : i32
    %c0_i32_1 = arith.constant 0 : i32
    return %c0_i32, %c0_i32_0 : i32, i32
  }
  func.func @transform_19(%arg0: i32) -> (i32, i32, i32) {
    %c0_i32 = arith.constant 0 : i32
    %c0_i32_0 = arith.constant 0 : i32
    %c0_i32_1 = arith.constant 0 : i32
    %c0_i32_2 = arith.constant 0 : i32
    return %c0_i32, %c0_i32_0, %c0_i32_1 : i32, i32, i32
  }
  func.func @transform_20(%arg0: i32) -> (i32, i32) {
    %c0_i32 = arith.constant 0 : i32
    %c0_i32_0 = arith.constant 0 : i32
    %c0_i32_1 = arith.constant 0 : i32
    return %c0_i32, %c0_i32_0 : i32, i32
  }
  func.func @transform_21(%arg0: i32) -> (i32, i32, i32, i32) {
    %c0_i32 = arith.constant 0 : i32
    %c0_i32_0 = arith.constant 0 : i32
    %c0_i32_1 = arith.constant 0 : i32
    %c0_i32_2 = arith.constant 0 : i32
    return %arg0, %c0_i32, %c0_i32_0, %c0_i32_1 : i32, i32, i32, i32
  }
  func.func @transform_22(%arg0: i32) -> (i32, i32, i32, i32) {
    %c0_i32 = arith.constant 0 : i32
    %c0_i32_0 = arith.constant 0 : i32
    %c0_i32_1 = arith.constant 0 : i32
    %c0_i32_2 = arith.constant 0 : i32
    return %arg0, %c0_i32, %c0_i32_0, %c0_i32_1 : i32, i32, i32, i32
  }
  func.func @transform_23(%arg0: i32) -> (i32, i32, i32, i32) {
    %c0_i32 = arith.constant 0 : i32
    %c0_i32_0 = arith.constant 0 : i32
    %c0_i32_1 = arith.constant 0 : i32
    %c0_i32_2 = arith.constant 0 : i32
    return %arg0, %c0_i32, %c0_i32_0, %c0_i32_1 : i32, i32, i32, i32
  }
  func.func @transform_24(%arg0: i32) -> (i32, i32, i32, i32) {
    %c0_i32 = arith.constant 0 : i32
    %c0_i32_0 = arith.constant 0 : i32
    %c0_i32_1 = arith.constant 0 : i32
    %c0_i32_2 = arith.constant 0 : i32
    return %arg0, %c0_i32, %c0_i32_0, %c0_i32_1 : i32, i32, i32, i32
  }
  func.func @transform_25(%arg0: i32) -> (i32, i32, i32, i32) {
    %c0_i32 = arith.constant 0 : i32
    %c0_i32_0 = arith.constant 0 : i32
    %c0_i32_1 = arith.constant 0 : i32
    %c0_i32_2 = arith.constant 0 : i32
    return %arg0, %c0_i32, %c0_i32_0, %c0_i32_1 : i32, i32, i32, i32
  }
}

</mosaic_0001>

<bundles_post_ra>
// kernel: encoder_forward.1
= control target key start
LH: loop header
LB: loop body
LE: loop exit
PB: predicated region body
PF: predicated region fallthrough
CT: control target
= control target key end

     0   :  { %s22915_s0 = inlined_call_operand.vmem [shape: f32[2,16,16,4], index: 0, kind: input, shape index: {}]   ;;  %s22916_s1 = inlined_call_operand.vmem [shape: bf16[9,4,8], index: 1, kind: input, shape index: {}]   ;;  %s22917_s2 = inlined_call_operand.vmem [shape: f32[1,8], index: 2, kind: input, shape index: {}]   ;;  %s22918_s3 = inlined_call_operand.vmem [shape: bf16[9,8,8], index: 3, kind: input, shape index: {}]   ;;  %s22919_s4 = inlined_call_operand.vmem [shape: f32[1,8], index: 4, kind: input, shape index: {}]   ;;  %s22920_s5 = inlined_call_operand.hbm [shape: bf16[9,8,16], index: 5, kind: input, shape index: {}]   ;;  %s22921_s6 = inlined_call_operand.vmem [shape: f32[1,16], index: 6, kind: input, shape index: {}]   ;;  %s22922_s7 = inlined_call_operand.hbm [shape: bf16[9,16,16], index: 7, kind: input, shape index: {}]   ;;  %s22923_s8 = inlined_call_operand.vmem [shape: f32[1,16], index: 8, kind: input, shape index: {}]   ;;  %s22924_s9 = inlined_call_operand.hbm [shape: bf16[9,16,32], index: 9, kind: input, shape index: {}]   ;;  %s22925_s10 = inlined_call_operand.vmem [shape: f32[1,32], index: 10, kind: input, shape index: {}]   ;;  %s22926_s11 = inlined_call_operand.vmem [shape: bf16[9,32,32], index: 11, kind: input, shape index: {}]   ;;  %s22927_s12 = inlined_call_operand.vmem [shape: f32[1,32], index: 12, kind: input, shape index: {}]   ;;  %s22928_s13 = inlined_call_operand.hbm [shape: bf16[9,32,64], index: 13, kind: input, shape index: {}]   ;;  %s22929_s14 = inlined_call_operand.vmem [shape: f32[1,64], index: 14, kind: input, shape index: {}]   ;;  %s22930_s15 = inlined_call_operand.vmem [shape: bf16[9,64,64], index: 15, kind: input, shape index: {}]   ;;  %s22931_s16 = inlined_call_operand.vmem [shape: f32[1,64], index: 16, kind: input, shape index: {}]   ;;  %s22932_s17 = inlined_call_operand.vmem [shape: bf16[9,64,64], index: 17, kind: input, shape index: {}]   ;;  %s22933_s18 = inlined_call_operand.vmem [shape: f32[1,64], index: 18, kind: input, shape index: {}]   ;;  %s22934_s19 = inlined_call_operand.hbm [shape: bf16[9,64,64], index: 19, kind: input, shape index: {}]   ;;  %s22935_s20 = inlined_call_operand.vmem [shape: f32[1,64], index: 20, kind: input, shape index: {}]   ;;  %s22936_s21 = inlined_call_operand.vmem [shape: f32[2,16,16,8], index: 21, kind: output, shape index: {0}]   ;;  %s22937_s22 = inlined_call_operand.hbm [shape: f32[2,8,8,16], index: 22, kind: output, shape index: {1}]   ;;  %s22938_s23 = inlined_call_operand.hbm [shape: f32[2,4,4,32], index: 23, kind: output, shape index: {2}]   ;;  %s22939_s24 = inlined_call_operand.hbm [shape: f32[2,2,2,64], index: 24, kind: output, shape index: {3}]   ;;  %s22940_s25 = inlined_call_operand.hbm [shape: f32[2,1,1,64], index: 25, kind: output, shape index: {4}]  }
   0x1   :  { %22969 = sst [smem:[#allocation31_spill]] %s22915_s0 }
   0x2   :  { %22970 = sst [smem:[#allocation32_spill]] %s22916_s1 }
   0x3   :  { %22971 = sst [smem:[#allocation33_spill]] %s22917_s2 }
   0x4   :  { %22972 = sst [smem:[#allocation34_spill]] %s22918_s3 }
   0x5   :  { %22973 = sst [smem:[#allocation35_spill]] %s22919_s4 }
   0x6   :  { %22974 = sst [smem:[#allocation36_spill]] %s22920_s5 }
   0x7   :  { %22975 = sst [smem:[#allocation37_spill]] %s22921_s6 }
   0x8   :  { %22976 = sst [smem:[#allocation38_spill]] %s22922_s7 }
   0x9   :  { %22977 = sst [smem:[#allocation39_spill]] %s22923_s8 }
   0xa   :  { %22978 = sst [smem:[#allocation40_spill]] %s22924_s9 }
   0xb   :  { %22979 = sst [smem:[#allocation41_spill]] %s22925_s10 }
   0xc   :  { %22980 = sst [smem:[#allocation42_spill]] %s22926_s11 }
   0xd   :  { %22981 = sst [smem:[#allocation43_spill]] %s22928_s13 }
   0xe   :  { %22982 = sst [smem:[#allocation44_spill]] %s22933_s18 }
   0xf   :  { %22983 = sst [smem:[#allocation45_spill]] %s22935_s20 }
  0x10   :  { %22984 = sst [smem:[#allocation46_spill]] %s22937_s22 }
  0x11   :  { %22985 = sst [smem:[#allocation47_spill]] %s22938_s23 }
  0x12   :  { %22986 = sst [smem:[#allocation48_spill]] %s22939_s24 }
  0x13   :  { %22987 = sst [smem:[#allocation49_spill]] %s22940_s25 }
  0x14   :  { %31 = vsyncpa [#allocation4], 0 }
  0x15   :  { %32 = vsyncpa [#allocation7], 0 }
  0x16   :  { %33 = vsyncpa [#allocation10], 0 }
  0x17   :  { %34 = vsyncpa [#allocation5], 0 }
  0x18   :  { %36 = vsyncpa [#allocation5 + $0x1], 0 }
  0x19   :  { %37 = vsyncpa [#allocation14], 0 }
  0x1a   :  { %39 = vsyncpa [#allocation14 + $0x1], 0 }
  0x1b   :  { %40 = vsyncpa [#allocation17], 0 }
  0x1c   :  { %42 = vsyncpa [#allocation17 + $0x1], 0  ;;  %s19638_s29 = smov 0   ;;  %s19640_s2 = smov 0  }
  0x1d   :  { %s19642_s6 = smov 0   ;;  %s19644_s30 = smov 0  }
  0x1e LB: > { %22988 = sst [smem:[#allocation24_spill]] %s19474_s29  ;;  %s19659_s7 = sadd.s32 4294967295, %s19486_s30   ;;  %s19486_s30 = sphi %s19644_s30, %s23036_s30   ;;  %s19482_s6 = sphi %s19642_s6, %s23038_s6   ;;  %s19478_s2 = sphi %s19640_s2, %s23040_s2   ;;  %s19474_s29 = sphi %s19638_s29, %s23039_s29  }
  0x1f   : > { %22989 = sst [smem:[#allocation25_spill]] %s19482_s6  ;;  %s22947_s3 = sadd.s32 4294967294, %s19486_s30  }
  0x20   : > { %22990 = sst [smem:[#allocation26_spill]] %s19486_s30  ;;  %s19663_s26 = sadd.s32 1, %s19486_s30  }
  0x21   : > { %22991 = sst [smem:[#allocation27_spill]] %s19663_s26  ;;  %s527_s1 = sadd.s32 1, %s19482_s6 }
  0x22   : > { %s524_s8 = ssub.s32 %s19486_s30, %s19663_s26  ;;  %p537_p0 = scmp.ne.s32.totalorder %s19482_s6, %s19478_s2 }
  0x23   : > { %p525_p1 = scmp.eq.s32.totalorder %s524_s8, 0  ;;  %p538_p2 = scmp.eq.s32.totalorder %s19659_s7, 1 }
  0x24   : > { %p543_p3 = scmp.ne.s32.totalorder %s19478_s2, %s19474_s29  ;;  %p544_p4 = scmp.eq.s32.totalorder %s22947_s3, 1 }
  0x25   : > { %s19676_s27 = scalar_select %p525_p1, %s19482_s6, %s527_s1  }
  0x26   : > { %p19678_p5 = por %p538_p2, %p537_p0  ;;  %p19682_p6 = por %p544_p4, %p543_p3 }
  0x27   : > { %22992 = sst [smem:[#allocation28_spill]] %s19676_s27  ;;  %p15465_p7 = scmp.ge.s32.totalorder %s19486_s30, 1 }
  0x28   : > { %s22993_s4 = scalar_select %p19678_p5, 1, 0 }
  0x29   : > { %s22995_s28 = scalar_select %p19682_p6, 1, 0 }
  0x2a   : > { %22994 = sst [smem:[#allocation29_spill]] %s22993_s4  ;;  %p629_p8 = scmp.lt.s32.totalorder %s19486_s30, 3 }
  0x2b   : > { %22996 = sst [smem:[#allocation30_spill]] %s22995_s28  ;;  %p22957_p9 = scmp.eq.s32.totalorder %s19659_s7, 0 }
  0x2c   : > { %p19689_p10 = pnand %p15465_p7, %p629_p8  ;;  %s19488_s5 = smov [#allocation6]  }
  0x2d   : > { %s669_s0 = sshll.u32 %s19488_s5, 4  ;;  %s19489_s8 = smov [#allocation9]   ;;  %s19695_s0 = int_to_ptr.vmem [resolvable:$true] %s669_s0 }
  0x2e   : > { %s22997_s9 = scalar_select %p19689_p10, 1, 0 }
  0x2f   : > { %p18874_p11 = pneg %p19689_p10  ;;  %s707_s3 = sshll.u32 %s19489_s8, 4  ;;  %s19703_s3 = int_to_ptr.vmem [resolvable:$true] %s707_s3 }
  0x30   : > { %s19490_s27 = smov [#allocation3]   ;;  %s22999_s29 = sld [smem:[#allocation38_spill]] }
  0x31   : > { %p19699_p12 = pnand %p22957_p9, %p18874_p11  ;;  %s19705_s6 = sshll.u32 %s19490_s27, 4  ;;  %s654_s6 = int_to_ptr.vmem [resolvable:$true] %s19705_s6 }
  0x33   : > { %p19715_p0 = pneg %p19699_p12 }
  0x36   : > { %s23000_s25 = smov %s22999_s29  ;;  %s19180_s30 = scalar_lea.hbm %s22999_s29, 1152 }
  0x37   : > { %p19181_p13 = scmp.ne.s32.totalorder %s23000_s25, %s19180_s30  ;;  %p19187_p3 = scmp.lt.u32.totalorder %s19180_s30, %s23000_s25 }
  0x39   : > { %p19183_p1 = pnand %p19715_p0, %p19181_p13 }
  0x3b   : > { %p19184_p2 = pneg %p19183_p1 }
  0x3d   : > { %p19189_p4 = pnand %p19187_p3, %p19184_p2 }
  0x3f   : > { %19192 = shalt.err (!%p19189_p4)
}
  0x40   : > { %s19193_s20 = scalar_lea.vmem %s19695_s0, 1152  ;;  %p19201_p9 = scmp.lt.s32.totalorder %s19695_s0, %s19695_s0 }
  0x41   : > { %p19194_p7 = scmp.ne.s32.totalorder %s19695_s0, %s19193_s20  ;;  %p19202_p6 = scmp.lt.s32.totalorder %s19193_s20, %s19193_s20 }
  0x43   : > { %p19196_p8 = pnand %p19194_p7, %p19715_p0  ;;  %p19203_p13 = por %p19202_p6, %p19201_p9 }
  0x45   : > { %p19197_p11 = pneg %p19196_p8 }
  0x47   : > { %p19204_p1 = pnand %p19203_p13, %p19197_p11 }
  0x49   : > { %19207 = shalt.err (!%p19204_p1)
}
  0x4a   : > { %s19491_s29 = smov 64   ;;  %s19492_s30 = smov 4  }
  0x4b   : > { %18880 = dma.hbm_to_vmem [thread:$0]  (!%p19699_p12), %s23000_s25, 1152, %s19695_s0, [#allocation7], %s19491_s29, %s19491_s29, %s19492_s30  }
  0x4c   : > { %s23002_s13 = sld [smem:[#allocation43_spill]] }
  0x52   : > { %s19208_s27 = scalar_lea.hbm %s23002_s13, 2304 }
  0x53   : > { %p19209_p6 = scmp.ne.s32.totalorder %s23002_s13, %s19208_s27  ;;  %p19215_p3 = scmp.lt.u32.totalorder %s19208_s27, %s23002_s13 }
  0x55   : > { %p19211_p9 = pnand %p19209_p6, %p19715_p0 }
  0x57   : > { %p19212_p2 = pneg %p19211_p9 }
  0x59   : > { %p19217_p4 = pnand %p19215_p3, %p19212_p2 }
  0x5b   : > { %19220 = shalt.err (!%p19217_p4)
}
  0x5c   : > { %s19221_s0 = scalar_lea.vmem %s19703_s3, 2304  ;;  %p19229_p13 = scmp.lt.s32.totalorder %s19703_s3, %s19703_s3 }
  0x5d   : > { %p19222_p7 = scmp.ne.s32.totalorder %s19703_s3, %s19221_s0  ;;  %p19230_p1 = scmp.lt.s32.totalorder %s19221_s0, %s19221_s0 }
  0x5f   : > { %p19224_p8 = pnand %p19222_p7, %p19715_p0  ;;  %p19231_p6 = por %p19230_p1, %p19229_p13 }
  0x61   : > { %p19225_p11 = pneg %p19224_p8 }
  0x63   : > { %p19232_p9 = pnand %p19231_p6, %p19225_p11 }
  0x65   : > { %19235 = shalt.err (!%p19232_p9)
}
  0x66   : > { %18886 = dma.hbm_to_vmem [thread:$0]  (!%p19699_p12), %s23002_s13, 2304, %s19703_s3, [#allocation10], %s19491_s29, %s19491_s29, %s19492_s30  }
  0x67   : > { %s23003_s28 = sld [smem:[#allocation36_spill]] }
  0x6d   : > { %s19236_s5 = scalar_lea.hbm %s23003_s28, 576 }
  0x6e   : > { %p19237_p2 = scmp.ne.s32.totalorder %s23003_s28, %s19236_s5  ;;  %p19243_p7 = scmp.lt.u32.totalorder %s19236_s5, %s23003_s28 }
  0x70   : > { %p19239_p3 = pnand %p19237_p2, %p19715_p0 }
  0x72   : > { %p19240_p4 = pneg %p19239_p3 }
  0x74   : > { %p19245_p8 = pnand %p19243_p7, %p19240_p4 }
  0x76   : > { %19248 = shalt.err (!%p19245_p8)
}
  0x77   : > { %s19249_s22 = scalar_lea.vmem %s654_s6, 576  ;;  %p19257_p6 = scmp.lt.s32.totalorder %s654_s6, %s654_s6 }
  0x78   : > { %p19250_p11 = scmp.ne.s32.totalorder %s654_s6, %s19249_s22  ;;  %p19258_p9 = scmp.lt.s32.totalorder %s19249_s22, %s19249_s22 }
  0x7a   : > { %p19252_p13 = pnand %p19250_p11, %p19715_p0  ;;  %p19259_p5 = por %p19258_p9, %p19257_p6 }
  0x7c   : > { %p19253_p1 = pneg %p19252_p13 }
  0x7e   : > { %p19260_p10 = pnand %p19259_p5, %p19253_p1 }
  0x80   : > { %19263 = shalt.err (!%p19260_p10)
}
  0x81   : > { %18877 = dma.hbm_to_vmem [thread:$0]  (!%p19699_p12), %s23003_s28, 576, %s654_s6, [#allocation4], %s19491_s29, %s19491_s29, %s19492_s30  }
  0x82   : > { %s19493_s4 = smov [#allocation8]   ;;  %s19494_s5 = smov [#allocation11]  }
  0x83   : > { %s685_s26 = sshll.u32 %s19493_s4, 4  ;;  %s735_s8 = sshll.u32 %s19494_s5, 4  ;;  %s686_s26 = int_to_ptr.vmem [resolvable:$true] %s685_s26  ;;  %s736_s8 = int_to_ptr.vmem [resolvable:$true] %s735_s8 }
  0x84   : > { %s23004_s0 = sld [smem:[#allocation40_spill]] }
  0x8a   : > { %s19264_s22 = scalar_lea.hbm %s23004_s0, 1152 }
  0x8b   : > { %p19265_p5 = scmp.ne.s32.totalorder %s23004_s0, %s19264_s22  ;;  %p19271_p3 = scmp.lt.u32.totalorder %s19264_s22, %s23004_s0 }
  0x8d   : > { %p19267_p10 = pnand %p19265_p5, %p19715_p0 }
  0x8f   : > { %p19268_p2 = pneg %p19267_p10 }
  0x91   : > { %p19273_p4 = pnand %p19271_p3, %p19268_p2 }
  0x93   : > { %19276 = shalt.err (!%p19273_p4)
}
  0x94   : > { %s19277_s6 = scalar_lea.vmem %s686_s26, 1152  ;;  %p19285_p13 = scmp.lt.s32.totalorder %s686_s26, %s686_s26 }
  0x95   : > { %p19278_p7 = scmp.ne.s32.totalorder %s686_s26, %s19277_s6  ;;  %p19286_p1 = scmp.lt.s32.totalorder %s19277_s6, %s19277_s6 }
  0x97   : > { %p19280_p8 = pnand %p19278_p7, %p19715_p0  ;;  %p19287_p6 = por %p19286_p1, %p19285_p13 }
  0x99   : > { %p19281_p11 = pneg %p19280_p8 }
  0x9b   : > { %p19288_p9 = pnand %p19287_p6, %p19281_p11 }
  0x9d   : > { %19291 = shalt.err (!%p19288_p9)
}
  0x9e   : > { %18883 = dma.hbm_to_vmem [thread:$0]  (!%p19699_p12), %s23004_s0, 1152, %s686_s26, [#allocation7], %s19491_s29, %s19491_s29, %s19492_s30  }
  0x9f   : > { %s19292_s4 = scalar_lea.hbm %s22934_s19, 4608 }
  0xa0   : > { %p19293_p5 = scmp.ne.s32.totalorder %s22934_s19, %s19292_s4  ;;  %p19299_p3 = scmp.lt.u32.totalorder %s19292_s4, %s22934_s19 }
  0xa2   : > { %p19295_p10 = pnand %p19293_p5, %p19715_p0 }
  0xa4   : > { %p19296_p2 = pneg %p19295_p10 }
  0xa6   : > { %p19301_p4 = pnand %p19299_p3, %p19296_p2 }
  0xa8   : > { %19304 = shalt.err (!%p19301_p4)
}
  0xa9   : > { %s19305_s3 = scalar_lea.vmem %s736_s8, 4608  ;;  %p19313_p13 = scmp.lt.s32.totalorder %s736_s8, %s736_s8 }
  0xaa   : > { %p19306_p7 = scmp.ne.s32.totalorder %s736_s8, %s19305_s3  ;;  %p19314_p1 = scmp.lt.s32.totalorder %s19305_s3, %s19305_s3 }
  0xac   : > { %p19308_p8 = pnand %p19306_p7, %p19715_p0  ;;  %p19315_p6 = por %p19314_p1, %p19313_p13 }
  0xae   : > { %p19309_p11 = pneg %p19308_p8 }
  0xb0   : > { %p19316_p9 = pnand %p19315_p6, %p19309_p11 }
  0xb2   : > { %19319 = shalt.err (!%p19316_p9)
}
  0xb3   : > { %18889 = dma.hbm_to_vmem [thread:$0]  (!%p19699_p12), %s22934_s19, 4608, %s736_s8, [#allocation10], %s19491_s29, %s19491_s29, %s19492_s30  }
  0xb4   : > { %p23005_p5 = scmp.ne.s32.totalorder %s22997_s9, 0 }
  0xb5   : > { %p23006_p0 = scmp.eq.s32.totalorder (!%p23005_p5), %s19659_s7, 0 }
  0xb6   : > { %762 = sbr.rel (%p23005_p5) target bundleno = 4454 (0x1166), region = 104 }
  0xbd   : > { %19449 = dma.done.wait (%p23006_p0), [#allocation4], 576   ;;  %p23007_p10 = pmov %p23006_p0 }
  0xbe   : > { %p23008_p2 = pmov %p23006_p0 }
  0xbf   : > { %19451 = vsyncadd (%p23007_p10), [#allocation4], 4294966720 }
  0xc0   : > { %19453 = dma.done.wait (%p23008_p2), [#allocation7], 2304   ;;  %p23009_p3 = pmov %p23006_p0 }
  0xc1   : > { %p23010_p4 = pmov %p23006_p0 }
  0xc2   : > { %19455 = vsyncadd (%p23009_p3), [#allocation7], 4294964992 }
  0xc3   : > { %19457 = dma.done.wait (%p23010_p4), [#allocation10], 6912   ;;  %p23011_p12 = pmov %p23006_p0 }
  0xc4   : > { %vm908_vm0 = vcmask 64512   ;;  %vm911_vm1 = vcmask 58368   ;;  %v19495_v0 = vmov 0.0   ;;  %p865_p7 = scmp.lt.s32.totalorder %s19659_s7, 1  ;;  %vm918_vm2 = vcmask 57344   ;;  %s23012_s30 = sld [smem:[#allocation31_spill]] }
  0xc5   : > { %19459 = vsyncadd (%p23011_p12), [#allocation10], 4294960384  ;;  %909 = vst.msk [vmem:[#allocation2] sm:$0xff] %vm908_vm0, %v19495_v0  ;;  %vm1131_vm3 = vcmask 1041408   ;;  %vm951_vm4 = vcmask 31744   ;;  %s23013_s25 = sld [smem:[#allocation32_spill]] }
  0xc6   : > { %910 = vst.msk [vmem:[#allocation2 + $0x8] sm:$0xff] %vm908_vm0, %v19495_v0  ;;  %914 = vst.msk [vmem:[#allocation2 + $0x198] sm:$0xff] %vm908_vm0, %v19495_v0  ;;  %s19923_s24 = scalar_select %p865_p7, %s19659_s7, 1  ;;  %vm3881_vm5 = vcmask 1043456   ;;  %vm8147_vm13 = vcmask 130048  }
  0xc7   : > { %912 = vst.msk [vmem:[#allocation2 + $0x10] sm:$0x3] %vm911_vm1, %v19495_v0  ;;  %916 = vst.msk [vmem:[#allocation2 + $0x1a8] sm:$0x3] %vm911_vm1, %v19495_v0  ;;  %s23014_s27 = sld [smem:[#allocation34_spill]]  ;;  %s23015_s6 = sld [smem:[#allocation33_spill]] }
  0xc8   : > { %915 = vst.msk [vmem:[#allocation2 + $0x1a0] sm:$0xff] %vm908_vm0, %v19495_v0  ;;  %s16257_s9 = sshll.u32 %s19923_s24, 8  ;;  %s23018_s3 = sld [smem:[#allocation37_spill]] }
  0xc9   : > { %919 = vst.msk [vmem:[#allocation2 + $0x18] sm:$0x1] %vm918_vm2, %v19495_v0  ;;  %920 = vst.msk [vmem:[#allocation2 + $0x30] sm:$0x1] %vm918_vm2, %v19495_v0  ;;  %s20998_s23 = scalar_lea.vmem %s22936_s21, %s16257_s9  ;;  %s21906_s26 = sand.u32 1, %s19478_s2  }
  0xca   : > { %921 = vst.msk [vmem:[#allocation2 + $0x48] sm:$0x1] %vm918_vm2, %v19495_v0  ;;  %922 = vst.msk [vmem:[#allocation2 + $0x60] sm:$0x1] %vm918_vm2, %v19495_v0  ;;  %s19931_s8 = scalar_lea.vmem %s23012_s30, %s16257_s9  ;;  %s23016_s30 = sld [smem:[#allocation35_spill]] }
  0xcb   : > { %923 = vst.msk [vmem:[#allocation2 + $0x78] sm:$0x1] %vm918_vm2, %v19495_v0  ;;  %924 = vst.msk [vmem:[#allocation2 + $0x90] sm:$0x1] %vm918_vm2, %v19495_v0  ;;  %v15485_v1 = vld [vmem:[%s23013_s25 + $0x2] sm:$0x3] }
  0xcc   : > { %925 = vst.msk [vmem:[#allocation2 + $0xa8] sm:$0x1] %vm918_vm2, %v19495_v0  ;;  %926 = vst.msk [vmem:[#allocation2 + $0xc0] sm:$0x1] %vm918_vm2, %v19495_v0  ;;  %v1032_v2 = vld [vmem:[%s23013_s25] sm:$0x3]  ;;  %18819 = vmatprep.subr.msk.bf16.mxu0 %vm1131_vm3, %v15485_v1 }
  0xcd   : > { %927 = vst.msk [vmem:[#allocation2 + $0xd8] sm:$0x1] %vm918_vm2, %v19495_v0  ;;  %928 = vst.msk [vmem:[#allocation2 + $0xf0] sm:$0x1] %vm918_vm2, %v19495_v0  ;;  %v876_v3 = vld [vmem:[%s19931_s8] sm:$0xff]  ;;  %v1133_v4 = vsel %vm1131_vm3, %v15485_v1, 0 }
  0xce   : > { %929 = vst.msk [vmem:[#allocation2 + $0x108] sm:$0x1] %vm918_vm2, %v19495_v0  ;;  %930 = vst.msk [vmem:[#allocation2 + $0x120] sm:$0x1] %vm918_vm2, %v19495_v0  ;;  %v1033_v5 = vld [vmem:[#allocation2 + $0x1] sm:$0xff]  ;;  %v1034_v6 = vld [vmem:[#allocation2 + $0x9] sm:$0xff]  ;;  %16866 = vmatpush3.bf16.msra.mxu0 %v1133_v4 }
  0xcf   : > { %931 = vst.msk [vmem:[#allocation2 + $0x138] sm:$0x1] %vm918_vm2, %v19495_v0  ;;  %932 = vst.msk [vmem:[#allocation2 + $0x150] sm:$0x1] %vm918_vm2, %v19495_v0  ;;  %v877_v7 = vld [vmem:[%s19931_s8 + $0x8] sm:$0xff]  ;;  %v1065_v8 = vpack.c.bf16 %v1034_v6, %v1033_v5  ;;  %v878_v9 = vld [vmem:[%s19931_s8 + $0x10] sm:$0xff]  ;;  %18820 = vmatprep.subr.msk.bf16.mxu0 %vm1131_vm3, %v1032_v2 }
  0xd0   : > { %933 = vst.msk [vmem:[#allocation2 + $0x168] sm:$0x1] %vm918_vm2, %v19495_v0  ;;  %934 = vst.msk [vmem:[#allocation2 + $0x180] sm:$0x1] %vm918_vm2, %v19495_v0  ;;  %v879_v10 = vld [vmem:[%s19931_s8 + $0x18] sm:$0xff]  ;;  %v880_v11 = vld [vmem:[%s19931_s8 + $0x20] sm:$0xff] }
  0xd1   : > { %935 = vst.msk [vmem:[#allocation2 + $0x29] sm:$0x1] %vm918_vm2, %v19495_v0  ;;  %936 = vst.msk [vmem:[#allocation2 + $0x41] sm:$0x1] %vm918_vm2, %v19495_v0  ;;  %v881_v12 = vld [vmem:[%s19931_s8 + $0x28] sm:$0xff]  ;;  %v882_v13 = vld [vmem:[%s19931_s8 + $0x30] sm:$0xff]  ;;  %16867 = vmatprep.mubr.msk.bf16.mxu0 %vm951_vm4, %v1065_v8 }
  0xd2   : > { %937 = vst.msk [vmem:[#allocation2 + $0x59] sm:$0x1] %vm918_vm2, %v19495_v0  ;;  %938 = vst.msk [vmem:[#allocation2 + $0x71] sm:$0x1] %vm918_vm2, %v19495_v0  ;;  %v883_v14 = vld [vmem:[%s19931_s8 + $0x38] sm:$0xff]  ;;  %v884_v15 = vld [vmem:[%s19931_s8 + $0x40] sm:$0xff] }
  0xd3   : > { %939 = vst.msk [vmem:[#allocation2 + $0x89] sm:$0x1] %vm918_vm2, %v19495_v0  ;;  %940 = vst.msk [vmem:[#allocation2 + $0xa1] sm:$0x1] %vm918_vm2, %v19495_v0  ;;  %v885_v16 = vld [vmem:[%s19931_s8 + $0x48] sm:$0xff]  ;;  %v886_v17 = vld [vmem:[%s19931_s8 + $0x50] sm:$0xff] }
  0xd4   : > { %941 = vst.msk [vmem:[#allocation2 + $0xb9] sm:$0x1] %vm918_vm2, %v19495_v0  ;;  %942 = vst.msk [vmem:[#allocation2 + $0xd1] sm:$0x1] %vm918_vm2, %v19495_v0  ;;  %v887_v18 = vld [vmem:[%s19931_s8 + $0x58] sm:$0xff]  ;;  %v888_v19 = vld [vmem:[%s19931_s8 + $0x60] sm:$0xff] }
  0xd5   : > { %943 = vst.msk [vmem:[#allocation2 + $0xe9] sm:$0x1] %vm918_vm2, %v19495_v0  ;;  %944 = vst.msk [vmem:[#allocation2 + $0x101] sm:$0x1] %vm918_vm2, %v19495_v0  ;;  %v889_v20 = vld [vmem:[%s19931_s8 + $0x68] sm:$0xff]  ;;  %v890_v21 = vld [vmem:[%s19931_s8 + $0x70] sm:$0xff] }
  0xd6   : > { %945 = vst.msk [vmem:[#allocation2 + $0x119] sm:$0x1] %vm918_vm2, %v19495_v0  ;;  %946 = vst.msk [vmem:[#allocation2 + $0x131] sm:$0x1] %vm918_vm2, %v19495_v0  ;;  %v891_v22 = vld [vmem:[%s19931_s8 + $0x78] sm:$0xff]  ;;  %v892_v23 = vld [vmem:[%s19931_s8 + $0x80] sm:$0xff] }
  0xd7   : > { %947 = vst.msk [vmem:[#allocation2 + $0x149] sm:$0x1] %vm918_vm2, %v19495_v0  ;;  %948 = vst.msk [vmem:[#allocation2 + $0x161] sm:$0x1] %vm918_vm2, %v19495_v0  ;;  %v893_v24 = vld [vmem:[%s19931_s8 + $0x88] sm:$0xff]  ;;  %v894_v25 = vld [vmem:[%s19931_s8 + $0x90] sm:$0xff] }
  0xd8   : > { %949 = vst.msk [vmem:[#allocation2 + $0x179] sm:$0x1] %vm918_vm2, %v19495_v0  ;;  %950 = vst.msk [vmem:[#allocation2 + $0x191] sm:$0x1] %vm918_vm2, %v19495_v0  ;;  %v895_v26 = vld [vmem:[%s19931_s8 + $0x98] sm:$0xff]  ;;  %v896_v28 = vld [vmem:[%s19931_s8 + $0xa0] sm:$0xff] }
  0xd9   : > { %952 = vst.msk [vmem:[#allocation2 + $0x19] sm:$0xff] %vm951_vm4, %v876_v3  ;;  %953 = vst.msk [vmem:[#allocation2 + $0x21] sm:$0xff] %vm951_vm4, %v877_v7  ;;  %v897_v30 = vld [vmem:[%s19931_s8 + $0xa8] sm:$0xff]  ;;  %v898_v31 = vld [vmem:[%s19931_s8 + $0xb0] sm:$0xff]  ;;  %v1345_v33 = vsel %vm1131_vm3, %v1032_v2, 0  ;;  %s23019_s29 = sld [smem:[#allocation39_spill]] }
  0xda   : > { %954 = vst.msk [vmem:[#allocation2 + $0x31] sm:$0xff] %vm951_vm4, %v878_v9  ;;  %955 = vst.msk [vmem:[#allocation2 + $0x39] sm:$0xff] %vm951_vm4, %v879_v10  ;;  %v899_v42 = vld [vmem:[%s19931_s8 + $0xb8] sm:$0xff]  ;;  %v900_v43 = vld [vmem:[%s19931_s8 + $0xc0] sm:$0xff]  ;;  %s23020_s11 = sld [smem:[#allocation42_spill]]  ;;  %s23021_s10 = sld [smem:[#allocation41_spill]] }
  0xdb   : > { %956 = vst.msk [vmem:[#allocation2 + $0x49] sm:$0xff] %vm951_vm4, %v880_v11  ;;  %957 = vst.msk [vmem:[#allocation2 + $0x51] sm:$0xff] %vm951_vm4, %v881_v12  ;;  %v901_v45 = vld [vmem:[%s19931_s8 + $0xc8] sm:$0xff]  ;;  %v902_v46 = vld [vmem:[%s19931_s8 + $0xd0] sm:$0xff]  ;;  %s15480_s9 = sshll.u32 %s21906_s26, 2  ;;  %s23023_s18 = sld [smem:[#allocation29_spill]] }
  0xdc   : > { %958 = vst.msk [vmem:[#allocation2 + $0x61] sm:$0xff] %vm951_vm4, %v882_v13  ;;  %959 = vst.msk [vmem:[#allocation2 + $0x69] sm:$0xff] %vm951_vm4, %v883_v14  ;;  %v903_v47 = vld [vmem:[%s19931_s8 + $0xd8] sm:$0xff]  ;;  %v904_v48 = vld [vmem:[%s19931_s8 + $0xe0] sm:$0xff]  ;;  %s22640_s4 = scalar_lea.vmem [#allocation15], %s15480_s9  ;;  %s15167_s9 = sand.u32 1, %s19659_s7  }
  0xdd   : > { %960 = vst.msk [vmem:[#allocation2 + $0x79] sm:$0xff] %vm951_vm4, %v884_v15  ;;  %961 = vst.msk [vmem:[#allocation2 + $0x81] sm:$0xff] %vm951_vm4, %v885_v16  ;;  %v905_v49 = vld [vmem:[%s19931_s8 + $0xe8] sm:$0xff]  ;;  %v15518_v50 = vld [vmem:[%s23013_s25 + $0x4] sm:$0x3]  ;;  %s16260_s5 = sshll.u32 %s19659_s7, 8 }
  0xde   : > { %962 = vst.msk [vmem:[#allocation2 + $0x91] sm:$0xff] %vm951_vm4, %v886_v17  ;;  %963 = vst.msk [vmem:[#allocation2 + $0x99] sm:$0xff] %vm951_vm4, %v887_v18  ;;  %v984_v18 = vld [vmem:[#allocation2] sm:$0xff]  ;;  %s22770_s1 = scalar_lea.sflag [#allocation14], %s15167_s9 }
  0xdf   : > { %964 = vst.msk [vmem:[#allocation2 + $0xa9] sm:$0xff] %vm951_vm4, %v888_v19  ;;  %965 = vst.msk [vmem:[#allocation2 + $0xb1] sm:$0xff] %vm951_vm4, %v889_v20  ;;  %v985_v19 = vld [vmem:[#allocation2 + $0x8] sm:$0xff] }
  0xe0   : > { %966 = vst.msk [vmem:[#allocation2 + $0xc1] sm:$0xff] %vm951_vm4, %v890_v21  ;;  %967 = vst.msk [vmem:[#allocation2 + $0xc9] sm:$0xff] %vm951_vm4, %v891_v22  ;;  %v1035_v27 = vld [vmem:[#allocation2 + $0x19] sm:$0xff]  ;;  %v1036_v29 = vld [vmem:[#allocation2 + $0x21] sm:$0xff] }
  0xe1   : > { %968 = vst.msk [vmem:[#allocation2 + $0xd9] sm:$0xff] %vm951_vm4, %v892_v23  ;;  %969 = vst.msk [vmem:[#allocation2 + $0xe1] sm:$0xff] %vm951_vm4, %v893_v24  ;;  %v19987_v32 = vpack.c.bf16 %v1036_v29, %v1035_v27  ;;  %v1037_v34 = vld [vmem:[#allocation2 + $0x31] sm:$0xff]  ;;  %v1038_v35 = vld [vmem:[#allocation2 + $0x39] sm:$0xff]  ;;  %v1016_v23 = vpack.c.bf16 %v985_v19, %v984_v18  ;;  %v1607_v27 = vsel %vm1131_vm3, %v15518_v50, 0  ;;  %p23025_p11 = scmp.ne.s32.totalorder %s23023_s18, 0 }
  0xe2   : > { %970 = vst.msk [vmem:[#allocation2 + $0xf1] sm:$0xff] %vm951_vm4, %v894_v25  ;;  %971 = vst.msk [vmem:[#allocation2 + $0xf9] sm:$0xff] %vm951_vm4, %v895_v26  ;;  %v19992_v36 = vpack.c.bf16 %v1038_v35, %v1037_v34  ;;  %v1039_v37 = vld [vmem:[#allocation2 + $0x49] sm:$0xff]  ;;  %v1040_v38 = vld [vmem:[#allocation2 + $0x51] sm:$0xff] }
  0xe3   : > { %972 = vst.msk [vmem:[#allocation2 + $0x109] sm:$0xff] %vm951_vm4, %v896_v28  ;;  %973 = vst.msk [vmem:[#allocation2 + $0x111] sm:$0xff] %vm951_vm4, %v897_v30  ;;  %16868 = vmatmul.mubr.msk.bf16.vlgmr.msra.gmra.mrb[0].mxu0 %vm951_vm4, %v19987_v32  ;;  %v1041_v39 = vld [vmem:[#allocation2 + $0x61] sm:$0xff]  ;;  %v1042_v40 = vld [vmem:[#allocation2 + $0x69] sm:$0xff]  ;;  %v19998_v41 = vpack.c.bf16 %v1040_v38, %v1039_v37 }
  0xe4   : > { %974 = vst.msk [vmem:[#allocation2 + $0x121] sm:$0xff] %vm951_vm4, %v898_v31  ;;  %16900 = vmatpush3.bf16.msra.mxu0 %v1345_v33  ;;  %16871 = vmatprep.mubr.msk.bf16.mxu0 %vm951_vm4, %v19992_v36  ;;  %v20002_v44 = vpack.c.bf16 %v1042_v40, %v1041_v39  ;;  %975 = vst.msk [vmem:[#allocation2 + $0x129] sm:$0xff] %vm951_vm4, %v899_v42  ;;  %v1043_v51 = vld [vmem:[#allocation2 + $0x79] sm:$0xff]  ;;  %v1044_v52 = vld [vmem:[#allocation2 + $0x81] sm:$0xff] }
  0xe5   : > { %976 = vst.msk [vmem:[#allocation2 + $0x139] sm:$0xff] %vm951_vm4, %v900_v43  ;;  %977 = vst.msk [vmem:[#allocation2 + $0x141] sm:$0xff] %vm951_vm4, %v901_v45  ;;  %18821 = vmatprep.subr.msk.bf16.mxu0 %vm1131_vm3, %v15518_v50  ;;  %v1045_v53 = vld [vmem:[#allocation2 + $0x91] sm:$0xff]  ;;  %v1046_v54 = vld [vmem:[#allocation2 + $0x99] sm:$0xff]  ;;  %v20024_v55 = vpack.c.bf16 %v1044_v52, %v1043_v51 }
  0xe6   : > { %978 = vst.msk [vmem:[#allocation2 + $0x151] sm:$0xff] %vm951_vm4, %v902_v46  ;;  %979 = vst.msk [vmem:[#allocation2 + $0x159] sm:$0xff] %vm951_vm4, %v903_v47  ;;  %v20026_v56 = vpack.c.bf16 %v1046_v54, %v1045_v53  ;;  %v1047_v57 = vld [vmem:[#allocation2 + $0xa9] sm:$0xff]  ;;  %v1048_v58 = vld [vmem:[#allocation2 + $0xb1] sm:$0xff] }
  0xe7   : > { %980 = vst.msk [vmem:[#allocation2 + $0x169] sm:$0xff] %vm951_vm4, %v904_v48  ;;  %981 = vst.msk [vmem:[#allocation2 + $0x171] sm:$0xff] %vm951_vm4, %v905_v49  ;;  %v1049_v59 = vld [vmem:[#allocation2 + $0xc1] sm:$0xff]  ;;  %v1050_v60 = vld [vmem:[#allocation2 + $0xc9] sm:$0xff]  ;;  %v20032_v61 = vpack.c.bf16 %v1048_v58, %v1047_v57 }
  0xe8   : > { %v20034_v62 = vpack.c.bf16 %v1050_v60, %v1049_v59  ;;  %v1051_v63 = vld [vmem:[#allocation2 + $0xd9] sm:$0xff]  ;;  %v1052_v1 = vld [vmem:[#allocation2 + $0xe1] sm:$0xff]  ;;  %v988_v26 = vld [vmem:[#allocation2 + $0x30] sm:$0xff] }
  0xe9   : > { %v1053_v2 = vld [vmem:[#allocation2 + $0xf1] sm:$0xff]  ;;  %v1054_v3 = vld [vmem:[#allocation2 + $0xf9] sm:$0xff]  ;;  %v20040_v4 = vpack.c.bf16 %v1052_v1, %v1051_v63  ;;  %v20077_v31 = vld [vmem:[%s23013_s25 + $0x6] sm:$0x3] }
  0xea   : > { %v20042_v5 = vpack.c.bf16 %v1054_v3, %v1053_v2  ;;  %v1055_v6 = vld [vmem:[#allocation2 + $0x109] sm:$0xff]  ;;  %v1056_v7 = vld [vmem:[#allocation2 + $0x111] sm:$0xff]  ;;  %v987_v25 = vld [vmem:[#allocation2 + $0x20] sm:$0xff] }
  0xeb   : > { %16872 = vmatmul.mubr.msk.bf16.gmra.mrb[4].mxu0 %vm951_vm4, %v19998_v41  ;;  %v1057_v8 = vld [vmem:[#allocation2 + $0x121] sm:$0xff]  ;;  %v1058_v9 = vld [vmem:[#allocation2 + $0x129] sm:$0xff]  ;;  %v20048_v10 = vpack.c.bf16 %v1056_v7, %v1055_v6  ;;  %v986_v24 = vld [vmem:[#allocation2 + $0x18] sm:$0xff] }
  0xec   : > { %16875 = vmatprep.mubr.msk.bf16.mxu0 %vm951_vm4, %v20002_v44  ;;  %v20050_v11 = vpack.c.bf16 %v1058_v9, %v1057_v8  ;;  %v1059_v12 = vld [vmem:[#allocation2 + $0x139] sm:$0xff]  ;;  %v1060_v13 = vld [vmem:[#allocation2 + $0x141] sm:$0xff]  ;;  %v20070_v29 = vpack.c.bf16 %v987_v25, %v986_v24  ;;  %v991_v34 = vld [vmem:[#allocation2 + $0x50] sm:$0xff] }
  0xed   : > { %v1061_v14 = vld [vmem:[#allocation2 + $0x151] sm:$0xff]  ;;  %v1062_v15 = vld [vmem:[#allocation2 + $0x159] sm:$0xff]  ;;  %v20056_v16 = vpack.c.bf16 %v1060_v13, %v1059_v12  ;;  %v990_v33 = vld [vmem:[#allocation2 + $0x48] sm:$0xff] }
  0xee   : > { %v20058_v17 = vpack.c.bf16 %v1062_v15, %v1061_v14  ;;  %v1063_v20 = vld [vmem:[#allocation2 + $0x169] sm:$0xff]  ;;  %v1064_v21 = vld [vmem:[#allocation2 + $0x171] sm:$0xff]  ;;  %v992_v35 = vld [vmem:[#allocation2 + $0x60] sm:$0xff]  ;;  %v20085_v38 = vpack.c.bf16 %v991_v34, %v990_v33 }
  0xef   : > { %v20064_v22 = vpack.c.bf16 %v1064_v21, %v1063_v20  ;;  %v989_v28 = vld [vmem:[#allocation2 + $0x38] sm:$0xff]  ;;  %v993_v37 = vld [vmem:[#allocation2 + $0x68] sm:$0xff]  ;;  %v995_v42 = vld [vmem:[#allocation2 + $0x80] sm:$0xff] }
  0xf0   : > { %v20072_v30 = vpack.c.bf16 %v989_v28, %v988_v26  ;;  %v20087_v39 = vpack.c.bf16 %v993_v37, %v992_v35  ;;  %v994_v40 = vld [vmem:[#allocation2 + $0x78] sm:$0xff]  ;;  %v996_v43 = vld [vmem:[#allocation2 + $0x90] sm:$0xff]  ;;  %v998_v48 = vld [vmem:[#allocation2 + $0xa8] sm:$0xff]  ;;  %v1901_v35 = vsel %vm1131_vm3, %v20077_v31, 0 }
  0xf1   : > { %v997_v45 = vld [vmem:[#allocation2 + $0x98] sm:$0xff]  ;;  %v20093_v46 = vpack.c.bf16 %v995_v42, %v994_v40  ;;  %v999_v49 = vld [vmem:[#allocation2 + $0xb0] sm:$0xff]  ;;  %v1000_v50 = vld [vmem:[#allocation2 + $0xc0] sm:$0xff] }
  0xf2   : > { %v20095_v47 = vpack.c.bf16 %v997_v45, %v996_v43  ;;  %v1001_v51 = vld [vmem:[#allocation2 + $0xc8] sm:$0xff]  ;;  %v20101_v52 = vpack.c.bf16 %v999_v49, %v998_v48  ;;  %v1002_v54 = vld [vmem:[#allocation2 + $0xd8] sm:$0xff]  ;;  %v1003_v57 = vld [vmem:[#allocation2 + $0xe0] sm:$0xff] }
  0xf3   : > { %16876 = vmatmul.mubr.msk.bf16.gmra.mrb[8].mxu0 %vm951_vm4, %v20024_v55  ;;  %v20103_v53 = vpack.c.bf16 %v1001_v51, %v1000_v50  ;;  %v1004_v58 = vld [vmem:[#allocation2 + $0xf0] sm:$0xff]  ;;  %v1005_v59 = vld [vmem:[#allocation2 + $0xf8] sm:$0xff]  ;;  %v20109_v60 = vpack.c.bf16 %v1003_v57, %v1002_v54  ;;  %v1006_v1 = vld [vmem:[#allocation2 + $0x108] sm:$0xff] }
  0xf4   : > { %16879 = vmatprep.mubr.msk.bf16.mxu0 %vm951_vm4, %v20026_v56  ;;  %v20111_v63 = vpack.c.bf16 %v1005_v59, %v1004_v58  ;;  %v1007_v2 = vld [vmem:[#allocation2 + $0x110] sm:$0xff]  ;;  %v1008_v3 = vld [vmem:[#allocation2 + $0x120] sm:$0xff]  ;;  %v1009_v6 = vld [vmem:[#allocation2 + $0x128] sm:$0xff] }
  0xf5   : > { %v20117_v7 = vpack.c.bf16 %v1007_v2, %v1006_v1  ;;  %v20119_v8 = vpack.c.bf16 %v1009_v6, %v1008_v3  ;;  %v1010_v9 = vld [vmem:[#allocation2 + $0x138] sm:$0xff]  ;;  %v1011_v12 = vld [vmem:[#allocation2 + $0x140] sm:$0xff]  ;;  %v1012_v13 = vld [vmem:[#allocation2 + $0x150] sm:$0xff] }
  0xf6   : > { %v1013_v14 = vld [vmem:[#allocation2 + $0x158] sm:$0xff]  ;;  %v20125_v15 = vpack.c.bf16 %v1011_v12, %v1010_v9  ;;  %v906_v19 = vld [vmem:[%s19931_s8 + $0xf0] sm:$0xff]  ;;  %v1014_v21 = vld [vmem:[#allocation2 + $0x168] sm:$0xff] }
  0xf7   : > { %v20127_v18 = vpack.c.bf16 %v1013_v14, %v1012_v13  ;;  %v907_v20 = vld [vmem:[%s19931_s8 + $0xf8] sm:$0xff]  ;;  %982 = vst.msk [vmem:[#allocation2 + $0x181] sm:$0xff] %vm951_vm4, %v906_v19  ;;  %v1508_v24 = vld [vmem:[#allocation2 + $0x2] sm:$0xff]  ;;  %v1509_v25 = vld [vmem:[#allocation2 + $0xa] sm:$0xff]  ;;  %s23017_s8 = smov %s23016_s30 }
  0xf8   : > { %983 = vst.msk [vmem:[#allocation2 + $0x189] sm:$0xff] %vm951_vm4, %v907_v20  ;;  %v1510_v28 = vld [vmem:[#allocation2 + $0x1a] sm:$0xff]  ;;  %v1511_v33 = vld [vmem:[#allocation2 + $0x22] sm:$0xff]  ;;  %v1512_v34 = vld [vmem:[#allocation2 + $0x32] sm:$0xff] }
  0xf9   : > { %v1513_v37 = vld [vmem:[#allocation2 + $0x3a] sm:$0xff]  ;;  %v20144_v40 = vpack.c.bf16 %v1511_v33, %v1510_v28  ;;  %v15552_v43 = vld [vmem:[%s23013_s25 + $0x8] sm:$0x3]  ;;  %v1514_v45 = vld [vmem:[#allocation2 + $0x4a] sm:$0xff] }
  0xfa   : > { %v20146_v42 = vpack.c.bf16 %v1513_v37, %v1512_v34  ;;  %v1515_v48 = vld [vmem:[#allocation2 + $0x52] sm:$0xff]  ;;  %v1516_v49 = vld [vmem:[#allocation2 + $0x62] sm:$0xff]  ;;  %v1517_v50 = vld [vmem:[#allocation2 + $0x6a] sm:$0xff] }
  0xfb   : > { %16880 = vmatmul.mubr.msk.bf16.gmra.mrb[12].mxu0 %vm951_vm4, %v20032_v61  ;;  %v20158_v51 = vpack.c.bf16 %v1517_v50, %v1516_v49  ;;  %v1518_v54 = vld [vmem:[#allocation2 + $0x7a] sm:$0xff]  ;;  %v1519_v57 = vld [vmem:[#allocation2 + $0x82] sm:$0xff]  ;;  %v1520_v58 = vld [vmem:[#allocation2 + $0x92] sm:$0xff] }
  0xfc   : > { %16883 = vmatprep.mubr.msk.bf16.mxu0 %vm951_vm4, %v20034_v62  ;;  %v1521_v59 = vld [vmem:[#allocation2 + $0x9a] sm:$0xff]  ;;  %v20164_v1 = vpack.c.bf16 %v1519_v57, %v1518_v54  ;;  %v1522_v3 = vld [vmem:[#allocation2 + $0xaa] sm:$0xff]  ;;  %v1523_v6 = vld [vmem:[#allocation2 + $0xb2] sm:$0xff] }
  0xfd   : > { %v20166_v2 = vpack.c.bf16 %v1521_v59, %v1520_v58  ;;  %v1524_v9 = vld [vmem:[#allocation2 + $0xc2] sm:$0xff]  ;;  %v1525_v12 = vld [vmem:[#allocation2 + $0xca] sm:$0xff]  ;;  %v20172_v13 = vpack.c.bf16 %v1523_v6, %v1522_v3  ;;  %v1526_v19 = vld [vmem:[#allocation2 + $0xda] sm:$0xff]  ;;  %v2195_v6 = vsel %vm1131_vm3, %v15552_v43, 0 }
  0xfe   : > { %v20174_v14 = vpack.c.bf16 %v1525_v12, %v1524_v9  ;;  %v1527_v20 = vld [vmem:[#allocation2 + $0xe2] sm:$0xff]  ;;  %v1531_v28 = vld [vmem:[#allocation2 + $0x112] sm:$0xff]  ;;  %v1533_v34 = vld [vmem:[#allocation2 + $0x12a] sm:$0xff] }
  0xff   : > { %v1532_v33 = vld [vmem:[#allocation2 + $0x122] sm:$0xff]  ;;  %v1536_v49 = vld [vmem:[#allocation2 + $0x152] sm:$0xff]  ;;  %v1537_v50 = vld [vmem:[#allocation2 + $0x15a] sm:$0xff] }
 0x100   : > { %v20190_v37 = vpack.c.bf16 %v1533_v34, %v1532_v33  ;;  %v20198_v57 = vpack.c.bf16 %v1537_v50, %v1536_v49  ;;  %v1538_v58 = vld [vmem:[#allocation2 + $0x16a] sm:$0xff]  ;;  %v1539_v59 = vld [vmem:[#allocation2 + $0x172] sm:$0xff] }
 0x101   : > { %v20204_v3 = vpack.c.bf16 %v1539_v59, %v1538_v58  ;;  %v15569_v9 = vld [vmem:[%s23013_s25 + $0xa] sm:$0x3]  ;;  %v15620_v33 = vld [vmem:[%s23013_s25 + $0x10] sm:$0x3] }
 0x103   : > { %16884 = vmatmul.mubr.msk.bf16.gmra.mrb[16].mxu0 %vm951_vm4, %v20040_v4 }
 0x104   : > { %16887 = vmatprep.mubr.msk.bf16.mxu0 %vm951_vm4, %v20042_v5 }
 0x10b   : > { %16888 = vmatmul.mubr.msk.bf16.gmra.mrb[20].mxu0 %vm951_vm4, %v20048_v10 }
 0x10c   : > { %16891 = vmatprep.mubr.msk.bf16.mxu0 %vm951_vm4, %v20050_v11 }
 0x113   : > { %16892 = vmatmul.mubr.msk.bf16.gmra.mrb[24].mxu0 %vm951_vm4, %v20056_v16 }
 0x114   : > { %16895 = vmatprep.mubr.msk.bf16.mxu0 %vm951_vm4, %v20058_v17 }
 0x11b   : > { %16896 = vmatmul.mubr.msk.bf16.gmra.mrb[28].mxu0 %vm951_vm4, %v20064_v22 }
 0x11c   : > { %16901 = vmatprep.mubr.msk.bf16.mxu0 %vm951_vm4, %v1016_v23  ;;  %v1015_v23 = vld [vmem:[#allocation2 + $0x170] sm:$0xff] }
 0x11d   : > { %v20137_v26 = vpack.c.bf16 %v1015_v23, %v1014_v21  ;;  %v1528_v21 = vld [vmem:[#allocation2 + $0xf2] sm:$0xff]  ;;  %v1529_v23 = vld [vmem:[#allocation2 + $0xfa] sm:$0xff] }
 0x123   : > { %16902 = vmatmul.mubr.msk.bf16.vlgmr.msra.gmra.mrb[0].mxu0 %vm951_vm4, %v20070_v29 }
 0x124   : > { %16934 = vmatpush3.bf16.msra.mxu0 %v1607_v27  ;;  %16905 = vmatprep.mubr.msk.bf16.mxu0 %vm951_vm4, %v20072_v30  ;;  %v1540_v27 = vpack.c.bf16 %v1509_v25, %v1508_v24  ;;  %v20180_v24 = vpack.c.bf16 %v1527_v20, %v1526_v19  ;;  %v20182_v25 = vpack.c.bf16 %v1529_v23, %v1528_v21  ;;  %v2489_v19 = vsel %vm1131_vm3, %v15569_v9, 0  ;;  %v15586_v20 = vld [vmem:[%s23013_s25 + $0xc] sm:$0x3]  ;;  %v15603_v21 = vld [vmem:[%s23013_s25 + $0xe] sm:$0x3] }
 0x125   : > { %18822 = vmatprep.subr.msk.bf16.mxu0 %vm1131_vm3, %v20077_v31  ;;  %v20156_v31 = vpack.c.bf16 %v1515_v48, %v1514_v45  ;;  %v1534_v45 = vld [vmem:[#allocation2 + $0x13a] sm:$0xff]  ;;  %v1535_v48 = vld [vmem:[#allocation2 + $0x142] sm:$0xff]  ;;  %v2421_v23 = vld [vmem:[#allocation2 + $0x18a] sm:$0xff] }
 0x126   : > { %v20196_v54 = vpack.c.bf16 %v1535_v48, %v1534_v45 }
 0x12b   : > { %16906 = vmatmul.mubr.msk.bf16.gmra.mrb[4].mxu0 %vm951_vm4, %v20085_v38 }
 0x12c   : > { %16909 = vmatprep.mubr.msk.bf16.mxu0 %vm951_vm4, %v20087_v39 }
 0x133   : > { %16910 = vmatmul.mubr.msk.bf16.gmra.mrb[8].mxu0 %vm951_vm4, %v20093_v46 }
 0x134   : > { %16913 = vmatprep.mubr.msk.bf16.mxu0 %vm951_vm4, %v20095_v47 }
 0x13b   : > { %16914 = vmatmul.mubr.msk.bf16.gmra.mrb[12].mxu0 %vm951_vm4, %v20101_v52 }
 0x13c   : > { %16917 = vmatprep.mubr.msk.bf16.mxu0 %vm951_vm4, %v20103_v53 }
 0x143   : > { %16918 = vmatmul.mubr.msk.bf16.gmra.mrb[16].mxu0 %vm951_vm4, %v20109_v60 }
 0x144   : > { %16921 = vmatprep.mubr.msk.bf16.mxu0 %vm951_vm4, %v20111_v63 }
 0x14b   : > { %16922 = vmatmul.mubr.msk.bf16.gmra.mrb[20].mxu0 %vm951_vm4, %v20117_v7 }
 0x14c   : > { %16925 = vmatprep.mubr.msk.bf16.mxu0 %vm951_vm4, %v20119_v8 }
 0x153   : > { %16926 = vmatmul.mubr.msk.bf16.gmra.mrb[24].mxu0 %vm951_vm4, %v20125_v15 }
 0x154   : > { %16929 = vmatprep.mubr.msk.bf16.mxu0 %vm951_vm4, %v20127_v18 }
 0x15b   : > { %16930 = vmatmul.mubr.msk.bf16.gmra.mrb[28].mxu0 %vm951_vm4, %v20137_v26 }
 0x15c   : > { %16935 = vmatprep.mubr.msk.bf16.mxu0 %vm951_vm4, %v1540_v27  ;;  %v1530_v27 = vld [vmem:[#allocation2 + $0x10a] sm:$0xff] }
 0x163   : > { %16936 = vmatmul.mubr.msk.bf16.vlgmr.msra.gmra.mrb[0].mxu0 %vm951_vm4, %v20144_v40 }
 0x164   : > { %16968 = vmatpush3.bf16.msra.mxu0 %v1901_v35  ;;  %16939 = vmatprep.mubr.msk.bf16.mxu0 %vm951_vm4, %v20146_v42  ;;  %v20188_v35 = vpack.c.bf16 %v1531_v28, %v1530_v27  ;;  %v3078_v28 = vsel %vm1131_vm3, %v15603_v21, 0 }
 0x165   : > { %18823 = vmatprep.subr.msk.bf16.mxu0 %vm1131_vm3, %v15552_v43  ;;  %v1833_v43 = vld [vmem:[#allocation2 + $0x188] sm:$0xff] }
 0x16b   : > { %16940 = vmatmul.mubr.msk.bf16.gmra.mrb[4].mxu0 %vm951_vm4, %v20156_v31 }
 0x16c   : > { %16943 = vmatprep.mubr.msk.bf16.mxu0 %vm951_vm4, %v20158_v51 }
 0x173   : > { %16944 = vmatmul.mubr.msk.bf16.gmra.mrb[8].mxu0 %vm951_vm4, %v20164_v1 }
 0x174   : > { %16947 = vmatprep.mubr.msk.bf16.mxu0 %vm951_vm4, %v20166_v2 }
 0x17b   : > { %16948 = vmatmul.mubr.msk.bf16.gmra.mrb[12].mxu0 %vm951_vm4, %v20172_v13 }
 0x17c   : > { %16951 = vmatprep.mubr.msk.bf16.mxu0 %vm951_vm4, %v20174_v14 }
 0x183   : > { %16952 = vmatmul.mubr.msk.bf16.gmra.mrb[16].mxu0 %vm951_vm4, %v20180_v24 }
 0x184   : > { %16955 = vmatprep.mubr.msk.bf16.mxu0 %vm951_vm4, %v20182_v25 }
 0x18b   : > { %16956 = vmatmul.mubr.msk.bf16.gmra.mrb[20].mxu0 %vm951_vm4, %v20188_v35 }
 0x18c   : > { %16959 = vmatprep.mubr.msk.bf16.mxu0 %vm951_vm4, %v20190_v37 }
 0x193   : > { %16960 = vmatmul.mubr.msk.bf16.gmra.mrb[24].mxu0 %vm951_vm4, %v20196_v54 }
 0x194   : > { %16963 = vmatprep.mubr.msk.bf16.mxu0 %vm951_vm4, %v20198_v57 }
 0x19b   : > { %16964 = vmatmul.mubr.msk.bf16.gmra.mrb[28].mxu0 %vm951_vm4, %v20204_v3 }
 0x19c   : > { %16969 = vmatprep.mubr.msk.bf16.mxu0 %vm951_vm4, %v20070_v29  ;;  %v1832_v29 = vld [vmem:[#allocation2 + $0x180] sm:$0xff] }
 0x19d   : > { %v20243_v12 = vpack.c.bf16 %v1833_v43, %v1832_v29 }
 0x1a3   : > { %16970 = vmatmul.mubr.msk.bf16.vlgmr.msra.gmra.mrb[0].mxu0 %vm951_vm4, %v20072_v30 }
 0x1a4   : > { %17002 = vmatpush3.bf16.msra.mxu0 %v2195_v6  ;;  %16973 = vmatprep.mubr.msk.bf16.mxu0 %vm951_vm4, %v20085_v38 }
 0x1a5   : > { %18824 = vmatprep.subr.msk.bf16.mxu0 %vm1131_vm3, %v15569_v9 }
 0x1ab   : > { %16974 = vmatmul.mubr.msk.bf16.gmra.mrb[4].mxu0 %vm951_vm4, %v20087_v39 }
 0x1ac   : > { %16977 = vmatprep.mubr.msk.bf16.mxu0 %vm951_vm4, %v20093_v46 }
 0x1b3   : > { %16978 = vmatmul.mubr.msk.bf16.gmra.mrb[8].mxu0 %vm951_vm4, %v20095_v47 }
 0x1b4   : > { %16981 = vmatprep.mubr.msk.bf16.mxu0 %vm951_vm4, %v20101_v52 }
 0x1bb   : > { %16982 = vmatmul.mubr.msk.bf16.gmra.mrb[12].mxu0 %vm951_vm4, %v20103_v53 }
 0x1bc   : > { %16985 = vmatprep.mubr.msk.bf16.mxu0 %vm951_vm4, %v20109_v60 }
 0x1c3   : > { %16986 = vmatmul.mubr.msk.bf16.gmra.mrb[16].mxu0 %vm951_vm4, %v20111_v63 }
 0x1c4   : > { %16989 = vmatprep.mubr.msk.bf16.mxu0 %vm951_vm4, %v20117_v7 }
 0x1cb   : > { %16990 = vmatmul.mubr.msk.bf16.gmra.mrb[20].mxu0 %vm951_vm4, %v20119_v8 }
 0x1cc   : > { %16993 = vmatprep.mubr.msk.bf16.mxu0 %vm951_vm4, %v20125_v15 }
 0x1d3   : > { %16994 = vmatmul.mubr.msk.bf16.gmra.mrb[24].mxu0 %vm951_vm4, %v20127_v18 }
 0x1d4   : > { %16997 = vmatprep.mubr.msk.bf16.mxu0 %vm951_vm4, %v20137_v26 }
 0x1db   : > { %16998 = vmatmul.mubr.msk.bf16.gmra.mrb[28].mxu0 %vm951_vm4, %v20243_v12 }
 0x1dc   : > { %17003 = vmatprep.mubr.msk.bf16.mxu0 %vm951_vm4, %v19987_v32  ;;  %v2126_v32 = vld [vmem:[#allocation2 + $0x181] sm:$0xff] }
 0x1e3   : > { %17004 = vmatmul.mubr.msk.bf16.vlgmr.msra.gmra.mrb[0].mxu0 %vm951_vm4, %v19992_v36  ;;  %v2127_v36 = vld [vmem:[#allocation2 + $0x189] sm:$0xff] }
 0x1e4   : > { %17036 = vmatpush3.bf16.msra.mxu0 %v2489_v19  ;;  %17007 = vmatprep.mubr.msk.bf16.mxu0 %vm951_vm4, %v19998_v41  ;;  %v20282_v41 = vpack.c.bf16 %v2127_v36, %v2126_v32  ;;  %v20448_v36 = vld [vmem:[#allocation2] sm:$0xff] }
 0x1e5   : > { %18825 = vmatprep.subr.msk.bf16.mxu0 %vm1131_vm3, %v15586_v20 }
 0x1eb   : > { %17008 = vmatmul.mubr.msk.bf16.gmra.mrb[4].mxu0 %vm951_vm4, %v20002_v44  ;;  %v2784_v44 = vsel %vm1131_vm3, %v15586_v20, 0 }
 0x1ec   : > { %17011 = vmatprep.mubr.msk.bf16.mxu0 %vm951_vm4, %v20024_v55 }
 0x1f3   : > { %17012 = vmatmul.mubr.msk.bf16.gmra.mrb[8].mxu0 %vm951_vm4, %v20026_v56 }
 0x1f4   : > { %17015 = vmatprep.mubr.msk.bf16.mxu0 %vm951_vm4, %v20032_v61 }
 0x1fb   : > { %17016 = vmatmul.mubr.msk.bf16.gmra.mrb[12].mxu0 %vm951_vm4, %v20034_v62 }
 0x1fc   : > { %17019 = vmatprep.mubr.msk.bf16.mxu0 %vm951_vm4, %v20040_v4 }
 0x203   : > { %17020 = vmatmul.mubr.msk.bf16.gmra.mrb[16].mxu0 %vm951_vm4, %v20042_v5 }
 0x204   : > { %17023 = vmatprep.mubr.msk.bf16.mxu0 %vm951_vm4, %v20048_v10 }
 0x20b   : > { %17024 = vmatmul.mubr.msk.bf16.gmra.mrb[20].mxu0 %vm951_vm4, %v20050_v11 }
 0x20c   : > { %17027 = vmatprep.mubr.msk.bf16.mxu0 %vm951_vm4, %v20056_v16 }
 0x213   : > { %17028 = vmatmul.mubr.msk.bf16.gmra.mrb[24].mxu0 %vm951_vm4, %v20058_v17 }
 0x214   : > { %17031 = vmatprep.mubr.msk.bf16.mxu0 %vm951_vm4, %v20064_v22 }
 0x21b   : > { %17032 = vmatmul.mubr.msk.bf16.gmra.mrb[28].mxu0 %vm951_vm4, %v20282_v41 }
 0x21c   : > { %17037 = vmatprep.mubr.msk.bf16.mxu0 %vm951_vm4, %v20144_v40  ;;  %v2420_v40 = vld [vmem:[#allocation2 + $0x182] sm:$0xff] }
 0x21d   : > { %v20321_v27 = vpack.c.bf16 %v2421_v23, %v2420_v40 }
 0x223   : > { %17038 = vmatmul.mubr.msk.bf16.vlgmr.msra.gmra.mrb[0].mxu0 %vm951_vm4, %v20146_v42 }
 0x224   : > { %17070 = vmatpush3.bf16.msra.mxu0 %v2784_v44  ;;  %17041 = vmatprep.mubr.msk.bf16.mxu0 %vm951_vm4, %v20156_v31 }
 0x225   : > { %18826 = vmatprep.subr.msk.bf16.mxu0 %vm1131_vm3, %v15603_v21 }
 0x22b   : > { %17042 = vmatmul.mubr.msk.bf16.gmra.mrb[4].mxu0 %vm951_vm4, %v20158_v51 }
 0x22c   : > { %17045 = vmatprep.mubr.msk.bf16.mxu0 %vm951_vm4, %v20164_v1 }
 0x233   : > { %17046 = vmatmul.mubr.msk.bf16.gmra.mrb[8].mxu0 %vm951_vm4, %v20166_v2 }
 0x234   : > { %17049 = vmatprep.mubr.msk.bf16.mxu0 %vm951_vm4, %v20172_v13 }
 0x23b   : > { %17050 = vmatmul.mubr.msk.bf16.gmra.mrb[12].mxu0 %vm951_vm4, %v20174_v14 }
 0x23c   : > { %17053 = vmatprep.mubr.msk.bf16.mxu0 %vm951_vm4, %v20180_v24 }
 0x243   : > { %17054 = vmatmul.mubr.msk.bf16.gmra.mrb[16].mxu0 %vm951_vm4, %v20182_v25 }
 0x244   : > { %17057 = vmatprep.mubr.msk.bf16.mxu0 %vm951_vm4, %v20188_v35 }
 0x24b   : > { %17058 = vmatmul.mubr.msk.bf16.gmra.mrb[20].mxu0 %vm951_vm4, %v20190_v37 }
 0x24c   : > { %17061 = vmatprep.mubr.msk.bf16.mxu0 %vm951_vm4, %v20196_v54 }
 0x253   : > { %17062 = vmatmul.mubr.msk.bf16.gmra.mrb[24].mxu0 %vm951_vm4, %v20198_v57 }
 0x254   : > { %17065 = vmatprep.mubr.msk.bf16.mxu0 %vm951_vm4, %v20204_v3 }
 0x25b   : > { %17066 = vmatmul.mubr.msk.bf16.gmra.mrb[28].mxu0 %vm951_vm4, %v20321_v27 }
 0x25c   : > { %17071 = vmatprep.mubr.msk.bf16.mxu0 %vm951_vm4, %v20072_v30  ;;  %v2715_v30 = vld [vmem:[#allocation2 + $0x198] sm:$0xff] }
 0x263   : > { %17072 = vmatmul.mubr.msk.bf16.vlgmr.msra.gmra.mrb[0].mxu0 %vm951_vm4, %v20085_v38  ;;  %v2716_v38 = vld [vmem:[#allocation2 + $0x1a0] sm:$0xff] }
 0x264   : > { %17104 = vmatpush3.bf16.msra.mxu0 %v3078_v28  ;;  %17075 = vmatprep.mubr.msk.bf16.mxu0 %vm951_vm4, %v20087_v39  ;;  %v2979_v39 = vld [vmem:[#allocation2 + $0x31] sm:$0xff] }
 0x265   : > { %18827 = vmatprep.subr.msk.bf16.mxu0 %vm1131_vm3, %v15620_v33 }
 0x26b   : > { %17076 = vmatmul.mubr.msk.bf16.gmra.mrb[4].mxu0 %vm951_vm4, %v20093_v46  ;;  %v2980_v46 = vld [vmem:[#allocation2 + $0x39] sm:$0xff] }
 0x26c   : > { %17079 = vmatprep.mubr.msk.bf16.mxu0 %vm951_vm4, %v20095_v47  ;;  %v2732_v47 = vpack.c.bf16 %v2716_v38, %v2715_v30 }
 0x273   : > { %17080 = vmatmul.mubr.msk.bf16.gmra.mrb[8].mxu0 %vm951_vm4, %v20101_v52  ;;  %v3011_v52 = vpack.c.bf16 %v2980_v46, %v2979_v39 }
 0x274   : > { %17083 = vmatprep.mubr.msk.bf16.mxu0 %vm951_vm4, %v20103_v53  ;;  %v2981_v53 = vld [vmem:[#allocation2 + $0x49] sm:$0xff] }
 0x27b   : > { %17084 = vmatmul.mubr.msk.bf16.gmra.mrb[12].mxu0 %vm951_vm4, %v20109_v60  ;;  %v2982_v60 = vld [vmem:[#allocation2 + $0x51] sm:$0xff] }
 0x27c   : > { %17087 = vmatprep.mubr.msk.bf16.mxu0 %vm951_vm4, %v20111_v63  ;;  %v2983_v63 = vld [vmem:[#allocation2 + $0x61] sm:$0xff] }
 0x283   : > { %17088 = vmatmul.mubr.msk.bf16.gmra.mrb[16].mxu0 %vm951_vm4, %v20117_v7  ;;  %v2984_v7 = vld [vmem:[#allocation2 + $0x69] sm:$0xff] }
 0x284   : > { %17091 = vmatprep.mubr.msk.bf16.mxu0 %vm951_vm4, %v20119_v8  ;;  %v3012_v8 = vpack.c.bf16 %v2982_v60, %v2981_v53 }
 0x28b   : > { %17092 = vmatmul.mubr.msk.bf16.gmra.mrb[20].mxu0 %vm951_vm4, %v20125_v15  ;;  %v3013_v15 = vpack.c.bf16 %v2984_v7, %v2983_v63  ;;  %v20468_v7 = vld [vmem:[%s23014_s27 + $0x8] sm:$0xf] }
 0x28c   : > { %17095 = vmatprep.mubr.msk.bf16.mxu0 %vm951_vm4, %v20127_v18  ;;  %v3372_v18 = vsel %vm1131_vm3, %v15620_v33, 0 }
 0x293   : > { %17096 = vmatmul.mubr.msk.bf16.gmra.mrb[24].mxu0 %vm951_vm4, %v20137_v26  ;;  %v3782_v26 = vld [vmem:[%s23014_s27] sm:$0xf] }
 0x294   : > { %17099 = vmatprep.mubr.msk.bf16.mxu0 %vm951_vm4, %v20243_v12 }
 0x29b   : > { %17100 = vmatmul.mubr.msk.bf16.gmra.mrb[28].mxu0 %vm951_vm4, %v2732_v47  ;;  %v4095_v47 = vsel %vm3881_vm5, %v3782_v26, 0 }
 0x29c   : > { %17105 = vmatprep.mubr.msk.bf16.mxu0 %vm951_vm4, %v3011_v52 }
 0x2a3   : > { %17106 = vmatmul.mubr.msk.bf16.vlgmr.msra.gmra.mrb[0].mxu0 %vm951_vm4, %v3012_v8 }
 0x2a4   : > { %17138 = vmatpush3.bf16.msra.mxu0 %v3372_v18  ;;  %17109 = vmatprep.mubr.msk.bf16.mxu0 %vm951_vm4, %v3013_v15 }
 0x2ab   : > { %17110 = vmatmul.mubr.msk.bf16.gmra.mrb[4].mxu0 %vm951_vm4, %v20024_v55  ;;  %v3009_v55 = vld [vmem:[#allocation2 + $0x199] sm:$0xff] }
 0x2ac   : > { %17113 = vmatprep.mubr.msk.bf16.mxu0 %vm951_vm4, %v20026_v56  ;;  %v3010_v56 = vld [vmem:[#allocation2 + $0x1a1] sm:$0xff] }
 0x2b3   : > { %17114 = vmatmul.mubr.msk.bf16.gmra.mrb[8].mxu0 %vm951_vm4, %v20032_v61  ;;  %v3026_v61 = vpack.c.bf16 %v3010_v56, %v3009_v55 }
 0x2b4   : > { %17117 = vmatprep.mubr.msk.bf16.mxu0 %vm951_vm4, %v20034_v62  ;;  %v3303_v62 = vld [vmem:[#allocation2 + $0x19a] sm:$0xff] }
 0x2bb   : > { %17118 = vmatmul.mubr.msk.bf16.gmra.mrb[12].mxu0 %vm951_vm4, %v20040_v4  ;;  %v3304_v4 = vld [vmem:[#allocation2 + $0x1a2] sm:$0xff] }
 0x2bc   : > { %17121 = vmatprep.mubr.msk.bf16.mxu0 %vm951_vm4, %v20042_v5  ;;  %v3320_v5 = vpack.c.bf16 %v3304_v4, %v3303_v62 }
 0x2c3   : > { %17122 = vmatmul.mubr.msk.bf16.gmra.mrb[16].mxu0 %vm951_vm4, %v20048_v10  ;;  %v15638_v10 = vld [vmem:[%s23014_s27 + $0x4] sm:$0xf] }
 0x2c4   : > { %17125 = vmatprep.mubr.msk.bf16.mxu0 %vm951_vm4, %v20050_v11  ;;  %18828 = vmatprep.subr.msk.bf16.mxu1 %vm3881_vm5, %v15638_v10  ;;  %v3883_v11 = vsel %vm3881_vm5, %v15638_v10, 0 }
 0x2c5   : > { %17172 = vmatpush3.bf16.msra.mxu1 %v3883_v11 }
 0x2c6   : > { %18829 = vmatprep.subr.msk.bf16.mxu1 %vm3881_vm5, %v3782_v26 }
 0x2cb   : > { %17126 = vmatmul.mubr.msk.bf16.gmra.mrb[20].mxu0 %vm951_vm4, %v20056_v16  ;;  %v3783_v16 = vld [vmem:[#allocation2 + $0x1] sm:$0xff] }
 0x2cc   : > { %17129 = vmatprep.mubr.msk.bf16.mxu0 %vm951_vm4, %v20058_v17  ;;  %v3784_v17 = vld [vmem:[#allocation2 + $0x9] sm:$0xff] }
 0x2d3   : > { %17130 = vmatmul.mubr.msk.bf16.gmra.mrb[24].mxu0 %vm951_vm4, %v20064_v22  ;;  %v3815_v22 = vpack.c.bf16 %v3784_v17, %v3783_v16 }
 0x2d4   : > { %17133 = vmatprep.mubr.msk.bf16.mxu0 %vm951_vm4, %v20282_v41  ;;  %v20450_v41 = vld [vmem:[#allocation2 + $0x2] sm:$0xff] }
 0x2d5   : > { %17173 = vmatprep.mubr.msk.bf16.mxu1 %vm908_vm0, %v3815_v22  ;;  %8148 = vst.msk [vmem:[#allocation2] sm:$0xff] %vm8147_vm13, %v19495_v0 }
 0x2db   : > { %17134 = vmatmul.mubr.msk.bf16.gmra.mrb[28].mxu0 %vm951_vm4, %v3026_v61 }
 0x2dc   : > { %17139 = vmatprep.mubr.msk.bf16.mxu0 %vm951_vm4, %v20146_v42  ;;  %v20434_v42 = vld [vmem:[%s23015_s6] ss:$0 sm:$0xff] }
 0x2e3   : > { %17140 = vmatmul.mubr.msk.bf16.vlgmr.msra.gmra.mrb[0].mxu0 %vm951_vm4, %v20156_v31 }
 0x2e4   : > { %17143 = vmatprep.mubr.msk.bf16.mxu0 %vm951_vm4, %v20158_v51 }
 0x2eb   : > { %17144 = vmatmul.mubr.msk.bf16.gmra.mrb[4].mxu0 %vm951_vm4, %v20164_v1 }
 0x2ec   : > { %17147 = vmatprep.mubr.msk.bf16.mxu0 %vm951_vm4, %v20166_v2 }
 0x2f3   : > { %17148 = vmatmul.mubr.msk.bf16.gmra.mrb[8].mxu0 %vm951_vm4, %v20172_v13 }
 0x2f4   : > { %17151 = vmatprep.mubr.msk.bf16.mxu0 %vm951_vm4, %v20174_v14 }
 0x2fb   : > { %17152 = vmatmul.mubr.msk.bf16.gmra.mrb[12].mxu0 %vm951_vm4, %v20180_v24 }
 0x2fc   : > { %17155 = vmatprep.mubr.msk.bf16.mxu0 %vm951_vm4, %v20182_v25 }
 0x303   : > { %17156 = vmatmul.mubr.msk.bf16.gmra.mrb[16].mxu0 %vm951_vm4, %v20188_v35 }
 0x304   : > { %17159 = vmatprep.mubr.msk.bf16.mxu0 %vm951_vm4, %v20190_v37 }
 0x30b   : > { %17160 = vmatmul.mubr.msk.bf16.gmra.mrb[20].mxu0 %vm951_vm4, %v20196_v54 }
 0x30c   : > { %17163 = vmatprep.mubr.msk.bf16.mxu0 %vm951_vm4, %v20198_v57 }
 0x313   : > { %17164 = vmatmul.mubr.msk.bf16.gmra.mrb[24].mxu0 %vm951_vm4, %v20204_v3 }
 0x314   : > { %17167 = vmatprep.mubr.msk.bf16.mxu0 %vm951_vm4, %v20321_v27 }
 0x31b   : > { %17168 = vmatmul.mubr.msk.bf16.gmra.mrb[28].mxu0 %vm951_vm4, %v3320_v5 }
 0x3b6   : > { %v17141_v31 = vpop.f32.mrb[0].mxu0 }
 0x3b7   : > { %v3576_v51 = vadd.f32 %v17141_v31, %v20434_v42  ;;  %v3408_v1 = vpop.f32.mrb[1].mxu0 }
 0x3b8   : > { %v3574_v2 = vadd.f32 %v20434_v42, %v3408_v1  ;;  %v17142_v13 = vpop.f32.mrb[2].mxu0 }
 0x3b9   : > { %vm3608_vm6 = vcmp.gt.f32.partialorder %v3576_v51, 0.0  ;;  %v3640_v14 = vmul.f32 0.01, %v3576_v51  ;;  %v3577_v24 = vadd.f32 %v17142_v13, %v20434_v42  ;;  %v3411_v25 = vpop.f32.mrb[3].mxu0 }
 0x3ba   : > { %vm3606_vm7 = vcmp.gt.f32.partialorder %v3574_v2, 0.0  ;;  %v3638_v34 = vmul.f32 0.01, %v3574_v2  ;;  %v3575_v35 = vadd.f32 %v20434_v42, %v3411_v25 }
 0x3bb   : > { %v3672_v37 = vsel %vm3608_vm6, %v3576_v51, %v3640_v14  ;;  %vm3609_vm8 = vcmp.gt.f32.partialorder %v3577_v24, 0.0  ;;  %v3641_v45 = vmul.f32 0.01, %v3577_v24 }
 0x3bc   : > { %3704 = vst.msk [vmem:[#allocation2 + $0x31] sm:$0xff] %vm908_vm0, %v3672_v37  ;;  %v3670_v48 = vsel %vm3606_vm7, %v3574_v2, %v3638_v34  ;;  %vm3607_vm9 = vcmp.gt.f32.partialorder %v3575_v35, 0.0  ;;  %v3639_v49 = vmul.f32 0.01, %v3575_v35 }
 0x3bd   : > { %3702 = vst.msk [vmem:[#allocation2 + $0x19] sm:$0xff] %vm908_vm0, %v3670_v48  ;;  %v3673_v50 = vsel %vm3609_vm8, %v3577_v24, %v3641_v45 }
 0x3be   : > { %3705 = vst.msk [vmem:[#allocation2 + $0x39] sm:$0xff] %vm908_vm0, %v3673_v50  ;;  %v3671_v54 = vsel %vm3607_vm9, %v3575_v35, %v3639_v49  ;;  %v17145_v57 = vpop.f32.mrb[4].mxu0 }
 0x3bf   : > { %3703 = vst.msk [vmem:[#allocation2 + $0x21] sm:$0xff] %vm908_vm0, %v3671_v54  ;;  %v3580_v58 = vadd.f32 %v17145_v57, %v20434_v42  ;;  %v3424_v59 = vpop.f32.mrb[5].mxu0 }
 0x3c0   : > { %v3578_v3 = vadd.f32 %v20434_v42, %v3424_v59  ;;  %v17146_v6 = vpop.f32.mrb[6].mxu0 }
 0x3c1   : > { %vm3612_vm10 = vcmp.gt.f32.partialorder %v3580_v58, 0.0  ;;  %v3644_v9 = vmul.f32 0.01, %v3580_v58  ;;  %v3581_v29 = vadd.f32 %v17146_v6, %v20434_v42  ;;  %v3427_v43 = vpop.f32.mrb[7].mxu0 }
 0x3c2   : > { %vm3610_vm11 = vcmp.gt.f32.partialorder %v3578_v3, 0.0  ;;  %v3642_v12 = vmul.f32 0.01, %v3578_v3  ;;  %v3579_v19 = vadd.f32 %v20434_v42, %v3427_v43 }
 0x3c3   : > { %v3676_v20 = vsel %vm3612_vm10, %v3580_v58, %v3644_v9  ;;  %vm3613_vm12 = vcmp.gt.f32.partialorder %v3581_v29, 0.0  ;;  %v3645_v32 = vmul.f32 0.01, %v3581_v29  ;;  %v3787_v52 = vld [vmem:[#allocation2 + $0x31] sm:$0xff] }
 0x3c4   : > { %3708 = vst.msk [vmem:[#allocation2 + $0x61] sm:$0xff] %vm908_vm0, %v3676_v20  ;;  %v3674_v44 = vsel %vm3610_vm11, %v3578_v3, %v3642_v12  ;;  %vm3611_vm14 = vcmp.gt.f32.partialorder %v3579_v19, 0.0  ;;  %v3643_v21 = vmul.f32 0.01, %v3579_v19  ;;  %v3785_v33 = vld [vmem:[#allocation2 + $0x19] sm:$0xff] }
 0x3c5   : > { %3706 = vst.msk [vmem:[#allocation2 + $0x49] sm:$0xff] %vm908_vm0, %v3674_v44  ;;  %v3677_v40 = vsel %vm3613_vm12, %v3581_v29, %v3645_v32  ;;  %v3788_v23 = vld [vmem:[#allocation2 + $0x39] sm:$0xff] }
 0x3c6   : > { %3709 = vst.msk [vmem:[#allocation2 + $0x69] sm:$0xff] %vm908_vm0, %v3677_v40  ;;  %v3675_v27 = vsel %vm3611_vm14, %v3579_v19, %v3643_v21  ;;  %v17149_v28 = vpop.f32.mrb[8].mxu0  ;;  %v3786_v30 = vld [vmem:[#allocation2 + $0x21] sm:$0xff]  ;;  %v20463_v63 = vpack.c.bf16 %v3788_v23, %v3787_v52 }
 0x3c7   : > { %3707 = vst.msk [vmem:[#allocation2 + $0x51] sm:$0xff] %vm908_vm0, %v3675_v27  ;;  %v3584_v38 = vadd.f32 %v17149_v28, %v20434_v42  ;;  %v3440_v39 = vpop.f32.mrb[9].mxu0  ;;  %v20459_v46 = vpack.c.bf16 %v3786_v30, %v3785_v33 }
 0x3c8   : > { %v3582_v53 = vadd.f32 %v20434_v42, %v3440_v39  ;;  %v17150_v60 = vpop.f32.mrb[10].mxu0 }
 0x3c9   : > { %vm3616_vm15 = vcmp.gt.f32.partialorder %v3584_v38, 0.0  ;;  %v3648_v8 = vmul.f32 0.01, %v3584_v38  ;;  %v3585_v15 = vadd.f32 %v17150_v60, %v20434_v42  ;;  %v3443_v18 = vpop.f32.mrb[11].mxu0  ;;  %17174 = vmatmul.mubr.msk.bf16.vlgmr.msra.gmra.mrb[0].mxu1 %vm908_vm0, %v20459_v46 }
 0x3ca   : > { %vm3614_vm2 = vcmp.gt.f32.partialorder %v3582_v53, 0.0  ;;  %v3646_v55 = vmul.f32 0.01, %v3582_v53  ;;  %v3583_v56 = vadd.f32 %v20434_v42, %v3443_v18  ;;  %17206 = vmatpush3.bf16.msra.mxu1 %v4095_v47  ;;  %17177 = vmatprep.mubr.msk.bf16.mxu1 %vm908_vm0, %v20463_v63 }
 0x3cb   : > { %v3680_v61 = vsel %vm3616_vm15, %v3584_v38, %v3648_v8  ;;  %vm3617_vm3 = vcmp.gt.f32.partialorder %v3585_v15, 0.0  ;;  %v3649_v62 = vmul.f32 0.01, %v3585_v15  ;;  %18830 = vmatprep.subr.msk.bf16.mxu1 %vm3881_vm5, %v20468_v7  ;;  %v3791_v2 = vld [vmem:[#allocation2 + $0x61] sm:$0xff] }
 0x3cc   : > { %3712 = vst.msk [vmem:[#allocation2 + $0x91] sm:$0xff] %vm908_vm0, %v3680_v61  ;;  %v3678_v4 = vsel %vm3614_vm2, %v3582_v53, %v3646_v55  ;;  %vm3615_vm4 = vcmp.gt.f32.partialorder %v3583_v56, 0.0  ;;  %v3647_v5 = vmul.f32 0.01, %v3583_v56  ;;  %v3789_v22 = vld [vmem:[#allocation2 + $0x49] sm:$0xff] }
 0x3cd   : > { %3710 = vst.msk [vmem:[#allocation2 + $0x79] sm:$0xff] %vm908_vm0, %v3678_v4  ;;  %v3681_v10 = vsel %vm3617_vm3, %v3585_v15, %v3649_v62  ;;  %v3792_v11 = vld [vmem:[#allocation2 + $0x69] sm:$0xff] }
 0x3ce   : > { %3713 = vst.msk [vmem:[#allocation2 + $0x99] sm:$0xff] %vm908_vm0, %v3681_v10  ;;  %v3679_v16 = vsel %vm3615_vm4, %v3583_v56, %v3647_v5  ;;  %v17153_v17 = vpop.f32.mrb[12].mxu0  ;;  %v3790_v26 = vld [vmem:[#allocation2 + $0x51] sm:$0xff]  ;;  %v20486_v24 = vpack.c.bf16 %v3792_v11, %v3791_v2 }
 0x3cf   : > { %3711 = vst.msk [vmem:[#allocation2 + $0x81] sm:$0xff] %vm908_vm0, %v3679_v16  ;;  %v3588_v31 = vadd.f32 %v17153_v17, %v20434_v42  ;;  %v3456_v51 = vpop.f32.mrb[13].mxu0  ;;  %v20483_v1 = vpack.c.bf16 %v3790_v26, %v3789_v22 }
 0x3d0   : > { %v3586_v13 = vadd.f32 %v20434_v42, %v3456_v51  ;;  %v17154_v14 = vpop.f32.mrb[14].mxu0 }
 0x3d1   : > { %vm3620_vm6 = vcmp.gt.f32.partialorder %v3588_v31, 0.0  ;;  %v3652_v25 = vmul.f32 0.01, %v3588_v31  ;;  %v3589_v34 = vadd.f32 %v17154_v14, %v20434_v42  ;;  %v3459_v35 = vpop.f32.mrb[15].mxu0  ;;  %17178 = vmatmul.mubr.msk.bf16.gmra.mrb[4].mxu1 %vm908_vm0, %v20483_v1 }
 0x3d2   : > { %vm3618_vm7 = vcmp.gt.f32.partialorder %v3586_v13, 0.0  ;;  %v3650_v37 = vmul.f32 0.01, %v3586_v13  ;;  %v3587_v45 = vadd.f32 %v20434_v42, %v3459_v35  ;;  %17181 = vmatprep.mubr.msk.bf16.mxu1 %vm908_vm0, %v20486_v24 }
 0x3d3   : > { %v3684_v48 = vsel %vm3620_vm6, %v3588_v31, %v3652_v25  ;;  %vm3621_vm8 = vcmp.gt.f32.partialorder %v3589_v34, 0.0  ;;  %v3653_v49 = vmul.f32 0.01, %v3589_v34  ;;  %v3795_v19 = vld [vmem:[#allocation2 + $0x91] sm:$0xff] }
 0x3d4   : > { %3716 = vst.msk [vmem:[#allocation2 + $0xc1] sm:$0xff] %vm908_vm0, %v3684_v48  ;;  %v3682_v50 = vsel %vm3618_vm7, %v3586_v13, %v3650_v37  ;;  %vm3619_vm9 = vcmp.gt.f32.partialorder %v3587_v45, 0.0  ;;  %v3651_v54 = vmul.f32 0.01, %v3587_v45  ;;  %v3793_v6 = vld [vmem:[#allocation2 + $0x79] sm:$0xff] }
 0x3d5   : > { %3714 = vst.msk [vmem:[#allocation2 + $0xa9] sm:$0xff] %vm908_vm0, %v3682_v50  ;;  %v3685_v57 = vsel %vm3621_vm8, %v3589_v34, %v3653_v49  ;;  %v3796_v58 = vld [vmem:[#allocation2 + $0x99] sm:$0xff] }
 0x3d6   : > { %3717 = vst.msk [vmem:[#allocation2 + $0xc9] sm:$0xff] %vm908_vm0, %v3685_v57  ;;  %v3683_v59 = vsel %vm3619_vm9, %v3587_v45, %v3651_v54  ;;  %v17157_v3 = vpop.f32.mrb[16].mxu0  ;;  %v3794_v9 = vld [vmem:[#allocation2 + $0x81] sm:$0xff]  ;;  %v20502_v44 = vpack.c.bf16 %v3796_v58, %v3795_v19 }
 0x3d7   : > { %3715 = vst.msk [vmem:[#allocation2 + $0xb1] sm:$0xff] %vm908_vm0, %v3683_v59  ;;  %v3592_v29 = vadd.f32 %v17157_v3, %v20434_v42  ;;  %v3472_v43 = vpop.f32.mrb[17].mxu0  ;;  %v20499_v12 = vpack.c.bf16 %v3794_v9, %v3793_v6 }
 0x3d8   : > { %v3590_v20 = vadd.f32 %v20434_v42, %v3472_v43  ;;  %v17158_v32 = vpop.f32.mrb[18].mxu0 }
 0x3d9   : > { %vm3624_vm10 = vcmp.gt.f32.partialorder %v3592_v29, 0.0  ;;  %v3656_v21 = vmul.f32 0.01, %v3592_v29  ;;  %v3593_v40 = vadd.f32 %v17158_v32, %v20434_v42  ;;  %v3475_v23 = vpop.f32.mrb[19].mxu0  ;;  %17182 = vmatmul.mubr.msk.bf16.gmra.mrb[8].mxu1 %vm908_vm0, %v20499_v12 }
 0x3da   : > { %vm3622_vm11 = vcmp.gt.f32.partialorder %v3590_v20, 0.0  ;;  %v3654_v27 = vmul.f32 0.01, %v3590_v20  ;;  %v3591_v28 = vadd.f32 %v20434_v42, %v3475_v23  ;;  %17185 = vmatprep.mubr.msk.bf16.mxu1 %vm908_vm0, %v20502_v44 }
 0x3db   : > { %v3688_v33 = vsel %vm3624_vm10, %v3592_v29, %v3656_v21  ;;  %vm3625_vm12 = vcmp.gt.f32.partialorder %v3593_v40, 0.0  ;;  %v3657_v30 = vmul.f32 0.01, %v3593_v40  ;;  %v3799_v61 = vld [vmem:[#allocation2 + $0xc1] sm:$0xff] }
 0x3dc   : > { %3720 = vst.msk [vmem:[#allocation2 + $0xf1] sm:$0xff] %vm908_vm0, %v3688_v33  ;;  %v3686_v38 = vsel %vm3622_vm11, %v3590_v20, %v3654_v27  ;;  %vm3623_vm14 = vcmp.gt.f32.partialorder %v3591_v28, 0.0  ;;  %v3655_v39 = vmul.f32 0.01, %v3591_v28  ;;  %v3797_v8 = vld [vmem:[#allocation2 + $0xa9] sm:$0xff] }
 0x3dd   : > { %3718 = vst.msk [vmem:[#allocation2 + $0xd9] sm:$0xff] %vm908_vm0, %v3686_v38  ;;  %v3689_v47 = vsel %vm3625_vm12, %v3593_v40, %v3657_v30  ;;  %v3800_v52 = vld [vmem:[#allocation2 + $0xc9] sm:$0xff] }
 0x3de   : > { %3721 = vst.msk [vmem:[#allocation2 + $0xf9] sm:$0xff] %vm908_vm0, %v3689_v47  ;;  %v3687_v53 = vsel %vm3623_vm14, %v3591_v28, %v3655_v39  ;;  %v17161_v60 = vpop.f32.mrb[20].mxu0  ;;  %v3798_v15 = vld [vmem:[#allocation2 + $0xb1] sm:$0xff]  ;;  %v20518_v5 = vpack.c.bf16 %v3800_v52, %v3799_v61 }
 0x3df   : > { %3719 = vst.msk [vmem:[#allocation2 + $0xe1] sm:$0xff] %vm908_vm0, %v3687_v53  ;;  %v3596_v18 = vadd.f32 %v17161_v60, %v20434_v42  ;;  %v3488_v55 = vpop.f32.mrb[21].mxu0  ;;  %v20515_v56 = vpack.c.bf16 %v3798_v15, %v3797_v8 }
 0x3e0   : > { %v3594_v62 = vadd.f32 %v20434_v42, %v3488_v55  ;;  %v17162_v4 = vpop.f32.mrb[22].mxu0 }
 0x3e1   : > { %vm3628_vm15 = vcmp.gt.f32.partialorder %v3596_v18, 0.0  ;;  %v3660_v10 = vmul.f32 0.01, %v3596_v18  ;;  %v3597_v11 = vadd.f32 %v17162_v4, %v20434_v42  ;;  %v3491_v16 = vpop.f32.mrb[23].mxu0  ;;  %17186 = vmatmul.mubr.msk.bf16.gmra.mrb[12].mxu1 %vm908_vm0, %v20515_v56 }
 0x3e2   : > { %vm3626_vm2 = vcmp.gt.f32.partialorder %v3594_v62, 0.0  ;;  %v3658_v17 = vmul.f32 0.01, %v3594_v62  ;;  %v3595_v22 = vadd.f32 %v20434_v42, %v3491_v16  ;;  %17189 = vmatprep.mubr.msk.bf16.mxu1 %vm908_vm0, %v20518_v5 }
 0x3e3   : > { %v3692_v26 = vsel %vm3628_vm15, %v3596_v18, %v3660_v10  ;;  %vm3629_vm3 = vcmp.gt.f32.partialorder %v3597_v11, 0.0  ;;  %v3661_v31 = vmul.f32 0.01, %v3597_v11  ;;  %v3803_v57 = vld [vmem:[#allocation2 + $0xf1] sm:$0xff]  ;;  %vm8154_vm15 = vcmask 122880  }
 0x3e4   : > { %3724 = vst.msk [vmem:[#allocation2 + $0x121] sm:$0xff] %vm908_vm0, %v3692_v26  ;;  %v3690_v51 = vsel %vm3626_vm2, %v3594_v62, %v3658_v17  ;;  %vm3627_vm4 = vcmp.gt.f32.partialorder %v3595_v22, 0.0  ;;  %v3659_v2 = vmul.f32 0.01, %v3595_v22  ;;  %v3801_v14 = vld [vmem:[#allocation2 + $0xd9] sm:$0xff] }
 0x3e5   : > { %3722 = vst.msk [vmem:[#allocation2 + $0x109] sm:$0xff] %vm908_vm0, %v3690_v51  ;;  %v3693_v13 = vsel %vm3629_vm3, %v3597_v11, %v3661_v31  ;;  %v3804_v25 = vld [vmem:[#allocation2 + $0xf9] sm:$0xff] }
 0x3e6   : > { %3725 = vst.msk [vmem:[#allocation2 + $0x129] sm:$0xff] %vm908_vm0, %v3693_v13  ;;  %v3691_v34 = vsel %vm3627_vm4, %v3595_v22, %v3659_v2  ;;  %v17165_v35 = vpop.f32.mrb[24].mxu0  ;;  %v3802_v37 = vld [vmem:[#allocation2 + $0xe1] sm:$0xff]  ;;  %v20529_v45 = vld [vmem:[#allocation2 + $0xd8] sm:$0xff]  ;;  %v20540_v3 = vpack.c.bf16 %v3804_v25, %v3803_v57 }
 0x3e7   : > { %v20531_v48 = vld [vmem:[#allocation2 + $0xda] sm:$0xff]  ;;  %3723 = vst.msk [vmem:[#allocation2 + $0x111] sm:$0xff] %vm908_vm0, %v3691_v34  ;;  %v3600_v49 = vadd.f32 %v17165_v35, %v20434_v42  ;;  %v3504_v50 = vpop.f32.mrb[25].mxu0  ;;  %v20535_v54 = vpack.c.bf16 %v3802_v37, %v3801_v14  ;;  %v3735_v25 = vld [vmem:[#allocation2 + $0x8] sm:$0xff] }
 0x3e8   : > { %8152 = vst.msk [vmem:[#allocation2 + $0xd8] sm:$0xff] %vm8147_vm13, %v19495_v0  ;;  %v3598_v58 = vadd.f32 %v20434_v42, %v3504_v50  ;;  %v17166_v59 = vpop.f32.mrb[26].mxu0  ;;  %v3766_v37 = vpack.c.bf16 %v3735_v25, %v20448_v36  ;;  %v3737_v50 = vld [vmem:[#allocation2 + $0x20] sm:$0xff]  ;;  %v3739_v57 = vld [vmem:[#allocation2 + $0x38] sm:$0xff]  ;;  %v20591_v36 = vld [vmem:[%s23014_s27 + $0xc] sm:$0xf] }
 0x3e9   : > { %vm3632_vm6 = vcmp.gt.f32.partialorder %v3600_v49, 0.0  ;;  %v3664_v6 = vmul.f32 0.01, %v3600_v49  ;;  %v3601_v9 = vadd.f32 %v17166_v59, %v20434_v42  ;;  %v3507_v29 = vpop.f32.mrb[27].mxu0  ;;  %17190 = vmatmul.mubr.msk.bf16.gmra.mrb[16].mxu1 %vm908_vm0, %v20535_v54 }
 0x3ea   : > { %vm3630_vm7 = vcmp.gt.f32.partialorder %v3598_v58, 0.0  ;;  %v3662_v43 = vmul.f32 0.01, %v3598_v58  ;;  %v3599_v19 = vadd.f32 %v20434_v42, %v3507_v29  ;;  %17193 = vmatprep.mubr.msk.bf16.mxu1 %vm908_vm0, %v20540_v3 }
 0x3eb   : > { %v3696_v20 = vsel %vm3632_vm6, %v3600_v49, %v3664_v6  ;;  %vm3633_vm8 = vcmp.gt.f32.partialorder %v3601_v9, 0.0  ;;  %v3665_v32 = vmul.f32 0.01, %v3601_v9  ;;  %v3807_v53 = vld [vmem:[#allocation2 + $0x121] sm:$0xff]  ;;  %v4357_v6 = vsel %vm3881_vm5, %v20468_v7, 0 }
 0x3ec   : > { %3728 = vst.msk [vmem:[#allocation2 + $0x151] sm:$0xff] %vm908_vm0, %v3696_v20  ;;  %v3694_v21 = vsel %vm3630_vm7, %v3598_v58, %v3662_v43  ;;  %vm3631_vm9 = vcmp.gt.f32.partialorder %v3599_v19, 0.0  ;;  %v3663_v40 = vmul.f32 0.01, %v3599_v19  ;;  %v3805_v30 = vld [vmem:[#allocation2 + $0x109] sm:$0xff]  ;;  %v3736_v58 = vld [vmem:[#allocation2 + $0x18] sm:$0xff] }
 0x3ed   : > { %3726 = vst.msk [vmem:[#allocation2 + $0x139] sm:$0xff] %vm908_vm0, %v3694_v21  ;;  %v3697_v23 = vsel %vm3633_vm8, %v3601_v9, %v3665_v32  ;;  %v3808_v27 = vld [vmem:[#allocation2 + $0x129] sm:$0xff]  ;;  %v20582_v59 = vpack.c.bf16 %v3737_v50, %v3736_v58  ;;  %v3742_v32 = vld [vmem:[#allocation2 + $0x60] sm:$0xff]  ;;  %vm8235_vm7 = vcmask 1041409   ;;  %vm8237_vm8 = vcmask 1042434  }
 0x3ee   : > { %3729 = vst.msk [vmem:[#allocation2 + $0x159] sm:$0xff] %vm908_vm0, %v3697_v23  ;;  %v3695_v28 = vsel %vm3631_vm9, %v3599_v19, %v3663_v40  ;;  %v17169_v33 = vpop.f32.mrb[28].mxu0  ;;  %v3806_v38 = vld [vmem:[#allocation2 + $0x111] sm:$0xff]  ;;  %v20556_v15 = vpack.c.bf16 %v3808_v27, %v3807_v53  ;;  %v3743_v7 = vld [vmem:[#allocation2 + $0x68] sm:$0xff]  ;;  %v3745_v40 = vld [vmem:[#allocation2 + $0x80] sm:$0xff]  ;;  %vm8239_vm9 = vcmask 1043459  }
 0x3ef   : > { %3727 = vst.msk [vmem:[#allocation2 + $0x141] sm:$0xff] %vm908_vm0, %v3695_v28  ;;  %v3604_v39 = vadd.f32 %v17169_v33, %v20434_v42  ;;  %v3520_v47 = vpop.f32.mrb[29].mxu0  ;;  %v20553_v52 = vpack.c.bf16 %v3806_v38, %v3805_v30  ;;  %v3738_v9 = vld [vmem:[#allocation2 + $0x30] sm:$0xff]  ;;  %v3740_v19 = vld [vmem:[#allocation2 + $0x48] sm:$0xff]  ;;  %v20601_v21 = vpack.c.bf16 %v3743_v7, %v3742_v32  ;;  %v3747_v23 = vld [vmem:[#allocation2 + $0x98] sm:$0xff] }
 0x3f0   : > { %v3602_v60 = vadd.f32 %v20434_v42, %v3520_v47  ;;  %v17170_v8 = vpop.f32.mrb[30].mxu0  ;;  %v20586_v29 = vpack.c.bf16 %v3739_v57, %v3738_v9  ;;  %v3741_v43 = vld [vmem:[#allocation2 + $0x50] sm:$0xff]  ;;  %v3744_v27 = vld [vmem:[#allocation2 + $0x78] sm:$0xff]  ;;  %v3748_v47 = vld [vmem:[#allocation2 + $0xa8] sm:$0xff]  ;;  %8155 = vst.msk [vmem:[#allocation2 + $0x18] sm:$0x1] %vm8154_vm15, %v19495_v0 }
 0x3f1   : > { %vm3636_vm10 = vcmp.gt.f32.partialorder %v3604_v39, 0.0  ;;  %v3668_v18 = vmul.f32 0.01, %v3604_v39  ;;  %v3605_v55 = vadd.f32 %v17170_v8, %v20434_v42  ;;  %v3523_v61 = vpop.f32.mrb[31].mxu0  ;;  %17194 = vmatmul.mubr.msk.bf16.gmra.mrb[20].mxu1 %vm908_vm0, %v20553_v52  ;;  %v20599_v20 = vpack.c.bf16 %v3741_v43, %v3740_v19  ;;  %v3746_v33 = vld [vmem:[#allocation2 + $0x90] sm:$0xff]  ;;  %v4260_v58 = vld [vmem:[#allocation2 + $0x1a] sm:$0xff] }
 0x3f2   : > { %vm3634_vm11 = vcmp.gt.f32.partialorder %v3602_v60, 0.0  ;;  %v3666_v62 = vmul.f32 0.01, %v3602_v60  ;;  %v3603_v4 = vadd.f32 %v20434_v42, %v3523_v61  ;;  %17197 = vmatprep.mubr.msk.bf16.mxu1 %vm908_vm0, %v20556_v15  ;;  %v20607_v28 = vpack.c.bf16 %v3745_v40, %v3744_v27  ;;  %v3749_v38 = vld [vmem:[#allocation2 + $0xb0] sm:$0xff]  ;;  %v4263_v43 = vld [vmem:[#allocation2 + $0x3a] sm:$0xff]  ;;  %v4266_v27 = vld [vmem:[#allocation2 + $0x62] sm:$0xff] }
 0x3f3   : > { %v3700_v10 = vsel %vm3636_vm10, %v3604_v39, %v3668_v18  ;;  %vm3637_vm12 = vcmp.gt.f32.partialorder %v3605_v55, 0.0  ;;  %v3669_v11 = vmul.f32 0.01, %v3605_v55  ;;  %v3811_v13 = vld [vmem:[#allocation2 + $0x151] sm:$0xff]  ;;  %v20609_v30 = vpack.c.bf16 %v3747_v23, %v3746_v33  ;;  %v3751_v39 = vld [vmem:[#allocation2 + $0xc8] sm:$0xff]  ;;  %v3753_v18 = vld [vmem:[#allocation2 + $0xe0] sm:$0xff] }
 0x3f4   : > { %3732 = vst.msk [vmem:[#allocation2 + $0x181] sm:$0xff] %vm908_vm0, %v3700_v10  ;;  %v3698_v16 = vsel %vm3634_vm11, %v3602_v60, %v3666_v62  ;;  %vm3635_vm14 = vcmp.gt.f32.partialorder %v3603_v4, 0.0  ;;  %v3667_v17 = vmul.f32 0.01, %v3603_v4  ;;  %v3809_v51 = vld [vmem:[#allocation2 + $0x139] sm:$0xff]  ;;  %v20615_v53 = vpack.c.bf16 %v3749_v38, %v3748_v47  ;;  %v3754_v62 = vld [vmem:[#allocation2 + $0xf0] sm:$0xff] }
 0x3f5   : > { %3730 = vst.msk [vmem:[#allocation2 + $0x169] sm:$0xff] %vm908_vm0, %v3698_v16  ;;  %v3701_v22 = vsel %vm3637_vm12, %v3605_v55, %v3669_v11  ;;  %v3812_v26 = vld [vmem:[#allocation2 + $0x159] sm:$0xff]  ;;  %v20624_v61 = vpack.c.bf16 %v3753_v18, %v20529_v45  ;;  %v3757_v10 = vld [vmem:[#allocation2 + $0x110] sm:$0xff]  ;;  %v3759_v11 = vld [vmem:[#allocation2 + $0x128] sm:$0xff]  ;;  %v4651_v19 = vsel %vm3881_vm5, %v20591_v36, 0  ;;  %vm8241_vm10 = vcmask 1044484  }
 0x3f6   : > { %3733 = vst.msk [vmem:[#allocation2 + $0x189] sm:$0xff] %vm908_vm0, %v3701_v22  ;;  %v3699_v31 = vsel %vm3635_vm14, %v3603_v4, %v3667_v17  ;;  %v3810_v42 = vld [vmem:[#allocation2 + $0x141] sm:$0xff]  ;;  %v20570_v14 = vpack.c.bf16 %v3812_v26, %v3811_v13  ;;  %v3755_v55 = vld [vmem:[#allocation2 + $0xf8] sm:$0xff]  ;;  %v3762_v13 = vld [vmem:[#allocation2 + $0x150] sm:$0xff]  ;;  %vm8243_vm11 = vcmask 1045509   ;;  %vm8245_vm12 = vcmask 1046534  }
 0x3f7   : > { %3731 = vst.msk [vmem:[#allocation2 + $0x171] sm:$0xff] %vm908_vm0, %v3699_v31  ;;  %v20568_v2 = vpack.c.bf16 %v3810_v42, %v3809_v51  ;;  %v3750_v60 = vld [vmem:[#allocation2 + $0xc0] sm:$0xff]  ;;  %v20626_v4 = vpack.c.bf16 %v3755_v55, %v3754_v62  ;;  %v3756_v16 = vld [vmem:[#allocation2 + $0x108] sm:$0xff]  ;;  %v3763_v31 = vld [vmem:[#allocation2 + $0x158] sm:$0xff]  ;;  %vm8247_vm14 = vcmask 1047559  }
 0x3f8   : > { %v20617_v8 = vpack.c.bf16 %v3751_v39, %v3750_v60  ;;  %v20632_v17 = vpack.c.bf16 %v3757_v10, %v3756_v16  ;;  %v3758_v22 = vld [vmem:[#allocation2 + $0x120] sm:$0xff]  ;;  %v3760_v51 = vld [vmem:[#allocation2 + $0x138] sm:$0xff]  ;;  %v20642_v25 = vpack.c.bf16 %v3763_v31, %v3762_v13  ;;  %v4264_v40 = vld [vmem:[#allocation2 + $0x4a] sm:$0xff]  ;;  %8159 = vst.msk [vmem:[#allocation2 + $0x78] sm:$0x1] %vm8154_vm15, %v19495_v0 }
 0x3f9   : > { %17198 = vmatmul.mubr.msk.bf16.gmra.mrb[24].mxu1 %vm908_vm0, %v20568_v2  ;;  %v20634_v26 = vpack.c.bf16 %v3759_v11, %v3758_v22  ;;  %v3761_v45 = vld [vmem:[#allocation2 + $0x140] sm:$0xff]  ;;  %v4262_v9 = vld [vmem:[#allocation2 + $0x32] sm:$0xff]  ;;  %v4267_v33 = vld [vmem:[#allocation2 + $0x6a] sm:$0xff]  ;;  %8156 = vst.msk [vmem:[#allocation2 + $0x30] sm:$0x1] %vm8154_vm15, %v19495_v0 }
 0x3fa   : > { %17201 = vmatprep.mubr.msk.bf16.mxu1 %vm908_vm0, %v20570_v14  ;;  %v20640_v42 = vpack.c.bf16 %v3761_v45, %v3760_v51  ;;  %v20658_v32 = vpack.c.bf16 %v4263_v43, %v4262_v9  ;;  %v4265_v23 = vld [vmem:[#allocation2 + $0x52] sm:$0xff]  ;;  %v20670_v38 = vpack.c.bf16 %v4267_v33, %v4266_v27  ;;  %v4268_v39 = vld [vmem:[#allocation2 + $0x7a] sm:$0xff]  ;;  %v4269_v47 = vld [vmem:[#allocation2 + $0x82] sm:$0xff]  ;;  %8157 = vst.msk [vmem:[#allocation2 + $0x48] sm:$0x1] %vm8154_vm15, %v19495_v0 }
 0x3fb   : > { %v4270_v60 = vld [vmem:[#allocation2 + $0x92] sm:$0xff]  ;;  %v4271_v18 = vld [vmem:[#allocation2 + $0x9a] sm:$0xff]  ;;  %v20676_v55 = vpack.c.bf16 %v4269_v47, %v4268_v39  ;;  %v4272_v10 = vld [vmem:[#allocation2 + $0xaa] sm:$0xff]  ;;  %8158 = vst.msk [vmem:[#allocation2 + $0x60] sm:$0x1] %vm8154_vm15, %v19495_v0 }
 0x3fc   : > { %v3813_v34 = vld [vmem:[#allocation2 + $0x169] sm:$0xff]  ;;  %v20678_v62 = vpack.c.bf16 %v4271_v18, %v4270_v60  ;;  %v4273_v11 = vld [vmem:[#allocation2 + $0xb2] sm:$0xff]  ;;  %v4287_v27 = vld [vmem:[#allocation2 + $0x15a] sm:$0xff]  ;;  %8163 = vst.msk [vmem:[#allocation2 + $0x21] sm:$0x1] %vm8154_vm15, %v19495_v0 }
 0x3fd   : > { %v4274_v16 = vld [vmem:[#allocation2 + $0xc2] sm:$0xff]  ;;  %v4275_v22 = vld [vmem:[#allocation2 + $0xca] sm:$0xff]  ;;  %v20684_v45 = vpack.c.bf16 %v4273_v11, %v4272_v10  ;;  %v4278_v13 = vld [vmem:[#allocation2 + $0xf2] sm:$0xff]  ;;  %8160 = vst.msk [vmem:[#allocation2 + $0x90] sm:$0x1] %vm8154_vm15, %v19495_v0 }
 0x3fe   : > { %v3814_v35 = vld [vmem:[#allocation2 + $0x171] sm:$0xff]  ;;  %v20686_v31 = vpack.c.bf16 %v4275_v22, %v4274_v16  ;;  %v4277_v51 = vld [vmem:[#allocation2 + $0xe2] sm:$0xff]  ;;  %8161 = vst.msk [vmem:[#allocation2 + $0xa8] sm:$0x1] %vm8154_vm15, %v19495_v0  ;;  %8162 = vst.msk [vmem:[#allocation2 + $0xc0] sm:$0x1] %vm8154_vm15, %v19495_v0 }
 0x3ff   : > { %v20577_v49 = vpack.c.bf16 %v3814_v35, %v3813_v34  ;;  %v4259_v34 = vld [vmem:[#allocation2 + $0xa] sm:$0xff]  ;;  %v4289_v60 = vld [vmem:[#allocation2 + $0x172] sm:$0xff] }
 0x400   : > { %v3765_v35 = vld [vmem:[#allocation2 + $0x170] sm:$0xff]  ;;  %v4290_v50 = vpack.c.bf16 %v4259_v34, %v20450_v41  ;;  %v4279_v34 = vld [vmem:[#allocation2 + $0xfa] sm:$0xff] }
 0x401   : > { %17202 = vmatmul.mubr.msk.bf16.gmra.mrb[28].mxu1 %vm908_vm0, %v20577_v49  ;;  %v15705_v41 = vld [vmem:[%s23014_s27 + $0x10] sm:$0xf]  ;;  %v15722_v11 = vld [vmem:[%s23014_s27 + $0x14] sm:$0xf] }
 0x402   : > { %17207 = vmatprep.mubr.msk.bf16.mxu1 %vm908_vm0, %v3766_v37  ;;  %v3764_v37 = vld [vmem:[#allocation2 + $0x168] sm:$0xff]  ;;  %v4945_v10 = vsel %vm3881_vm5, %v15705_v41, 0  ;;  %v5239_v22 = vsel %vm3881_vm5, %v15722_v11, 0 }
 0x403   : > { %v20649_v57 = vpack.c.bf16 %v3765_v35, %v3764_v37  ;;  %v20693_v35 = vpack.c.bf16 %v4277_v51, %v20531_v48  ;;  %v20695_v37 = vpack.c.bf16 %v4279_v34, %v4278_v13  ;;  %v4283_v9 = vld [vmem:[#allocation2 + $0x12a] sm:$0xff]  ;;  %v4284_v48 = vld [vmem:[#allocation2 + $0x13a] sm:$0xff] }
 0x404   : > { %v4288_v47 = vld [vmem:[#allocation2 + $0x16a] sm:$0xff]  ;;  %v15739_v51 = vld [vmem:[%s23014_s27 + $0x18] sm:$0xf] }
 0x405   : > { %v20717_v18 = vpack.c.bf16 %v4289_v60, %v4288_v47  ;;  %v20771_v13 = vld [vmem:[#allocation2 + $0x39] sm:$0xff]  ;;  %v20773_v34 = vld [vmem:[#allocation2 + $0x51] sm:$0xff]  ;;  %v5740_v47 = vld [vmem:[#allocation2 + $0xc1] sm:$0xff] }
 0x406   : > { %8164 = vst.msk [vmem:[#allocation2 + $0x39] sm:$0x1] %vm8154_vm15, %v19495_v0  ;;  %8165 = vst.msk [vmem:[#allocation2 + $0x51] sm:$0x1] %vm8154_vm15, %v19495_v0 }
 0x409   : > { %17208 = vmatmul.mubr.msk.bf16.vlgmr.msra.gmra.mrb[0].mxu1 %vm908_vm0, %v20582_v59 }
 0x40a   : > { %17240 = vmatpush3.bf16.msra.mxu1 %v4357_v6  ;;  %17211 = vmatprep.mubr.msk.bf16.mxu1 %vm908_vm0, %v20586_v29  ;;  %v4261_v6 = vld [vmem:[#allocation2 + $0x22] sm:$0xff] }
 0x40b   : > { %18831 = vmatprep.subr.msk.bf16.mxu1 %vm3881_vm5, %v20591_v36  ;;  %v20654_v7 = vpack.c.bf16 %v4261_v6, %v4260_v58  ;;  %v20668_v36 = vpack.c.bf16 %v4265_v23, %v4264_v40  ;;  %v4281_v58 = vld [vmem:[#allocation2 + $0x112] sm:$0xff]  ;;  %v4282_v6 = vld [vmem:[#allocation2 + $0x122] sm:$0xff] }
 0x40c   : > { %v4285_v40 = vld [vmem:[#allocation2 + $0x142] sm:$0xff]  ;;  %v4286_v23 = vld [vmem:[#allocation2 + $0x152] sm:$0xff] }
 0x40d   : > { %v20709_v33 = vpack.c.bf16 %v4285_v40, %v4284_v48  ;;  %v20711_v39 = vpack.c.bf16 %v4287_v27, %v4286_v23  ;;  %v15773_v40 = vld [vmem:[%s23014_s27 + $0x20] sm:$0xf]  ;;  %v5738_v23 = vld [vmem:[#allocation2 + $0xa9] sm:$0xff] }
 0x411   : > { %17212 = vmatmul.mubr.msk.bf16.gmra.mrb[4].mxu1 %vm908_vm0, %v20599_v20 }
 0x412   : > { %17215 = vmatprep.mubr.msk.bf16.mxu1 %vm908_vm0, %v20601_v21 }
 0x419   : > { %17216 = vmatmul.mubr.msk.bf16.gmra.mrb[8].mxu1 %vm908_vm0, %v20607_v28 }
 0x41a   : > { %17219 = vmatprep.mubr.msk.bf16.mxu1 %vm908_vm0, %v20609_v30 }
 0x421   : > { %17220 = vmatmul.mubr.msk.bf16.gmra.mrb[12].mxu1 %vm908_vm0, %v20615_v53 }
 0x422   : > { %17223 = vmatprep.mubr.msk.bf16.mxu1 %vm908_vm0, %v20617_v8 }
 0x429   : > { %17224 = vmatmul.mubr.msk.bf16.gmra.mrb[16].mxu1 %vm908_vm0, %v20624_v61 }
 0x42a   : > { %17227 = vmatprep.mubr.msk.bf16.mxu1 %vm908_vm0, %v20626_v4 }
 0x431   : > { %17228 = vmatmul.mubr.msk.bf16.gmra.mrb[20].mxu1 %vm908_vm0, %v20632_v17 }
 0x432   : > { %17231 = vmatprep.mubr.msk.bf16.mxu1 %vm908_vm0, %v20634_v26 }
 0x439   : > { %17232 = vmatmul.mubr.msk.bf16.gmra.mrb[24].mxu1 %vm908_vm0, %v20640_v42 }
 0x43a   : > { %17235 = vmatprep.mubr.msk.bf16.mxu1 %vm908_vm0, %v20642_v25 }
 0x441   : > { %17236 = vmatmul.mubr.msk.bf16.gmra.mrb[28].mxu1 %vm908_vm0, %v20649_v57 }
 0x442   : > { %17241 = vmatprep.mubr.msk.bf16.mxu1 %vm908_vm0, %v4290_v50  ;;  %v4280_v50 = vld [vmem:[#allocation2 + $0x10a] sm:$0xff] }
 0x443   : > { %v20701_v43 = vpack.c.bf16 %v4281_v58, %v4280_v50  ;;  %v20777_v50 = vld [vmem:[#allocation2 + $0x81] sm:$0xff]  ;;  %v20781_v58 = vld [vmem:[#allocation2 + $0x99] sm:$0xff] }
 0x444   : > { %8167 = vst.msk [vmem:[#allocation2 + $0x81] sm:$0x1] %vm8154_vm15, %v19495_v0  ;;  %8168 = vst.msk [vmem:[#allocation2 + $0x99] sm:$0x1] %vm8154_vm15, %v19495_v0 }
 0x449   : > { %17242 = vmatmul.mubr.msk.bf16.vlgmr.msra.gmra.mrb[0].mxu1 %vm908_vm0, %v20654_v7 }
 0x44a   : > { %17274 = vmatpush3.bf16.msra.mxu1 %v4651_v19  ;;  %17245 = vmatprep.mubr.msk.bf16.mxu1 %vm908_vm0, %v20658_v32  ;;  %v20703_v19 = vpack.c.bf16 %v4283_v9, %v4282_v6  ;;  %v20785_v6 = vld [vmem:[#allocation2 + $0xc9] sm:$0xff] }
 0x44b   : > { %18832 = vmatprep.subr.msk.bf16.mxu1 %vm3881_vm5, %v15705_v41  ;;  %v4582_v41 = vld [vmem:[#allocation2 + $0x180] sm:$0xff]  ;;  %8170 = vst.msk [vmem:[#allocation2 + $0xc9] sm:$0x1] %vm8154_vm15, %v19495_v0  ;;  %v5766_v60 = vpack.c.bf16 %v20785_v6, %v5740_v47 }
 0x451   : > { %17246 = vmatmul.mubr.msk.bf16.gmra.mrb[4].mxu1 %vm908_vm0, %v20668_v36 }
 0x452   : > { %17249 = vmatprep.mubr.msk.bf16.mxu1 %vm908_vm0, %v20670_v38 }
 0x459   : > { %17250 = vmatmul.mubr.msk.bf16.gmra.mrb[8].mxu1 %vm908_vm0, %v20676_v55 }
 0x45a   : > { %17253 = vmatprep.mubr.msk.bf16.mxu1 %vm908_vm0, %v20678_v62 }
 0x461   : > { %17254 = vmatmul.mubr.msk.bf16.gmra.mrb[12].mxu1 %vm908_vm0, %v20684_v45 }
 0x462   : > { %17257 = vmatprep.mubr.msk.bf16.mxu1 %vm908_vm0, %v20686_v31 }
 0x469   : > { %17258 = vmatmul.mubr.msk.bf16.gmra.mrb[16].mxu1 %vm908_vm0, %v20693_v35 }
 0x46a   : > { %17261 = vmatprep.mubr.msk.bf16.mxu1 %vm908_vm0, %v20695_v37 }
 0x471   : > { %17262 = vmatmul.mubr.msk.bf16.gmra.mrb[20].mxu1 %vm908_vm0, %v20701_v43 }
 0x472   : > { %17265 = vmatprep.mubr.msk.bf16.mxu1 %vm908_vm0, %v20703_v19 }
 0x479   : > { %17266 = vmatmul.mubr.msk.bf16.gmra.mrb[24].mxu1 %vm908_vm0, %v20709_v33 }
 0x47a   : > { %17269 = vmatprep.mubr.msk.bf16.mxu1 %vm908_vm0, %v20711_v39 }
 0x481   : > { %17270 = vmatmul.mubr.msk.bf16.gmra.mrb[28].mxu1 %vm908_vm0, %v20717_v18 }
 0x482   : > { %17275 = vmatprep.mubr.msk.bf16.mxu1 %vm908_vm0, %v20582_v59  ;;  %v4583_v59 = vld [vmem:[#allocation2 + $0x188] sm:$0xff] }
 0x483   : > { %v20756_v16 = vpack.c.bf16 %v4583_v59, %v4582_v41 }
 0x489   : > { %17276 = vmatmul.mubr.msk.bf16.vlgmr.msra.gmra.mrb[0].mxu1 %vm908_vm0, %v20586_v29 }
 0x48a   : > { %17308 = vmatpush3.bf16.msra.mxu1 %v4945_v10  ;;  %17279 = vmatprep.mubr.msk.bf16.mxu1 %vm908_vm0, %v20599_v20 }
 0x48b   : > { %18833 = vmatprep.subr.msk.bf16.mxu1 %vm3881_vm5, %v15722_v11 }
 0x491   : > { %17280 = vmatmul.mubr.msk.bf16.gmra.mrb[4].mxu1 %vm908_vm0, %v20601_v21 }
 0x492   : > { %17283 = vmatprep.mubr.msk.bf16.mxu1 %vm908_vm0, %v20607_v28 }
 0x499   : > { %17284 = vmatmul.mubr.msk.bf16.gmra.mrb[8].mxu1 %vm908_vm0, %v20609_v30 }
 0x49a   : > { %17287 = vmatprep.mubr.msk.bf16.mxu1 %vm908_vm0, %v20615_v53 }
 0x4a1   : > { %17288 = vmatmul.mubr.msk.bf16.gmra.mrb[12].mxu1 %vm908_vm0, %v20617_v8 }
 0x4a2   : > { %17291 = vmatprep.mubr.msk.bf16.mxu1 %vm908_vm0, %v20624_v61 }
 0x4a9   : > { %17292 = vmatmul.mubr.msk.bf16.gmra.mrb[16].mxu1 %vm908_vm0, %v20626_v4 }
 0x4aa   : > { %17295 = vmatprep.mubr.msk.bf16.mxu1 %vm908_vm0, %v20632_v17 }
 0x4b1   : > { %17296 = vmatmul.mubr.msk.bf16.gmra.mrb[20].mxu1 %vm908_vm0, %v20634_v26 }
 0x4b2   : > { %17299 = vmatprep.mubr.msk.bf16.mxu1 %vm908_vm0, %v20640_v42 }
 0x4b9   : > { %17300 = vmatmul.mubr.msk.bf16.gmra.mrb[24].mxu1 %vm908_vm0, %v20642_v25 }
 0x4ba   : > { %17303 = vmatprep.mubr.msk.bf16.mxu1 %vm908_vm0, %v20649_v57 }
 0x4c1   : > { %17304 = vmatmul.mubr.msk.bf16.gmra.mrb[28].mxu1 %vm908_vm0, %v20756_v16 }
 0x4c2   : > { %17309 = vmatprep.mubr.msk.bf16.mxu1 %vm908_vm0, %v20459_v46  ;;  %v20775_v46 = vld [vmem:[#allocation2 + $0x69] sm:$0xff] }
 0x4c3   : > { %8166 = vst.msk [vmem:[#allocation2 + $0x69] sm:$0x1] %vm8154_vm15, %v19495_v0 }
 0x4c9   : > { %17310 = vmatmul.mubr.msk.bf16.vlgmr.msra.gmra.mrb[0].mxu1 %vm908_vm0, %v20463_v63  ;;  %v20783_v63 = vld [vmem:[#allocation2 + $0xb1] sm:$0xff] }
 0x4ca   : > { %17342 = vmatpush3.bf16.msra.mxu1 %v5239_v22  ;;  %17313 = vmatprep.mubr.msk.bf16.mxu1 %vm908_vm0, %v20483_v1  ;;  %8169 = vst.msk [vmem:[#allocation2 + $0xb1] sm:$0x1] %vm8154_vm15, %v19495_v0  ;;  %v4877_v1 = vld [vmem:[#allocation2 + $0x189] sm:$0xff]  ;;  %v5765_v27 = vpack.c.bf16 %v20783_v63, %v5738_v23 }
 0x4cb   : > { %18834 = vmatprep.subr.msk.bf16.mxu1 %vm3881_vm5, %v15739_v51 }
 0x4d1   : > { %17314 = vmatmul.mubr.msk.bf16.gmra.mrb[4].mxu1 %vm908_vm0, %v20486_v24  ;;  %v4876_v24 = vld [vmem:[#allocation2 + $0x181] sm:$0xff] }
 0x4d2   : > { %17317 = vmatprep.mubr.msk.bf16.mxu1 %vm908_vm0, %v20499_v12  ;;  %v20841_v12 = vpack.c.bf16 %v4877_v1, %v4876_v24 }
 0x4d9   : > { %17318 = vmatmul.mubr.msk.bf16.gmra.mrb[8].mxu1 %vm908_vm0, %v20502_v44  ;;  %v5533_v44 = vsel %vm3881_vm5, %v15739_v51, 0 }
 0x4da   : > { %17321 = vmatprep.mubr.msk.bf16.mxu1 %vm908_vm0, %v20515_v56  ;;  %v15756_v56 = vld [vmem:[%s23014_s27 + $0x1c] sm:$0xf] }
 0x4db   : > { %v5827_v48 = vsel %vm3881_vm5, %v15756_v56, 0 }
 0x4e1   : > { %17322 = vmatmul.mubr.msk.bf16.gmra.mrb[12].mxu1 %vm908_vm0, %v20518_v5  ;;  %v5170_v5 = vld [vmem:[#allocation2 + $0x182] sm:$0xff] }
 0x4e2   : > { %17325 = vmatprep.mubr.msk.bf16.mxu1 %vm908_vm0, %v20535_v54 }
 0x4e9   : > { %17326 = vmatmul.mubr.msk.bf16.gmra.mrb[16].mxu1 %vm908_vm0, %v20540_v3 }
 0x4ea   : > { %17329 = vmatprep.mubr.msk.bf16.mxu1 %vm908_vm0, %v20553_v52 }
 0x4f1   : > { %17330 = vmatmul.mubr.msk.bf16.gmra.mrb[20].mxu1 %vm908_vm0, %v20556_v15 }
 0x4f2   : > { %17333 = vmatprep.mubr.msk.bf16.mxu1 %vm908_vm0, %v20568_v2 }
 0x4f9   : > { %17334 = vmatmul.mubr.msk.bf16.gmra.mrb[24].mxu1 %vm908_vm0, %v20570_v14 }
 0x4fa   : > { %17337 = vmatprep.mubr.msk.bf16.mxu1 %vm908_vm0, %v20577_v49 }
 0x501   : > { %17338 = vmatmul.mubr.msk.bf16.gmra.mrb[28].mxu1 %vm908_vm0, %v20841_v12 }
 0x502   : > { %17343 = vmatprep.mubr.msk.bf16.mxu1 %vm908_vm0, %v20654_v7  ;;  %v5171_v7 = vld [vmem:[#allocation2 + $0x18a] sm:$0xff] }
 0x503   : > { %v20880_v9 = vpack.c.bf16 %v5171_v7, %v5170_v5 }
 0x509   : > { %17344 = vmatmul.mubr.msk.bf16.vlgmr.msra.gmra.mrb[0].mxu1 %vm908_vm0, %v20658_v32 }
 0x50a   : > { %17376 = vmatpush3.bf16.msra.mxu1 %v5533_v44  ;;  %17347 = vmatprep.mubr.msk.bf16.mxu1 %vm908_vm0, %v20668_v36 }
 0x50b   : > { %18835 = vmatprep.subr.msk.bf16.mxu1 %vm3881_vm5, %v15756_v56 }
 0x511   : > { %17348 = vmatmul.mubr.msk.bf16.gmra.mrb[4].mxu1 %vm908_vm0, %v20670_v38 }
 0x512   : > { %17351 = vmatprep.mubr.msk.bf16.mxu1 %vm908_vm0, %v20676_v55 }
 0x519   : > { %17352 = vmatmul.mubr.msk.bf16.gmra.mrb[8].mxu1 %vm908_vm0, %v20678_v62 }
 0x51a   : > { %17355 = vmatprep.mubr.msk.bf16.mxu1 %vm908_vm0, %v20684_v45 }
 0x521   : > { %17356 = vmatmul.mubr.msk.bf16.gmra.mrb[12].mxu1 %vm908_vm0, %v20686_v31 }
 0x522   : > { %17359 = vmatprep.mubr.msk.bf16.mxu1 %vm908_vm0, %v20693_v35 }
 0x529   : > { %17360 = vmatmul.mubr.msk.bf16.gmra.mrb[16].mxu1 %vm908_vm0, %v20695_v37 }
 0x52a   : > { %17363 = vmatprep.mubr.msk.bf16.mxu1 %vm908_vm0, %v20701_v43 }
 0x531   : > { %17364 = vmatmul.mubr.msk.bf16.gmra.mrb[20].mxu1 %vm908_vm0, %v20703_v19 }
 0x532   : > { %17367 = vmatprep.mubr.msk.bf16.mxu1 %vm908_vm0, %v20709_v33 }
 0x539   : > { %17368 = vmatmul.mubr.msk.bf16.gmra.mrb[24].mxu1 %vm908_vm0, %v20711_v39 }
 0x53a   : > { %17371 = vmatprep.mubr.msk.bf16.mxu1 %vm908_vm0, %v20717_v18 }
 0x541   : > { %17372 = vmatmul.mubr.msk.bf16.gmra.mrb[28].mxu1 %vm908_vm0, %v20880_v9 }
 0x542   : > { %17377 = vmatprep.mubr.msk.bf16.mxu1 %vm908_vm0, %v20586_v29  ;;  %v5464_v29 = vld [vmem:[#allocation2 + $0x198] sm:$0xff] }
 0x549   : > { %17378 = vmatmul.mubr.msk.bf16.vlgmr.msra.gmra.mrb[0].mxu1 %vm908_vm0, %v20599_v20  ;;  %v5465_v20 = vld [vmem:[#allocation2 + $0x1a0] sm:$0xff] }
 0x54a   : > { %17410 = vmatpush3.bf16.msra.mxu1 %v5827_v48  ;;  %17381 = vmatprep.mubr.msk.bf16.mxu1 %vm908_vm0, %v20601_v21  ;;  %v5481_v21 = vpack.c.bf16 %v5465_v20, %v5464_v29 }
 0x54b   : > { %18836 = vmatprep.subr.msk.bf16.mxu1 %vm3881_vm5, %v15773_v40 }
 0x551   : > { %17382 = vmatmul.mubr.msk.bf16.gmra.mrb[4].mxu1 %vm908_vm0, %v20607_v28  ;;  %v5728_v28 = vld [vmem:[#allocation2 + $0x31] sm:$0xff] }
 0x552   : > { %17385 = vmatprep.mubr.msk.bf16.mxu1 %vm908_vm0, %v20609_v30  ;;  %v5760_v30 = vpack.c.bf16 %v20771_v13, %v5728_v28 }
 0x559   : > { %17386 = vmatmul.mubr.msk.bf16.gmra.mrb[8].mxu1 %vm908_vm0, %v20615_v53  ;;  %v5730_v53 = vld [vmem:[#allocation2 + $0x49] sm:$0xff] }
 0x55a   : > { %17389 = vmatprep.mubr.msk.bf16.mxu1 %vm908_vm0, %v20617_v8  ;;  %v5761_v8 = vpack.c.bf16 %v20773_v34, %v5730_v53 }
 0x561   : > { %17390 = vmatmul.mubr.msk.bf16.gmra.mrb[12].mxu1 %vm908_vm0, %v20624_v61  ;;  %v6121_v61 = vsel %vm3881_vm5, %v15773_v40, 0 }
 0x562   : > { %17393 = vmatprep.mubr.msk.bf16.mxu1 %vm908_vm0, %v20626_v4  ;;  %v5732_v4 = vld [vmem:[#allocation2 + $0x61] sm:$0xff] }
 0x569   : > { %17394 = vmatmul.mubr.msk.bf16.gmra.mrb[16].mxu1 %vm908_vm0, %v20632_v17  ;;  %v5762_v17 = vpack.c.bf16 %v20775_v46, %v5732_v4 }
 0x56a   : > { %17397 = vmatprep.mubr.msk.bf16.mxu1 %vm908_vm0, %v20634_v26  ;;  %v5734_v26 = vld [vmem:[#allocation2 + $0x79] sm:$0xff] }
 0x571   : > { %17398 = vmatmul.mubr.msk.bf16.gmra.mrb[20].mxu1 %vm908_vm0, %v20640_v42  ;;  %v5763_v42 = vpack.c.bf16 %v20777_v50, %v5734_v26 }
 0x572   : > { %17401 = vmatprep.mubr.msk.bf16.mxu1 %vm908_vm0, %v20642_v25  ;;  %v5736_v25 = vld [vmem:[#allocation2 + $0x91] sm:$0xff] }
 0x579   : > { %17402 = vmatmul.mubr.msk.bf16.gmra.mrb[24].mxu1 %vm908_vm0, %v20649_v57  ;;  %v5764_v57 = vpack.c.bf16 %v20781_v58, %v5736_v25 }
 0x57a   : > { %17405 = vmatprep.mubr.msk.bf16.mxu1 %vm908_vm0, %v20756_v16 }
 0x581   : > { %17406 = vmatmul.mubr.msk.bf16.gmra.mrb[28].mxu1 %vm908_vm0, %v5481_v21 }
 0x582   : > { %17411 = vmatprep.mubr.msk.bf16.mxu1 %vm908_vm0, %v5760_v30 }
 0x589   : > { %17412 = vmatmul.mubr.msk.bf16.vlgmr.msra.gmra.mrb[0].mxu1 %vm908_vm0, %v5761_v8 }
 0x58a   : > { %17444 = vmatpush3.bf16.msra.mxu1 %v6121_v61  ;;  %17415 = vmatprep.mubr.msk.bf16.mxu1 %vm908_vm0, %v5762_v17 }
 0x591   : > { %17416 = vmatmul.mubr.msk.bf16.gmra.mrb[4].mxu1 %vm908_vm0, %v5763_v42 }
 0x592   : > { %17419 = vmatprep.mubr.msk.bf16.mxu1 %vm908_vm0, %v5764_v57 }
 0x599   : > { %17420 = vmatmul.mubr.msk.bf16.gmra.mrb[8].mxu1 %vm908_vm0, %v5765_v27 }
 0x59a   : > { %17423 = vmatprep.mubr.msk.bf16.mxu1 %vm908_vm0, %v5766_v60 }
 0x5a1   : > { %17424 = vmatmul.mubr.msk.bf16.gmra.mrb[12].mxu1 %vm908_vm0, %v20535_v54  ;;  %v5758_v54 = vld [vmem:[#allocation2 + $0x199] sm:$0xff] }
 0x5a2   : > { %17427 = vmatprep.mubr.msk.bf16.mxu1 %vm908_vm0, %v20540_v3  ;;  %v5759_v3 = vld [vmem:[#allocation2 + $0x1a1] sm:$0xff] }
 0x5a3   : > { %v5775_v10 = vpack.c.bf16 %v5759_v3, %v5758_v54 }
 0x5a9   : > { %17428 = vmatmul.mubr.msk.bf16.gmra.mrb[16].mxu1 %vm908_vm0, %v20553_v52  ;;  %v6052_v52 = vld [vmem:[#allocation2 + $0x19a] sm:$0xff] }
 0x5aa   : > { %17431 = vmatprep.mubr.msk.bf16.mxu1 %vm908_vm0, %v20556_v15  ;;  %v6053_v15 = vld [vmem:[#allocation2 + $0x1a2] sm:$0xff] }
 0x5b1   : > { %17432 = vmatmul.mubr.msk.bf16.gmra.mrb[20].mxu1 %vm908_vm0, %v20568_v2  ;;  %v6069_v2 = vpack.c.bf16 %v6053_v15, %v6052_v52 }
 0x5b2   : > { %17435 = vmatprep.mubr.msk.bf16.mxu1 %vm908_vm0, %v20570_v14  ;;  %v8340_v14 = vld [vmem:[#allocation3 + $0x4] sm:$0xf] }
 0x5b3   : > { %18837 = vmatprep.subr.msk.bf16.mxu0 %vm3881_vm5, %v8340_v14  ;;  %v8354_v22 = vsel %vm3881_vm5, %v8340_v14, 0 }
 0x5b4   : > { %17478 = vmatpush3.bf16.msra.mxu0 %v8354_v22 }
 0x5b9   : > { %17436 = vmatmul.mubr.msk.bf16.gmra.mrb[24].mxu1 %vm908_vm0, %v20577_v49  ;;  %v19496_v49 = vmov 1983009808  }
 0x5ba   : > { %17439 = vmatprep.mubr.msk.bf16.mxu1 %vm908_vm0, %v20841_v12 }
 0x5c1   : > { %17440 = vmatmul.mubr.msk.bf16.gmra.mrb[28].mxu1 %vm908_vm0, %v5775_v10 }
 0x5c2   : > { %17445 = vmatprep.mubr.msk.bf16.mxu1 %vm908_vm0, %v20658_v32  ;;  %v6517_v32 = vunpack.c.l.s4 %v19496_v49 }
 0x5c9   : > { %17446 = vmatmul.mubr.msk.bf16.vlgmr.msra.gmra.mrb[0].mxu1 %vm908_vm0, %v20668_v36  ;;  %v6519_v36 = vlaneseq }
 0x5ca   : > { %17449 = vmatprep.mubr.msk.bf16.mxu1 %vm908_vm0, %v20670_v38  ;;  %v20987_v38 = vld [vmem:[%s23016_s30] ss:$0 sm:$0xff]  ;;  %s15478_s30 = sshll.u32 %s21906_s26, 6 }
 0x5cb   : > { %s21917_s13 = scalar_lea.vmem [#allocation12], %s15478_s30  ;;  %s23022_s30 = sld [smem:[#allocation44_spill]] }
 0x5d1   : > { %17450 = vmatmul.mubr.msk.bf16.gmra.mrb[4].mxu1 %vm908_vm0, %v20676_v55  ;;  %v6518_v55 = vunpack.c.0.s8 %v6517_v32 }
 0x5d2   : > { %17453 = vmatprep.mubr.msk.bf16.mxu1 %vm908_vm0, %v20678_v62  ;;  %v6520_v62 = vshrl.u32 %v6519_v36, 7 }
 0x5d9   : > { %17454 = vmatmul.mubr.msk.bf16.gmra.mrb[8].mxu1 %vm908_vm0, %v20684_v45 }
 0x5da   : > { %17457 = vmatprep.mubr.msk.bf16.mxu1 %vm908_vm0, %v20686_v31 }
 0x5e1   : > { %17458 = vmatmul.mubr.msk.bf16.gmra.mrb[12].mxu1 %vm908_vm0, %v20693_v35 }
 0x5e2   : > { %17461 = vmatprep.mubr.msk.bf16.mxu1 %vm908_vm0, %v20695_v37  ;;  %v20990_v37 = vsub.s32 %v6518_v55, %v6520_v62 }
 0x5e9   : > { %17462 = vmatmul.mubr.msk.bf16.gmra.mrb[16].mxu1 %vm908_vm0, %v20701_v43 }
 0x5ea   : > { %17465 = vmatprep.mubr.msk.bf16.mxu1 %vm908_vm0, %v20703_v19 }
 0x5f1   : > { %17466 = vmatmul.mubr.msk.bf16.gmra.mrb[20].mxu1 %vm908_vm0, %v20709_v33 }
 0x5f2   : > { %17469 = vmatprep.mubr.msk.bf16.mxu1 %vm908_vm0, %v20711_v39 }
 0x5f9   : > { %17470 = vmatmul.mubr.msk.bf16.gmra.mrb[24].mxu1 %vm908_vm0, %v20717_v18 }
 0x5fa   : > { %17473 = vmatprep.mubr.msk.bf16.mxu1 %vm908_vm0, %v20880_v9 }
 0x601   : > { %17474 = vmatmul.mubr.msk.bf16.gmra.mrb[28].mxu1 %vm908_vm0, %v6069_v2 }
 0x69c   : > { %v17447_v45 = vpop.f32.mrb[0].mxu1 }
 0x69d   : > { %v6325_v31 = vadd.f32 %v17447_v45, %v20987_v38  ;;  %v6157_v35 = vpop.f32.mrb[1].mxu1 }
 0x69e   : > { %v6323_v43 = vadd.f32 %v20987_v38, %v6157_v35  ;;  %v17448_v19 = vpop.f32.mrb[2].mxu1 }
 0x69f   : > { %vm6357_vm2 = vcmp.gt.f32.partialorder %v6325_v31, 0.0  ;;  %v6389_v33 = vmul.f32 0.01, %v6325_v31  ;;  %v6326_v39 = vadd.f32 %v17448_v19, %v20987_v38  ;;  %v6160_v18 = vpop.f32.mrb[3].mxu1 }
 0x6a0   : > { %vm6355_vm3 = vcmp.gt.f32.partialorder %v6323_v43, 0.0  ;;  %v6387_v11 = vmul.f32 0.01, %v6323_v43  ;;  %v21002_v59 = vadd.f32 %v20987_v38, %v6160_v18 }
 0x6a1   : > { %v6421_v41 = vsel %vm6357_vm2, %v6325_v31, %v6389_v33  ;;  %vm6358_vm4 = vcmp.gt.f32.partialorder %v6326_v39, 0.0  ;;  %v6390_v16 = vmul.f32 0.01, %v6326_v39 }
 0x6a2   : > { %6453 = vst.msk [vmem:[%s20998_s23 + $0x10] sm:$0xff] %vm908_vm0, %v6421_v41  ;;  %v6549_v51 = vcombine.high %v6421_v41, %v6421_v41  ;;  %v6556_v13 = vrot.slane %v6421_v41, %v20990_v37  ;;  %v6419_v34 = vsel %vm6355_vm3, %v6323_v43, %v6387_v11  ;;  %v21014_v63 = vmul.f32 0.01, %v21002_v59 }
 0x6a3   : > { %6451 = vst.msk [vmem:[%s20998_s23] sm:$0xff] %vm908_vm0, %v6419_v34  ;;  %v6515_v46 = vcombine.high %v6419_v34, %v6419_v34  ;;  %v6522_v50 = vrot.slane %v6419_v34, %v20990_v37  ;;  %v21011_v58 = vsel %vm6358_vm4, %v6326_v39, %v6390_v16  ;;  %vm6356_vm6 = vcmp.gt.f32.partialorder %v21002_v59, 0.0 }
 0x6a4   : > { %v6563_v6 = vrot.slane %v6549_v51, %v20990_v37  ;;  %v6564_v1 = vcombine.high %v6556_v13, %v6556_v13  ;;  %v7243_v24 = vsel %vm911_vm1, %v6556_v13, -inf  ;;  %6454 = vst.msk [vmem:[%s20998_s23 + $0x18] sm:$0xff] %vm908_vm0, %v21011_v58  ;;  %v6566_v12 = vcombine.high %v21011_v58, %v21011_v58  ;;  %v21023_v44 = vpop.f32.mrb[4].mxu1 }
 0x6a5   : > { %v7244_v56 = vrot.slane %v7243_v24, 4  ;;  %v6529_v5 = vrot.slane %v6515_v46, %v20990_v37  ;;  %v6530_v7 = vcombine.high %v6522_v50, %v6522_v50  ;;  %v7187_v9 = vsel %vm911_vm1, %v6522_v50, -inf  ;;  %v21027_v48 = vpop.f32.mrb[5].mxu1 }
 0x6a6   : > { %v6565_v40 = vcombine.high %v6563_v6, %v6563_v6  ;;  %v7250_v29 = vsel %vm911_vm1, %v6564_v1, -inf  ;;  %v7257_v20 = vsel %vm911_vm1, %v6563_v6, -inf  ;;  %v7188_v21 = vrot.slane %v7187_v9, 4  ;;  %v21031_v28 = vpop.f32.mrb[6].mxu1 }
 0x6a7   : > { %v7245_v30 = vmax.f32 %v7243_v24, %v7244_v56  ;;  %v7251_v53 = vrot.slane %v7250_v29, 4  ;;  %v7258_v8 = vrot.slane %v7257_v20, 4  ;;  %v6531_v61 = vcombine.high %v6529_v5, %v6529_v5  ;;  %v21033_v4 = vpop.f32.mrb[7].mxu1 }
 0x6a8   : > { %v7264_v17 = vsel %vm911_vm1, %v6565_v40, -inf  ;;  %v7189_v26 = vmax.f32 %v7187_v9, %v7188_v21  ;;  %v7194_v42 = vsel %vm911_vm1, %v6530_v7, -inf  ;;  %v7201_v25 = vsel %vm911_vm1, %v6529_v5, -inf }
 0x6a9   : > { %v7246_v57 = vrot.slane %v7245_v30, 2  ;;  %v7252_v23 = vmax.f32 %v7250_v29, %v7251_v53  ;;  %v7259_v27 = vmax.f32 %v7257_v20, %v7258_v8  ;;  %v7265_v47 = vrot.slane %v7264_v17, 4 }
 0x6aa   : > { %v7190_v60 = vrot.slane %v7189_v26, 2  ;;  %v7195_v54 = vrot.slane %v7194_v42, 4  ;;  %v7202_v3 = vrot.slane %v7201_v25, 4  ;;  %v7208_v10 = vsel %vm911_vm1, %v6531_v61, -inf }
 0x6ab   : > { %v7247_v52 = vmax.f32 %v7245_v30, %v7246_v57  ;;  %v7253_v15 = vrot.slane %v7252_v23, 2  ;;  %v7260_v2 = vrot.slane %v7259_v27, 2  ;;  %v7266_v14 = vmax.f32 %v7264_v17, %v7265_v47 }
 0x6ac   : > { %v7191_v49 = vmax.f32 %v7189_v26, %v7190_v60  ;;  %v7196_v32 = vmax.f32 %v7194_v42, %v7195_v54  ;;  %v7203_v36 = vmax.f32 %v7201_v25, %v7202_v3  ;;  %v7209_v55 = vrot.slane %v7208_v10, 4  ;;  %v21040_v62 = vpop.f32.mrb[8].mxu1 }
 0x6ad   : > { %v7248_v45 = vrot.slane %v7247_v52, 1  ;;  %v7254_v31 = vmax.f32 %v7252_v23, %v7253_v15  ;;  %v7261_v35 = vmax.f32 %v7259_v27, %v7260_v2  ;;  %v7267_v43 = vrot.slane %v7266_v14, 2  ;;  %v21042_v19 = vpop.f32.mrb[9].mxu1 }
 0x6ae   : > { %v7192_v33 = vrot.slane %v7191_v49, 1  ;;  %v7197_v39 = vrot.slane %v7196_v32, 2  ;;  %v7204_v18 = vrot.slane %v7203_v36, 2  ;;  %v7210_v11 = vmax.f32 %v7208_v10, %v7209_v55  ;;  %v21044_v41 = vpop.f32.mrb[10].mxu1 }
 0x6af   : > { %v7249_v16 = vmax.f32 %v7247_v52, %v7248_v45  ;;  %v7255_v22 = vrot.slane %v7254_v31, 1  ;;  %v7262_v51 = vrot.slane %v7261_v35, 1  ;;  %v7268_v13 = vmax.f32 %v7266_v14, %v7267_v43  ;;  %v21046_v34 = vpop.f32.mrb[11].mxu1 }
 0x6b0   : > { %v7193_v46 = vmax.f32 %v7191_v49, %v7192_v33  ;;  %v7198_v50 = vmax.f32 %v7196_v32, %v7197_v39  ;;  %v7205_v6 = vmax.f32 %v7203_v36, %v7204_v18  ;;  %v7211_v1 = vrot.slane %v7210_v11, 2 }
 0x6b1   : > { %v7256_v24 = vmax.f32 %v7254_v31, %v7255_v22  ;;  %v7263_v56 = vmax.f32 %v7261_v35, %v7262_v51  ;;  %v7269_v5 = vrot.slane %v7268_v13, 1  ;;  %v6573_v7 = vrot.slane %v21011_v58, %v20990_v37 }
 0x6b2   : > { %v7199_v9 = vrot.slane %v7198_v50, 1  ;;  %v7206_v40 = vrot.slane %v7205_v6, 1  ;;  %v7212_v29 = vmax.f32 %v7210_v11, %v7211_v1  ;;  %v8083_v20 = vmax.f32 %v7193_v46, %v7249_v16 }
 0x6b3   : > { %v7270_v21 = vmax.f32 %v7268_v13, %v7269_v5  ;;  %v6580_v30 = vrot.slane %v6566_v12, %v20990_v37  ;;  %v6581_v53 = vcombine.high %v6573_v7, %v6573_v7  ;;  %v7271_v8 = vsel %vm911_vm1, %v6573_v7, -inf }
 0x6b4   : > { %v7200_v61 = vmax.f32 %v7198_v50, %v7199_v9  ;;  %v7207_v17 = vmax.f32 %v7205_v6, %v7206_v40  ;;  %v7213_v26 = vrot.slane %v7212_v29, 1  ;;  %v7272_v42 = vrot.slane %v7271_v8, 4  ;;  %v21055_v25 = vpop.f32.mrb[12].mxu1 }
 0x6b5   : > { %v6582_v57 = vcombine.high %v6580_v30, %v6580_v30  ;;  %v7278_v23 = vsel %vm911_vm1, %v6581_v53, -inf  ;;  %v7285_v27 = vsel %vm911_vm1, %v6580_v30, -inf  ;;  %v6420_v58 = vsel %vm6356_vm6, %v21002_v59, %v21014_v63  ;;  %v21063_v12 = vpop.f32.mrb[13].mxu1 }
 0x6b6   : > { %v7214_v47 = vmax.f32 %v7212_v29, %v7213_v26  ;;  %v8084_v60 = vmax.f32 %v7200_v61, %v7256_v24  ;;  %v8085_v54 = vmax.f32 %v7207_v17, %v7263_v56  ;;  %v7273_v3 = vmax.f32 %v7271_v8, %v7272_v42  ;;  %6452 = vst.msk [vmem:[%s20998_s23 + $0x8] sm:$0xff] %vm908_vm0, %v6420_v58  ;;  %v21067_v10 = vpop.f32.mrb[14].mxu1 }
 0x6b7   : > { %v7279_v52 = vrot.slane %v7278_v23, 4  ;;  %v7286_v15 = vrot.slane %v7285_v27, 4  ;;  %v7292_v2 = vsel %vm911_vm1, %v6582_v57, -inf  ;;  %v6532_v14 = vcombine.high %v6420_v58, %v6420_v58  ;;  %v21070_v49 = vpop.f32.mrb[15].mxu1 }
 0x6b8   : > { %v8086_v32 = vmax.f32 %v7214_v47, %v7270_v21  ;;  %v8236_v59 = vsel %vm8235_vm7, %v8084_v60, %v8083_v20  ;;  %v7274_v63 = vrot.slane %v7273_v3, 2  ;;  %v7293_v36 = vrot.slane %v7292_v2, 4 }
 0x6b9   : > { %v8238_v55 = vsel %vm8237_vm8, %v8085_v54, %v8236_v59  ;;  %v7280_v45 = vmax.f32 %v7278_v23, %v7279_v52  ;;  %v7287_v31 = vmax.f32 %v7285_v27, %v7286_v15  ;;  %v6539_v35 = vrot.slane %v6420_v58, %v20990_v37 }
 0x6ba   : > { %v7275_v43 = vmax.f32 %v7273_v3, %v7274_v63  ;;  %v7294_v33 = vmax.f32 %v7292_v2, %v7293_v36  ;;  %v6546_v39 = vrot.slane %v6532_v14, %v20990_v37  ;;  %v21077_v18 = vsel %vm8239_vm9, %v8086_v32, %v8238_v55 }
 0x6bb   : > { %v7281_v11 = vrot.slane %v7280_v45, 2  ;;  %v7288_v16 = vrot.slane %v7287_v31, 2  ;;  %v6547_v22 = vcombine.high %v6539_v35, %v6539_v35  ;;  %v7215_v51 = vsel %vm911_vm1, %v6539_v35, -inf }
 0x6bc   : > { %v7276_v13 = vrot.slane %v7275_v43, 1  ;;  %v7295_v46 = vrot.slane %v7294_v33, 2  ;;  %v6548_v50 = vcombine.high %v6546_v39, %v6546_v39  ;;  %v7216_v6 = vrot.slane %v7215_v51, 4  ;;  %v21080_v1 = vpop.f32.mrb[16].mxu1 }
 0x6bd   : > { %v7282_v24 = vmax.f32 %v7280_v45, %v7281_v11  ;;  %v7289_v56 = vmax.f32 %v7287_v31, %v7288_v16  ;;  %v7222_v5 = vsel %vm911_vm1, %v6547_v22, -inf  ;;  %v7229_v7 = vsel %vm911_vm1, %v6546_v39, -inf  ;;  %v21084_v9 = vpop.f32.mrb[17].mxu1 }
 0x6be   : > { %v7296_v40 = vmax.f32 %v7294_v33, %v7295_v46  ;;  %v7217_v29 = vmax.f32 %v7215_v51, %v7216_v6  ;;  %v7223_v20 = vrot.slane %v7222_v5, 4  ;;  %v7230_v53 = vrot.slane %v7229_v7, 4  ;;  %v21101_v46 = vpop.f32.mrb[18].mxu1 }
 0x6bf   : > { %v7283_v21 = vrot.slane %v7282_v24, 1  ;;  %v7290_v30 = vrot.slane %v7289_v56, 1  ;;  %v7236_v8 = vsel %vm911_vm1, %v6548_v50, -inf  ;;  %v7277_v57 = vmax.f32 %v7275_v43, %v7276_v13 }
 0x6c0   : > { %v7297_v61 = vrot.slane %v7296_v40, 1  ;;  %v7218_v17 = vrot.slane %v7217_v29, 2  ;;  %v7224_v26 = vmax.f32 %v7222_v5, %v7223_v20  ;;  %v7237_v42 = vrot.slane %v7236_v8, 4 }
 0x6c1   : > { %v7284_v23 = vmax.f32 %v7282_v24, %v7283_v21  ;;  %v7231_v27 = vmax.f32 %v7229_v7, %v7230_v53  ;;  %v6329_v58 = vadd.f32 %v21023_v44, %v20987_v38  ;;  %v7291_v47 = vmax.f32 %v7289_v56, %v7290_v30 }
 0x6c2   : > { %v7219_v60 = vmax.f32 %v7217_v29, %v7218_v17  ;;  %v7225_v54 = vrot.slane %v7224_v26, 2  ;;  %v7238_v3 = vmax.f32 %v7236_v8, %v7237_v42  ;;  %v6327_v2 = vadd.f32 %v20987_v38, %v21027_v48 }
 0x6c3   : > { %v7232_v52 = vrot.slane %v7231_v27, 2  ;;  %vm6361_vm15 = vcmp.gt.f32.partialorder %v6329_v58, 0.0  ;;  %v6393_v15 = vmul.f32 0.01, %v6329_v58  ;;  %v7298_v14 = vmax.f32 %v7296_v40, %v7297_v61 }
 0x6c4   : > { %v7220_v32 = vrot.slane %v7219_v60, 1  ;;  %v7226_v59 = vmax.f32 %v7224_v26, %v7225_v54  ;;  %v7239_v63 = vrot.slane %v7238_v3, 2  ;;  %vm6359_vm2 = vcmp.gt.f32.partialorder %v6327_v2, 0.0 }
 0x6c5   : > { %v7233_v36 = vmax.f32 %v7231_v27, %v7232_v52  ;;  %v6425_v55 = vsel %vm6361_vm15, %v6329_v58, %v6393_v15  ;;  %v6391_v44 = vmul.f32 0.01, %v6327_v2  ;;  %v21096_v48 = vadd.f32 %v21031_v28, %v20987_v38 }
 0x6c6   : > { %v7221_v45 = vmax.f32 %v7219_v60, %v7220_v32  ;;  %v7227_v31 = vrot.slane %v7226_v59, 1  ;;  %v7240_v35 = vmax.f32 %v7238_v3, %v7239_v63  ;;  %6457 = vst.msk [vmem:[%s20998_s23 + $0x30] sm:$0xff] %vm908_vm0, %v6425_v55  ;;  %v6617_v43 = vcombine.high %v6425_v55, %v6425_v55 }
 0x6c7   : > { %v7234_v33 = vrot.slane %v7233_v36, 1  ;;  %v6624_v39 = vrot.slane %v6425_v55, %v20990_v37  ;;  %v6423_v11 = vsel %vm6359_vm2, %v6327_v2, %v6391_v44  ;;  %vm6362_vm3 = vcmp.gt.f32.partialorder %v21096_v48, 0.0 }
 0x6c8   : > { %v7228_v16 = vmax.f32 %v7226_v59, %v7227_v31  ;;  %v7241_v22 = vrot.slane %v7240_v35, 1  ;;  %v8087_v51 = vmax.f32 %v7221_v45, %v7277_v57  ;;  %v6631_v13 = vrot.slane %v6617_v43, %v20990_v37  ;;  %6455 = vst.msk [vmem:[%s20998_s23 + $0x20] sm:$0xff] %vm908_vm0, %v6423_v11 }
 0x6c9   : > { %v7235_v50 = vmax.f32 %v7233_v36, %v7234_v33  ;;  %v6632_v6 = vcombine.high %v6624_v39, %v6624_v39  ;;  %v7355_v24 = vsel %vm911_vm1, %v6624_v39, -inf  ;;  %v6583_v56 = vcombine.high %v6423_v11, %v6423_v11 }
 0x6ca   : > { %v7242_v5 = vmax.f32 %v7240_v35, %v7241_v22  ;;  %v8088_v7 = vmax.f32 %v7228_v16, %v7284_v23  ;;  %v8242_v28 = vsel %vm8241_vm10, %v8087_v51, %v21077_v18  ;;  %v6633_v40 = vcombine.high %v6631_v13, %v6631_v13  ;;  %v21112_v18 = vpop.f32.mrb[19].mxu1 }
 0x6cb   : > { %v8089_v29 = vmax.f32 %v7235_v50, %v7291_v47  ;;  %v7356_v20 = vrot.slane %v7355_v24, 4  ;;  %v7362_v21 = vsel %vm911_vm1, %v6632_v6, -inf  ;;  %v7369_v30 = vsel %vm911_vm1, %v6631_v13, -inf }
 0x6cc   : > { %v8090_v53 = vmax.f32 %v7242_v5, %v7298_v14  ;;  %v8244_v8 = vsel %vm8243_vm11, %v8088_v7, %v8242_v28  ;;  %v7363_v61 = vrot.slane %v7362_v21, 4  ;;  %v7370_v17 = vrot.slane %v7369_v30, 4 }
 0x6cd   : > { %v8246_v26 = vsel %vm8245_vm12, %v8089_v29, %v8244_v8  ;;  %v7357_v42 = vmax.f32 %v7355_v24, %v7356_v20  ;;  %v7376_v57 = vsel %vm911_vm1, %v6633_v40, -inf  ;;  %v6590_v23 = vrot.slane %v6423_v11, %v20990_v37 }
 0x6ce   : > { %v8248_v27 = vsel %vm8247_vm14, %v8090_v53, %v8246_v26  ;;  %v7364_v58 = vmax.f32 %v7362_v21, %v7363_v61  ;;  %v7371_v47 = vmax.f32 %v7369_v30, %v7370_v17  ;;  %v7377_v60 = vrot.slane %v7376_v57, 4 }
 0x6cf   : > { %8306 = vst.msk [vmem:[#allocation2 + $0x19] sm:$0xff] %vm908_vm0, %v8248_v27  ;;  %v7358_v54 = vrot.slane %v7357_v42, 2  ;;  %v6597_v3 = vrot.slane %v6583_v56, %v20990_v37  ;;  %v6598_v52 = vcombine.high %v6590_v23, %v6590_v23  ;;  %v7299_v15 = vsel %vm911_vm1, %v6590_v23, -inf }
 0x6d0   : > { %v7365_v2 = vrot.slane %v7364_v58, 2  ;;  %v7372_v14 = vrot.slane %v7371_v47, 2  ;;  %v7378_v32 = vmax.f32 %v7376_v57, %v7377_v60  ;;  %v7300_v59 = vrot.slane %v7299_v15, 4 }
 0x6d1   : > { %v7359_v63 = vmax.f32 %v7357_v42, %v7358_v54  ;;  %v6599_v36 = vcombine.high %v6597_v3, %v6597_v3  ;;  %v7306_v55 = vsel %vm911_vm1, %v6598_v52, -inf  ;;  %v7313_v44 = vsel %vm911_vm1, %v6597_v3, -inf }
 0x6d2   : > { %v7366_v45 = vmax.f32 %v7364_v58, %v7365_v2  ;;  %v7373_v31 = vmax.f32 %v7371_v47, %v7372_v14  ;;  %v7379_v35 = vrot.slane %v7378_v32, 2  ;;  %v7301_v43 = vmax.f32 %v7299_v15, %v7300_v59 }
 0x6d3   : > { %v7360_v33 = vrot.slane %v7359_v63, 1  ;;  %v7307_v39 = vrot.slane %v7306_v55, 4  ;;  %v7314_v11 = vrot.slane %v7313_v44, 4  ;;  %v7320_v16 = vsel %vm911_vm1, %v6599_v36, -inf }
 0x6d4   : > { %v7367_v22 = vrot.slane %v7366_v45, 1  ;;  %v7374_v51 = vrot.slane %v7373_v31, 1  ;;  %v7380_v13 = vmax.f32 %v7378_v32, %v7379_v35  ;;  %v7302_v50 = vrot.slane %v7301_v43, 2 }
 0x6d5   : > { %v7308_v6 = vmax.f32 %v7306_v55, %v7307_v39  ;;  %v7315_v24 = vmax.f32 %v7313_v44, %v7314_v11  ;;  %v7321_v56 = vrot.slane %v7320_v16, 4  ;;  %v7361_v5 = vmax.f32 %v7359_v63, %v7360_v33  ;;  %v21138_v39 = vpop.f32.mrb[20].mxu1 }
 0x6d6   : > { %v7368_v7 = vmax.f32 %v7366_v45, %v7367_v22  ;;  %v7381_v28 = vrot.slane %v7380_v13, 1  ;;  %v7303_v40 = vmax.f32 %v7301_v43, %v7302_v50  ;;  %v6394_v30 = vmul.f32 0.01, %v21096_v48 }
 0x6d7   : > { %v7309_v29 = vrot.slane %v7308_v6, 2  ;;  %v7316_v20 = vrot.slane %v7315_v24, 2  ;;  %v7322_v21 = vmax.f32 %v7320_v16, %v7321_v56  ;;  %v7375_v53 = vmax.f32 %v7373_v31, %v7374_v51 }
 0x6d8   : > { %v7382_v8 = vmax.f32 %v7380_v13, %v7381_v28  ;;  %v7304_v61 = vrot.slane %v7303_v40, 1  ;;  %v6328_v17 = vadd.f32 %v20987_v38, %v21033_v4  ;;  %v6426_v23 = vsel %vm6362_vm3, %v21096_v48, %v6394_v30  ;;  %v21141_v13 = vpop.f32.mrb[21].mxu1 }
 0x6d9   : > { %v7310_v26 = vmax.f32 %v7308_v6, %v7309_v29  ;;  %v7317_v42 = vmax.f32 %v7315_v24, %v7316_v20  ;;  %v7323_v57 = vrot.slane %v7322_v21, 2  ;;  %6458 = vst.msk [vmem:[%s20998_s23 + $0x38] sm:$0xff] %vm908_vm0, %v6426_v23  ;;  %v6634_v58 = vcombine.high %v6426_v23, %v6426_v23 }
 0x6da   : > { %v7305_v27 = vmax.f32 %v7303_v40, %v7304_v61  ;;  %v6641_v47 = vrot.slane %v6426_v23, %v20990_v37  ;;  %vm6360_vm4 = vcmp.gt.f32.partialorder %v6328_v17, 0.0  ;;  %v6392_v52 = vmul.f32 0.01, %v6328_v17 }
 0x6db   : > { %v7311_v60 = vrot.slane %v7310_v26, 1  ;;  %v7318_v54 = vrot.slane %v7317_v42, 1  ;;  %v7324_v3 = vmax.f32 %v7322_v21, %v7323_v57  ;;  %v6648_v4 = vrot.slane %v6634_v58, %v20990_v37 }
 0x6dc   : > { %v8091_v15 = vmax.f32 %v7305_v27, %v7361_v5  ;;  %v6649_v2 = vcombine.high %v6641_v47, %v6641_v47  ;;  %v7383_v14 = vsel %vm911_vm1, %v6641_v47, -inf  ;;  %v6424_v45 = vsel %vm6360_vm4, %v6328_v17, %v6392_v52 }
 0x6dd   : > { %v7312_v32 = vmax.f32 %v7310_v26, %v7311_v60  ;;  %v7319_v48 = vmax.f32 %v7317_v42, %v7318_v54  ;;  %v7325_v59 = vrot.slane %v7324_v3, 1  ;;  %v7384_v63 = vrot.slane %v7383_v14, 4  ;;  %6456 = vst.msk [vmem:[%s20998_s23 + $0x28] sm:$0xff] %vm908_vm0, %v6424_v45 }
 0x6de   : > { %v6650_v36 = vcombine.high %v6648_v4, %v6648_v4  ;;  %v7390_v55 = vsel %vm911_vm1, %v6649_v2, -inf  ;;  %v7397_v44 = vsel %vm911_vm1, %v6648_v4, -inf  ;;  %v6600_v51 = vcombine.high %v6424_v45, %v6424_v45 }
 0x6df   : > { %v7326_v31 = vmax.f32 %v7324_v3, %v7325_v59  ;;  %v8092_v35 = vmax.f32 %v7312_v32, %v7368_v7  ;;  %v8093_v43 = vmax.f32 %v7319_v48, %v7375_v53  ;;  %v7385_v33 = vmax.f32 %v7383_v14, %v7384_v63 }
 0x6e0   : > { %v7391_v11 = vrot.slane %v7390_v55, 4  ;;  %v7398_v16 = vrot.slane %v7397_v44, 4  ;;  %v7404_v22 = vsel %vm911_vm1, %v6650_v36, -inf  ;;  %v6607_v40 = vrot.slane %v6424_v45, %v20990_v37 }
 0x6e1   : > { %v8094_v50 = vmax.f32 %v7326_v31, %v7382_v8  ;;  %v8249_v6 = vsel %vm8235_vm7, %v8092_v35, %v8091_v15  ;;  %v7386_v24 = vrot.slane %v7385_v33, 2  ;;  %v7405_v56 = vrot.slane %v7404_v22, 4 }
 0x6e2   : > { %v8250_v5 = vsel %vm8237_vm8, %v8093_v43, %v8249_v6  ;;  %v7392_v7 = vmax.f32 %v7390_v55, %v7391_v11  ;;  %v7399_v28 = vmax.f32 %v7397_v44, %v7398_v16  ;;  %v6614_v21 = vrot.slane %v6600_v51, %v20990_v37 }
 0x6e3   : > { %v7387_v29 = vmax.f32 %v7385_v33, %v7386_v24  ;;  %v7406_v20 = vmax.f32 %v7404_v22, %v7405_v56  ;;  %v21148_v30 = vsel %vm8239_vm9, %v8094_v50, %v8250_v5  ;;  %v6615_v8 = vcombine.high %v6607_v40, %v6607_v40 }
 0x6e4   : > { %v7393_v53 = vrot.slane %v7392_v7, 2  ;;  %v7400_v61 = vrot.slane %v7399_v28, 2  ;;  %v7327_v17 = vsel %vm911_vm1, %v6607_v40, -inf  ;;  %v6616_v57 = vcombine.high %v6614_v21, %v6614_v21 }
 0x6e5   : > { %v7388_v26 = vrot.slane %v7387_v29, 1  ;;  %v7407_v42 = vrot.slane %v7406_v20, 2  ;;  %v7328_v23 = vrot.slane %v7327_v17, 4  ;;  %v7334_v47 = vsel %vm911_vm1, %v6615_v8, -inf }
 0x6e6   : > { %v7394_v27 = vmax.f32 %v7392_v7, %v7393_v53  ;;  %v7401_v58 = vmax.f32 %v7399_v28, %v7400_v61  ;;  %v7341_v60 = vsel %vm911_vm1, %v6614_v21, -inf  ;;  %v7335_v52 = vrot.slane %v7334_v47, 4 }
 0x6e7   : > { %v7408_v54 = vmax.f32 %v7406_v20, %v7407_v42  ;;  %v7329_v3 = vmax.f32 %v7327_v17, %v7328_v23  ;;  %v6333_v15 = vadd.f32 %v21040_v62, %v20987_v38  ;;  %v7342_v14 = vrot.slane %v7341_v60, 4  ;;  %v21172_v42 = vpop.f32.mrb[22].mxu1 }
 0x6e8   : > { %v7395_v4 = vrot.slane %v7394_v27, 1  ;;  %v7402_v2 = vrot.slane %v7401_v58, 1  ;;  %v7348_v32 = vsel %vm911_vm1, %v6616_v57, -inf  ;;  %v7336_v63 = vmax.f32 %v7334_v47, %v7335_v52 }
 0x6e9   : > { %v7409_v48 = vrot.slane %v7408_v54, 1  ;;  %v7330_v59 = vrot.slane %v7329_v3, 2  ;;  %v7349_v36 = vrot.slane %v7348_v32, 4  ;;  %v7389_v55 = vmax.f32 %v7387_v29, %v7388_v26 }
 0x6ea   : > { %v7396_v44 = vmax.f32 %v7394_v27, %v7395_v4  ;;  %v7403_v45 = vmax.f32 %v7401_v58, %v7402_v2  ;;  %v7343_v31 = vmax.f32 %v7341_v60, %v7342_v14  ;;  %v7337_v43 = vrot.slane %v7336_v63, 2 }
 0x6eb   : > { %v7331_v35 = vmax.f32 %v7329_v3, %v7330_v59  ;;  %v7350_v33 = vmax.f32 %v7348_v32, %v7349_v36  ;;  %vm6365_vm6 = vcmp.gt.f32.partialorder %v6333_v15, 0.0  ;;  %v7410_v11 = vmax.f32 %v7408_v54, %v7409_v48 }
 0x6ec   : > { %v7344_v62 = vrot.slane %v7343_v31, 2  ;;  %v6397_v16 = vmul.f32 0.01, %v6333_v15  ;;  %v6331_v22 = vadd.f32 %v20987_v38, %v21042_v19  ;;  %v7338_v50 = vmax.f32 %v7336_v63, %v7337_v43 }
 0x6ed   : > { %v7332_v51 = vrot.slane %v7331_v35, 1  ;;  %v7351_v6 = vrot.slane %v7350_v33, 2  ;;  %v21160_v24 = vadd.f32 %v21044_v41, %v20987_v38  ;;  %v21167_v61 = vadd.f32 %v20987_v38, %v21046_v34 }
 0x6ee   : > { %v7345_v56 = vmax.f32 %v7343_v31, %v7344_v62  ;;  %v6429_v5 = vsel %vm6365_vm6, %v6333_v15, %v6397_v16  ;;  %vm6363_vm15 = vcmp.gt.f32.partialorder %v6331_v22, 0.0  ;;  %v6395_v7 = vmul.f32 0.01, %v6331_v22 }
 0x6ef   : > { %v7333_v28 = vmax.f32 %v7331_v35, %v7332_v51  ;;  %v7339_v40 = vrot.slane %v7338_v50, 1  ;;  %v7352_v29 = vmax.f32 %v7350_v33, %v7351_v6  ;;  %6461 = vst.msk [vmem:[%s20998_s23 + $0x50] sm:$0xff] %vm908_vm0, %v6429_v5  ;;  %v6685_v20 = vcombine.high %v6429_v5, %v6429_v5 }
 0x6f0   : > { %v7346_v21 = vrot.slane %v7345_v56, 1  ;;  %v6692_v19 = vrot.slane %v6429_v5, %v20990_v37  ;;  %v6427_v53 = vsel %vm6363_vm15, %v6331_v22, %v6395_v7  ;;  %vm6366_vm2 = vcmp.gt.f32.partialorder %v21160_v24, 0.0 }
 0x6f1   : > { %v7340_v41 = vmax.f32 %v7338_v50, %v7339_v40  ;;  %v7353_v8 = vrot.slane %v7352_v29, 1  ;;  %v8095_v17 = vmax.f32 %v7333_v28, %v7389_v55  ;;  %v6699_v26 = vrot.slane %v6685_v20, %v20990_v37  ;;  %6459 = vst.msk [vmem:[%s20998_s23 + $0x40] sm:$0xff] %vm908_vm0, %v6427_v53 }
 0x6f2   : > { %v7347_v57 = vmax.f32 %v7345_v56, %v7346_v21  ;;  %v6700_v23 = vcombine.high %v6692_v19, %v6692_v19  ;;  %v7467_v27 = vsel %vm911_vm1, %v6692_v19, -inf  ;;  %v6651_v58 = vcombine.high %v6427_v53, %v6427_v53 }
 0x6f3   : > { %v7354_v47 = vmax.f32 %v7352_v29, %v7353_v8  ;;  %v8096_v60 = vmax.f32 %v7340_v41, %v7396_v44  ;;  %v8252_v38 = vsel %vm8241_vm10, %v8095_v17, %v21148_v30  ;;  %v6701_v34 = vcombine.high %v6699_v26, %v6699_v26  ;;  %v21183_v30 = vpop.f32.mrb[23].mxu1 }
 0x6f4   : > { %v8097_v54 = vmax.f32 %v7347_v57, %v7403_v45  ;;  %v7468_v3 = vrot.slane %v7467_v27, 4  ;;  %v7474_v52 = vsel %vm911_vm1, %v6700_v23, -inf  ;;  %v7481_v15 = vsel %vm911_vm1, %v6699_v26, -inf }
 0x6f5   : > { %v8098_v4 = vmax.f32 %v7354_v47, %v7410_v11  ;;  %v8253_v2 = vsel %vm8243_vm11, %v8096_v60, %v8252_v38  ;;  %v7475_v14 = vrot.slane %v7474_v52, 4  ;;  %v7482_v32 = vrot.slane %v7481_v15, 4 }
 0x6f6   : > { %v8254_v48 = vsel %vm8245_vm12, %v8097_v54, %v8253_v2  ;;  %v7469_v59 = vmax.f32 %v7467_v27, %v7468_v3  ;;  %v7488_v63 = vsel %vm911_vm1, %v6701_v34, -inf  ;;  %v6658_v36 = vrot.slane %v6427_v53, %v20990_v37 }
 0x6f7   : > { %v8255_v55 = vsel %vm8247_vm14, %v8098_v4, %v8254_v48  ;;  %v7476_v44 = vmax.f32 %v7474_v52, %v7475_v14  ;;  %v7483_v45 = vmax.f32 %v7481_v15, %v7482_v32  ;;  %v7489_v31 = vrot.slane %v7488_v63, 4 }
 0x6f8   : > { %8307 = vst.msk [vmem:[#allocation2 + $0x31] sm:$0xff] %vm908_vm0, %v8255_v55  ;;  %v7470_v35 = vrot.slane %v7469_v59, 2  ;;  %v6665_v43 = vrot.slane %v6651_v58, %v20990_v37  ;;  %v6666_v33 = vcombine.high %v6658_v36, %v6658_v36  ;;  %v7411_v11 = vsel %vm911_vm1, %v6658_v36, -inf }
 0x6f9   : > { %v7477_v62 = vrot.slane %v7476_v44, 2  ;;  %v7484_v16 = vrot.slane %v7483_v45, 2  ;;  %v7490_v22 = vmax.f32 %v7488_v63, %v7489_v31  ;;  %v7412_v51 = vrot.slane %v7411_v11, 4 }
 0x6fa   : > { %v7471_v50 = vmax.f32 %v7469_v59, %v7470_v35  ;;  %v6667_v6 = vcombine.high %v6665_v43, %v6665_v43  ;;  %v7418_v56 = vsel %vm911_vm1, %v6666_v33, -inf  ;;  %v7425_v5 = vsel %vm911_vm1, %v6665_v43, -inf }
 0x6fb   : > { %v7478_v7 = vmax.f32 %v7476_v44, %v7477_v62  ;;  %v7485_v28 = vmax.f32 %v7483_v45, %v7484_v16  ;;  %v7491_v40 = vrot.slane %v7490_v22, 2  ;;  %v7413_v29 = vmax.f32 %v7411_v11, %v7412_v51 }
 0x6fc   : > { %v7472_v20 = vrot.slane %v7471_v50, 1  ;;  %v7419_v21 = vrot.slane %v7418_v56, 4  ;;  %v7426_v19 = vrot.slane %v7425_v5, 4  ;;  %v7432_v53 = vsel %vm911_vm1, %v6667_v6, -inf }
 0x6fd   : > { %v7479_v41 = vrot.slane %v7478_v7, 1  ;;  %v7486_v8 = vrot.slane %v7485_v28, 1  ;;  %v7492_v17 = vmax.f32 %v7490_v22, %v7491_v40  ;;  %v7414_v26 = vrot.slane %v7413_v29, 2 }
 0x6fe   : > { %v7473_v57 = vmax.f32 %v7471_v50, %v7472_v20  ;;  %v7420_v23 = vmax.f32 %v7418_v56, %v7419_v21  ;;  %v7427_v27 = vmax.f32 %v7425_v5, %v7426_v19  ;;  %v7433_v58 = vrot.slane %v7432_v53, 4 }
 0x6ff   : > { %v7480_v47 = vmax.f32 %v7478_v7, %v7479_v41  ;;  %v7487_v60 = vmax.f32 %v7485_v28, %v7486_v8  ;;  %v7493_v38 = vrot.slane %v7492_v17, 1  ;;  %v7415_v34 = vmax.f32 %v7413_v29, %v7414_v26 }
 0x700   : > { %v7421_v54 = vrot.slane %v7420_v23, 2  ;;  %v7428_v3 = vrot.slane %v7427_v27, 2  ;;  %v7434_v52 = vmax.f32 %v7432_v53, %v7433_v58  ;;  %v6398_v15 = vmul.f32 0.01, %v21160_v24 }
 0x701   : > { %v21194_v4 = vmax.f32 %v7492_v17, %v7493_v38  ;;  %v7416_v2 = vrot.slane %v7415_v34, 1  ;;  %vm6364_vm3 = vcmp.gt.f32.partialorder %v21167_v61, 0.0  ;;  %v6396_v14 = vmul.f32 0.01, %v21167_v61 }
 0x702   : > { %v7422_v32 = vmax.f32 %v7420_v23, %v7421_v54  ;;  %v7429_v48 = vmax.f32 %v7427_v27, %v7428_v3  ;;  %v7435_v59 = vrot.slane %v7434_v52, 2  ;;  %v6430_v63 = vsel %vm6366_vm2, %v21160_v24, %v6398_v15 }
 0x703   : > { %v7417_v36 = vmax.f32 %v7415_v34, %v7416_v2  ;;  %6462 = vst.msk [vmem:[%s20998_s23 + $0x58] sm:$0xff] %vm908_vm0, %v6430_v63  ;;  %v6702_v55 = vcombine.high %v6430_v63, %v6430_v63  ;;  %v6709_v44 = vrot.slane %v6430_v63, %v20990_v37  ;;  %v6428_v45 = vsel %vm6364_vm3, %v21167_v61, %v6396_v14 }
 0x704   : > { %v7423_v31 = vrot.slane %v7422_v32, 1  ;;  %v7430_v35 = vrot.slane %v7429_v48, 1  ;;  %v7436_v43 = vmax.f32 %v7434_v52, %v7435_v59  ;;  %6460 = vst.msk [vmem:[%s20998_s23 + $0x48] sm:$0xff] %vm908_vm0, %v6428_v45  ;;  %v6668_v33 = vcombine.high %v6428_v45, %v6428_v45 }
 0x705   : > { %v8099_v11 = vmax.f32 %v7417_v36, %v7473_v57  ;;  %v6716_v62 = vrot.slane %v6702_v55, %v20990_v37  ;;  %v6717_v16 = vcombine.high %v6709_v44, %v6709_v44  ;;  %v7495_v24 = vsel %vm911_vm1, %v6709_v44, -inf }
 0x706   : > { %v7424_v22 = vmax.f32 %v7422_v32, %v7423_v31  ;;  %v7431_v51 = vmax.f32 %v7429_v48, %v7430_v35  ;;  %v7437_v50 = vrot.slane %v7436_v43, 1  ;;  %v7496_v6 = vrot.slane %v7495_v24, 4 }
 0x707   : > { %v6718_v56 = vcombine.high %v6716_v62, %v6716_v62  ;;  %v7502_v5 = vsel %vm911_vm1, %v6717_v16, -inf  ;;  %v7509_v61 = vsel %vm911_vm1, %v6716_v62, -inf  ;;  %v6675_v7 = vrot.slane %v6428_v45, %v20990_v37  ;;  %v21221_v62 = vpop.f32.mrb[24].mxu1 }
 0x708   : > { %v7438_v28 = vmax.f32 %v7436_v43, %v7437_v50  ;;  %v8100_v40 = vmax.f32 %v7424_v22, %v7480_v47  ;;  %v8101_v29 = vmax.f32 %v7431_v51, %v7487_v60  ;;  %v7497_v20 = vmax.f32 %v7495_v24, %v7496_v6  ;;  %v21224_v50 = vpop.f32.mrb[25].mxu1 }
 0x709   : > { %v7503_v21 = vrot.slane %v7502_v5, 4  ;;  %v7510_v19 = vrot.slane %v7509_v61, 4  ;;  %v7516_v53 = vsel %vm911_vm1, %v6718_v56, -inf  ;;  %v6682_v41 = vrot.slane %v6668_v33, %v20990_v37 }
 0x70a   : > { %v8102_v8 = vmax.f32 %v7438_v28, %v21194_v4  ;;  %v8256_v17 = vsel %vm8235_vm7, %v8100_v40, %v8099_v11  ;;  %v7498_v26 = vrot.slane %v7497_v20, 2  ;;  %v7517_v57 = vrot.slane %v7516_v53, 4 }
 0x70b   : > { %v8257_v23 = vsel %vm8237_vm8, %v8101_v29, %v8256_v17  ;;  %v7504_v27 = vmax.f32 %v7502_v5, %v7503_v21  ;;  %v7511_v58 = vmax.f32 %v7509_v61, %v7510_v19  ;;  %v6683_v38 = vcombine.high %v6675_v7, %v6675_v7  ;;  %v21229_v29 = vld [vmem:[%s23017_s8] ss:$0 sm:$0xff] }
 0x70c   : > { %v7499_v47 = vmax.f32 %v7497_v20, %v7498_v26  ;;  %v7518_v60 = vmax.f32 %v7516_v53, %v7517_v57  ;;  %v6684_v34 = vcombine.high %v6682_v41, %v6682_v41  ;;  %v7439_v54 = vsel %vm911_vm1, %v6675_v7, -inf }
 0x70d   : > { %v7505_v3 = vrot.slane %v7504_v27, 2  ;;  %v7512_v52 = vrot.slane %v7511_v58, 2  ;;  %v7440_v15 = vrot.slane %v7439_v54, 4  ;;  %v7446_v2 = vsel %vm911_vm1, %v6683_v38, -inf }
 0x70e   : > { %v7500_v4 = vrot.slane %v7499_v47, 1  ;;  %v7519_v14 = vrot.slane %v7518_v60, 2  ;;  %v7447_v32 = vrot.slane %v7446_v2, 4  ;;  %v7453_v48 = vsel %vm911_vm1, %v6682_v41, -inf }
 0x70f   : > { %v7506_v59 = vmax.f32 %v7504_v27, %v7505_v3  ;;  %v7513_v63 = vmax.f32 %v7511_v58, %v7512_v52  ;;  %v7441_v36 = vmax.f32 %v7439_v54, %v7440_v15  ;;  %v7454_v55 = vrot.slane %v7453_v48, 4  ;;  %v21239_v58 = vpop.f32.mrb[26].mxu1 }
 0x710   : > { %v7520_v44 = vmax.f32 %v7518_v60, %v7519_v14  ;;  %v7448_v45 = vmax.f32 %v7446_v2, %v7447_v32  ;;  %v7460_v31 = vsel %vm911_vm1, %v6684_v34, -inf  ;;  %v7501_v16 = vmax.f32 %v7499_v47, %v7500_v4 }
 0x711   : > { %v7507_v35 = vrot.slane %v7506_v59, 1  ;;  %v7514_v43 = vrot.slane %v7513_v63, 1  ;;  %v7442_v33 = vrot.slane %v7441_v36, 2  ;;  %v7455_v11 = vmax.f32 %v7453_v48, %v7454_v55 }
 0x712   : > { %v7449_v24 = vrot.slane %v7448_v45, 2  ;;  %v7461_v22 = vrot.slane %v7460_v31, 4  ;;  %v8258_v51 = vsel %vm8239_vm9, %v8102_v8, %v8257_v23  ;;  %v7521_v56 = vrot.slane %v7520_v44, 1 }
 0x713   : > { %v7508_v6 = vmax.f32 %v7506_v59, %v7507_v35  ;;  %v7443_v5 = vmax.f32 %v7441_v36, %v7442_v33  ;;  %v7456_v61 = vrot.slane %v7455_v11, 2  ;;  %v7515_v7 = vmax.f32 %v7513_v63, %v7514_v43 }
 0x714   : > { %v7450_v28 = vmax.f32 %v7448_v45, %v7449_v24  ;;  %v7462_v40 = vmax.f32 %v7460_v31, %v7461_v22  ;;  %v6337_v20 = vadd.f32 %v21229_v29, %v21055_v25  ;;  %v6335_v53 = vadd.f32 %v21229_v29, %v21063_v12 }
 0x715   : > { %v7444_v21 = vrot.slane %v7443_v5, 1  ;;  %v7457_v19 = vmax.f32 %v7455_v11, %v7456_v61  ;;  %v21237_v41 = vadd.f32 %v21229_v29, %v21067_v10  ;;  %v7522_v25 = vmax.f32 %v7520_v44, %v7521_v56 }
 0x716   : > { %v7451_v8 = vrot.slane %v7450_v28, 1  ;;  %v7463_v17 = vrot.slane %v7462_v40, 2  ;;  %vm6369_vm4 = vcmp.gt.f32.partialorder %v6337_v20, 0.0  ;;  %v6401_v26 = vmul.f32 0.01, %v6337_v20 }
 0x717   : > { %v7445_v57 = vmax.f32 %v7443_v5, %v7444_v21  ;;  %v7458_v23 = vrot.slane %v7457_v19, 1  ;;  %vm6367_vm6 = vcmp.gt.f32.partialorder %v6335_v53, 0.0  ;;  %v6399_v27 = vmul.f32 0.01, %v6335_v53 }
 0x718   : > { %v7452_v38 = vmax.f32 %v7450_v28, %v7451_v8  ;;  %v7464_v47 = vmax.f32 %v7462_v40, %v7463_v17  ;;  %v6433_v12 = vsel %vm6369_vm4, %v6337_v20, %v6401_v26  ;;  %v21245_v2 = vmul.f32 0.01, %v21237_v41 }
 0x719   : > { %v7459_v60 = vmax.f32 %v7457_v19, %v7458_v23  ;;  %v8103_v34 = vmax.f32 %v7445_v57, %v7501_v16  ;;  %6465 = vst.msk [vmem:[%s20998_s23 + $0x70] sm:$0xff] %vm908_vm0, %v6433_v12  ;;  %v6753_v10 = vcombine.high %v6433_v12, %v6433_v12  ;;  %v6760_v54 = vrot.slane %v6433_v12, %v20990_v37  ;;  %v21263_v19 = vpop.f32.mrb[27].mxu1 }
 0x71a   : > { %v7465_v3 = vrot.slane %v7464_v47, 1  ;;  %v8104_v52 = vmax.f32 %v7452_v38, %v7508_v6  ;;  %v6431_v15 = vsel %vm6367_vm6, %v6335_v53, %v6399_v27  ;;  %vm6370_vm15 = vcmp.gt.f32.partialorder %v21237_v41, 0.0 }
 0x71b   : > { %v8105_v4 = vmax.f32 %v7459_v60, %v7515_v7  ;;  %v8259_v14 = vsel %vm8241_vm10, %v8103_v34, %v8258_v51  ;;  %v6767_v32 = vrot.slane %v6753_v10, %v20990_v37  ;;  %v6768_v48 = vcombine.high %v6760_v54, %v6760_v54  ;;  %6463 = vst.msk [vmem:[%s20998_s23 + $0x60] sm:$0xff] %vm908_vm0, %v6431_v15 }
 0x71c   : > { %v7466_v59 = vmax.f32 %v7464_v47, %v7465_v3  ;;  %v8260_v63 = vsel %vm8243_vm11, %v8104_v52, %v8259_v14  ;;  %v7579_v36 = vsel %vm911_vm1, %v6760_v54, -inf  ;;  %v6719_v55 = vcombine.high %v6431_v15, %v6431_v15 }
 0x71d   : > { %v8261_v44 = vsel %vm8245_vm12, %v8105_v4, %v8260_v63  ;;  %v6769_v45 = vcombine.high %v6767_v32, %v6767_v32  ;;  %v7580_v31 = vrot.slane %v7579_v36, 4  ;;  %v7586_v35 = vsel %vm911_vm1, %v6768_v48, -inf }
 0x71e   : > { %v8106_v43 = vmax.f32 %v7466_v59, %v7522_v25  ;;  %v7587_v33 = vrot.slane %v7586_v35, 4  ;;  %v7593_v11 = vsel %vm911_vm1, %v6767_v32, -inf  ;;  %v6726_v16 = vrot.slane %v6431_v15, %v20990_v37 }
 0x71f   : > { %v7581_v24 = vmax.f32 %v7579_v36, %v7580_v31  ;;  %v7594_v22 = vrot.slane %v7593_v11, 4  ;;  %v7600_v51 = vsel %vm911_vm1, %v6769_v45, -inf  ;;  %v6733_v6 = vrot.slane %v6719_v55, %v20990_v37 }
 0x720   : > { %v8262_v56 = vsel %vm8247_vm14, %v8106_v43, %v8261_v44  ;;  %v7588_v5 = vmax.f32 %v7586_v35, %v7587_v33  ;;  %v7601_v61 = vrot.slane %v7600_v51, 4  ;;  %v6734_v7 = vcombine.high %v6726_v16, %v6726_v16 }
 0x721   : > { %8308 = vst.msk [vmem:[#allocation2 + $0x49] sm:$0xff] %vm908_vm0, %v8262_v56  ;;  %v7582_v28 = vrot.slane %v7581_v24, 2  ;;  %v7595_v40 = vmax.f32 %v7593_v11, %v7594_v22  ;;  %v6735_v20 = vcombine.high %v6733_v6, %v6733_v6  ;;  %v7523_v21 = vsel %vm911_vm1, %v6726_v16, -inf }
 0x722   : > { %v7589_v53 = vrot.slane %v7588_v5, 2  ;;  %v7602_v8 = vmax.f32 %v7600_v51, %v7601_v61  ;;  %v7524_v17 = vrot.slane %v7523_v21, 4  ;;  %v7530_v26 = vsel %vm911_vm1, %v6734_v7, -inf }
 0x723   : > { %v7583_v57 = vmax.f32 %v7581_v24, %v7582_v28  ;;  %v7596_v23 = vrot.slane %v7595_v40, 2  ;;  %v7531_v27 = vrot.slane %v7530_v26, 4  ;;  %v7537_v25 = vsel %vm911_vm1, %v6733_v6, -inf }
 0x724   : > { %v7590_v38 = vmax.f32 %v7588_v5, %v7589_v53  ;;  %v7603_v47 = vrot.slane %v7602_v8, 2  ;;  %v7525_v12 = vmax.f32 %v7523_v21, %v7524_v17  ;;  %v7538_v60 = vrot.slane %v7537_v25, 4 }
 0x725   : > { %v7584_v34 = vrot.slane %v7583_v57, 1  ;;  %v7597_v10 = vmax.f32 %v7595_v40, %v7596_v23  ;;  %v7532_v54 = vmax.f32 %v7530_v26, %v7531_v27  ;;  %v7544_v3 = vsel %vm911_vm1, %v6735_v20, -inf }
 0x726   : > { %v7591_v52 = vrot.slane %v7590_v38, 1  ;;  %v7604_v15 = vmax.f32 %v7602_v8, %v7603_v47  ;;  %v7526_v4 = vrot.slane %v7525_v12, 2  ;;  %v7539_v14 = vmax.f32 %v7537_v25, %v7538_v60 }
 0x727   : > { %v7585_v32 = vmax.f32 %v7583_v57, %v7584_v34  ;;  %v7598_v48 = vrot.slane %v7597_v10, 1  ;;  %v7533_v59 = vrot.slane %v7532_v54, 2  ;;  %v7545_v63 = vrot.slane %v7544_v3, 4 }
 0x728   : > { %v7592_v36 = vmax.f32 %v7590_v38, %v7591_v52  ;;  %v7605_v55 = vrot.slane %v7604_v15, 1  ;;  %v7527_v44 = vmax.f32 %v7525_v12, %v7526_v4  ;;  %v7540_v45 = vrot.slane %v7539_v14, 2 }
 0x729   : > { %v7599_v31 = vmax.f32 %v7597_v10, %v7598_v48  ;;  %v7534_v35 = vmax.f32 %v7532_v54, %v7533_v59  ;;  %v7546_v43 = vmax.f32 %v7544_v3, %v7545_v63  ;;  %v6434_v33 = vsel %vm6370_vm15, %v21237_v41, %v21245_v2 }
 0x72a   : > { %v7606_v11 = vmax.f32 %v7604_v15, %v7605_v55  ;;  %v7528_v16 = vrot.slane %v7527_v44, 1  ;;  %v7541_v24 = vmax.f32 %v7539_v14, %v7540_v45  ;;  %6466 = vst.msk [vmem:[%s20998_s23 + $0x78] sm:$0xff] %vm908_vm0, %v6434_v33  ;;  %v6770_v22 = vcombine.high %v6434_v33, %v6434_v33 }
 0x72b   : > { %v7535_v51 = vrot.slane %v7534_v35, 1  ;;  %v7547_v6 = vrot.slane %v7546_v43, 2  ;;  %v6777_v56 = vrot.slane %v6434_v33, %v20990_v37  ;;  %v6336_v5 = vadd.f32 %v21229_v29, %v21070_v49 }
 0x72c   : > { %v7529_v61 = vmax.f32 %v7527_v44, %v7528_v16  ;;  %v7542_v7 = vrot.slane %v7541_v24, 1  ;;  %v6784_v28 = vrot.slane %v6770_v22, %v20990_v37  ;;  %v6341_v41 = vadd.f32 %v21229_v29, %v21080_v1  ;;  %v21283_v1 = vpop.f32.mrb[28].mxu1 }
 0x72d   : > { %v7536_v2 = vmax.f32 %v7534_v35, %v7535_v51  ;;  %v7548_v40 = vmax.f32 %v7546_v43, %v7547_v6  ;;  %v6785_v20 = vcombine.high %v6777_v56, %v6777_v56  ;;  %v7607_v21 = vsel %vm911_vm1, %v6777_v56, -inf  ;;  %v21288_v55 = vpop.f32.mrb[29].mxu1 }
 0x72e   : > { %v7543_v53 = vmax.f32 %v7541_v24, %v7542_v7  ;;  %v8107_v8 = vmax.f32 %v7529_v61, %v7585_v32  ;;  %v6786_v17 = vcombine.high %v6784_v28, %v6784_v28  ;;  %v7608_v26 = vrot.slane %v7607_v21, 4 }
 0x72f   : > { %v7549_v57 = vrot.slane %v7548_v40, 1  ;;  %v8108_v23 = vmax.f32 %v7536_v2, %v7592_v36  ;;  %v7614_v49 = vsel %vm911_vm1, %v6785_v20, -inf  ;;  %v7621_v27 = vsel %vm911_vm1, %v6784_v28, -inf }
 0x730   : > { %v8109_v25 = vmax.f32 %v7543_v53, %v7599_v31  ;;  %v7609_v38 = vmax.f32 %v7607_v21, %v7608_v26  ;;  %v7615_v47 = vrot.slane %v7614_v49, 4  ;;  %v7622_v12 = vrot.slane %v7621_v27, 4 }
 0x731   : > { %v7550_v60 = vmax.f32 %v7548_v40, %v7549_v57  ;;  %v8263_v34 = vsel %vm8235_vm7, %v8108_v23, %v8107_v8  ;;  %v7628_v10 = vsel %vm911_vm1, %v6786_v17, -inf  ;;  %vm6368_vm2 = vcmp.gt.f32.partialorder %v6336_v5, 0.0 }
 0x732   : > { %v8264_v54 = vsel %vm8237_vm8, %v8109_v25, %v8263_v34  ;;  %v7610_v3 = vrot.slane %v7609_v38, 2  ;;  %v7616_v52 = vmax.f32 %v7614_v49, %v7615_v47  ;;  %v7623_v15 = vmax.f32 %v7621_v27, %v7622_v12 }
 0x733   : > { %v8110_v4 = vmax.f32 %v7550_v60, %v7606_v11  ;;  %v7629_v14 = vrot.slane %v7628_v10, 4  ;;  %v6400_v32 = vmul.f32 0.01, %v6336_v5  ;;  %vm6373_vm3 = vcmp.gt.f32.partialorder %v6341_v41, 0.0 }
 0x734   : > { %v7611_v48 = vmax.f32 %v7609_v38, %v7610_v3  ;;  %v7617_v59 = vrot.slane %v7616_v52, 2  ;;  %v7624_v63 = vrot.slane %v7623_v15, 2  ;;  %v6405_v36 = vmul.f32 0.01, %v6341_v41 }
 0x735   : > { %v7630_v44 = vmax.f32 %v7628_v10, %v7629_v14  ;;  %v6432_v45 = vsel %vm6368_vm2, %v6336_v5, %v6400_v32  ;;  %v21291_v31 = vsel %vm8239_vm9, %v8110_v4, %v8264_v54  ;;  %v21299_v51 = vadd.f32 %v21229_v29, %v21084_v9 }
 0x736   : > { %v7612_v35 = vrot.slane %v7611_v48, 1  ;;  %v7618_v43 = vmax.f32 %v7616_v52, %v7617_v59  ;;  %v7625_v33 = vmax.f32 %v7623_v15, %v7624_v63  ;;  %6464 = vst.msk [vmem:[%s20998_s23 + $0x68] sm:$0xff] %vm908_vm0, %v6432_v45  ;;  %v6736_v11 = vcombine.high %v6432_v45, %v6432_v45 }
 0x737   : > { %v7631_v16 = vrot.slane %v7630_v44, 2  ;;  %v6743_v24 = vrot.slane %v6432_v45, %v20990_v37  ;;  %v6437_v22 = vsel %vm6373_vm3, %v6341_v41, %v6405_v36  ;;  %vm6371_vm4 = vcmp.gt.f32.partialorder %v21299_v51, 0.0 }
 0x738   : > { %v21301_v6 = vmax.f32 %v7611_v48, %v7612_v35  ;;  %v7619_v56 = vrot.slane %v7618_v43, 1  ;;  %v7626_v5 = vrot.slane %v7625_v33, 1  ;;  %v6750_v61 = vrot.slane %v6736_v11, %v20990_v37  ;;  %6469 = vst.msk [vmem:[%s20998_s23 + $0x90] sm:$0xff] %vm908_vm0, %v6437_v22 }
 0x739   : > { %v7632_v7 = vmax.f32 %v7630_v44, %v7631_v16  ;;  %v6751_v28 = vcombine.high %v6743_v24, %v6743_v24  ;;  %v7551_v2 = vsel %vm911_vm1, %v6743_v24, -inf  ;;  %v6821_v40 = vcombine.high %v6437_v22, %v6437_v22  ;;  %v21322_v16 = vpop.f32.mrb[30].mxu1 }
 0x73a   : > { %v21307_v20 = vmax.f32 %v7618_v43, %v7619_v56  ;;  %v21309_v41 = vmax.f32 %v7625_v33, %v7626_v5  ;;  %v6752_v21 = vcombine.high %v6750_v61, %v6750_v61  ;;  %v7552_v9 = vrot.slane %v7551_v2, 4 }
 0x73b   : > { %v7633_v53 = vrot.slane %v7632_v7, 1  ;;  %v7558_v8 = vsel %vm911_vm1, %v6751_v28, -inf  ;;  %v7565_v17 = vsel %vm911_vm1, %v6750_v61, -inf  ;;  %v6828_v26 = vrot.slane %v6437_v22, %v20990_v37 }
 0x73c   : > { %v7553_v57 = vmax.f32 %v7551_v2, %v7552_v9  ;;  %v7559_v23 = vrot.slane %v7558_v8, 4  ;;  %v7566_v49 = vrot.slane %v7565_v17, 4  ;;  %v7572_v27 = vsel %vm911_vm1, %v6752_v21, -inf }
 0x73d   : > { %v21315_v25 = vmax.f32 %v7632_v7, %v7633_v53  ;;  %v7573_v38 = vrot.slane %v7572_v27, 4  ;;  %v6835_v47 = vrot.slane %v6821_v40, %v20990_v37  ;;  %v6836_v12 = vcombine.high %v6828_v26, %v6828_v26 }
 0x73e   : > { %v7554_v60 = vrot.slane %v7553_v57, 2  ;;  %v7560_v34 = vmax.f32 %v7558_v8, %v7559_v23  ;;  %v7567_v10 = vmax.f32 %v7565_v17, %v7566_v49  ;;  %v7691_v54 = vsel %vm911_vm1, %v6828_v26, -inf }
 0x73f   : > { %v7574_v3 = vmax.f32 %v7572_v27, %v7573_v38  ;;  %v6837_v52 = vcombine.high %v6835_v47, %v6835_v47  ;;  %v7692_v15 = vrot.slane %v7691_v54, 4  ;;  %v7698_v4 = vsel %vm911_vm1, %v6836_v12, -inf }
 0x740   : > { %v7555_v14 = vmax.f32 %v7553_v57, %v7554_v60  ;;  %v7561_v32 = vrot.slane %v7560_v34, 2  ;;  %v7568_v48 = vrot.slane %v7567_v10, 2  ;;  %v7699_v59 = vrot.slane %v7698_v4, 4 }
 0x741   : > { %v7575_v63 = vrot.slane %v7574_v3, 2  ;;  %v7693_v36 = vmax.f32 %v7691_v54, %v7692_v15  ;;  %v7705_v44 = vsel %vm911_vm1, %v6835_v47, -inf  ;;  %v7712_v45 = vsel %vm911_vm1, %v6837_v52, -inf }
 0x742   : > { %v7556_v35 = vrot.slane %v7555_v14, 1  ;;  %v7562_v43 = vmax.f32 %v7560_v34, %v7561_v32  ;;  %v7569_v33 = vmax.f32 %v7567_v10, %v7568_v48  ;;  %v7700_v11 = vmax.f32 %v7698_v4, %v7699_v59  ;;  %v21330_v34 = vpop.f32.mrb[31].mxu1 }
 0x743   : > { %v7576_v24 = vmax.f32 %v7574_v3, %v7575_v63  ;;  %v7694_v22 = vrot.slane %v7693_v36, 2  ;;  %v7706_v56 = vrot.slane %v7705_v44, 4  ;;  %v7713_v5 = vrot.slane %v7712_v45, 4 }
 0x744   : > { %v7557_v61 = vmax.f32 %v7555_v14, %v7556_v35  ;;  %v7563_v7 = vrot.slane %v7562_v43, 1  ;;  %v7570_v28 = vrot.slane %v7569_v33, 1  ;;  %v7701_v2 = vrot.slane %v7700_v11, 2 }
 0x745   : > { %v7577_v40 = vrot.slane %v7576_v24, 1  ;;  %v7695_v21 = vmax.f32 %v7693_v36, %v7694_v22  ;;  %v7707_v9 = vmax.f32 %v7705_v44, %v7706_v56  ;;  %v7714_v53 = vmax.f32 %v7712_v45, %v7713_v5 }
 0x746   : > { %v7564_v8 = vmax.f32 %v7562_v43, %v7563_v7  ;;  %v7571_v17 = vmax.f32 %v7569_v33, %v7570_v28  ;;  %v8111_v26 = vmax.f32 %v7557_v61, %v21301_v6  ;;  %v7702_v57 = vmax.f32 %v7700_v11, %v7701_v2 }
 0x747   : > { %v7578_v23 = vmax.f32 %v7576_v24, %v7577_v40  ;;  %v7696_v49 = vrot.slane %v7695_v21, 1  ;;  %v7708_v27 = vrot.slane %v7707_v9, 2  ;;  %v7715_v38 = vrot.slane %v7714_v53, 2 }
 0x748   : > { %v8112_v47 = vmax.f32 %v7564_v8, %v21307_v20  ;;  %v8113_v12 = vmax.f32 %v7571_v17, %v21309_v41  ;;  %v8266_v60 = vsel %vm8241_vm10, %v8111_v26, %v21291_v31  ;;  %v7703_v54 = vrot.slane %v7702_v57, 1 }
 0x749   : > { %v8114_v10 = vmax.f32 %v7578_v23, %v21315_v25  ;;  %v7709_v6 = vmax.f32 %v7707_v9, %v7708_v27  ;;  %v7716_v3 = vmax.f32 %v7714_v53, %v7715_v38  ;;  %v21334_v15 = vmax.f32 %v7695_v21, %v7696_v49 }
 0x74a   : > { %v8267_v52 = vsel %vm8243_vm11, %v8112_v47, %v8266_v60  ;;  %v6403_v20 = vmul.f32 0.01, %v21299_v51  ;;  %v6342_v41 = vadd.f32 %v21229_v29, %v21101_v46  ;;  %v6340_v25 = vadd.f32 %v21229_v29, %v21112_v18 }
 0x74b   : > { %v8268_v31 = vsel %vm8245_vm12, %v8113_v12, %v8267_v52  ;;  %v7710_v4 = vrot.slane %v7709_v6, 1  ;;  %v7717_v14 = vrot.slane %v7716_v3, 1  ;;  %v21345_v63 = vmax.f32 %v7702_v57, %v7703_v54 }
 0x74c   : > { %v8269_v32 = vsel %vm8247_vm14, %v8114_v10, %v8268_v31  ;;  %v6435_v48 = vsel %vm6371_vm4, %v21299_v51, %v6403_v20  ;;  %vm6374_vm6 = vcmp.gt.f32.partialorder %v6342_v41, 0.0  ;;  %v6406_v59 = vmul.f32 0.01, %v6342_v41 }
 0x74d   : > { %8309 = vst.msk [vmem:[#allocation2 + $0x61] sm:$0xff] %vm908_vm0, %v8269_v32  ;;  %v21347_v36 = vmax.f32 %v7709_v6, %v7710_v4  ;;  %6467 = vst.msk [vmem:[%s20998_s23 + $0x80] sm:$0xff] %vm908_vm0, %v6435_v48  ;;  %v6787_v46 = vcombine.high %v6435_v48, %v6435_v48  ;;  %v6794_v44 = vrot.slane %v6435_v48, %v20990_v37  ;;  %vm6372_vm15 = vcmp.gt.f32.partialorder %v6340_v25, 0.0 }
 0x74e   : > { %v21352_v45 = vmax.f32 %v7716_v3, %v7717_v14  ;;  %v6438_v18 = vsel %vm6374_vm6, %v6342_v41, %v6406_v59  ;;  %v6404_v51 = vmul.f32 0.01, %v6340_v25  ;;  %v21363_v5 = vadd.f32 %v21229_v29, %v21138_v39 }
 0x74f   : > { %v6801_v35 = vrot.slane %v6787_v46, %v20990_v37  ;;  %v6802_v43 = vcombine.high %v6794_v44, %v6794_v44  ;;  %v7635_v33 = vsel %vm911_vm1, %v6794_v44, -inf  ;;  %6470 = vst.msk [vmem:[%s20998_s23 + $0x98] sm:$0xff] %vm908_vm0, %v6438_v18  ;;  %v6838_v11 = vcombine.high %v6438_v18, %v6438_v18 }
 0x750   : > { %v7636_v24 = vrot.slane %v7635_v33, 4  ;;  %v6845_v22 = vrot.slane %v6438_v18, %v20990_v37  ;;  %v21359_v56 = vsel %vm6372_vm15, %v6340_v25, %v6404_v51  ;;  %vm6377_vm2 = vcmp.gt.f32.partialorder %v21363_v5, 0.0 }
 0x751   : > { %v6803_v61 = vcombine.high %v6801_v35, %v6801_v35  ;;  %v7642_v7 = vsel %vm911_vm1, %v6802_v43, -inf  ;;  %v7649_v28 = vsel %vm911_vm1, %v6801_v35, -inf  ;;  %v6852_v2 = vrot.slane %v6838_v11, %v20990_v37  ;;  %6468 = vst.msk [vmem:[%s20998_s23 + $0x88] sm:$0xff] %vm908_vm0, %v21359_v56 }
 0x752   : > { %v7637_v40 = vmax.f32 %v7635_v33, %v7636_v24  ;;  %v7643_v21 = vrot.slane %v7642_v7, 4  ;;  %v7650_v9 = vrot.slane %v7649_v28, 4  ;;  %v6853_v53 = vcombine.high %v6845_v22, %v6845_v22 }
 0x753   : > { %v7656_v8 = vsel %vm911_vm1, %v6803_v61, -inf  ;;  %v6854_v17 = vcombine.high %v6852_v2, %v6852_v2  ;;  %v7719_v39 = vsel %vm911_vm1, %v6845_v22, -inf  ;;  %v7733_v26 = vsel %vm911_vm1, %v6852_v2, -inf }
 0x754   : > { %v7638_v57 = vrot.slane %v7637_v40, 2  ;;  %v7644_v23 = vmax.f32 %v7642_v7, %v7643_v21  ;;  %v7651_v49 = vmax.f32 %v7649_v28, %v7650_v9  ;;  %v7657_v27 = vrot.slane %v7656_v8, 4 }
 0x755   : > { %v7720_v38 = vrot.slane %v7719_v39, 4  ;;  %v7726_v47 = vsel %vm911_vm1, %v6853_v53, -inf  ;;  %v7734_v12 = vrot.slane %v7733_v26, 4  ;;  %v7740_v60 = vsel %vm911_vm1, %v6854_v17, -inf }
 0x756   : > { %v7639_v10 = vmax.f32 %v7637_v40, %v7638_v57  ;;  %v7645_v54 = vrot.slane %v7644_v23, 2  ;;  %v7652_v6 = vrot.slane %v7651_v49, 2  ;;  %v7658_v3 = vmax.f32 %v7656_v8, %v7657_v27 }
 0x757   : > { %v7721_v52 = vmax.f32 %v7719_v39, %v7720_v38  ;;  %v7727_v20 = vrot.slane %v7726_v47, 4  ;;  %v7735_v41 = vmax.f32 %v7733_v26, %v7734_v12  ;;  %v7741_v31 = vrot.slane %v7740_v60, 4 }
 0x758   : > { %v7640_v4 = vrot.slane %v7639_v10, 1  ;;  %v7646_v14 = vmax.f32 %v7644_v23, %v7645_v54  ;;  %v7653_v25 = vmax.f32 %v7651_v49, %v7652_v6  ;;  %v7659_v32 = vrot.slane %v7658_v3, 2 }
 0x759   : > { %v7722_v48 = vrot.slane %v7721_v52, 2  ;;  %v7728_v59 = vmax.f32 %v7726_v47, %v7727_v20  ;;  %v7736_v46 = vrot.slane %v7735_v41, 2  ;;  %v7742_v44 = vmax.f32 %v7740_v60, %v7741_v31 }
 0x75a   : > { %v7641_v18 = vmax.f32 %v7639_v10, %v7640_v4  ;;  %v7647_v51 = vrot.slane %v7646_v14, 1  ;;  %v7654_v35 = vrot.slane %v7653_v25, 1  ;;  %v7660_v43 = vmax.f32 %v7658_v3, %v7659_v32 }
 0x75b   : > { %v7723_v33 = vmax.f32 %v7721_v52, %v7722_v48  ;;  %v7729_v11 = vrot.slane %v7728_v59, 2  ;;  %v7737_v24 = vmax.f32 %v7735_v41, %v7736_v46  ;;  %v7743_v22 = vrot.slane %v7742_v44, 2 }
 0x75c   : > { %v7648_v61 = vmax.f32 %v7646_v14, %v7647_v51  ;;  %v7655_v7 = vmax.f32 %v7653_v25, %v7654_v35  ;;  %v7661_v28 = vrot.slane %v7660_v43, 1  ;;  %v8115_v2 = vmax.f32 %v7641_v18, %v21334_v15 }
 0x75d   : > { %v7724_v40 = vrot.slane %v7723_v33, 1  ;;  %v7730_v21 = vmax.f32 %v7728_v59, %v7729_v11  ;;  %v7738_v9 = vrot.slane %v7737_v24, 1  ;;  %v7744_v53 = vmax.f32 %v7742_v44, %v7743_v22 }
 0x75e   : > { %v7662_v8 = vmax.f32 %v7660_v43, %v7661_v28  ;;  %v8116_v17 = vmax.f32 %v7648_v61, %v21345_v63  ;;  %v8117_v39 = vmax.f32 %v7655_v7, %v21347_v36  ;;  %v6804_v26 = vcombine.high %v21359_v56, %v21359_v56 }
 0x75f   : > { %v21382_v57 = vmax.f32 %v7723_v33, %v7724_v40  ;;  %v7731_v23 = vrot.slane %v7730_v21, 1  ;;  %v21384_v49 = vmax.f32 %v7737_v24, %v7738_v9  ;;  %v7745_v27 = vrot.slane %v7744_v53, 1 }
 0x760   : > { %v8118_v15 = vmax.f32 %v7662_v8, %v21352_v45  ;;  %v8270_v38 = vsel %vm8235_vm7, %v8116_v17, %v8115_v2  ;;  %v6811_v47 = vrot.slane %v21359_v56, %v20990_v37  ;;  %v6818_v63 = vrot.slane %v6804_v26, %v20990_v37 }
 0x761   : > { %v8271_v36 = vsel %vm8237_vm8, %v8117_v39, %v8270_v38  ;;  %v21392_v12 = vmax.f32 %v7730_v21, %v7731_v23  ;;  %v21394_v60 = vmax.f32 %v7744_v53, %v7745_v27  ;;  %v6409_v10 = vmul.f32 0.01, %v21363_v5 }
 0x762   : > { %v6819_v54 = vcombine.high %v6811_v47, %v6811_v47  ;;  %v6820_v6 = vcombine.high %v6818_v63, %v6818_v63  ;;  %v7663_v45 = vsel %vm911_vm1, %v6811_v47, -inf  ;;  %v7677_v3 = vsel %vm911_vm1, %v6818_v63, -inf }
 0x763   : > { %v7664_v52 = vrot.slane %v7663_v45, 4  ;;  %v7678_v20 = vrot.slane %v7677_v3, 4  ;;  %v8272_v56 = vsel %vm8239_vm9, %v8118_v15, %v8271_v36  ;;  %v6441_v41 = vsel %vm6377_vm2, %v21363_v5, %v6409_v10 }
 0x764   : > { %v7670_v31 = vsel %vm911_vm1, %v6819_v54, -inf  ;;  %v7684_v4 = vsel %vm911_vm1, %v6820_v6, -inf  ;;  %6473 = vst.msk [vmem:[%s20998_s23 + $0xb0] sm:$0xff] %vm908_vm0, %v6441_v41  ;;  %v6889_v14 = vcombine.high %v6441_v41, %v6441_v41  ;;  %v6896_v25 = vrot.slane %v6441_v41, %v20990_v37 }
 0x765   : > { %v7665_v32 = vmax.f32 %v7663_v45, %v7664_v52  ;;  %v7671_v48 = vrot.slane %v7670_v31, 4  ;;  %v7679_v59 = vmax.f32 %v7677_v3, %v7678_v20  ;;  %v7685_v46 = vrot.slane %v7684_v4, 4 }
 0x766   : > { %v6903_v44 = vrot.slane %v6889_v14, %v20990_v37  ;;  %v6904_v18 = vcombine.high %v6896_v25, %v6896_v25  ;;  %v7803_v51 = vsel %vm911_vm1, %v6896_v25, -inf  ;;  %v6343_v5 = vadd.f32 %v21229_v29, %v21141_v13  ;;  %v21417_v14 = vld [vmem:[#allocation3] sm:$0xf] }
 0x767   : > { %v7666_v35 = vrot.slane %v7665_v32, 2  ;;  %v7672_v43 = vmax.f32 %v7670_v31, %v7671_v48  ;;  %v7680_v33 = vrot.slane %v7679_v59, 2  ;;  %v7686_v11 = vmax.f32 %v7684_v4, %v7685_v46  ;;  %18838 = vmatprep.subr.msk.bf16.mxu0 %vm3881_vm5, %v21417_v14 }
 0x768   : > { %v6905_v24 = vcombine.high %v6903_v44, %v6903_v44  ;;  %v7804_v22 = vrot.slane %v7803_v51, 4  ;;  %v7810_v61 = vsel %vm911_vm1, %v6904_v18, -inf  ;;  %v7817_v7 = vsel %vm911_vm1, %v6903_v44, -inf }
 0x769   : > { %v7667_v28 = vmax.f32 %v7665_v32, %v7666_v35  ;;  %v7673_v2 = vrot.slane %v7672_v43, 2  ;;  %v7681_v40 = vmax.f32 %v7679_v59, %v7680_v33  ;;  %v7687_v21 = vrot.slane %v7686_v11, 2 }
 0x76a   : > { %v7805_v9 = vmax.f32 %v7803_v51, %v7804_v22  ;;  %v7811_v53 = vrot.slane %v7810_v61, 4  ;;  %v7818_v8 = vrot.slane %v7817_v7, 4  ;;  %v7824_v17 = vsel %vm911_vm1, %v6905_v24, -inf }
 0x76b   : > { %v7668_v13 = vrot.slane %v7667_v28, 1  ;;  %v7674_v39 = vmax.f32 %v7672_v43, %v7673_v2  ;;  %v7682_v26 = vrot.slane %v7681_v40, 1  ;;  %v7688_v23 = vmax.f32 %v7686_v11, %v7687_v21 }
 0x76c   : > { %v7806_v27 = vrot.slane %v7805_v9, 2  ;;  %v7812_v15 = vmax.f32 %v7810_v61, %v7811_v53  ;;  %v7819_v38 = vmax.f32 %v7817_v7, %v7818_v8  ;;  %v7825_v47 = vrot.slane %v7824_v17, 4 }
 0x76d   : > { %v7669_v63 = vmax.f32 %v7667_v28, %v7668_v13  ;;  %v7675_v36 = vrot.slane %v7674_v39, 1  ;;  %v7683_v10 = vmax.f32 %v7681_v40, %v7682_v26  ;;  %v7689_v54 = vrot.slane %v7688_v23, 1 }
 0x76e   : > { %v7807_v6 = vmax.f32 %v7805_v9, %v7806_v27  ;;  %v7813_v45 = vrot.slane %v7812_v15, 2  ;;  %v7820_v3 = vrot.slane %v7819_v38, 2  ;;  %v7826_v52 = vmax.f32 %v7824_v17, %v7825_v47 }
 0x76f   : > { %v7676_v20 = vmax.f32 %v7674_v39, %v7675_v36  ;;  %v7690_v41 = vmax.f32 %v7688_v23, %v7689_v54  ;;  %v8119_v31 = vmax.f32 %v7669_v63, %v21382_v57  ;;  %v8121_v4 = vmax.f32 %v7683_v10, %v21384_v49 }
 0x770   : > { %v7808_v25 = vrot.slane %v7807_v6, 1  ;;  %v7814_v32 = vmax.f32 %v7812_v15, %v7813_v45  ;;  %v7821_v48 = vmax.f32 %v7819_v38, %v7820_v3  ;;  %v7827_v59 = vrot.slane %v7826_v52, 2 }
 0x771   : > { %v8120_v46 = vmax.f32 %v7676_v20, %v21392_v12  ;;  %v8122_v44 = vmax.f32 %v7690_v41, %v21394_v60  ;;  %v8273_v18 = vsel %vm8241_vm10, %v8119_v31, %v8272_v56  ;;  %vm6375_vm3 = vcmp.gt.f32.partialorder %v6343_v5, 0.0 }
 0x772   : > { %v7815_v51 = vrot.slane %v7814_v32, 1  ;;  %v7822_v35 = vrot.slane %v7821_v48, 1  ;;  %v7828_v57 = vmax.f32 %v7826_v52, %v7827_v59  ;;  %v6407_v43 = vmul.f32 0.01, %v6343_v5 }
 0x773   : > { %v8274_v49 = vsel %vm8243_vm11, %v8120_v46, %v8273_v18  ;;  %v6346_v33 = vadd.f32 %v21229_v29, %v21172_v42  ;;  %v6344_v11 = vadd.f32 %v21229_v29, %v21183_v30  ;;  %v21430_v24 = vmax.f32 %v7807_v6, %v7808_v25 }
 0x774   : > { %v8275_v12 = vsel %vm8245_vm12, %v8121_v4, %v8274_v49  ;;  %v21432_v60 = vmax.f32 %v7814_v32, %v7815_v51  ;;  %v7829_v56 = vrot.slane %v7828_v57, 1  ;;  %v6439_v61 = vsel %vm6375_vm3, %v6343_v5, %v6407_v43 }
 0x775   : > { %v8276_v22 = vsel %vm8247_vm14, %v8122_v44, %v8275_v12  ;;  %vm6378_vm4 = vcmp.gt.f32.partialorder %v6346_v33, 0.0  ;;  %v6410_v7 = vmul.f32 0.01, %v6346_v33  ;;  %v21436_v28 = vmax.f32 %v7821_v48, %v7822_v35  ;;  %6471 = vst.msk [vmem:[%s20998_s23 + $0xa0] sm:$0xff] %vm908_vm0, %v6439_v61 }
 0x776   : > { %8310 = vst.msk [vmem:[#allocation2 + $0x79] sm:$0xff] %vm908_vm0, %v8276_v22  ;;  %v6855_v42 = vcombine.high %v6439_v61, %v6439_v61  ;;  %v6862_v30 = vrot.slane %v6439_v61, %v20990_v37  ;;  %vm6376_vm6 = vcmp.gt.f32.partialorder %v6344_v11, 0.0  ;;  %v21441_v2 = vmax.f32 %v7828_v57, %v7829_v56 }
 0x777   : > { %v6442_v40 = vsel %vm6378_vm4, %v6346_v33, %v6410_v7  ;;  %v6408_v21 = vmul.f32 0.01, %v6344_v11  ;;  %vm8149_vm15 = vcmask 123904   ;;  %v21456_v26 = vadd.f32 %v21229_v29, %v21221_v62 }
 0x778   : > { %v6869_v5 = vrot.slane %v6855_v42, %v20990_v37  ;;  %v6870_v9 = vcombine.high %v6862_v30, %v6862_v30  ;;  %v7747_v53 = vsel %vm911_vm1, %v6862_v30, -inf  ;;  %6474 = vst.msk [vmem:[%s20998_s23 + $0xb8] sm:$0xff] %vm908_vm0, %v6442_v40  ;;  %v6906_v8 = vcombine.high %v6442_v40, %v6442_v40 }
 0x779   : > { %8150 = vst.msk [vmem:[#allocation2 + $0x8] sm:$0x3] %vm8149_vm15, %v19495_v0  ;;  %8153 = vst.msk [vmem:[#allocation2 + $0xe0] sm:$0x3] %vm8149_vm15, %v19495_v0  ;;  %v7748_v17 = vrot.slane %v7747_v53, 4  ;;  %v6913_v13 = vrot.slane %v6442_v40, %v20990_v37  ;;  %v21452_v39 = vsel %vm6376_vm6, %v6344_v11, %v6408_v21  ;;  %vm6381_vm2 = vcmp.gt.f32.partialorder %v21456_v26, 0.0 }
 0x77a   : > { %v6871_v23 = vcombine.high %v6869_v5, %v6869_v5  ;;  %v7754_v27 = vsel %vm911_vm1, %v6870_v9, -inf  ;;  %v7761_v15 = vsel %vm911_vm1, %v6869_v5, -inf  ;;  %v6920_v38 = vrot.slane %v6906_v8, %v20990_v37  ;;  %6472 = vst.msk [vmem:[%s20998_s23 + $0xa8] sm:$0xff] %vm908_vm0, %v21452_v39 }
 0x77b   : > { %v7749_v47 = vmax.f32 %v7747_v53, %v7748_v17  ;;  %v7755_v63 = vrot.slane %v7754_v27, 4  ;;  %v7762_v36 = vrot.slane %v7761_v15, 4  ;;  %v6921_v10 = vcombine.high %v6913_v13, %v6913_v13 }
 0x77c   : > { %v7768_v54 = vsel %vm911_vm1, %v6871_v23, -inf  ;;  %v6922_v6 = vcombine.high %v6920_v38, %v6920_v38  ;;  %v7831_v62 = vsel %vm911_vm1, %v6913_v13, -inf  ;;  %v7845_v45 = vsel %vm911_vm1, %v6920_v38, -inf }
 0x77d   : > { %v7750_v3 = vrot.slane %v7749_v47, 2  ;;  %v7756_v52 = vmax.f32 %v7754_v27, %v7755_v63  ;;  %v7763_v20 = vmax.f32 %v7761_v15, %v7762_v36  ;;  %v7769_v41 = vrot.slane %v7768_v54, 4 }
 0x77e   : > { %v7832_v31 = vrot.slane %v7831_v62, 4  ;;  %v7838_v4 = vsel %vm911_vm1, %v6921_v10, -inf  ;;  %v7846_v25 = vrot.slane %v7845_v45, 4  ;;  %v7852_v32 = vsel %vm911_vm1, %v6922_v6, -inf }
 0x77f   : > { %v7751_v48 = vmax.f32 %v7749_v47, %v7750_v3  ;;  %v7757_v59 = vrot.slane %v7756_v52, 2  ;;  %v7764_v46 = vrot.slane %v7763_v20, 2  ;;  %v7770_v44 = vmax.f32 %v7768_v54, %v7769_v41 }
 0x780   : > { %v7833_v18 = vmax.f32 %v7831_v62, %v7832_v31  ;;  %v7839_v51 = vrot.slane %v7838_v4, 4  ;;  %v7847_v35 = vmax.f32 %v7845_v45, %v7846_v25  ;;  %v7853_v57 = vrot.slane %v7852_v32, 4  ;;  %v8327_v6 = vld [vmem:[#allocation2 + $0x1] sm:$0xff]  ;;  %v21474_v62 = vld [vmem:[#allocation2 + $0x19] sm:$0xff] }
 0x781   : > { %v7752_v49 = vrot.slane %v7751_v48, 1  ;;  %v7758_v43 = vmax.f32 %v7756_v52, %v7757_v59  ;;  %v7765_v33 = vmax.f32 %v7763_v20, %v7764_v46  ;;  %v7771_v11 = vrot.slane %v7770_v44, 2 }
 0x782   : > { %v7834_v12 = vrot.slane %v7833_v18, 2  ;;  %v7840_v56 = vmax.f32 %v7838_v4, %v7839_v51  ;;  %v7848_v22 = vrot.slane %v7847_v35, 2  ;;  %v7854_v61 = vmax.f32 %v7852_v32, %v7853_v57 }
 0x783   : > { %v7753_v7 = vmax.f32 %v7751_v48, %v7752_v49  ;;  %v7759_v42 = vrot.slane %v7758_v43, 1  ;;  %v7766_v30 = vrot.slane %v7765_v33, 1  ;;  %v7772_v40 = vmax.f32 %v7770_v44, %v7771_v11  ;;  %v21502_v49 = vld [vmem:[%s23017_s8] ss:$0 sm:$0xff] }
 0x784   : > { %v7835_v21 = vmax.f32 %v7833_v18, %v7834_v12  ;;  %v7841_v5 = vrot.slane %v7840_v56, 2  ;;  %v7849_v9 = vmax.f32 %v7847_v35, %v7848_v22  ;;  %v7855_v53 = vrot.slane %v7854_v61, 2 }
 0x785   : > { %v7760_v8 = vmax.f32 %v7758_v43, %v7759_v42  ;;  %v7767_v17 = vmax.f32 %v7765_v33, %v7766_v30  ;;  %v7773_v13 = vrot.slane %v7772_v40, 1  ;;  %v8123_v23 = vmax.f32 %v7753_v7, %v21430_v24 }
 0x786   : > { %v7836_v27 = vrot.slane %v7835_v21, 1  ;;  %v7842_v15 = vmax.f32 %v7840_v56, %v7841_v5  ;;  %v7850_v38 = vrot.slane %v7849_v9, 1  ;;  %v7856_v47 = vmax.f32 %v7854_v61, %v7855_v53 }
 0x787   : > { %v7774_v63 = vmax.f32 %v7772_v40, %v7773_v13  ;;  %v8124_v36 = vmax.f32 %v7760_v8, %v21432_v60  ;;  %v8125_v10 = vmax.f32 %v7767_v17, %v21436_v28  ;;  %v6872_v54 = vcombine.high %v21452_v39, %v21452_v39 }
 0x788   : > { %v21476_v45 = vmax.f32 %v7835_v21, %v7836_v27  ;;  %v7843_v3 = vrot.slane %v7842_v15, 1  ;;  %v21478_v52 = vmax.f32 %v7849_v9, %v7850_v38  ;;  %v6879_v60 = vrot.slane %v21452_v39, %v20990_v37 }
 0x789   : > { %v8126_v24 = vmax.f32 %v7774_v63, %v21441_v2  ;;  %v8277_v20 = vsel %vm8235_vm7, %v8124_v36, %v8123_v23  ;;  %v6886_v28 = vrot.slane %v6872_v54, %v20990_v37  ;;  %v7857_v4 = vrot.slane %v7856_v47, 1 }
 0x78a   : > { %v8278_v41 = vsel %vm8237_vm8, %v8125_v10, %v8277_v20  ;;  %v21487_v31 = vmax.f32 %v7842_v15, %v7843_v3  ;;  %v8335_v25 = vpack.c.bf16 %v21474_v62, %v8327_v6  ;;  %v6887_v32 = vcombine.high %v6879_v60, %v6879_v60 }
 0x78b   : > { %v6888_v48 = vcombine.high %v6886_v28, %v6886_v28  ;;  %v7775_v59 = vsel %vm911_vm1, %v6879_v60, -inf  ;;  %v7789_v2 = vsel %vm911_vm1, %v6886_v28, -inf  ;;  %v8279_v18 = vsel %vm8239_vm9, %v8126_v24, %v8278_v41 }
 0x78c   : > { %v7776_v46 = vrot.slane %v7775_v59, 4  ;;  %v7790_v44 = vrot.slane %v7789_v2, 4  ;;  %17479 = vmatprep.mubr.msk.bf16.mxu0 %vm908_vm0, %v8335_v25  ;;  %v6413_v39 = vmul.f32 0.01, %v21456_v26  ;;  %v7782_v51 = vsel %vm911_vm1, %v6887_v32, -inf }
 0x78d   : > { %v7796_v35 = vsel %vm911_vm1, %v6888_v48, -inf  ;;  %v6347_v57 = vadd.f32 %v21229_v29, %v21224_v50  ;;  %v21506_v43 = vadd.f32 %v21502_v49, %v21239_v58  ;;  %v7783_v11 = vrot.slane %v7782_v51, 4 }
 0x78e   : > { %v7777_v33 = vmax.f32 %v7775_v59, %v7776_v46  ;;  %v7791_v12 = vmax.f32 %v7789_v2, %v7790_v44  ;;  %v7797_v56 = vrot.slane %v7796_v35, 4  ;;  %v21508_v22 = vmax.f32 %v7856_v47, %v7857_v4 }
 0x78f   : > { %v6445_v61 = vsel %vm6381_vm2, %v21456_v26, %v6413_v39  ;;  %vm6379_vm3 = vcmp.gt.f32.partialorder %v6347_v57, 0.0  ;;  %v6411_v50 = vmul.f32 0.01, %v6347_v57  ;;  %v7784_v7 = vmax.f32 %v7782_v51, %v7783_v11 }
 0x790   : > { %v7778_v29 = vrot.slane %v7777_v33, 2  ;;  %v7792_v42 = vrot.slane %v7791_v12, 2  ;;  %v7798_v30 = vmax.f32 %v7796_v35, %v7797_v56  ;;  %6477 = vst.msk [vmem:[%s20998_s23 + $0xd0] sm:$0xff] %vm908_vm0, %v6445_v61  ;;  %v6957_v58 = vcombine.high %v6445_v61, %v6445_v61 }
 0x791   : > { %v6964_v40 = vrot.slane %v6445_v61, %v20990_v37  ;;  %v6443_v21 = vsel %vm6379_vm3, %v6347_v57, %v6411_v50  ;;  %v21517_v5 = vmul.f32 0.01, %v21506_v43  ;;  %v7785_v53 = vrot.slane %v7784_v7, 2 }
 0x792   : > { %v7779_v9 = vmax.f32 %v7777_v33, %v7778_v29  ;;  %v7793_v8 = vmax.f32 %v7791_v12, %v7792_v42  ;;  %v7799_v26 = vrot.slane %v7798_v30, 2  ;;  %6475 = vst.msk [vmem:[%s20998_s23 + $0xc0] sm:$0xff] %vm908_vm0, %v6443_v21  ;;  %v6971_v17 = vrot.slane %v6957_v58, %v20990_v37 }
 0x793   : > { %v6972_v13 = vcombine.high %v6964_v40, %v6964_v40  ;;  %v7915_v23 = vsel %vm911_vm1, %v6964_v40, -inf  ;;  %v6923_v27 = vcombine.high %v6443_v21, %v6443_v21  ;;  %v7786_v38 = vmax.f32 %v7784_v7, %v7785_v53 }
 0x794   : > { %v7780_v15 = vrot.slane %v7779_v9, 1  ;;  %v7794_v47 = vrot.slane %v7793_v8, 1  ;;  %v7800_v63 = vmax.f32 %v7798_v30, %v7799_v26  ;;  %v6973_v36 = vcombine.high %v6971_v17, %v6971_v17 }
 0x795   : > { %v7916_v10 = vrot.slane %v7915_v23, 4  ;;  %v7922_v54 = vsel %vm911_vm1, %v6972_v13, -inf  ;;  %v7929_v6 = vsel %vm911_vm1, %v6971_v17, -inf  ;;  %v7787_v24 = vrot.slane %v7786_v38, 1 }
 0x796   : > { %v7781_v3 = vmax.f32 %v7779_v9, %v7780_v15  ;;  %v7795_v20 = vmax.f32 %v7793_v8, %v7794_v47  ;;  %v7801_v60 = vrot.slane %v7800_v63, 1  ;;  %v7923_v41 = vrot.slane %v7922_v54, 4 }
 0x797   : > { %v7917_v28 = vmax.f32 %v7915_v23, %v7916_v10  ;;  %v7930_v4 = vrot.slane %v7929_v6, 4  ;;  %v7936_v25 = vsel %vm911_vm1, %v6973_v36, -inf  ;;  %v7788_v32 = vmax.f32 %v7786_v38, %v7787_v24 }
 0x798   : > { %v7802_v48 = vmax.f32 %v7800_v63, %v7801_v60  ;;  %v8127_v59 = vmax.f32 %v7781_v3, %v21476_v45  ;;  %v8129_v2 = vmax.f32 %v7795_v20, %v21478_v52  ;;  %vm6382_vm4 = vcmp.gt.f32.partialorder %v21506_v43, 0.0 }
 0x799   : > { %v7918_v46 = vrot.slane %v7917_v28, 2  ;;  %v7924_v44 = vmax.f32 %v7922_v54, %v7923_v41  ;;  %v7931_v39 = vmax.f32 %v7929_v6, %v7930_v4  ;;  %v7937_v51 = vrot.slane %v7936_v25, 4 }
 0x79a   : > { %v8128_v35 = vmax.f32 %v7788_v32, %v21487_v31  ;;  %v8130_v57 = vmax.f32 %v7802_v48, %v21508_v22  ;;  %v8280_v33 = vsel %vm8241_vm10, %v8127_v59, %v8279_v18  ;;  %v6930_v11 = vrot.slane %v6443_v21, %v20990_v37 }
 0x79b   : > { %v7919_v12 = vmax.f32 %v7917_v28, %v7918_v46  ;;  %v7925_v56 = vrot.slane %v7924_v44, 2  ;;  %v7932_v61 = vrot.slane %v7931_v39, 2  ;;  %v7938_v45 = vmax.f32 %v7936_v25, %v7937_v51 }
 0x79c   : > { %v8281_v52 = vsel %vm8243_vm11, %v8128_v35, %v8280_v33  ;;  %v6937_v50 = vrot.slane %v6923_v27, %v20990_v37  ;;  %v6938_v29 = vcombine.high %v6930_v11, %v6930_v11  ;;  %v7859_v7 = vsel %vm911_vm1, %v6930_v11, -inf }
 0x79d   : > { %v8282_v42 = vsel %vm8245_vm12, %v8129_v2, %v8281_v52  ;;  %v7920_v31 = vrot.slane %v7919_v12, 1  ;;  %v7926_v30 = vmax.f32 %v7924_v44, %v7925_v56  ;;  %v7933_v22 = vmax.f32 %v7931_v39, %v7932_v61 }
 0x79e   : > { %v8283_v18 = vsel %vm8247_vm14, %v8130_v57, %v8282_v42  ;;  %v7939_v58 = vrot.slane %v7938_v45, 2  ;;  %v6939_v40 = vcombine.high %v6937_v50, %v6937_v50  ;;  %v7860_v21 = vrot.slane %v7859_v7, 4 }
 0x79f   : > { %8311 = vst.msk [vmem:[#allocation2 + $0x91] sm:$0xff] %vm908_vm0, %v8283_v18  ;;  %v21539_v9 = vmax.f32 %v7919_v12, %v7920_v31  ;;  %v7927_v53 = vrot.slane %v7926_v30, 1  ;;  %v7934_v8 = vrot.slane %v7933_v22, 1  ;;  %v7866_v26 = vsel %vm911_vm1, %v6938_v29, -inf }
 0x7a0   : > { %v7940_v17 = vmax.f32 %v7938_v45, %v7939_v58  ;;  %v7861_v13 = vmax.f32 %v7859_v7, %v7860_v21  ;;  %v7867_v23 = vrot.slane %v7866_v26, 4  ;;  %v7873_v27 = vsel %vm911_vm1, %v6937_v50, -inf }
 0x7a1   : > { %v7928_v15 = vmax.f32 %v7926_v30, %v7927_v53  ;;  %v7935_v38 = vmax.f32 %v7933_v22, %v7934_v8  ;;  %v7874_v47 = vrot.slane %v7873_v27, 4  ;;  %v7880_v63 = vsel %vm911_vm1, %v6939_v40, -inf }
 0x7a2   : > { %v7941_v36 = vrot.slane %v7940_v17, 1  ;;  %v7862_v10 = vrot.slane %v7861_v13, 2  ;;  %v7868_v54 = vmax.f32 %v7866_v26, %v7867_v23  ;;  %v7881_v6 = vrot.slane %v7880_v63, 4 }
 0x7a3   : > { %v7875_v3 = vmax.f32 %v7873_v27, %v7874_v47  ;;  %v6446_v24 = vsel %vm6382_vm4, %v21506_v43, %v21517_v5  ;;  %v6348_v20 = vadd.f32 %v21502_v49, %v21263_v19  ;;  %v21552_v60 = vadd.f32 %v21502_v49, %v21283_v1 }
 0x7a4   : > { %v7942_v28 = vmax.f32 %v7940_v17, %v7941_v36  ;;  %v7863_v41 = vmax.f32 %v7861_v13, %v7862_v10  ;;  %v7869_v4 = vrot.slane %v7868_v54, 2  ;;  %v7882_v25 = vmax.f32 %v7880_v63, %v7881_v6  ;;  %6478 = vst.msk [vmem:[%s20998_s23 + $0xd8] sm:$0xff] %vm908_vm0, %v6446_v24 }
 0x7a5   : > { %v7876_v32 = vrot.slane %v7875_v3, 2  ;;  %v6974_v48 = vcombine.high %v6446_v24, %v6446_v24  ;;  %v6981_v59 = vrot.slane %v6446_v24, %v20990_v37  ;;  %vm6380_vm6 = vcmp.gt.f32.partialorder %v6348_v20, 0.0 }
 0x7a6   : > { %v7864_v2 = vrot.slane %v7863_v41, 1  ;;  %v7870_v43 = vmax.f32 %v7868_v54, %v7869_v4  ;;  %v7883_v5 = vrot.slane %v7882_v25, 2  ;;  %v6412_v46 = vmul.f32 0.01, %v6348_v20 }
 0x7a7   : > { %v7877_v19 = vmax.f32 %v7875_v3, %v7876_v32  ;;  %v6988_v44 = vrot.slane %v6974_v48, %v20990_v37  ;;  %v6989_v1 = vcombine.high %v6981_v59, %v6981_v59  ;;  %v7943_v39 = vsel %vm911_vm1, %v6981_v59, -inf }
 0x7a8   : > { %v7865_v51 = vmax.f32 %v7863_v41, %v7864_v2  ;;  %v7871_v35 = vrot.slane %v7870_v43, 1  ;;  %v7884_v57 = vmax.f32 %v7882_v25, %v7883_v5  ;;  %v7944_v33 = vrot.slane %v7943_v39, 4 }
 0x7a9   : > { %v7878_v11 = vrot.slane %v7877_v19, 1  ;;  %v6990_v12 = vcombine.high %v6988_v44, %v6988_v44  ;;  %v7950_v56 = vsel %vm911_vm1, %v6989_v1, -inf  ;;  %v7957_v61 = vsel %vm911_vm1, %v6988_v44, -inf }
 0x7aa   : > { %v7872_v45 = vmax.f32 %v7870_v43, %v7871_v35  ;;  %v7885_v52 = vrot.slane %v7884_v57, 1  ;;  %v8131_v50 = vmax.f32 %v7865_v51, %v21539_v9  ;;  %v7945_v29 = vmax.f32 %v7943_v39, %v7944_v33 }
 0x7ab   : > { %v7879_v7 = vmax.f32 %v7877_v19, %v7878_v11  ;;  %v7951_v42 = vrot.slane %v7950_v56, 4  ;;  %v7958_v31 = vrot.slane %v7957_v61, 4  ;;  %v7964_v30 = vsel %vm911_vm1, %v6990_v12, -inf }
 0x7ac   : > { %v7886_v22 = vmax.f32 %v7884_v57, %v7885_v52  ;;  %v8132_v18 = vmax.f32 %v7872_v45, %v7928_v15  ;;  %v7946_v58 = vrot.slane %v7945_v29, 2  ;;  %v7965_v40 = vrot.slane %v7964_v30, 4 }
 0x7ad   : > { %v8133_v21 = vmax.f32 %v7879_v7, %v7935_v38  ;;  %v7952_v53 = vmax.f32 %v7950_v56, %v7951_v42  ;;  %v7959_v8 = vmax.f32 %v7957_v61, %v7958_v31  ;;  %v6444_v26 = vsel %vm6380_vm6, %v6348_v20, %v6412_v46 }
 0x7ae   : > { %v8134_v17 = vmax.f32 %v7886_v22, %v7942_v28  ;;  %v8284_v13 = vsel %vm8235_vm7, %v8132_v18, %v8131_v50  ;;  %v7947_v9 = vmax.f32 %v7945_v29, %v7946_v58  ;;  %v7966_v23 = vmax.f32 %v7964_v30, %v7965_v40  ;;  %6476 = vst.msk [vmem:[%s20998_s23 + $0xc8] sm:$0xff] %vm908_vm0, %v6444_v26 }
 0x7af   : > { %v8285_v27 = vsel %vm8237_vm8, %v8133_v21, %v8284_v13  ;;  %v7953_v47 = vrot.slane %v7952_v53, 2  ;;  %v7960_v63 = vrot.slane %v7959_v8, 2  ;;  %v6940_v36 = vcombine.high %v6444_v26, %v6444_v26 }
 0x7b0   : > { %v7948_v15 = vrot.slane %v7947_v9, 1  ;;  %v7967_v10 = vrot.slane %v7966_v23, 2  ;;  %v6947_v38 = vrot.slane %v6444_v26, %v20990_v37  ;;  %v21570_v54 = vsel %vm8239_vm9, %v8134_v17, %v8285_v27 }
 0x7b1   : > { %v7954_v6 = vmax.f32 %v7952_v53, %v7953_v47  ;;  %v7961_v3 = vmax.f32 %v7959_v8, %v7960_v63  ;;  %v6954_v24 = vrot.slane %v6940_v36, %v20990_v37  ;;  %vm6385_vm2 = vcmp.gt.f32.partialorder %v21552_v60, 0.0 }
 0x7b2   : > { %v21574_v20 = vmax.f32 %v7947_v9, %v7948_v15  ;;  %v7968_v28 = vmax.f32 %v7966_v23, %v7967_v10  ;;  %v6955_v41 = vcombine.high %v6947_v38, %v6947_v38  ;;  %v7887_v4 = vsel %vm911_vm1, %v6947_v38, -inf }
 0x7b3   : > { %v7955_v25 = vrot.slane %v7954_v6, 1  ;;  %v7962_v32 = vrot.slane %v7961_v3, 1  ;;  %v6956_v48 = vcombine.high %v6954_v24, %v6954_v24  ;;  %v7888_v59 = vrot.slane %v7887_v4, 4 }
 0x7b4   : > { %v7969_v2 = vrot.slane %v7968_v28, 1  ;;  %v7894_v43 = vsel %vm911_vm1, %v6955_v41, -inf  ;;  %v7901_v5 = vsel %vm911_vm1, %v6954_v24, -inf  ;;  %v6417_v46 = vmul.f32 0.01, %v21552_v60 }
 0x7b5   : > { %v7956_v19 = vmax.f32 %v7954_v6, %v7955_v25  ;;  %v7963_v44 = vmax.f32 %v7961_v3, %v7962_v32  ;;  %v7889_v1 = vmax.f32 %v7887_v4, %v7888_v59  ;;  %v7895_v39 = vrot.slane %v7894_v43, 4 }
 0x7b6   : > { %v21580_v51 = vmax.f32 %v7968_v28, %v7969_v2  ;;  %v7902_v35 = vrot.slane %v7901_v5, 4  ;;  %v7908_v57 = vsel %vm911_vm1, %v6956_v48, -inf  ;;  %v6449_v33 = vsel %vm6385_vm2, %v21552_v60, %v6417_v46 }
 0x7b7   : > { %v7890_v11 = vrot.slane %v7889_v1, 2  ;;  %v7896_v12 = vmax.f32 %v7894_v43, %v7895_v39  ;;  %v7909_v56 = vrot.slane %v7908_v57, 4  ;;  %6481 = vst.msk [vmem:[%s20998_s23 + $0xf0] sm:$0xff] %vm908_vm0, %v6449_v33  ;;  %v7025_v61 = vcombine.high %v6449_v33, %v6449_v33 }
 0x7b8   : > { %v7903_v45 = vmax.f32 %v7901_v5, %v7902_v35  ;;  %v7032_v52 = vrot.slane %v6449_v33, %v20990_v37  ;;  %v6351_v50 = vadd.f32 %v21502_v49, %v21288_v55  ;;  %v21593_v29 = vadd.f32 %v21502_v49, %v21322_v16 }
 0x7b9   : > { %v7891_v7 = vmax.f32 %v7889_v1, %v7890_v11  ;;  %v7897_v42 = vrot.slane %v7896_v12, 2  ;;  %v7910_v31 = vmax.f32 %v7908_v57, %v7909_v56  ;;  %v7039_v60 = vrot.slane %v7025_v61, %v20990_v37 }
 0x7ba   : > { %v7904_v30 = vrot.slane %v7903_v45, 2  ;;  %v7040_v22 = vcombine.high %v7032_v52, %v7032_v52  ;;  %v8027_v18 = vsel %vm911_vm1, %v7032_v52, -inf  ;;  %vm6383_vm3 = vcmp.gt.f32.partialorder %v6351_v50, 0.0 }
 0x7bb   : > { %v7892_v58 = vrot.slane %v7891_v7, 1  ;;  %v7898_v40 = vmax.f32 %v7896_v12, %v7897_v42  ;;  %v7911_v21 = vrot.slane %v7910_v31, 2  ;;  %v7041_v53 = vcombine.high %v7039_v60, %v7039_v60  ;;  %v21608_v12 = vld [vmem:[#allocation2 + $0x49] sm:$0xff]  ;;  %v21622_v42 = vld [vmem:[#allocation2 + $0x31] sm:$0xff] }
 0x7bc   : > { %v7905_v8 = vmax.f32 %v7903_v45, %v7904_v30  ;;  %v8028_v55 = vrot.slane %v8027_v18, 4  ;;  %v8034_v26 = vsel %vm911_vm1, %v7040_v22, -inf  ;;  %v8041_v16 = vsel %vm911_vm1, %v7039_v60, -inf }
 0x7bd   : > { %v7893_v17 = vmax.f32 %v7891_v7, %v7892_v58  ;;  %v7899_v13 = vrot.slane %v7898_v40, 1  ;;  %v7912_v9 = vmax.f32 %v7910_v31, %v7911_v21  ;;  %v8035_v23 = vrot.slane %v8034_v26, 4 }
 0x7be   : > { %v7906_v27 = vrot.slane %v7905_v8, 1  ;;  %v8029_v47 = vmax.f32 %v8027_v18, %v8028_v55  ;;  %v8042_v63 = vrot.slane %v8041_v16, 4  ;;  %v8048_v36 = vsel %vm911_vm1, %v7041_v53, -inf }
 0x7bf   : > { %v7900_v15 = vmax.f32 %v7898_v40, %v7899_v13  ;;  %v7913_v10 = vrot.slane %v7912_v9, 1  ;;  %v8135_v38 = vmax.f32 %v7893_v17, %v21574_v20  ;;  %v8036_v6 = vmax.f32 %v8034_v26, %v8035_v23 }
 0x7c0   : > { %v7907_v3 = vmax.f32 %v7905_v8, %v7906_v27  ;;  %v8030_v24 = vrot.slane %v8029_v47, 2  ;;  %v8043_v28 = vmax.f32 %v8041_v16, %v8042_v63  ;;  %v8049_v41 = vrot.slane %v8048_v36, 4 }
 0x7c1   : > { %v7914_v4 = vmax.f32 %v7912_v9, %v7913_v10  ;;  %v8136_v25 = vmax.f32 %v7900_v15, %v7956_v19  ;;  %v8287_v32 = vsel %vm8241_vm10, %v8135_v38, %v21570_v54  ;;  %v8037_v48 = vrot.slane %v8036_v6, 2 }
 0x7c2   : > { %v8137_v59 = vmax.f32 %v7907_v3, %v7963_v44  ;;  %v8031_v2 = vmax.f32 %v8029_v47, %v8030_v24  ;;  %v8044_v43 = vrot.slane %v8043_v28, 2  ;;  %v8050_v5 = vmax.f32 %v8048_v36, %v8049_v41 }
 0x7c3   : > { %v8138_v46 = vmax.f32 %v7914_v4, %v21580_v51  ;;  %v8288_v20 = vsel %vm8243_vm11, %v8136_v25, %v8287_v32  ;;  %v8038_v1 = vmax.f32 %v8036_v6, %v8037_v48  ;;  %v6415_v39 = vmul.f32 0.01, %v6351_v50 }
 0x7c4   : > { %v8289_v35 = vsel %vm8245_vm12, %v8137_v59, %v8288_v20  ;;  %v8032_v57 = vrot.slane %v8031_v2, 1  ;;  %v8045_v33 = vmax.f32 %v8043_v28, %v8044_v43  ;;  %v8051_v19 = vrot.slane %v8050_v5, 2 }
 0x7c5   : > { %v8290_v11 = vsel %vm8247_vm14, %v8138_v46, %v8289_v35  ;;  %v8039_v54 = vrot.slane %v8038_v1, 1  ;;  %v6447_v44 = vsel %vm6383_vm3, %v6351_v50, %v6415_v39  ;;  %vm6386_vm4 = vcmp.gt.f32.partialorder %v21593_v29, 0.0 }
 0x7c6   : > { %8312 = vst.msk [vmem:[#allocation2 + $0xa9] sm:$0xff] %vm908_vm0, %v8290_v11  ;;  %v8046_v56 = vrot.slane %v8045_v33, 1  ;;  %v21611_v51 = vmax.f32 %v8050_v5, %v8051_v19  ;;  %6479 = vst.msk [vmem:[%s20998_s23 + $0xe0] sm:$0xff] %vm908_vm0, %v6447_v44  ;;  %v6991_v61 = vcombine.high %v6447_v44, %v6447_v44  ;;  %v21616_v45 = vmax.f32 %v8031_v2, %v8032_v57 }
 0x7c7   : > { %v6998_v52 = vrot.slane %v6447_v44, %v20990_v37  ;;  %v6418_v7 = vmul.f32 0.01, %v21593_v29  ;;  %v6352_v50 = vadd.f32 %v21502_v49, %v21330_v34  ;;  %v21624_v31 = vmax.f32 %v8038_v1, %v8039_v54 }
 0x7c8   : > { %v21626_v60 = vmax.f32 %v8045_v33, %v8046_v56  ;;  %v7005_v30 = vrot.slane %v6991_v61, %v20990_v37  ;;  %v21631_v22 = vpack.c.bf16 %v21608_v12, %v21622_v42  ;;  %v8053_v18 = vrot.slane %v21611_v51, 1 }
 0x7c9   : > { %v7006_v58 = vcombine.high %v6998_v52, %v6998_v52  ;;  %v7971_v40 = vsel %vm911_vm1, %v6998_v52, -inf  ;;  %v6450_v21 = vsel %vm6386_vm4, %v21593_v29, %v6418_v7  ;;  %vm6384_vm6 = vcmp.gt.f32.partialorder %v6352_v50, 0.0 }
 0x7ca   : > { %v7007_v34 = vcombine.high %v7005_v30, %v7005_v30  ;;  %v7972_v49 = vrot.slane %v7971_v40, 4  ;;  %v7985_v53 = vsel %vm911_vm1, %v7005_v30, -inf  ;;  %6482 = vst.msk [vmem:[%s20998_s23 + $0xf8] sm:$0xff] %vm908_vm0, %v6450_v21  ;;  %17480 = vmatmul.mubr.msk.bf16.vlgmr.msra.gmra.mrb[32].mxu0 %vm908_vm0, %v21631_v22  ;;  %v7042_v26 = vcombine.high %v6450_v21, %v6450_v21 }
 0x7cb   : > { %v7978_v8 = vsel %vm911_vm1, %v7006_v58, -inf  ;;  %v7986_v55 = vrot.slane %v7985_v53, 4  ;;  %v7049_v16 = vrot.slane %v6450_v21, %v20990_v37  ;;  %v6416_v9 = vmul.f32 0.01, %v6352_v50 }
 0x7cc   : > { %v7973_v17 = vmax.f32 %v7971_v40, %v7972_v49  ;;  %v7979_v13 = vrot.slane %v7978_v8, 4  ;;  %v7992_v29 = vsel %vm911_vm1, %v7007_v34, -inf  ;;  %v7056_v47 = vrot.slane %v7042_v26, %v20990_v37 }
 0x7cd   : > { %v7987_v23 = vmax.f32 %v7985_v53, %v7986_v55  ;;  %v7993_v27 = vrot.slane %v7992_v29, 4  ;;  %v7057_v63 = vcombine.high %v7049_v16, %v7049_v16  ;;  %v8055_v10 = vsel %vm911_vm1, %v7049_v16, -inf }
 0x7ce   : > { %v7974_v36 = vrot.slane %v7973_v17, 2  ;;  %v7980_v15 = vmax.f32 %v7978_v8, %v7979_v13  ;;  %v6448_v38 = vsel %vm6384_vm6, %v6352_v50, %v6416_v9  ;;  %v7058_v24 = vcombine.high %v7056_v47, %v7056_v47 }
 0x7cf   : > { %v7988_v6 = vrot.slane %v7987_v23, 2  ;;  %v7994_v3 = vmax.f32 %v7992_v29, %v7993_v27  ;;  %v8056_v28 = vrot.slane %v8055_v10, 4  ;;  %6480 = vst.msk [vmem:[%s20998_s23 + $0xe8] sm:$0xff] %vm908_vm0, %v6448_v38  ;;  %v8062_v25 = vsel %vm911_vm1, %v7057_v63, -inf  ;;  %v21665_v63 = vld [vmem:[#allocation2 + $0x61] sm:$0xff]  ;;  %s15479_s23 = sshll.u32 %s21906_s26, 4 }
 0x7d0   : > { %v7975_v41 = vmax.f32 %v7973_v17, %v7974_v36  ;;  %v7981_v4 = vrot.slane %v7980_v15, 2  ;;  %v8069_v32 = vsel %vm911_vm1, %v7056_v47, -inf  ;;  %v8063_v43 = vrot.slane %v8062_v25, 4  ;;  %v21659_v17 = vld [vmem:[#allocation2 + $0x79] sm:$0xff]  ;;  %v21667_v36 = vld [vmem:[#allocation2 + $0xa9] sm:$0xff]  ;;  %s22234_s24 = scalar_lea.vmem [#allocation13], %s15479_s23 }
 0x7d1   : > { %v7989_v48 = vmax.f32 %v7987_v23, %v7988_v6  ;;  %v7995_v59 = vrot.slane %v7994_v3, 2  ;;  %v8057_v2 = vmax.f32 %v8055_v10, %v8056_v28  ;;  %v8070_v20 = vrot.slane %v8069_v32, 4  ;;  %s15209_s23 = sshll.u32 %s22234_s24, 4  ;;  %s22761_s23 = int_to_ptr.vmem [resolvable:$true] %s15209_s23 }
 0x7d2   : > { %v7976_v5 = vrot.slane %v7975_v41, 1  ;;  %v7982_v46 = vmax.f32 %v7980_v15, %v7981_v4  ;;  %v8076_v1 = vsel %vm911_vm1, %v7058_v24, -inf  ;;  %v8064_v33 = vmax.f32 %v8062_v25, %v8063_v43  ;;  %v21669_v15 = vld [vmem:[#allocation2 + $0x18] sm:$0xff] }
 0x7d3   : > { %v7990_v39 = vrot.slane %v7989_v48, 1  ;;  %v7996_v35 = vmax.f32 %v7994_v3, %v7995_v59  ;;  %v8058_v57 = vrot.slane %v8057_v2, 2  ;;  %v8071_v54 = vmax.f32 %v8069_v32, %v8070_v20  ;;  %v21678_v25 = vld [vmem:[#allocation2 + $0x91] sm:$0xff] }
 0x7d4   : > { %v7977_v19 = vmax.f32 %v7975_v41, %v7976_v5  ;;  %v7983_v11 = vrot.slane %v7982_v46, 1  ;;  %v8077_v44 = vrot.slane %v8076_v1, 4  ;;  %v8054_v56 = vmax.f32 %v21611_v51, %v8053_v18  ;;  %v8514_v32 = vld [vmem:[#allocation3 + $0x8] sm:$0xf] }
 0x7d5   : > { %v7991_v61 = vmax.f32 %v7989_v48, %v7990_v39  ;;  %v7997_v52 = vrot.slane %v7996_v35, 1  ;;  %v8059_v21 = vmax.f32 %v8057_v2, %v8058_v57  ;;  %v8065_v49 = vrot.slane %v8064_v33, 2 }
 0x7d6   : > { %v7984_v7 = vmax.f32 %v7982_v46, %v7983_v11  ;;  %v8139_v50 = vmax.f32 %v7977_v19, %v21616_v45  ;;  %v8078_v30 = vmax.f32 %v8076_v1, %v8077_v44  ;;  %v8072_v53 = vrot.slane %v8071_v54, 2 }
 0x7d7   : > { %v7998_v58 = vmax.f32 %v7996_v35, %v7997_v52  ;;  %v8141_v40 = vmax.f32 %v7991_v61, %v21626_v60  ;;  %v7008_v8 = vcombine.high %v6448_v38, %v6448_v38  ;;  %v7015_v26 = vrot.slane %v6448_v38, %v20990_v37 }
 0x7d8   : > { %v8140_v34 = vmax.f32 %v7984_v7, %v21624_v31  ;;  %v8079_v18 = vrot.slane %v8078_v30, 2  ;;  %v8060_v13 = vrot.slane %v8059_v21, 1  ;;  %v21663_v31 = vld [vmem:[#allocation2] sm:$0xff]  ;;  %v8066_v9 = vmax.f32 %v8064_v33, %v8065_v49 }
 0x7d9   : > { %v8142_v55 = vmax.f32 %v7998_v58, %v8054_v56  ;;  %v7022_v16 = vrot.slane %v7008_v8, %v20990_v37  ;;  %v7023_v60 = vcombine.high %v7015_v26, %v7015_v26  ;;  %v7999_v29 = vsel %vm911_vm1, %v7015_v26, -inf  ;;  %v8316_v8 = vld [vmem:[#allocation2 + $0x30] sm:$0xff] }
 0x7da   : > { %v8291_v51 = vsel %vm8235_vm7, %v8140_v34, %v8139_v50  ;;  %v8073_v23 = vmax.f32 %v8071_v54, %v8072_v53  ;;  %v8000_v47 = vrot.slane %v7999_v29, 4  ;;  %v21676_v3 = vpack.c.bf16 %v21659_v17, %v21665_v63  ;;  %v21695_v50 = vld [vmem:[#allocation2 + $0x48] sm:$0xff] }
 0x7db   : > { %v8292_v45 = vsel %vm8237_vm8, %v8141_v40, %v8291_v51  ;;  %v7024_v27 = vcombine.high %v7022_v16, %v7022_v16  ;;  %v8006_v10 = vsel %vm911_vm1, %v7023_v60, -inf  ;;  %v8013_v38 = vsel %vm911_vm1, %v7022_v16, -inf  ;;  %v8318_v60 = vld [vmem:[#allocation2 + $0x60] sm:$0xff] }
 0x7dc   : > { %v8293_v6 = vsel %vm8239_vm9, %v8142_v55, %v8292_v45  ;;  %v8080_v24 = vmax.f32 %v8078_v30, %v8079_v18  ;;  %v8001_v28 = vmax.f32 %v7999_v29, %v8000_v47  ;;  %v8007_v41 = vrot.slane %v8006_v10, 4  ;;  %17483 = vmatprep.mubr.msk.bf16.mxu0 %vm908_vm0, %v21676_v3  ;;  %v8319_v55 = vld [vmem:[#allocation2 + $0x78] sm:$0xff] }
 0x7dd   : > { %v8014_v4 = vrot.slane %v8013_v38, 4  ;;  %v8020_v48 = vsel %vm911_vm1, %v7024_v27, -inf  ;;  %v8434_v59 = vsel %vm3881_vm5, %v21417_v14, 0  ;;  %v21687_v2 = vpack.c.bf16 %v21667_v36, %v21678_v25  ;;  %v18962_v14 = vld [vmem:[#allocation6 + $0x8] sm:$0xff]  }
 0x7de   : > { %v8322_v43 = vpack.c.bf16 %v21669_v15, %v21663_v31  ;;  %v8002_v5 = vrot.slane %v8001_v28, 2  ;;  %v8008_v46 = vmax.f32 %v8006_v10, %v8007_v41  ;;  %v8021_v1 = vrot.slane %v8020_v48, 4  ;;  %17488 = vmatpush3.bf16.msra.mxu0 %v8434_v59  ;;  %17567 = vmatprep.subr.bf16.mxu1 %v18962_v14  ;;  %v8616_v29 = vld [vmem:[#allocation3 + $0xc] sm:$0xf]  ;;  %v8320_v59 = vld [vmem:[#allocation2 + $0x90] sm:$0xff] }
 0x7df   : > { %v8015_v20 = vmax.f32 %v8013_v38, %v8014_v4  ;;  %v8067_v39 = vrot.slane %v8066_v9, 1  ;;  %v8074_v35 = vrot.slane %v8073_v23, 1  ;;  %17484 = vmatmul.mubr.msk.bf16.gmra.mrb[36].mxu0 %vm908_vm0, %v21687_v2  ;;  %18839 = vmatprep.subr.msk.bf16.mxu0 %vm3881_vm5, %v8514_v32  ;;  %v8061_v54 = vmax.f32 %v8059_v21, %v8060_v13  ;;  %v21711_v4 = vld [vmem:[#allocation2 + $0x2] sm:$0xff] }
 0x7e0   : > { %v8003_v57 = vmax.f32 %v8001_v28, %v8002_v5  ;;  %v8009_v33 = vrot.slane %v8008_v46, 2  ;;  %v8022_v11 = vmax.f32 %v8020_v48, %v8021_v1  ;;  %17489 = vmatprep.mubr.msk.bf16.mxu0 %vm908_vm0, %v8322_v43  ;;  %v8081_v44 = vrot.slane %v8080_v24, 1  ;;  %17568 = vmatpush3.bf16.msra.mxu1 %v18962_v14  ;;  %v8321_v28 = vld [vmem:[#allocation2 + $0xa8] sm:$0xff] }
 0x7e1   : > { %v8016_v19 = vrot.slane %v8015_v20, 2  ;;  %v8068_v30 = vmax.f32 %v8066_v9, %v8067_v39  ;;  %v8075_v58 = vmax.f32 %v8073_v23, %v8074_v35  ;;  %v21698_v21 = vpack.c.bf16 %v21695_v50, %v8316_v8  ;;  %v8504_v5 = vld [vmem:[#allocation2 + $0x4a] sm:$0xff]  ;;  %v8505_v35 = vld [vmem:[#allocation2 + $0x62] sm:$0xff] }
 0x7e2   : > { %v8004_v56 = vrot.slane %v8003_v57, 1  ;;  %v8010_v61 = vmax.f32 %v8008_v46, %v8009_v33  ;;  %v8023_v7 = vrot.slane %v8022_v11, 2  ;;  %v8082_v26 = vmax.f32 %v8080_v24, %v8081_v44  ;;  %v8506_v46 = vld [vmem:[#allocation2 + $0x7a] sm:$0xff]  ;;  %v8508_v33 = vld [vmem:[#allocation2 + $0xaa] sm:$0xff] }
 0x7e3   : > { %v8017_v52 = vmax.f32 %v8015_v20, %v8016_v19  ;;  %v8528_v51 = vsel %vm3881_vm5, %v8514_v32, 0  ;;  %v21703_v9 = vpack.c.bf16 %v8319_v55, %v8318_v60  ;;  %v8502_v32 = vld [vmem:[#allocation2 + $0x1a] sm:$0xff]  ;;  %v8503_v20 = vld [vmem:[#allocation2 + $0x32] sm:$0xff]  ;;  %v8630_v39 = vsel %vm3881_vm5, %v8616_v29, 0 }
 0x7e4   : > { %v8005_v40 = vmax.f32 %v8003_v57, %v8004_v56  ;;  %v8011_v34 = vrot.slane %v8010_v61, 1  ;;  %v8024_v53 = vmax.f32 %v8022_v11, %v8023_v7  ;;  %v8509_v43 = vpack.c.bf16 %v8502_v32, %v21711_v4  ;;  %v8718_v57 = vld [vmem:[#allocation3 + $0x10] sm:$0xf]  ;;  %v8507_v19 = vld [vmem:[#allocation2 + $0x92] sm:$0xff] }
 0x7e5   : > { %v8018_v49 = vrot.slane %v8017_v52, 1  ;;  %v21721_v1 = vpack.c.bf16 %v8504_v5, %v8503_v20  ;;  %v21724_v14 = vpack.c.bf16 %v8506_v46, %v8505_v35  ;;  %v8512_v11 = vpack.c.bf16 %v8508_v33, %v8507_v19 }
 0x7e6   : > { %v8012_v18 = vmax.f32 %v8010_v61, %v8011_v34  ;;  %v8025_v45 = vrot.slane %v8024_v53, 1  ;;  %v8143_v13 = vmax.f32 %v8005_v40, %v8061_v54  ;;  %v8611_v54 = vpack.c.bf16 %v8316_v8, %v21669_v15  ;;  %v8922_v34 = vld [vmem:[#allocation3 + $0x18] sm:$0xf] }
 0x7e7   : > { %v8019_v16 = vmax.f32 %v8017_v52, %v8018_v49  ;;  %17490 = vmatmul.mubr.msk.bf16.vlgmr.msra.gmra.mrb[32].mxu0 %vm908_vm0, %v21698_v21  ;;  %v8612_v44 = vpack.c.bf16 %v8318_v60, %v21695_v50  ;;  %v8732_v56 = vsel %vm3881_vm5, %v8718_v57, 0  ;;  %v8613_v61 = vpack.c.bf16 %v8320_v59, %v8319_v55  ;;  %v8820_v52 = vld [vmem:[#allocation3 + $0x14] sm:$0xf]  ;;  %v9126_v55 = vld [vmem:[#allocation3 + $0x20] sm:$0xf] }
 0x7e8   : > { %v8026_v23 = vmax.f32 %v8024_v53, %v8025_v45  ;;  %v8144_v27 = vmax.f32 %v8012_v18, %v8068_v30  ;;  %v8294_v10 = vsel %vm8241_vm10, %v8143_v13, %v8293_v6  ;;  %17498 = vmatpush3.bf16.msra.mxu0 %v8528_v51  ;;  %17493 = vmatprep.mubr.msk.bf16.mxu0 %vm908_vm0, %v21703_v9  ;;  %v21779_v18 = vld [vmem:[#allocation2 + $0xd9] sm:$0xff]  ;;  %vm10666_vm3 = vcmask 253952  }
 0x7e9   : > { %v8145_v47 = vmax.f32 %v8019_v16, %v8075_v58  ;;  %18840 = vmatprep.subr.msk.bf16.mxu0 %vm3881_vm5, %v8616_v29  ;;  %v21715_v6 = vpack.c.bf16 %v8321_v28, %v8320_v59  ;;  %v8713_v15 = vpack.c.bf16 %v21622_v42, %v21474_v62  ;;  %v8714_v50 = vpack.c.bf16 %v21665_v63, %v21608_v12  ;;  %v15827_v45 = vld [vmem:[%s23018_s3] ss:$0 sm:$0xff]  ;;  %s23024_s3 = sld [smem:[#allocation47_spill]] }
 0x7ea   : > { %v8146_v38 = vmax.f32 %v8026_v23, %v8082_v26  ;;  %v8295_v24 = vsel %vm8243_vm11, %v8144_v27, %v8294_v10  ;;  %v8834_v58 = vsel %vm3881_vm5, %v8820_v52, 0  ;;  %v8715_v40 = vpack.c.bf16 %v21678_v25, %v21659_v17  ;;  %v9024_v25 = vld [vmem:[#allocation3 + $0x1c] sm:$0xf]  ;;  %v21767_v26 = vld [vmem:[#allocation2 + $0xd8] sm:$0xff] }
 0x7eb   : > { %v8296_v41 = vsel %vm8245_vm12, %v8145_v47, %v8295_v24  ;;  %v8815_v49 = vpack.c.bf16 %v8503_v20, %v8502_v32  ;;  %v8816_v12 = vpack.c.bf16 %v8505_v35, %v8504_v5  ;;  %v8936_v63 = vsel %vm3881_vm5, %v8922_v34, 0 }
 0x7ec   : > { %v8297_v48 = vsel %vm8247_vm14, %v8146_v38, %v8296_v41  ;;  %v8817_v17 = vpack.c.bf16 %v8507_v19, %v8506_v46  ;;  %v9276_v19 = vld [vmem:[#allocation2 + $0x1] sm:$0xff]  ;;  %vm10662_vm4 = vcmask 259072   ;;  %vm19497_vm6 = vmmov 0  }
 0x7ed   : > { %8313 = vst.msk [vmem:[#allocation2 + $0xc1] sm:$0xff] %vm908_vm0, %v8297_v48 }
 0x7ee   : > { %10663 = vst.msk [vmem:[#allocation2] sm:$0x3f] %vm10662_vm4, %v19495_v0 }
 0x7ef   : > { %17494 = vmatmul.mubr.msk.bf16.gmra.mrb[36].mxu0 %vm908_vm0, %v21715_v6  ;;  %s22768_s6 = scalar_lea.hbm %s23024_s3, %s16260_s5 }
 0x7f0   : > { %17499 = vmatprep.mubr.msk.bf16.mxu0 %vm908_vm0, %v8509_v43 }
 0x7f4   : > { %v8610_v7 = vld [vmem:[#allocation2 + $0xc0] sm:$0xff] }
 0x7f5   : > { %v8614_v30 = vpack.c.bf16 %v8610_v7, %v8321_v28  ;;  %v8712_v62 = vld [vmem:[#allocation2 + $0xc1] sm:$0xff]  ;;  %v8920_v51 = vpack.c.bf16 %v21767_v26, %v8610_v7 }
 0x7f6   : > { %v8716_v42 = vpack.c.bf16 %v8712_v62, %v21667_v36  ;;  %v8814_v53 = vld [vmem:[#allocation2 + $0xc2] sm:$0xff]  ;;  %v9038_v36 = vsel %vm3881_vm5, %v9024_v25, 0  ;;  %v9022_v16 = vpack.c.bf16 %v21779_v18, %v8712_v62 }
 0x7f7   : > { %17500 = vmatmul.mubr.msk.bf16.vlgmr.msra.gmra.mrb[32].mxu0 %vm908_vm0, %v21721_v1  ;;  %v8818_v8 = vpack.c.bf16 %v8814_v53, %v8508_v33 }
 0x7f8   : > { %17508 = vmatpush3.bf16.msra.mxu0 %v8630_v39  ;;  %17503 = vmatprep.mubr.msk.bf16.mxu0 %vm908_vm0, %v21724_v14 }
 0x7f9   : > { %18841 = vmatprep.subr.msk.bf16.mxu0 %vm3881_vm5, %v8718_v57 }
 0x7ff   : > { %17504 = vmatmul.mubr.msk.bf16.gmra.mrb[36].mxu0 %vm908_vm0, %v8512_v11 }
 0x800   : > { %17509 = vmatprep.mubr.msk.bf16.mxu0 %vm908_vm0, %v8611_v54 }
 0x807   : > { %17510 = vmatmul.mubr.msk.bf16.vlgmr.msra.gmra.mrb[32].mxu0 %vm908_vm0, %v8612_v44 }
 0x808   : > { %17518 = vmatpush3.bf16.msra.mxu0 %v8732_v56  ;;  %17513 = vmatprep.mubr.msk.bf16.mxu0 %vm908_vm0, %v8613_v61 }
 0x809   : > { %18842 = vmatprep.subr.msk.bf16.mxu0 %vm3881_vm5, %v8820_v52 }
 0x80f   : > { %17514 = vmatmul.mubr.msk.bf16.gmra.mrb[36].mxu0 %vm908_vm0, %v8614_v30 }
 0x810   : > { %17519 = vmatprep.mubr.msk.bf16.mxu0 %vm908_vm0, %v8713_v15 }
 0x817   : > { %17520 = vmatmul.mubr.msk.bf16.vlgmr.msra.gmra.mrb[32].mxu0 %vm908_vm0, %v8714_v50 }
 0x818   : > { %17528 = vmatpush3.bf16.msra.mxu0 %v8834_v58  ;;  %17523 = vmatprep.mubr.msk.bf16.mxu0 %vm908_vm0, %v8715_v40  ;;  %v18964_v40 = vld [vmem:[#allocation6 + $0x10] sm:$0xff]  }
 0x819   : > { %18843 = vmatprep.subr.msk.bf16.mxu0 %vm3881_vm5, %v8922_v34 }
 0x81f   : > { %17524 = vmatmul.mubr.msk.bf16.gmra.mrb[36].mxu0 %vm908_vm0, %v8716_v42 }
 0x820   : > { %17529 = vmatprep.mubr.msk.bf16.mxu0 %vm908_vm0, %v8815_v49 }
 0x827   : > { %17530 = vmatmul.mubr.msk.bf16.vlgmr.msra.gmra.mrb[32].mxu0 %vm908_vm0, %v8816_v12 }
 0x828   : > { %17538 = vmatpush3.bf16.msra.mxu0 %v8936_v63  ;;  %17533 = vmatprep.mubr.msk.bf16.mxu0 %vm908_vm0, %v8817_v17 }
 0x829   : > { %18844 = vmatprep.subr.msk.bf16.mxu0 %vm3881_vm5, %v9024_v25 }
 0x82f   : > { %17534 = vmatmul.mubr.msk.bf16.gmra.mrb[36].mxu0 %vm908_vm0, %v8818_v8 }
 0x830   : > { %17539 = vmatprep.mubr.msk.bf16.mxu0 %vm908_vm0, %v21698_v21  ;;  %v9140_v21 = vsel %vm3881_vm5, %v9126_v55, 0 }
 0x837   : > { %17540 = vmatmul.mubr.msk.bf16.vlgmr.msra.gmra.mrb[32].mxu0 %vm908_vm0, %v21703_v9 }
 0x838   : > { %17548 = vmatpush3.bf16.msra.mxu0 %v9038_v36  ;;  %17543 = vmatprep.mubr.msk.bf16.mxu0 %vm908_vm0, %v21715_v6 }
 0x839   : > { %18845 = vmatprep.subr.msk.bf16.mxu0 %vm3881_vm5, %v9126_v55 }
 0x83f   : > { %17544 = vmatmul.mubr.msk.bf16.gmra.mrb[36].mxu0 %vm908_vm0, %v8920_v51 }
 0x840   : > { %17549 = vmatprep.mubr.msk.bf16.mxu0 %vm908_vm0, %v21631_v22  ;;  %v21788_v22 = vld [vmem:[#allocation2 + $0xda] sm:$0xff] }
 0x847   : > { %17550 = vmatmul.mubr.msk.bf16.vlgmr.msra.gmra.mrb[32].mxu0 %vm908_vm0, %v21676_v3  ;;  %v9124_v3 = vpack.c.bf16 %v21788_v22, %v8814_v53 }
 0x848   : > { %17558 = vmatpush3.bf16.msra.mxu0 %v9140_v21  ;;  %17553 = vmatprep.mubr.msk.bf16.mxu0 %vm908_vm0, %v21687_v2  ;;  %v18963_v2 = vld [vmem:[#allocation6] sm:$0xff]   ;;  %v18965_v21 = vld [vmem:[#allocation6 + $0x18] sm:$0xff]  }
 0x849   : > { %17657 = vmatprep.subr.bf16.mxu0 %v19495_v0  ;;  %17577 = vmatprep.subr.bf16.mxu1 %v18963_v2 }
 0x84f   : > { %17554 = vmatmul.mubr.msk.bf16.gmra.mrb[36].mxu0 %vm908_vm0, %v9022_v16 }
 0x850   : > { %17559 = vmatprep.mubr.msk.bf16.mxu0 %vm908_vm0, %v21721_v1 }
 0x857   : > { %17560 = vmatmul.mubr.msk.bf16.vlgmr.msra.gmra.mrb[32].mxu0 %vm908_vm0, %v21724_v14 }
 0x858   : > { %17563 = vmatprep.mubr.msk.bf16.mxu0 %vm908_vm0, %v8512_v11 }
 0x85f   : > { %17564 = vmatmul.mubr.msk.bf16.gmra.mrb[36].mxu0 %vm908_vm0, %v9124_v3 }
 0x860   : > { %17659 = vmatprep.mubr.msk.bf16.mxu0 %vm19497_vm6, %v19495_v0 }
 0x92a   : > { %v17561_v13 = vpop.f32.mrb[32].mxu0 }
 0x92b   : > { %v9224_v60 = vadd.f32 %v17561_v13, %v15827_v45  ;;  %v9176_v29 = vpop.f32.mrb[33].mxu0 }
 0x92c   : > { %v9222_v9 = vadd.f32 %v15827_v45, %v9176_v29  ;;  %v17562_v23 = vpop.f32.mrb[34].mxu0 }
 0x92d   : > { %vm9232_vm1 = vcmp.gt.f32.partialorder %v9224_v60, 0.0  ;;  %v9240_v27 = vmul.f32 0.01, %v9224_v60  ;;  %v9225_v47 = vadd.f32 %v17562_v23, %v15827_v45  ;;  %v9179_v10 = vpop.f32.mrb[35].mxu0 }
 0x92e   : > { %vm9230_vm5 = vcmp.gt.f32.partialorder %v9222_v9, 0.0  ;;  %v9238_v38 = vmul.f32 0.01, %v9222_v9  ;;  %v9223_v24 = vadd.f32 %v15827_v45, %v9179_v10 }
 0x92f   : > { %v9248_v28 = vsel %vm9232_vm1, %v9224_v60, %v9240_v27  ;;  %vm9233_vm0 = vcmp.gt.f32.partialorder %v9225_v47, 0.0  ;;  %v9241_v41 = vmul.f32 0.01, %v9225_v47 }
 0x930   : > { %9256 = vst.msk [vmem:[#allocation2 + $0x49] sm:$0xff] %vm8147_vm13, %v9248_v28  ;;  %v9246_v32 = vsel %vm9230_vm5, %v9222_v9, %v9238_v38  ;;  %vm9231_vm10 = vcmp.gt.f32.partialorder %v9223_v24, 0.0  ;;  %v9239_v48 = vmul.f32 0.01, %v9223_v24 }
 0x931   : > { %9254 = vst.msk [vmem:[#allocation2 + $0x19] sm:$0xff] %vm8147_vm13, %v9246_v32  ;;  %v9249_v59 = vsel %vm9233_vm0, %v9225_v47, %v9241_v41  ;;  %v18966_v47 = vld [vmem:[#allocation6 + $0x20] sm:$0xff]   ;;  %v18967_v32 = vld [vmem:[#allocation6 + $0x28] sm:$0xff]  }
 0x932   : > { %9257 = vst.msk [vmem:[#allocation2 + $0x61] sm:$0xff] %vm8147_vm13, %v9249_v59  ;;  %v9247_v6 = vsel %vm9231_vm10, %v9223_v24, %v9239_v48  ;;  %v17565_v43 = vpop.f32.mrb[36].mxu0 }
 0x933   : > { %9255 = vst.msk [vmem:[#allocation2 + $0x31] sm:$0xff] %vm8147_vm13, %v9247_v6  ;;  %v9228_v5 = vadd.f32 %v17565_v43, %v15827_v45  ;;  %v9192_v46 = vpop.f32.mrb[37].mxu0 }
 0x934   : > { %v9226_v20 = vadd.f32 %v15827_v45, %v9192_v46  ;;  %v17566_v1 = vpop.f32.mrb[38].mxu0  ;;  %v18968_v46 = vld [vmem:[#allocation6 + $0x30] sm:$0xff]  }
 0x935   : > { %vm9236_vm11 = vcmp.gt.f32.partialorder %v9228_v5, 0.0  ;;  %v9244_v39 = vmul.f32 0.01, %v9228_v5  ;;  %v9229_v35 = vadd.f32 %v17566_v1, %v15827_v45  ;;  %v9195_v14 = vpop.f32.mrb[39].mxu0 }
 0x936   : > { %vm9234_vm12 = vcmp.gt.f32.partialorder %v9226_v20, 0.0  ;;  %v9242_v57 = vmul.f32 0.01, %v9226_v20  ;;  %v9227_v33 = vadd.f32 %v15827_v45, %v9195_v14 }
 0x937   : > { %v9252_v11 = vsel %vm9236_vm11, %v9228_v5, %v9244_v39  ;;  %vm9237_vm14 = vcmp.gt.f32.partialorder %v9229_v35, 0.0  ;;  %v9245_v54 = vmul.f32 0.01, %v9229_v35  ;;  %v21807_v50 = vld [vmem:[#allocation2 + $0x49] sm:$0xff]  ;;  %vm10707_vm11 = vcmask 125952  }
 0x938   : > { %9260 = vst.msk [vmem:[#allocation2 + $0xa9] sm:$0xff] %vm8147_vm13, %v9252_v11  ;;  %v9250_v44 = vsel %vm9234_vm12, %v9226_v20, %v9242_v57  ;;  %vm9235_vm2 = vcmp.gt.f32.partialorder %v9227_v33, 0.0  ;;  %v9243_v56 = vmul.f32 0.01, %v9227_v33  ;;  %v21800_v61 = vld [vmem:[#allocation2 + $0x19] sm:$0xff]  ;;  %v9265_v36 = vld [vmem:[#allocation2 + $0x48] sm:$0xff] }
 0x939   : > { %9258 = vst.msk [vmem:[#allocation2 + $0x79] sm:$0xff] %vm8147_vm13, %v9250_v44  ;;  %v9253_v52 = vsel %vm9237_vm14, %v9229_v35, %v9245_v54  ;;  %v9284_v7 = vpack.c.bf16 %v21800_v61, %v9276_v19  ;;  %v9280_v34 = vld [vmem:[#allocation2 + $0x61] sm:$0xff]  ;;  %v9263_v49 = vld [vmem:[#allocation2 + $0x18] sm:$0xff]  ;;  %v9460_v9 = vld [vmem:[#allocation2 + $0x4a] sm:$0xff] }
 0x93a   : > { %9261 = vst.msk [vmem:[#allocation2 + $0xc1] sm:$0xff] %vm8147_vm13, %v9253_v52  ;;  %v9251_v30 = vsel %vm9235_vm2, %v9227_v33, %v9243_v56  ;;  %v21805_v15 = vld [vmem:[#allocation2 + $0x31] sm:$0xff]  ;;  %v9270_v25 = vpack.c.bf16 %v9263_v49, %v21663_v31  ;;  %v9266_v51 = vld [vmem:[#allocation2 + $0x60] sm:$0xff]  ;;  %v9678_v5 = vpack.c.bf16 %v9280_v34, %v21807_v50 }
 0x93b   : > { %9259 = vst.msk [vmem:[#allocation2 + $0x91] sm:$0xff] %vm8147_vm13, %v9251_v30  ;;  %17569 = vmatprep.mubr.msk.bf16.mxu1 %vm8147_vm13, %v9284_v7  ;;  %v21813_v58 = vpack.c.bf16 %v21807_v50, %v21805_v15  ;;  %v9264_v53 = vld [vmem:[#allocation2 + $0x30] sm:$0xff]  ;;  %v9458_v3 = vld [vmem:[#allocation2 + $0x1a] sm:$0xff]  ;;  %v9461_v27 = vld [vmem:[#allocation2 + $0x62] sm:$0xff]  ;;  %v9572_v41 = vpack.c.bf16 %v9266_v51, %v9265_v36  ;;  %v9677_v43 = vpack.c.bf16 %v21805_v15, %v21800_v61 }
 0x93c   : > { %v21833_v55 = vpack.c.bf16 %v9265_v36, %v9264_v53  ;;  %v9465_v13 = vpack.c.bf16 %v9458_v3, %v21711_v4  ;;  %v9459_v60 = vld [vmem:[#allocation2 + $0x32] sm:$0xff]  ;;  %v9571_v28 = vpack.c.bf16 %v9264_v53, %v9263_v49  ;;  %v9784_v14 = vpack.c.bf16 %v9461_v27, %v9460_v9  ;;  %10667 = vst.msk [vmem:[#allocation2 + $0x18] sm:$0x1] %vm10666_vm3, %v19495_v0  ;;  %v21911_v61 = vld [vmem:[%s23019_s29] ss:$0 sm:$0xff]  ;;  %s19320_s29 = scalar_lea.vmem %s22761_s23, 256 }
 0x93d   : > { %17570 = vmatmul.mubr.msk.bf16.vlgmr.msra.gmra.mrb[32].mxu1 %vm8147_vm13, %v21813_v58  ;;  %v21844_v23 = vpack.c.bf16 %v9460_v9, %v9459_v60  ;;  %v9783_v35 = vpack.c.bf16 %v9459_v60, %v9458_v3  ;;  %v18969_v57 = vld [vmem:[#allocation6 + $0x38] sm:$0xff]   ;;  %v18970_v54 = vld [vmem:[#allocation6 + $0x40] sm:$0xff]   ;;  %10668 = vst.msk [vmem:[#allocation2 + $0x30] sm:$0x1] %vm10666_vm3, %v19495_v0  ;;  %10669 = vst.msk [vmem:[#allocation2 + $0x48] sm:$0x1] %vm10666_vm3, %v19495_v0  ;;  %p19321_p8 = scmp.ne.s32.totalorder %s22761_s23, %s19320_s29 }
 0x93e   : > { %17578 = vmatpush3.bf16.msra.mxu1 %v18963_v2  ;;  %10670 = vst.msk [vmem:[#allocation2 + $0x60] sm:$0x1] %vm10666_vm3, %v19495_v0  ;;  %10671 = vst.msk [vmem:[#allocation2 + $0x1d] sm:$0x1] %vm10666_vm3, %v19495_v0 }
 0x93f   : > { %17587 = vmatprep.subr.bf16.mxu1 %v18964_v40  ;;  %v21822_v63 = vld [vmem:[#allocation2 + $0xa9] sm:$0xff]  ;;  %10672 = vst.msk [vmem:[#allocation2 + $0x35] sm:$0x1] %vm10666_vm3, %v19495_v0  ;;  %10673 = vst.msk [vmem:[#allocation2 + $0x4d] sm:$0x1] %vm10666_vm3, %v19495_v0  ;;  %p19322_p13 = pnand %p19321_p8, %p23025_p11 }
 0x940   : > { %v21817_v62 = vld [vmem:[#allocation2 + $0x79] sm:$0xff]  ;;  %v9269_v2 = vld [vmem:[#allocation2 + $0xa8] sm:$0xff]  ;;  %10674 = vst.msk [vmem:[#allocation2 + $0x65] sm:$0x1] %vm10666_vm3, %v19495_v0 }
 0x941   : > { %v21820_v42 = vpack.c.bf16 %v21817_v62, %v9280_v34  ;;  %v9267_v8 = vld [vmem:[#allocation2 + $0x78] sm:$0xff]  ;;  %v9464_v38 = vld [vmem:[#allocation2 + $0xaa] sm:$0xff]  ;;  %v9570_v59 = vld [vmem:[#allocation2 + $0xc0] sm:$0xff]  ;;  %p19323_p1 = pneg %p19322_p13 }
 0x942   : > { %v9282_v12 = vld [vmem:[#allocation2 + $0x91] sm:$0xff]  ;;  %v21835_v16 = vpack.c.bf16 %v9267_v8, %v9266_v51  ;;  %v9462_v29 = vld [vmem:[#allocation2 + $0x7a] sm:$0xff]  ;;  %v9574_v6 = vpack.c.bf16 %v9570_v59, %v9269_v2  ;;  %v9782_v19 = vld [vmem:[#allocation2 + $0xc2] sm:$0xff]  ;;  %v9892_v44 = vpack.c.bf16 %v21767_v26, %v9570_v59 }
 0x943   : > { %17573 = vmatprep.mubr.msk.bf16.mxu1 %vm8147_vm13, %v21820_v42  ;;  %v21827_v17 = vpack.c.bf16 %v21822_v63, %v9282_v12  ;;  %v9268_v31 = vld [vmem:[#allocation2 + $0x90] sm:$0xff]  ;;  %v9467_v10 = vpack.c.bf16 %v9462_v29, %v9461_v27  ;;  %v9679_v20 = vpack.c.bf16 %v9282_v12, %v21817_v62  ;;  %v9676_v1 = vld [vmem:[#allocation2 + $0xc1] sm:$0xff]  ;;  %v9786_v11 = vpack.c.bf16 %v9782_v19, %v9464_v38 }
 0x944   : > { %v9273_v45 = vpack.c.bf16 %v9269_v2, %v9268_v31  ;;  %v9463_v4 = vld [vmem:[#allocation2 + $0x92] sm:$0xff]  ;;  %v9573_v48 = vpack.c.bf16 %v9268_v31, %v9267_v8  ;;  %v9680_v39 = vpack.c.bf16 %v9676_v1, %v21822_v63  ;;  %v9998_v56 = vpack.c.bf16 %v21779_v18, %v9676_v1  ;;  %10665 = vst.msk [vmem:[#allocation2 + $0x78] sm:$0x3f] %vm10662_vm4, %v19495_v0  ;;  %v18971_v18 = vld [vmem:[#allocation8 + $0x8] sm:$0xff]  }
 0x945   : > { %17574 = vmatmul.mubr.msk.bf16.gmra.mrb[36].mxu1 %vm8147_vm13, %v21827_v17  ;;  %v9468_v24 = vpack.c.bf16 %v9464_v38, %v9463_v4  ;;  %v9785_v33 = vpack.c.bf16 %v9463_v4, %v9462_v29  ;;  %v10104_v26 = vpack.c.bf16 %v21788_v22, %v9782_v19  ;;  %v18972_v22 = vld [vmem:[#allocation8] sm:$0xff]   ;;  %17658 = vmatpush3.bf16.msra.mxu0 %v18971_v18  ;;  %vm12151_vm4 = vcmask 519168  }
 0x946   : > { %17579 = vmatprep.mubr.msk.bf16.mxu1 %vm8147_vm13, %v9270_v25  ;;  %17669 = vmatprep.subr.bf16.mxu0 %v19495_v0 }
 0x94d   : > { %17580 = vmatmul.mubr.msk.bf16.vlgmr.msra.gmra.mrb[32].mxu1 %vm8147_vm13, %v21833_v55 }
 0x94e   : > { %17588 = vmatpush3.bf16.msra.mxu1 %v18964_v40  ;;  %17583 = vmatprep.mubr.msk.bf16.mxu1 %vm8147_vm13, %v21835_v16 }
 0x94f   : > { %17597 = vmatprep.subr.bf16.mxu1 %v18965_v21 }
 0x955   : > { %17584 = vmatmul.mubr.msk.bf16.gmra.mrb[36].mxu1 %vm8147_vm13, %v9273_v45 }
 0x956   : > { %17589 = vmatprep.mubr.msk.bf16.mxu1 %vm8147_vm13, %v9465_v13 }
 0x95d   : > { %17590 = vmatmul.mubr.msk.bf16.vlgmr.msra.gmra.mrb[32].mxu1 %vm8147_vm13, %v21844_v23 }
 0x95e   : > { %17598 = vmatpush3.bf16.msra.mxu1 %v18965_v21  ;;  %17593 = vmatprep.mubr.msk.bf16.mxu1 %vm8147_vm13, %v9467_v10 }
 0x95f   : > { %17607 = vmatprep.subr.bf16.mxu1 %v18966_v47 }
 0x965   : > { %17594 = vmatmul.mubr.msk.bf16.gmra.mrb[36].mxu1 %vm8147_vm13, %v9468_v24 }
 0x966   : > { %17599 = vmatprep.mubr.msk.bf16.mxu1 %vm8147_vm13, %v9571_v28 }
 0x96d   : > { %17600 = vmatmul.mubr.msk.bf16.vlgmr.msra.gmra.mrb[32].mxu1 %vm8147_vm13, %v9572_v41 }
 0x96e   : > { %17608 = vmatpush3.bf16.msra.mxu1 %v18966_v47  ;;  %17603 = vmatprep.mubr.msk.bf16.mxu1 %vm8147_vm13, %v9573_v48 }
 0x96f   : > { %17617 = vmatprep.subr.bf16.mxu1 %v18967_v32 }
 0x975   : > { %17604 = vmatmul.mubr.msk.bf16.gmra.mrb[36].mxu1 %vm8147_vm13, %v9574_v6 }
 0x976   : > { %17609 = vmatprep.mubr.msk.bf16.mxu1 %vm8147_vm13, %v9677_v43 }
 0x97d   : > { %17610 = vmatmul.mubr.msk.bf16.vlgmr.msra.gmra.mrb[32].mxu1 %vm8147_vm13, %v9678_v5 }
 0x97e   : > { %17618 = vmatpush3.bf16.msra.mxu1 %v18967_v32  ;;  %17613 = vmatprep.mubr.msk.bf16.mxu1 %vm8147_vm13, %v9679_v20 }
 0x97f   : > { %17627 = vmatprep.subr.bf16.mxu1 %v18968_v46 }
 0x985   : > { %17614 = vmatmul.mubr.msk.bf16.gmra.mrb[36].mxu1 %vm8147_vm13, %v9680_v39 }
 0x986   : > { %17619 = vmatprep.mubr.msk.bf16.mxu1 %vm8147_vm13, %v9783_v35 }
 0x98d   : > { %17620 = vmatmul.mubr.msk.bf16.vlgmr.msra.gmra.mrb[32].mxu1 %vm8147_vm13, %v9784_v14 }
 0x98e   : > { %17628 = vmatpush3.bf16.msra.mxu1 %v18968_v46  ;;  %17623 = vmatprep.mubr.msk.bf16.mxu1 %vm8147_vm13, %v9785_v33 }
 0x98f   : > { %17637 = vmatprep.subr.bf16.mxu1 %v18969_v57 }
 0x995   : > { %17624 = vmatmul.mubr.msk.bf16.gmra.mrb[36].mxu1 %vm8147_vm13, %v9786_v11 }
 0x996   : > { %17629 = vmatprep.mubr.msk.bf16.mxu1 %vm8147_vm13, %v21833_v55 }
 0x99d   : > { %17630 = vmatmul.mubr.msk.bf16.vlgmr.msra.gmra.mrb[32].mxu1 %vm8147_vm13, %v21835_v16 }
 0x99e   : > { %17638 = vmatpush3.bf16.msra.mxu1 %v18969_v57  ;;  %17633 = vmatprep.mubr.msk.bf16.mxu1 %vm8147_vm13, %v9273_v45 }
 0x99f   : > { %17647 = vmatprep.subr.bf16.mxu1 %v18970_v54 }
 0x9a5   : > { %17634 = vmatmul.mubr.msk.bf16.gmra.mrb[36].mxu1 %vm8147_vm13, %v9892_v44 }
 0x9a6   : > { %17639 = vmatprep.mubr.msk.bf16.mxu1 %vm8147_vm13, %v21813_v58 }
 0x9ad   : > { %17640 = vmatmul.mubr.msk.bf16.vlgmr.msra.gmra.mrb[32].mxu1 %vm8147_vm13, %v21820_v42 }
 0x9ae   : > { %17648 = vmatpush3.bf16.msra.mxu1 %v18970_v54  ;;  %17643 = vmatprep.mubr.msk.bf16.mxu1 %vm8147_vm13, %v21827_v17 }
 0x9af   : > { %17663 = vmatprep.subr.bf16.mxu1 %v19495_v0 }
 0x9b5   : > { %17644 = vmatmul.mubr.msk.bf16.gmra.mrb[36].mxu1 %vm8147_vm13, %v9998_v56 }
 0x9b6   : > { %17649 = vmatprep.mubr.msk.bf16.mxu1 %vm8147_vm13, %v21844_v23 }
 0x9bd   : > { %17650 = vmatmul.mubr.msk.bf16.vlgmr.msra.gmra.mrb[32].mxu1 %vm8147_vm13, %v9467_v10 }
 0x9be   : > { %17653 = vmatprep.mubr.msk.bf16.mxu1 %vm8147_vm13, %v9468_v24  ;;  %17664 = vmatpush3.bf16.msra.mxu1 %v18972_v22 }
 0x9bf   : > { %17675 = vmatprep.subr.bf16.mxu1 %v19495_v0 }
 0x9c5   : > { %17654 = vmatmul.mubr.msk.bf16.gmra.mrb[36].mxu1 %vm8147_vm13, %v10104_v26 }
 0x9c6   : > { %17665 = vmatprep.mubr.msk.bf16.mxu1 %vm19497_vm6, %v19495_v0 }
 0xa90   : > { %v17651_v52 = vpop.f32.mrb[32].mxu1 }
 0xa91   : > { %v10208_v7 = vadd.f32 %v17651_v52, %v21911_v61  ;;  %v10160_v30 = vpop.f32.mrb[33].mxu1 }
 0xa92   : > { %v10206_v15 = vadd.f32 %v21911_v61, %v10160_v30  ;;  %v17652_v50 = vpop.f32.mrb[34].mxu1 }
 0xa93   : > { %vm10216_vm1 = vcmp.gt.f32.partialorder %v10208_v7, 0.0  ;;  %v10224_v58 = vmul.f32 0.01, %v10208_v7  ;;  %v10209_v40 = vadd.f32 %v17652_v50, %v21911_v61  ;;  %v10163_v34 = vpop.f32.mrb[35].mxu1 }
 0xa94   : > { %vm10214_vm5 = vcmp.gt.f32.partialorder %v10206_v15, 0.0  ;;  %v10222_v62 = vmul.f32 0.01, %v10206_v15  ;;  %v21928_v36 = vadd.f32 %v21911_v61, %v10163_v34 }
 0xa95   : > { %v10232_v42 = vsel %vm10216_vm1, %v10208_v7, %v10224_v58  ;;  %vm10217_vm0 = vcmp.gt.f32.partialorder %v10209_v40, 0.0  ;;  %v10225_v49 = vmul.f32 0.01, %v10209_v40  ;;  %vm12155_vm1 = vcmask 516096  }
 0xa96   : > { %10240 = vst.msk [vmem:[%s21917_s13 + $0x10] sm:$0xff] %vm8147_vm13, %v10232_v42  ;;  %v10288_v12 = vcombine.high %v10232_v42, %v10232_v42  ;;  %v10295_v63 = vrot.slane %v10232_v42, %v20990_v37  ;;  %v10230_v17 = vsel %vm10214_vm5, %v10206_v15, %v10222_v62  ;;  %vm10215_vm10 = vcmp.gt.f32.partialorder %v21928_v36, 0.0 }
 0xa97   : > { %10238 = vst.msk [vmem:[%s21917_s13] sm:$0xff] %vm8147_vm13, %v10230_v17  ;;  %v10254_v25 = vcombine.high %v10230_v17, %v10230_v17  ;;  %v10261_v53 = vrot.slane %v10230_v17, %v20990_v37  ;;  %v21925_v8 = vsel %vm10217_vm0, %v10209_v40, %v10225_v49  ;;  %v10223_v62 = vmul.f32 0.01, %v21928_v36 }
 0xa98   : > { %v10302_v55 = vrot.slane %v10288_v12, %v20990_v37  ;;  %v10303_v51 = vcombine.high %v10295_v63, %v10295_v63  ;;  %v10478_v21 = vsel %vm8149_vm15, %v10295_v63, -inf  ;;  %10241 = vst.msk [vmem:[%s21917_s13 + $0x18] sm:$0xff] %vm8147_vm13, %v21925_v8  ;;  %v10305_v16 = vcombine.high %v21925_v8, %v21925_v8  ;;  %v21937_v31 = vpop.f32.mrb[36].mxu1 }
 0xa99   : > { %v10479_v3 = vrot.slane %v10478_v21, 4  ;;  %v10268_v2 = vrot.slane %v10254_v25, %v20990_v37  ;;  %v10269_v45 = vcombine.high %v10261_v53, %v10261_v53  ;;  %v10422_v13 = vsel %vm8149_vm15, %v10261_v53, -inf  ;;  %v21941_v60 = vpop.f32.mrb[37].mxu1 }
 0xa9a   : > { %v10304_v29 = vcombine.high %v10302_v55, %v10302_v55  ;;  %v10485_v9 = vsel %vm8149_vm15, %v10303_v51, -inf  ;;  %v10492_v23 = vsel %vm8149_vm15, %v10302_v55, -inf  ;;  %v10423_v27 = vrot.slane %v10422_v13, 4  ;;  %v21945_v47 = vpop.f32.mrb[38].mxu1 }
 0xa9b   : > { %v10480_v10 = vmax.f32 %v10478_v21, %v10479_v3  ;;  %v10486_v4 = vrot.slane %v10485_v9, 4  ;;  %v10493_v38 = vrot.slane %v10492_v23, 4  ;;  %v10270_v24 = vcombine.high %v10268_v2, %v10268_v2  ;;  %v21947_v28 = vpop.f32.mrb[39].mxu1 }
 0xa9c   : > { %v10499_v41 = vsel %vm8149_vm15, %v10304_v29, -inf  ;;  %v10424_v32 = vmax.f32 %v10422_v13, %v10423_v27  ;;  %v10429_v48 = vsel %vm8149_vm15, %v10269_v45, -inf  ;;  %v10436_v59 = vsel %vm8149_vm15, %v10268_v2, -inf }
 0xa9d   : > { %v10481_v6 = vrot.slane %v10480_v10, 2  ;;  %v10487_v43 = vmax.f32 %v10485_v9, %v10486_v4  ;;  %v10494_v5 = vmax.f32 %v10492_v23, %v10493_v38  ;;  %v10500_v46 = vrot.slane %v10499_v41, 4 }
 0xa9e   : > { %v10425_v20 = vrot.slane %v10424_v32, 2  ;;  %v10430_v1 = vrot.slane %v10429_v48, 4  ;;  %v10437_v39 = vrot.slane %v10436_v59, 4  ;;  %v10443_v35 = vsel %vm8149_vm15, %v10270_v24, -inf }
 0xa9f   : > { %v10482_v14 = vmax.f32 %v10480_v10, %v10481_v6  ;;  %v10488_v57 = vrot.slane %v10487_v43, 2  ;;  %v10495_v33 = vrot.slane %v10494_v5, 2  ;;  %v10501_v19 = vmax.f32 %v10499_v41, %v10500_v46 }
 0xaa0   : > { %v10426_v11 = vmax.f32 %v10424_v32, %v10425_v20  ;;  %v10431_v54 = vmax.f32 %v10429_v48, %v10430_v1  ;;  %v10438_v44 = vmax.f32 %v10436_v59, %v10437_v39  ;;  %v10444_v56 = vrot.slane %v10443_v35, 4 }
 0xaa1   : > { %v10483_v26 = vrot.slane %v10482_v14, 1  ;;  %v10489_v18 = vmax.f32 %v10487_v43, %v10488_v57  ;;  %v10496_v22 = vmax.f32 %v10494_v5, %v10495_v33  ;;  %v10502_v52 = vrot.slane %v10501_v19, 2 }
 0xaa2   : > { %v10427_v7 = vrot.slane %v10426_v11, 1  ;;  %v10432_v30 = vrot.slane %v10431_v54, 2  ;;  %v10439_v15 = vrot.slane %v10438_v44, 2  ;;  %v10445_v50 = vmax.f32 %v10443_v35, %v10444_v56 }
 0xaa3   : > { %v10490_v58 = vrot.slane %v10489_v18, 1  ;;  %v10497_v40 = vrot.slane %v10496_v22, 1  ;;  %v10503_v34 = vmax.f32 %v10501_v19, %v10502_v52  ;;  %v21955_v42 = vmax.f32 %v10482_v14, %v10483_v26 }
 0xaa4   : > { %v10433_v49 = vmax.f32 %v10431_v54, %v10432_v30  ;;  %v10440_v12 = vmax.f32 %v10438_v44, %v10439_v15  ;;  %v10446_v63 = vrot.slane %v10445_v50, 2  ;;  %v21959_v53 = vmax.f32 %v10426_v11, %v10427_v7 }
 0xaa5   : > { %v21957_v17 = vmax.f32 %v10489_v18, %v10490_v58  ;;  %v10504_v25 = vrot.slane %v10503_v34, 1  ;;  %v10312_v55 = vrot.slane %v21925_v8, %v20990_v37  ;;  %v10319_v2 = vrot.slane %v10305_v16, %v20990_v37 }
 0xaa6   : > { %v10434_v51 = vrot.slane %v10433_v49, 1  ;;  %v10441_v21 = vrot.slane %v10440_v12, 1  ;;  %v21963_v3 = vmax.f32 %v10445_v50, %v10446_v63  ;;  %v21966_v45 = vmax.f32 %v10496_v22, %v10497_v40 }
 0xaa7   : > { %v10320_v13 = vcombine.high %v10312_v55, %v10312_v55  ;;  %v10506_v29 = vsel %vm8149_vm15, %v10312_v55, -inf  ;;  %v10231_v9 = vsel %vm10215_vm10, %v21928_v36, %v10223_v62  ;;  %v21972_v23 = vmax.f32 %v10503_v34, %v10504_v25 }
 0xaa8   : > { %v21974_v27 = vmax.f32 %v10433_v49, %v10434_v51  ;;  %v21976_v8 = vmax.f32 %v10440_v12, %v10441_v21  ;;  %v10321_v10 = vcombine.high %v10319_v2, %v10319_v2  ;;  %10239 = vst.msk [vmem:[%s21917_s13 + $0x8] sm:$0xff] %vm8147_vm13, %v10231_v9  ;;  %v10507_v4 = vrot.slane %v10506_v29, 4 }
 0xaa9   : > { %v10513_v16 = vsel %vm8149_vm15, %v10320_v13, -inf  ;;  %v10520_v38 = vsel %vm8149_vm15, %v10319_v2, -inf  ;;  %v10271_v24 = vcombine.high %v10231_v9, %v10231_v9  ;;  %v10448_v41 = vrot.slane %v21963_v3, 1 }
 0xaaa   : > { %v10514_v32 = vrot.slane %v10513_v16, 4  ;;  %v10521_v48 = vrot.slane %v10520_v38, 4  ;;  %v10527_v36 = vsel %vm8149_vm15, %v10321_v10, -inf  ;;  %v10508_v59 = vmax.f32 %v10506_v29, %v10507_v4 }
 0xaab   : > { %v10528_v6 = vrot.slane %v10527_v36, 4  ;;  %v10278_v43 = vrot.slane %v10231_v9, %v20990_v37  ;;  %v10285_v5 = vrot.slane %v10271_v24, %v20990_v37  ;;  %v10212_v1 = vadd.f32 %v21937_v31, %v21911_v61 }
 0xaac   : > { %v10515_v46 = vmax.f32 %v10513_v16, %v10514_v32  ;;  %v10522_v20 = vmax.f32 %v10520_v38, %v10521_v48  ;;  %v21990_v39 = vadd.f32 %v21911_v61, %v21941_v60  ;;  %v10509_v35 = vrot.slane %v10508_v59, 2 }
 0xaad   : > { %v10529_v14 = vmax.f32 %v10527_v36, %v10528_v6  ;;  %v10286_v57 = vcombine.high %v10278_v43, %v10278_v43  ;;  %v10287_v33 = vcombine.high %v10285_v5, %v10285_v5  ;;  %v10450_v54 = vsel %vm8149_vm15, %v10278_v43, -inf }
 0xaae   : > { %v10516_v19 = vrot.slane %v10515_v46, 2  ;;  %v10523_v11 = vrot.slane %v10522_v20, 2  ;;  %v10464_v44 = vsel %vm8149_vm15, %v10285_v5, -inf  ;;  %v10510_v56 = vmax.f32 %v10508_v59, %v10509_v35 }
 0xaaf   : > { %v10530_v26 = vrot.slane %v10529_v14, 2  ;;  %v10451_v18 = vrot.slane %v10450_v54, 4  ;;  %v10457_v22 = vsel %vm8149_vm15, %v10286_v57, -inf  ;;  %v10465_v60 = vrot.slane %v10464_v44, 4 }
 0xab0   : > { %v10517_v31 = vmax.f32 %v10515_v46, %v10516_v19  ;;  %v10524_v52 = vmax.f32 %v10522_v20, %v10523_v11  ;;  %v10458_v7 = vrot.slane %v10457_v22, 4  ;;  %v10511_v30 = vrot.slane %v10510_v56, 1 }
 0xab1   : > { %v10531_v15 = vmax.f32 %v10529_v14, %v10530_v26  ;;  %v10452_v50 = vmax.f32 %v10450_v54, %v10451_v18  ;;  %v10471_v58 = vsel %vm8149_vm15, %v10287_v33, -inf  ;;  %v10466_v49 = vmax.f32 %v10464_v44, %v10465_v60 }
 0xab2   : > { %v10518_v40 = vrot.slane %v10517_v31, 1  ;;  %v10525_v34 = vrot.slane %v10524_v52, 1  ;;  %v10459_v62 = vmax.f32 %v10457_v22, %v10458_v7  ;;  %v10512_v12 = vmax.f32 %v10510_v56, %v10511_v30 }
 0xab3   : > { %v10532_v63 = vrot.slane %v10531_v15, 1  ;;  %v10453_v25 = vrot.slane %v10452_v50, 2  ;;  %v10472_v55 = vrot.slane %v10471_v58, 4  ;;  %v10467_v13 = vrot.slane %v10466_v49, 2 }
 0xab4   : > { %v10519_v51 = vmax.f32 %v10517_v31, %v10518_v40  ;;  %v10526_v21 = vmax.f32 %v10524_v52, %v10525_v34  ;;  %v10460_v2 = vrot.slane %v10459_v62, 2  ;;  %v10650_v9 = vmax.f32 %v21955_v42, %v10512_v12 }
 0xab5   : > { %v10533_v29 = vmax.f32 %v10531_v15, %v10532_v63  ;;  %v10454_v10 = vmax.f32 %v10452_v50, %v10453_v25  ;;  %v10473_v4 = vmax.f32 %v10471_v58, %v10472_v55  ;;  %v10468_v32 = vmax.f32 %v10466_v49, %v10467_v13 }
 0xab6   : > { %v10651_v16 = vmax.f32 %v21957_v17, %v10519_v51  ;;  %v10652_v38 = vmax.f32 %v21966_v45, %v10526_v21  ;;  %v10461_v24 = vmax.f32 %v10459_v62, %v10460_v2  ;;  %vm10220_vm12 = vcmp.gt.f32.partialorder %v10212_v1, 0.0 }
 0xab7   : > { %v10653_v48 = vmax.f32 %v21972_v23, %v10533_v29  ;;  %v10455_v36 = vrot.slane %v10454_v10, 1  ;;  %v10474_v59 = vrot.slane %v10473_v4, 2  ;;  %v10469_v5 = vrot.slane %v10468_v32, 1 }
 0xab8   : > { %v10694_v6 = vsel %vm8235_vm7, %v10651_v16, %v10650_v9  ;;  %v10462_v43 = vrot.slane %v10461_v24, 1  ;;  %v10228_v46 = vmul.f32 0.01, %v10212_v1  ;;  %vm10218_vm14 = vcmp.gt.f32.partialorder %v21990_v39, 0.0 }
 0xab9   : > { %v10695_v42 = vsel %vm8237_vm8, %v10652_v38, %v10694_v6  ;;  %v10456_v20 = vmax.f32 %v10454_v10, %v10455_v36  ;;  %v10475_v35 = vmax.f32 %v10473_v4, %v10474_v59  ;;  %v10470_v14 = vmax.f32 %v10468_v32, %v10469_v5 }
 0xaba   : > { %v10696_v17 = vsel %vm8239_vm9, %v10653_v48, %v10695_v42  ;;  %v10463_v45 = vmax.f32 %v10461_v24, %v10462_v43  ;;  %v10236_v23 = vsel %vm10220_vm12, %v10212_v1, %v10228_v46  ;;  %v10449_v54 = vmax.f32 %v21963_v3, %v10448_v41 }
 0xabb   : > { %v10476_v57 = vrot.slane %v10475_v35, 1  ;;  %v10646_v33 = vmax.f32 %v21959_v53, %v10456_v20  ;;  %10244 = vst.msk [vmem:[%s21917_s13 + $0x30] sm:$0xff] %vm8147_vm13, %v10236_v23  ;;  %v10356_v19 = vcombine.high %v10236_v23, %v10236_v23  ;;  %v10363_v11 = vrot.slane %v10236_v23, %v20990_v37 }
 0xabc   : > { %10709 = vst.msk [vmem:[#allocation2 + $0x31] sm:$0xf] %vm10707_vm11, %v10696_v17  ;;  %v10647_v44 = vmax.f32 %v21974_v27, %v10463_v45  ;;  %v10648_v56 = vmax.f32 %v21976_v8, %v10470_v14  ;;  %v10226_v1 = vmul.f32 0.01, %v21990_v39  ;;  %v10213_v27 = vadd.f32 %v21945_v47, %v21911_v61 }
 0xabd   : > { %v10477_v26 = vmax.f32 %v10475_v35, %v10476_v57  ;;  %v10370_v53 = vrot.slane %v10356_v19, %v20990_v37  ;;  %v10371_v18 = vcombine.high %v10363_v11, %v10363_v11  ;;  %v10590_v22 = vsel %vm8149_vm15, %v10363_v11, -inf }
 0xabe   : > { %v10691_v31 = vsel %vm8235_vm7, %v10647_v44, %v10646_v33  ;;  %v10591_v52 = vrot.slane %v10590_v22, 4  ;;  %v10234_v3 = vsel %vm10218_vm14, %v21990_v39, %v10226_v1  ;;  %v10229_v16 = vmul.f32 0.01, %v10213_v27 }
 0xabf   : > { %v10649_v41 = vmax.f32 %v10449_v54, %v10477_v26  ;;  %v10692_v8 = vsel %vm8237_vm8, %v10648_v56, %v10691_v31  ;;  %v10372_v7 = vcombine.high %v10370_v53, %v10370_v53  ;;  %v10597_v60 = vsel %vm8149_vm15, %v10371_v18, -inf  ;;  %10242 = vst.msk [vmem:[%s21917_s13 + $0x20] sm:$0xff] %vm8147_vm13, %v10234_v3 }
 0xac0   : > { %v10592_v30 = vmax.f32 %v10590_v22, %v10591_v52  ;;  %v10598_v15 = vrot.slane %v10597_v60, 4  ;;  %v10604_v50 = vsel %vm8149_vm15, %v10370_v53, -inf  ;;  %v10322_v58 = vcombine.high %v10234_v3, %v10234_v3 }
 0xac1   : > { %v10693_v40 = vsel %vm8239_vm9, %v10649_v41, %v10692_v8  ;;  %v10605_v34 = vrot.slane %v10604_v50, 4  ;;  %v10611_v39 = vsel %vm8149_vm15, %v10372_v7, -inf  ;;  %v10329_v47 = vrot.slane %v10234_v3, %v20990_v37 }
 0xac2   : > { %v10593_v62 = vrot.slane %v10592_v30, 2  ;;  %v10599_v49 = vmax.f32 %v10597_v60, %v10598_v15  ;;  %v10612_v12 = vrot.slane %v10611_v39, 4  ;;  %v10336_v63 = vrot.slane %v10322_v58, %v20990_v37  ;;  %10708 = vst.msk [vmem:[#allocation2 + $0x19] sm:$0xf] %vm10707_vm11, %v10693_v40 }
 0xac3   : > { %v10606_v25 = vmax.f32 %v10604_v50, %v10605_v34  ;;  %v10337_v55 = vcombine.high %v10329_v47, %v10329_v47  ;;  %v10534_v51 = vsel %vm8149_vm15, %v10329_v47, -inf  ;;  %vm10221_vm2 = vcmp.gt.f32.partialorder %v10213_v27, 0.0 }
 0xac4   : > { %v10600_v21 = vrot.slane %v10599_v49, 2  ;;  %v10613_v2 = vmax.f32 %v10611_v39, %v10612_v12  ;;  %v10594_v13 = vmax.f32 %v10592_v30, %v10593_v62  ;;  %v10535_v9 = vrot.slane %v10534_v51, 4 }
 0xac5   : > { %v10607_v29 = vrot.slane %v10606_v25, 2  ;;  %v10541_v10 = vsel %vm8149_vm15, %v10337_v55, -inf  ;;  %v10548_v4 = vsel %vm8149_vm15, %v10336_v63, -inf  ;;  %v10338_v32 = vcombine.high %v10336_v63, %v10336_v63 }
 0xac6   : > { %v10601_v38 = vmax.f32 %v10599_v49, %v10600_v21  ;;  %v10614_v24 = vrot.slane %v10613_v2, 2  ;;  %v10542_v48 = vrot.slane %v10541_v10, 4  ;;  %v10595_v36 = vrot.slane %v10594_v13, 1 }
 0xac7   : > { %v10608_v59 = vmax.f32 %v10606_v25, %v10607_v29  ;;  %v10536_v6 = vmax.f32 %v10534_v51, %v10535_v9  ;;  %v10549_v43 = vrot.slane %v10548_v4, 4  ;;  %v10237_v5 = vsel %vm10221_vm2, %v10213_v27, %v10229_v16 }
 0xac8   : > { %v10602_v46 = vrot.slane %v10601_v38, 1  ;;  %v10615_v42 = vmax.f32 %v10613_v2, %v10614_v24  ;;  %10245 = vst.msk [vmem:[%s21917_s13 + $0x38] sm:$0xff] %vm8147_vm13, %v10237_v5  ;;  %v10543_v20 = vmax.f32 %v10541_v10, %v10542_v48  ;;  %v10555_v35 = vsel %vm8149_vm15, %v10338_v32, -inf }
 0xac9   : > { %v10373_v17 = vcombine.high %v10237_v5, %v10237_v5  ;;  %v10380_v45 = vrot.slane %v10237_v5, %v20990_v37  ;;  %v22040_v14 = vmax.f32 %v10594_v13, %v10595_v36  ;;  %v10609_v23 = vrot.slane %v10608_v59, 1 }
 0xaca   : > { %v10537_v57 = vrot.slane %v10536_v6, 2  ;;  %v10550_v33 = vmax.f32 %v10548_v4, %v10549_v43  ;;  %v10211_v44 = vadd.f32 %v21911_v61, %v21947_v28  ;;  %v22046_v56 = vmax.f32 %v10601_v38, %v10602_v46 }
 0xacb   : > { %v10387_v19 = vrot.slane %v10373_v17, %v20990_v37  ;;  %v10388_v11 = vcombine.high %v10380_v45, %v10380_v45  ;;  %v10618_v54 = vsel %vm8149_vm15, %v10380_v45, -inf  ;;  %v10616_v1 = vrot.slane %v10615_v42, 1 }
 0xacc   : > { %v10556_v26 = vrot.slane %v10555_v35, 4  ;;  %v10619_v53 = vrot.slane %v10618_v54, 4  ;;  %v10544_v18 = vrot.slane %v10543_v20, 2  ;;  %v22050_v3 = vmax.f32 %v10608_v59, %v10609_v23 }
 0xacd   : > { %v10389_v22 = vcombine.high %v10387_v19, %v10387_v19  ;;  %v10625_v31 = vsel %vm8149_vm15, %v10388_v11, -inf  ;;  %v10632_v52 = vsel %vm8149_vm15, %v10387_v19, -inf  ;;  %v10551_v27 = vrot.slane %v10550_v33, 2 }
 0xace   : > { %v10620_v41 = vmax.f32 %v10618_v54, %v10619_v53  ;;  %v10626_v8 = vrot.slane %v10625_v31, 4  ;;  %v10633_v7 = vrot.slane %v10632_v52, 4  ;;  %vm10219_vm3 = vcmp.gt.f32.partialorder %v10211_v44, 0.0 }
 0xacf   : > { %v10639_v61 = vsel %vm8149_vm15, %v10389_v22, -inf  ;;  %v10227_v28 = vmul.f32 0.01, %v10211_v44  ;;  %v22053_v60 = vmax.f32 %v10536_v6, %v10537_v57  ;;  %v10617_v58 = vmax.f32 %v10615_v42, %v10616_v1 }
 0xad0   : > { %v10621_v30 = vrot.slane %v10620_v41, 2  ;;  %v10627_v15 = vmax.f32 %v10625_v31, %v10626_v8  ;;  %v10640_v50 = vrot.slane %v10639_v61, 4  ;;  %v10557_v40 = vmax.f32 %v10555_v35, %v10556_v26 }
 0xad1   : > { %v10634_v34 = vmax.f32 %v10632_v52, %v10633_v7  ;;  %v10235_v39 = vsel %vm10219_vm3, %v10211_v44, %v10227_v28  ;;  %v10545_v63 = vmax.f32 %v10543_v20, %v10544_v18  ;;  %v10552_v25 = vmax.f32 %v10550_v33, %v10551_v27 }
 0xad2   : > { %v10622_v47 = vmax.f32 %v10620_v41, %v10621_v30  ;;  %v10628_v62 = vrot.slane %v10627_v15, 2  ;;  %v10641_v49 = vmax.f32 %v10639_v61, %v10640_v50  ;;  %10243 = vst.msk [vmem:[%s21917_s13 + $0x28] sm:$0xff] %vm8147_vm13, %v10235_v39  ;;  %v10339_v12 = vcombine.high %v10235_v39, %v10235_v39 }
 0xad3   : > { %v10635_v55 = vrot.slane %v10634_v34, 2  ;;  %v10346_v51 = vrot.slane %v10235_v39, %v20990_v37  ;;  %v10558_v9 = vrot.slane %v10557_v40, 2  ;;  %v10539_v31 = vrot.slane %v22053_v60, 1 }
 0xad4   : > { %v10623_v21 = vrot.slane %v10622_v47, 1  ;;  %v10629_v2 = vmax.f32 %v10627_v15, %v10628_v62  ;;  %v10642_v13 = vrot.slane %v10641_v49, 2  ;;  %v10353_v29 = vrot.slane %v10339_v12, %v20990_v37 }
 0xad5   : > { %v10636_v10 = vmax.f32 %v10634_v34, %v10635_v55  ;;  %v10354_v4 = vcombine.high %v10346_v51, %v10346_v51  ;;  %v10562_v16 = vsel %vm8149_vm15, %v10346_v51, -inf  ;;  %v10559_v54 = vmax.f32 %v10557_v40, %v10558_v9 }
 0xad6   : > { %v10624_v38 = vmax.f32 %v10622_v47, %v10623_v21  ;;  %v10630_v24 = vrot.slane %v10629_v2, 1  ;;  %v10643_v32 = vmax.f32 %v10641_v49, %v10642_v13  ;;  %v10355_v48 = vcombine.high %v10353_v29, %v10353_v29 }
 0xad7   : > { %v10637_v36 = vrot.slane %v10636_v10, 1  ;;  %v10563_v59 = vrot.slane %v10562_v16, 4  ;;  %v10569_v6 = vsel %vm8149_vm15, %v10354_v4, -inf  ;;  %v10576_v43 = vsel %vm8149_vm15, %v10353_v29, -inf }
 0xad8   : > { %v10631_v5 = vmax.f32 %v10629_v2, %v10630_v24  ;;  %v10644_v46 = vrot.slane %v10643_v32, 1  ;;  %v10658_v42 = vmax.f32 %v22040_v14, %v10624_v38  ;;  %v10570_v20 = vrot.slane %v10569_v6, 4  ;;  %v18975_v24 = vld [vmem:[#allocation2] ss:$24 sps:$4 sm:$0xff]  }
 0xad9   : > { %v10638_v35 = vmax.f32 %v10636_v10, %v10637_v36  ;;  %v10564_v17 = vmax.f32 %v10562_v16, %v10563_v59  ;;  %v10577_v45 = vrot.slane %v10576_v43, 4  ;;  %v10583_v23 = vsel %vm8149_vm15, %v10355_v48, -inf  ;;  %v18978_v48 = vld [vmem:[#allocation8 + $0x18] sm:$0xff]  }
 0xada   : > { %v10645_v57 = vmax.f32 %v10643_v32, %v10644_v46  ;;  %v10659_v33 = vmax.f32 %v22046_v56, %v10631_v5  ;;  %v10571_v19 = vmax.f32 %v10569_v6, %v10570_v20  ;;  %v10584_v11 = vrot.slane %v10583_v23, 4  ;;  %v18981_v5 = vld [vmem:[#allocation2 + $0x18] ss:$24 sps:$4 sm:$0xff]   ;;  %v18983_v46 = vld [vmem:[#allocation8 + $0x20] sm:$0xff]   ;;  %v18984_v20 = vld [vmem:[#allocation8 + $0x28] sm:$0xff]  }
 0xadb   : > { %v10660_v44 = vmax.f32 %v22050_v3, %v10638_v35  ;;  %v10565_v1 = vrot.slane %v10564_v17, 2  ;;  %v10578_v26 = vmax.f32 %v10576_v43, %v10577_v45  ;;  %v10546_v8 = vrot.slane %v10545_v63, 1  ;;  %v18979_v43 = vld [vmem:[#allocation2 + $0x2] ss:$24 sps:$4 sm:$0xff]  }
 0xadc   : > { %v10661_v53 = vmax.f32 %v10617_v58, %v10645_v57  ;;  %v10700_v18 = vsel %vm8235_vm7, %v10659_v33, %v10658_v42  ;;  %v10572_v14 = vrot.slane %v10571_v19, 2  ;;  %v10585_v22 = vmax.f32 %v10583_v23, %v10584_v11  ;;  %v18985_v23 = vld [vmem:[#allocation2 + $0x19] ss:$24 sps:$4 sm:$0xff]  }
 0xadd   : > { %v10701_v52 = vsel %vm8237_vm8, %v10660_v44, %v10700_v18  ;;  %v10566_v27 = vmax.f32 %v10564_v17, %v10565_v1  ;;  %v10579_v41 = vrot.slane %v10578_v26, 2  ;;  %v10553_v28 = vrot.slane %v10552_v25, 1  ;;  %v18987_v57 = vld [vmem:[#allocation2 + $0x1a] ss:$24 sps:$4 sm:$0xff]  }
 0xade   : > { %v10702_v56 = vsel %vm8239_vm9, %v10661_v53, %v10701_v52  ;;  %v10573_v7 = vmax.f32 %v10571_v19, %v10572_v14  ;;  %v10586_v61 = vrot.slane %v10585_v22, 2  ;;  %v10560_v15 = vrot.slane %v10559_v54, 1  ;;  %v18989_v33 = vld [vmem:[#allocation8 + $0x30] sm:$0xff]   ;;  %v18990_v11 = vld [vmem:[#allocation8 + $0x38] sm:$0xff]   ;;  %v18995_v18 = vld [vmem:[#allocation8 + $0x40] sm:$0xff]  }
 0xadf   : > { %v10567_v3 = vrot.slane %v10566_v27, 1  ;;  %v10580_v30 = vmax.f32 %v10578_v26, %v10579_v41  ;;  %10711 = vst.msk [vmem:[#allocation2 + $0x61] sm:$0xf] %vm10707_vm11, %v10702_v56  ;;  %v10540_v40 = vmax.f32 %v22053_v60, %v10539_v31  ;;  %v10547_v47 = vmax.f32 %v10545_v63, %v10546_v8  ;;  %v18973_v60 = vld [vmem:[#allocation2 + $0x1] ss:$24 sps:$4 sm:$0xff]   ;;  %v18977_v63 = vld [vmem:[#allocation8 + $0x10] sm:$0xff]  }
 0xae0   : > { %v10574_v50 = vrot.slane %v10573_v7, 1  ;;  %v10587_v58 = vmax.f32 %v10585_v22, %v10586_v61  ;;  %v10554_v12 = vmax.f32 %v10552_v25, %v10553_v28  ;;  %v10561_v21 = vmax.f32 %v10559_v54, %v10560_v15  ;;  %v18998_v41 = vld [vmem:[%s23020_s11 + $0x10] sm:$0xff]   ;;  %v18999_v8 = vld [vmem:[%s23020_s11] sm:$0xff]   ;;  %v19000_v56 = vld [vmem:[%s23020_s11 + $0x18] sm:$0xff]  }
 0xae1   : > { %v10568_v34 = vmax.f32 %v10566_v27, %v10567_v3  ;;  %v10581_v39 = vrot.slane %v10580_v30, 1  ;;  %vm11392_vm15 = vcmask 261120   ;;  %vm12090_vm0 = vcmask 254976  }
 0xae2   : > { %v10575_v62 = vmax.f32 %v10573_v7, %v10574_v50  ;;  %v10588_v49 = vrot.slane %v10587_v58, 1  ;;  %v19001_v7 = vld [vmem:[%s23020_s11 + $0x8] sm:$0xff]   ;;  %vm12936_vm12 = vcmask 523264   ;;  %vm13723_vm14 = vcmask 518144  }
 0xae3   : > { %v10582_v55 = vmax.f32 %v10580_v30, %v10581_v39  ;;  %v10654_v51 = vmax.f32 %v10540_v40, %v10568_v34 }
 0xae4   : > { %v10589_v2 = vmax.f32 %v10587_v58, %v10588_v49  ;;  %v10655_v13 = vmax.f32 %v10547_v47, %v10575_v62 }
 0xae5   : > { %v10656_v29 = vmax.f32 %v10554_v12, %v10582_v55 }
 0xae6   : > { %v10657_v9 = vmax.f32 %v10561_v21, %v10589_v2  ;;  %v10697_v10 = vsel %vm8235_vm7, %v10655_v13, %v10654_v51  ;;  %v18992_v1 = vld [vmem:[#allocation2 + $0x60] ss:$24 sps:$4 sm:$0xff]  }
 0xae7   : > { %v10698_v4 = vsel %vm8237_vm8, %v10656_v29, %v10697_v10  ;;  %v18994_v53 = vld [vmem:[#allocation2 + $0x61] ss:$24 sps:$4 sm:$0xff]   ;;  %vm11340_vm8 = vcmask 257024  }
 0xae8   : > { %v10699_v16 = vsel %vm8239_vm9, %v10657_v9, %v10698_v4  ;;  %v18997_v52 = vld [vmem:[#allocation2 + $0x62] ss:$24 sps:$4 sm:$0xff]  }
 0xae9   : > { %10710 = vst.msk [vmem:[#allocation2 + $0x49] sm:$0xf] %vm10707_vm11, %v10699_v16  ;;  %vm12864_vm11 = vcmask 517120  }
 0xaf0   : > { %v18974_v38 = vld [vmem:[#allocation2 + $0x31] ss:$24 sps:$4 sm:$0xff]  }
 0xaf1   : > { %v18976_v25 = vld [vmem:[#allocation2 + $0x30] ss:$24 sps:$4 sm:$0xff]   ;;  %v10739_v32 = vpack.c.bf16 %v18974_v38, %v18973_v60 }
 0xaf2   : > { %v10724_v36 = vpack.c.bf16 %v18976_v25, %v18975_v24  ;;  %v18980_v59 = vld [vmem:[#allocation2 + $0x32] ss:$24 sps:$4 sm:$0xff]  }
 0xaf3   : > { %17660 = vmatmul.mubr.msk.bf16.vlgmr.msra.gmra.mrb[40].mxu0 %vm8147_vm13, %v10739_v32  ;;  %v18982_v6 = vld [vmem:[#allocation2 + $0x48] ss:$24 sps:$4 sm:$0xff]   ;;  %v10855_v42 = vpack.c.bf16 %v18980_v59, %v18979_v43 }
 0xaf4   : > { %17666 = vmatmul.mubr.msk.bf16.vlgmr.msra.gmra.mrb[40].mxu1 %vm8147_vm13, %v10724_v36  ;;  %17670 = vmatpush3.bf16.msra.mxu0 %v18977_v63  ;;  %v10923_v35 = vpack.c.bf16 %v18982_v6, %v18981_v5  ;;  %v18986_v17 = vld [vmem:[#allocation2 + $0x49] ss:$24 sps:$4 sm:$0xff]  }
 0xaf5   : > { %17676 = vmatpush3.bf16.msra.mxu1 %v18978_v48  ;;  %17671 = vmatprep.mubr.msk.bf16.mxu0 %vm19497_vm6, %v19495_v0  ;;  %v18988_v45 = vld [vmem:[#allocation2 + $0x4a] ss:$24 sps:$4 sm:$0xff]   ;;  %v10991_v19 = vpack.c.bf16 %v18986_v17, %v18985_v23 }
 0xaf6   : > { %17677 = vmatprep.mubr.msk.bf16.mxu1 %vm19497_vm6, %v19495_v0  ;;  %17681 = vmatprep.subr.bf16.mxu0 %v19495_v0  ;;  %v11059_v54 = vpack.c.bf16 %v18988_v45, %v18987_v57  ;;  %v18991_v44 = vld [vmem:[#allocation2 + $0x30] ss:$24 sps:$4 sm:$0xff]  }
 0xaf7   : > { %17687 = vmatprep.subr.bf16.mxu1 %v19495_v0  ;;  %v18993_v26 = vld [vmem:[#allocation2 + $0x31] ss:$24 sps:$4 sm:$0xff]   ;;  %v11127_v14 = vpack.c.bf16 %v18992_v1, %v18991_v44 }
 0xaf8   : > { %v11195_v22 = vpack.c.bf16 %v18994_v53, %v18993_v26  ;;  %v18996_v31 = vld [vmem:[#allocation2 + $0x32] ss:$24 sps:$4 sm:$0xff]  }
 0xaf9   : > { %v11263_v27 = vpack.c.bf16 %v18997_v52, %v18996_v31 }
 0xafb   : > { %17672 = vmatmul.mubr.msk.bf16.vlgmr.msra.gmra.mrb[44].mxu0 %vm8147_vm13, %v10855_v42 }
 0xafc   : > { %17678 = vmatmul.mubr.msk.bf16.vlgmr.msra.gmra.mrb[44].mxu1 %vm8147_vm13, %v10923_v35  ;;  %17682 = vmatpush3.bf16.msra.mxu0 %v18983_v46 }
 0xafd   : > { %17688 = vmatpush3.bf16.msra.mxu1 %v18984_v20  ;;  %17683 = vmatprep.mubr.msk.bf16.mxu0 %vm19497_vm6, %v19495_v0 }
 0xafe   : > { %17689 = vmatprep.mubr.msk.bf16.mxu1 %vm19497_vm6, %v19495_v0  ;;  %17693 = vmatprep.subr.bf16.mxu0 %v19495_v0 }
 0xaff   : > { %17699 = vmatprep.subr.bf16.mxu1 %v19495_v0 }
 0xb03   : > { %17684 = vmatmul.mubr.msk.bf16.vlgmr.msra.gmra.mrb[48].mxu0 %vm8147_vm13, %v10991_v19 }
 0xb04   : > { %17690 = vmatmul.mubr.msk.bf16.vlgmr.msra.gmra.mrb[48].mxu1 %vm8147_vm13, %v11059_v54  ;;  %17694 = vmatpush3.bf16.msra.mxu0 %v18989_v33  ;;  %v15892_v54 = vld [vmem:[%s23021_s10] ss:$0 sm:$0xff] }
 0xb05   : > { %17700 = vmatpush3.bf16.msra.mxu1 %v18990_v11  ;;  %17695 = vmatprep.mubr.msk.bf16.mxu0 %vm19497_vm6, %v19495_v0 }
 0xb06   : > { %17701 = vmatprep.mubr.msk.bf16.mxu1 %vm19497_vm6, %v19495_v0  ;;  %17705 = vmatprep.subr.bf16.mxu0 %v19495_v0 }
 0xb07   : > { %17711 = vmatprep.subr.bf16.mxu1 %v19495_v0 }
 0xb0b   : > { %17696 = vmatmul.mubr.msk.bf16.vlgmr.msra.gmra.mrb[52].mxu0 %vm8147_vm13, %v11127_v14 }
 0xb0c   : > { %17702 = vmatmul.mubr.msk.bf16.vlgmr.msra.gmra.mrb[52].mxu1 %vm8147_vm13, %v11195_v22  ;;  %17706 = vmatpush3.bf16.msra.mxu0 %v18995_v18 }
 0xb0d   : > { %17707 = vmatprep.mubr.msk.bf16.mxu0 %vm19497_vm6, %v19495_v0  ;;  %17719 = vmatprep.subr.bf16.mxu0 %v19495_v0 }
 0xb0e   : > { %17715 = vmatprep.mubr.msk.bf16.mxu1 %vm19497_vm6, %v19495_v0  ;;  %17712 = vmatpush3.bf16.msra.mxu1 %v18998_v41 }
 0xb0f   : > { %17713 = vmatprep.subr.bf16.mxu1 %v19495_v0 }
 0xb12   : > { %17714 = vmatpush3.bf16.msra.mxu1 %v19000_v56 }
 0xb13   : > { %17708 = vmatmul.mubr.msk.bf16.vlgmr.msra.gmra.mrb[56].mxu0 %vm8147_vm13, %v11263_v27  ;;  %17727 = vmatprep.subr.bf16.mxu1 %v19495_v0 }
 0xb14   : > { %17723 = vmatprep.mubr.msk.bf16.mxu0 %vm19497_vm6, %v19495_v0  ;;  %17720 = vmatpush3.bf16.msra.mxu0 %v18999_v8 }
 0xb15   : > { %17721 = vmatprep.subr.bf16.mxu0 %v19495_v0 }
 0xb18   : > { %17722 = vmatpush3.bf16.msra.mxu0 %v19001_v7 }
 0xb19   : > { %17735 = vmatprep.subr.bf16.mxu0 %v19495_v0 }
 0xbc6   : > { %v10786_v61 = vpop.f32.mrb[40].mxu0 }
 0xbc7   : > { %v10836_v28 = vpop.f32.mrb[40].mxu1  ;;  %v17661_v3 = vpop.f32.mrb[41].mxu0 }
 0xbc8   : > { %v10837_v30 = vadd.f32 %v10836_v28, %v10786_v61  ;;  %v17667_v15 = vpop.f32.mrb[41].mxu1  ;;  %v10789_v50 = vpop.f32.mrb[42].mxu0  ;;  %v19006_v28 = vld [vmem:[%s23020_s11 + $0x20] sm:$0xff]  }
 0xbc9   : > { %v10839_v58 = vpop.f32.mrb[42].mxu1  ;;  %v17662_v40 = vpop.f32.mrb[43].mxu0 }
 0xbca   : > { %v10840_v34 = vadd.f32 %v10839_v58, %v10789_v50  ;;  %v17668_v39 = vpop.f32.mrb[43].mxu1  ;;  %v19007_v50 = vld [vmem:[%s23020_s11 + $0x30] sm:$0xff]   ;;  %v19008_v40 = vld [vmem:[%s23020_s11 + $0x28] sm:$0xff]  }
 0xbce   : > { %v10902_v47 = vpop.f32.mrb[44].mxu0 }
 0xbcf   : > { %v10909_v62 = vadd.f32 %v10902_v47, %v10837_v30  ;;  %v10970_v49 = vpop.f32.mrb[44].mxu1  ;;  %v17673_v12 = vpop.f32.mrb[45].mxu0 }
 0xbd0   : > { %v17679_v55 = vpop.f32.mrb[45].mxu1  ;;  %v10905_v51 = vpop.f32.mrb[46].mxu0 }
 0xbd1   : > { %v10977_v21 = vadd.f32 %v10970_v49, %v10909_v62  ;;  %v10910_v2 = vadd.f32 %v10905_v51, %v10840_v34  ;;  %v10973_v13 = vpop.f32.mrb[46].mxu1  ;;  %v17674_v29 = vpop.f32.mrb[47].mxu0  ;;  %v19009_v34 = vld [vmem:[%s23020_s11 + $0x38] sm:$0xff]   ;;  %v19014_v62 = vld [vmem:[%s23020_s11 + $0x40] sm:$0xff]   ;;  %v19015_v51 = vld [vmem:[%s23020_s11 + $0x50] sm:$0xff]  }
 0xbd2   : > { %v17680_v9 = vpop.f32.mrb[47].mxu1 }
 0xbd3   : > { %v10978_v10 = vadd.f32 %v10973_v13, %v10910_v2  ;;  %v19016_v2 = vld [vmem:[%s23020_s11 + $0x48] sm:$0xff]   ;;  %v19017_v13 = vld [vmem:[%s23020_s11 + $0x58] sm:$0xff]  }
 0xbd6   : > { %v11038_v4 = vpop.f32.mrb[48].mxu0 }
 0xbd7   : > { %v11045_v16 = vadd.f32 %v11038_v4, %v10977_v21  ;;  %v11106_v60 = vpop.f32.mrb[48].mxu1  ;;  %v17685_v63 = vpop.f32.mrb[49].mxu0 }
 0xbd8   : > { %v17691_v38 = vpop.f32.mrb[49].mxu1  ;;  %v11041_v24 = vpop.f32.mrb[50].mxu0  ;;  %v19023_v63 = vld [vmem:[%s23020_s11 + $0x70] sm:$0xff]  }
 0xbd9   : > { %v11113_v25 = vadd.f32 %v11106_v60, %v11045_v16  ;;  %v11046_v32 = vadd.f32 %v11041_v24, %v10978_v10  ;;  %v11109_v48 = vpop.f32.mrb[50].mxu1  ;;  %v17686_v36 = vpop.f32.mrb[51].mxu0  ;;  %v19022_v16 = vld [vmem:[%s23020_s11 + $0x60] sm:$0xff]   ;;  %v19024_v24 = vld [vmem:[%s23020_s11 + $0x68] sm:$0xff]  }
 0xbda   : > { %v17692_v59 = vpop.f32.mrb[51].mxu1 }
 0xbdb   : > { %v11114_v6 = vadd.f32 %v11109_v48, %v11046_v32 }
 0xbde   : > { %v11174_v43 = vpop.f32.mrb[52].mxu0 }
 0xbdf   : > { %v11181_v5 = vadd.f32 %v11174_v43, %v11113_v25  ;;  %v11242_v46 = vpop.f32.mrb[52].mxu1  ;;  %v17697_v42 = vpop.f32.mrb[53].mxu0  ;;  %v19025_v25 = vld [vmem:[%s23020_s11 + $0x78] sm:$0xff]  }
 0xbe0   : > { %v17703_v20 = vpop.f32.mrb[53].mxu1  ;;  %v11177_v35 = vpop.f32.mrb[54].mxu0 }
 0xbe1   : > { %v11249_v17 = vadd.f32 %v11242_v46, %v11181_v5  ;;  %v11182_v45 = vadd.f32 %v11177_v35, %v11114_v6  ;;  %v11245_v23 = vpop.f32.mrb[54].mxu1  ;;  %v17698_v57 = vpop.f32.mrb[55].mxu0  ;;  %v19030_v6 = vld [vmem:[%s23020_s11 + $0x80] sm:$0xff]   ;;  %v19031_v46 = vld [vmem:[%s23020_s11 + $0x88] sm:$0xff]  }
 0xbe2   : > { %v17704_v33 = vpop.f32.mrb[55].mxu1  ;;  %v19037_v57 = vld [vmem:[#allocation9 + $0x8] sm:$0xff]  }
 0xbe3   : > { %v11250_v19 = vadd.f32 %v11245_v23, %v11182_v45  ;;  %v19035_v45 = vld [vmem:[#allocation9] sm:$0xff]   ;;  %v19036_v23 = vld [vmem:[#allocation9 + $0x18] sm:$0xff]  }
 0xbe6   : > { %v11310_v11 = vpop.f32.mrb[56].mxu0 }
 0xbe7   : > { %v11317_v44 = vadd.f32 %v11310_v11, %v11249_v17  ;;  %v17709_v1 = vpop.f32.mrb[57].mxu0  ;;  %v19034_v17 = vld [vmem:[#allocation9 + $0x10] sm:$0xff]  }
 0xbe8   : > { %v11313_v26 = vpop.f32.mrb[58].mxu0 }
 0xbe9   : > { %v11326_v53 = vadd.f32 %v15892_v54, %v11317_v44  ;;  %v11318_v18 = vadd.f32 %v11313_v26, %v11250_v19  ;;  %v17710_v14 = vpop.f32.mrb[59].mxu0 }
 0xbeb   : > { %vm11328_vm13 = vcmp.gt.f32.partialorder %v11326_v53, 0.0  ;;  %v11330_v22 = vmul.f32 0.01, %v11326_v53  ;;  %v11327_v31 = vadd.f32 %v15892_v54, %v11318_v18 }
 0xbed   : > { %v11332_v52 = vsel %vm11328_vm13, %v11326_v53, %v11330_v22  ;;  %vm11329_vm9 = vcmp.gt.f32.partialorder %v11327_v31, 0.0  ;;  %v11331_v27 = vmul.f32 0.01, %v11327_v31 }
 0xbee   : > { %v11336_v41 = vcombine.high %v11332_v52, %v11332_v52  ;;  %11341 = vst.msk [vmem:[#allocation2 + $0x19] sm:$0xf] %vm11340_vm8, %v11332_v52 }
 0xbef   : > { %v11333_v8 = vsel %vm11329_vm9, %v11327_v31, %v11331_v27 }
 0xbf0   : > { %v11337_v56 = vcombine.high %v11333_v8, %v11333_v8  ;;  %11342 = vst.msk [vmem:[#allocation2 + $0x31] sm:$0xf] %vm11340_vm8, %v11336_v41  ;;  %11343 = vst.msk [vmem:[#allocation2 + $0x49] sm:$0xf] %vm11340_vm8, %v11333_v8 }
 0xbf2   : > { %11344 = vst.msk [vmem:[#allocation2 + $0x61] sm:$0xf] %vm11340_vm8, %v11337_v56 }
 0xbf5   : > { %v19002_v7 = vld [vmem:[#allocation2 + $0x1] ss:$24 sps:$4 sm:$0xff]  }
 0xbf6   : > { %v19004_v61 = vld [vmem:[#allocation2] ss:$24 sps:$4 sm:$0xff]  }
 0xbf7   : > { %v19003_v3 = vld [vmem:[#allocation2 + $0x31] ss:$24 sps:$4 sm:$0xff]   ;;  %v19010_v49 = vld [vmem:[#allocation2 + $0x2] ss:$24 sps:$4 sm:$0xff]  }
 0xbf8   : > { %v19005_v30 = vld [vmem:[#allocation2 + $0x30] ss:$24 sps:$4 sm:$0xff]   ;;  %v11374_v15 = vpack.c.bf16 %v19003_v3, %v19002_v7  ;;  %12152 = vst.msk [vmem:[#allocation2] sm:$0xf] %vm12151_vm4, %v19495_v0 }
 0xbf9   : > { %v11357_v58 = vpack.c.bf16 %v19005_v30, %v19004_v61  ;;  %v19011_v39 = vld [vmem:[#allocation2 + $0x32] ss:$24 sps:$4 sm:$0xff]   ;;  %v19027_v32 = vld [vmem:[#allocation2 + $0x60] ss:$24 sps:$4 sm:$0xff]  }
 0xbfa   : > { %17716 = vmatmul.mubr.msk.bf16.vlgmr.msra.gmra.mrb[56].mxu1 %vm11392_vm15, %v11374_v15  ;;  %v19013_v47 = vld [vmem:[#allocation2 + $0x48] ss:$24 sps:$4 sm:$0xff]   ;;  %v19012_v12 = vld [vmem:[#allocation2 + $0x18] ss:$24 sps:$4 sm:$0xff]   ;;  %v11505_v55 = vpack.c.bf16 %v19011_v39, %v19010_v49 }
 0xbfb   : > { %17724 = vmatmul.mubr.msk.bf16.vlgmr.msra.gmra.mrb[60].mxu0 %vm11392_vm15, %v11357_v58  ;;  %17728 = vmatpush3.bf16.msra.mxu1 %v19006_v28  ;;  %v11581_v21 = vpack.c.bf16 %v19013_v47, %v19012_v12  ;;  %v19019_v29 = vld [vmem:[#allocation2 + $0x49] ss:$24 sps:$4 sm:$0xff]   ;;  %v19018_v10 = vld [vmem:[#allocation2 + $0x19] ss:$24 sps:$4 sm:$0xff]   ;;  %12156 = vst.msk [vmem:[#allocation2 + $0x18] sm:$0x1] %vm12155_vm1, %v19495_v0 }
 0xbfc   : > { %17736 = vmatpush3.bf16.msra.mxu0 %v19007_v50  ;;  %17729 = vmatprep.subr.bf16.mxu1 %v19495_v0  ;;  %v19021_v9 = vld [vmem:[#allocation2 + $0x4a] ss:$24 sps:$4 sm:$0xff]   ;;  %v19020_v4 = vld [vmem:[#allocation2 + $0x1a] ss:$24 sps:$4 sm:$0xff]   ;;  %v11657_v60 = vpack.c.bf16 %v19019_v29, %v19018_v10 }
 0xbfd   : > { %17737 = vmatprep.subr.bf16.mxu0 %v19495_v0  ;;  %17731 = vmatprep.mubr.msk.bf16.mxu1 %vm19497_vm6, %v19495_v0  ;;  %v11733_v38 = vpack.c.bf16 %v19021_v9, %v19020_v4  ;;  %v19029_v48 = vld [vmem:[#allocation2 + $0x61] ss:$24 sps:$4 sm:$0xff]   ;;  %v19026_v36 = vld [vmem:[#allocation2 + $0x30] ss:$24 sps:$4 sm:$0xff]   ;;  %12158 = vst.msk [vmem:[#allocation2 + $0x1b] sm:$0x1] %vm12155_vm1, %v19495_v0 }
 0xbfe   : > { %17739 = vmatprep.mubr.msk.bf16.mxu0 %vm19497_vm6, %v19495_v0  ;;  %v19028_v59 = vld [vmem:[#allocation2 + $0x31] ss:$24 sps:$4 sm:$0xff]   ;;  %v11809_v43 = vpack.c.bf16 %v19027_v32, %v19026_v36  ;;  %v19033_v42 = vld [vmem:[#allocation2 + $0x62] ss:$24 sps:$4 sm:$0xff]   ;;  %12157 = vst.msk [vmem:[#allocation2 + $0x30] sm:$0x1] %vm12155_vm1, %v19495_v0 }
 0xbff   : > { %17730 = vmatpush3.bf16.msra.mxu1 %v19008_v40  ;;  %v11885_v5 = vpack.c.bf16 %v19029_v48, %v19028_v59  ;;  %v19032_v20 = vld [vmem:[#allocation2 + $0x32] ss:$24 sps:$4 sm:$0xff]   ;;  %v15952_v32 = vld [vmem:[%s22927_s12] ss:$0 sm:$0xff] }
 0xc00   : > { %17738 = vmatpush3.bf16.msra.mxu0 %v19009_v34  ;;  %17743 = vmatprep.subr.bf16.mxu1 %v19495_v0  ;;  %v11961_v35 = vpack.c.bf16 %v19033_v42, %v19032_v20  ;;  %12154 = vst.msk [vmem:[#allocation2 + $0x48] sm:$0xf] %vm12151_vm4, %v19495_v0 }
 0xc01   : > { %17751 = vmatprep.subr.bf16.mxu0 %v19495_v0  ;;  %12159 = vst.msk [vmem:[#allocation2 + $0x33] sm:$0x1] %vm12155_vm1, %v19495_v0 }
 0xc02   : > { %17732 = vmatmul.mubr.msk.bf16.vlgmr.msra.gmra.mrb[60].mxu1 %vm11392_vm15, %v11505_v55 }
 0xc03   : > { %17740 = vmatmul.mubr.msk.bf16.vlgmr.msra.gmra.mrb[64].mxu0 %vm11392_vm15, %v11581_v21  ;;  %17744 = vmatpush3.bf16.msra.mxu1 %v19014_v62 }
 0xc04   : > { %17752 = vmatpush3.bf16.msra.mxu0 %v19015_v51  ;;  %17745 = vmatprep.subr.bf16.mxu1 %v19495_v0 }
 0xc05   : > { %17753 = vmatprep.subr.bf16.mxu0 %v19495_v0  ;;  %17747 = vmatprep.mubr.msk.bf16.mxu1 %vm19497_vm6, %v19495_v0 }
 0xc06   : > { %17755 = vmatprep.mubr.msk.bf16.mxu0 %vm19497_vm6, %v19495_v0 }
 0xc07   : > { %17746 = vmatpush3.bf16.msra.mxu1 %v19016_v2 }
 0xc08   : > { %17754 = vmatpush3.bf16.msra.mxu0 %v19017_v13  ;;  %17759 = vmatprep.subr.bf16.mxu1 %v19495_v0 }
 0xc09   : > { %17767 = vmatprep.subr.bf16.mxu0 %v19495_v0 }
 0xc0a   : > { %17748 = vmatmul.mubr.msk.bf16.vlgmr.msra.gmra.mrb[64].mxu1 %vm11392_vm15, %v11657_v60 }
 0xc0b   : > { %17756 = vmatmul.mubr.msk.bf16.vlgmr.msra.gmra.mrb[68].mxu0 %vm11392_vm15, %v11733_v38  ;;  %17760 = vmatpush3.bf16.msra.mxu1 %v19022_v16 }
 0xc0c   : > { %17768 = vmatpush3.bf16.msra.mxu0 %v19023_v63  ;;  %17761 = vmatprep.subr.bf16.mxu1 %v19495_v0 }
 0xc0d   : > { %17769 = vmatprep.subr.bf16.mxu0 %v19495_v0  ;;  %17763 = vmatprep.mubr.msk.bf16.mxu1 %vm19497_vm6, %v19495_v0 }
 0xc0e   : > { %17771 = vmatprep.mubr.msk.bf16.mxu0 %vm19497_vm6, %v19495_v0 }
 0xc0f   : > { %17762 = vmatpush3.bf16.msra.mxu1 %v19024_v24 }
 0xc10   : > { %17770 = vmatpush3.bf16.msra.mxu0 %v19025_v25  ;;  %17775 = vmatprep.subr.bf16.mxu1 %v19495_v0 }
 0xc11   : > { %17783 = vmatprep.subr.bf16.mxu0 %v19495_v0 }
 0xc12   : > { %17764 = vmatmul.mubr.msk.bf16.vlgmr.msra.gmra.mrb[68].mxu1 %vm11392_vm15, %v11809_v43 }
 0xc13   : > { %17772 = vmatmul.mubr.msk.bf16.vlgmr.msra.gmra.mrb[72].mxu0 %vm11392_vm15, %v11885_v5  ;;  %17776 = vmatpush3.bf16.msra.mxu1 %v19030_v6 }
 0xc14   : > { %17777 = vmatprep.subr.bf16.mxu1 %v19495_v0  ;;  %17779 = vmatprep.mubr.msk.bf16.mxu1 %vm19497_vm6, %v19495_v0 }
 0xc15   : > { %17787 = vmatprep.mubr.msk.bf16.mxu0 %vm19497_vm6, %v19495_v0  ;;  %17784 = vmatpush3.bf16.msra.mxu0 %v19034_v17 }
 0xc16   : > { %17785 = vmatprep.subr.bf16.mxu0 %v19495_v0 }
 0xc17   : > { %17778 = vmatpush3.bf16.msra.mxu1 %v19031_v46 }
 0xc18   : > { %17791 = vmatprep.subr.bf16.mxu1 %v19495_v0 }
 0xc19   : > { %17786 = vmatpush3.bf16.msra.mxu0 %v19036_v23 }
 0xc1a   : > { %17780 = vmatmul.mubr.msk.bf16.vlgmr.msra.gmra.mrb[72].mxu1 %vm11392_vm15, %v11961_v35  ;;  %17799 = vmatprep.subr.bf16.mxu0 %v19495_v0 }
 0xc1b   : > { %17795 = vmatprep.mubr.msk.bf16.mxu1 %vm19497_vm6, %v19495_v0  ;;  %17792 = vmatpush3.bf16.msra.mxu1 %v19035_v45 }
 0xc1c   : > { %17793 = vmatprep.subr.bf16.mxu1 %v19495_v0 }
 0xc1f   : > { %17794 = vmatpush3.bf16.msra.mxu1 %v19037_v57 }
 0xc20   : > { %17807 = vmatprep.subr.bf16.mxu1 %v19495_v0 }
 0xccd   : > { %v11430_v33 = vpop.f32.mrb[56].mxu1 }
 0xcce   : > { %v11486_v19 = vpop.f32.mrb[60].mxu0  ;;  %v17717_v11 = vpop.f32.mrb[57].mxu1 }
 0xccf   : > { %v11487_v54 = vadd.f32 %v11486_v19, %v11430_v33  ;;  %v17725_v44 = vpop.f32.mrb[61].mxu0  ;;  %v11433_v1 = vpop.f32.mrb[58].mxu1 }
 0xcd0   : > { %v11489_v26 = vpop.f32.mrb[62].mxu0  ;;  %v17718_v53 = vpop.f32.mrb[59].mxu1 }
 0xcd1   : > { %v11490_v18 = vadd.f32 %v11489_v26, %v11433_v1  ;;  %v17726_v14 = vpop.f32.mrb[63].mxu0 }
 0xcd5   : > { %v11560_v22 = vpop.f32.mrb[60].mxu1 }
 0xcd6   : > { %v11567_v31 = vadd.f32 %v11560_v22, %v11487_v54  ;;  %v11636_v52 = vpop.f32.mrb[64].mxu0  ;;  %v17733_v27 = vpop.f32.mrb[61].mxu1 }
 0xcd7   : > { %v17741_v41 = vpop.f32.mrb[65].mxu0  ;;  %v11563_v8 = vpop.f32.mrb[62].mxu1 }
 0xcd8   : > { %v11643_v56 = vadd.f32 %v11636_v52, %v11567_v31  ;;  %v11568_v7 = vadd.f32 %v11563_v8, %v11490_v18  ;;  %v11639_v61 = vpop.f32.mrb[66].mxu0  ;;  %v17734_v28 = vpop.f32.mrb[63].mxu1 }
 0xcd9   : > { %v17742_v3 = vpop.f32.mrb[67].mxu0 }
 0xcda   : > { %v11644_v30 = vadd.f32 %v11639_v61, %v11568_v7 }
 0xcdd   : > { %v11712_v15 = vpop.f32.mrb[64].mxu1 }
 0xcde   : > { %v11719_v50 = vadd.f32 %v11712_v15, %v11643_v56  ;;  %v11788_v58 = vpop.f32.mrb[68].mxu0  ;;  %v17749_v40 = vpop.f32.mrb[65].mxu1 }
 0xcdf   : > { %v17757_v34 = vpop.f32.mrb[69].mxu0  ;;  %v11715_v39 = vpop.f32.mrb[66].mxu1 }
 0xce0   : > { %v11795_v47 = vadd.f32 %v11788_v58, %v11719_v50  ;;  %v11720_v62 = vadd.f32 %v11715_v39, %v11644_v30  ;;  %v11791_v49 = vpop.f32.mrb[70].mxu0  ;;  %v17750_v12 = vpop.f32.mrb[67].mxu1 }
 0xce1   : > { %v17758_v55 = vpop.f32.mrb[71].mxu0 }
 0xce2   : > { %v11796_v51 = vadd.f32 %v11791_v49, %v11720_v62 }
 0xce5   : > { %v11864_v21 = vpop.f32.mrb[68].mxu1 }
 0xce6   : > { %v11871_v2 = vadd.f32 %v11864_v21, %v11795_v47  ;;  %v11940_v13 = vpop.f32.mrb[72].mxu0  ;;  %v17765_v29 = vpop.f32.mrb[69].mxu1 }
 0xce7   : > { %v17773_v9 = vpop.f32.mrb[73].mxu0  ;;  %v11867_v10 = vpop.f32.mrb[70].mxu1 }
 0xce8   : > { %v11947_v4 = vadd.f32 %v11940_v13, %v11871_v2  ;;  %v11872_v16 = vadd.f32 %v11867_v10, %v11796_v51  ;;  %v11943_v60 = vpop.f32.mrb[74].mxu0  ;;  %v17766_v63 = vpop.f32.mrb[71].mxu1 }
 0xce9   : > { %v17774_v38 = vpop.f32.mrb[75].mxu0 }
 0xcea   : > { %v11948_v24 = vadd.f32 %v11943_v60, %v11872_v16 }
 0xced   : > { %v12016_v25 = vpop.f32.mrb[72].mxu1 }
 0xcee   : > { %v12023_v48 = vadd.f32 %v12016_v25, %v11947_v4  ;;  %v17781_v36 = vpop.f32.mrb[73].mxu1 }
 0xcef   : > { %v12019_v59 = vpop.f32.mrb[74].mxu1 }
 0xcf0   : > { %v12032_v6 = vadd.f32 %v15952_v32, %v12023_v48  ;;  %v12024_v43 = vadd.f32 %v12019_v59, %v11948_v24  ;;  %v17782_v5 = vpop.f32.mrb[75].mxu1 }
 0xcf2   : > { %vm12034_vm5 = vcmp.gt.f32.partialorder %v12032_v6, 0.0  ;;  %v12036_v46 = vmul.f32 0.01, %v12032_v6  ;;  %v12033_v42 = vadd.f32 %v15952_v32, %v12024_v43 }
 0xcf4   : > { %v12038_v20 = vsel %vm12034_vm5, %v12032_v6, %v12036_v46  ;;  %vm12035_vm10 = vcmp.gt.f32.partialorder %v12033_v42, 0.0  ;;  %v12037_v35 = vmul.f32 0.01, %v12033_v42 }
 0xcf5   : > { %v12042_v17 = vcombine.high %v12038_v20, %v12038_v20  ;;  %12046 = vst.msk [vmem:[%s22234_s24] sm:$0xf] %vm11340_vm8, %v12038_v20  ;;  %v12056_v45 = vrot.slane %v12038_v20, %v20990_v37 }
 0xcf6   : > { %v12039_v23 = vsel %vm12035_vm10, %v12033_v42, %v12037_v35 }
 0xcf7   : > { %12047 = vst.msk [vmem:[%s22234_s24 + $0x4] sm:$0xf] %vm11340_vm8, %v12042_v17  ;;  %v12063_v57 = vrot.slane %v12042_v17, %v20990_v37  ;;  %v12064_v33 = vcombine.high %v12056_v45, %v12056_v45  ;;  %v12091_v19 = vsel %vm12090_vm0, %v12056_v45, -inf  ;;  %v12043_v11 = vcombine.high %v12039_v23, %v12039_v23  ;;  %12048 = vst.msk [vmem:[%s22234_s24 + $0x8] sm:$0xf] %vm11340_vm8, %v12039_v23 }
 0xcf8   : > { %v12092_v54 = vrot.slane %v12091_v19, 4  ;;  %v12072_v44 = vrot.slane %v12039_v23, %v20990_v37 }
 0xcf9   : > { %v12065_v1 = vcombine.high %v12063_v57, %v12063_v57  ;;  %v12098_v26 = vsel %vm12090_vm0, %v12064_v33, -inf  ;;  %v12105_v53 = vsel %vm12090_vm0, %v12063_v57, -inf  ;;  %12049 = vst.msk [vmem:[%s22234_s24 + $0xc] sm:$0xf] %vm11340_vm8, %v12043_v11  ;;  %v12079_v18 = vrot.slane %v12043_v11, %v20990_v37  ;;  %s19498_s24 = smov [#allocation13]  }
 0xcfa   : > { %v12093_v14 = vmax.f32 %v12091_v19, %v12092_v54  ;;  %v12099_v22 = vrot.slane %v12098_v26, 4  ;;  %v12106_v31 = vrot.slane %v12105_v53, 4  ;;  %v12080_v52 = vcombine.high %v12072_v44, %v12072_v44 }
 0xcfb   : > { %v12112_v27 = vsel %vm12090_vm0, %v12065_v1, -inf  ;;  %v12081_v41 = vcombine.high %v12079_v18, %v12079_v18  ;;  %v12119_v8 = vsel %vm12090_vm0, %v12072_v44, -inf  ;;  %v12133_v56 = vsel %vm12090_vm0, %v12079_v18, -inf }
 0xcfc   : > { %v12094_v7 = vrot.slane %v12093_v14, 2  ;;  %v12100_v61 = vmax.f32 %v12098_v26, %v12099_v22  ;;  %v12107_v28 = vmax.f32 %v12105_v53, %v12106_v31  ;;  %v12113_v3 = vrot.slane %v12112_v27, 4  ;;  %v19040_v22 = vld [vmem:[#allocation9 + $0x20] sm:$0xff]  }
 0xcfd   : > { %v12120_v30 = vrot.slane %v12119_v8, 4  ;;  %v12126_v15 = vsel %vm12090_vm0, %v12080_v52, -inf  ;;  %v12134_v50 = vrot.slane %v12133_v56, 4  ;;  %v12140_v58 = vsel %vm12090_vm0, %v12081_v41, -inf }
 0xcfe   : > { %v12095_v40 = vmax.f32 %v12093_v14, %v12094_v7  ;;  %v12101_v34 = vrot.slane %v12100_v61, 2  ;;  %v12108_v39 = vrot.slane %v12107_v28, 2  ;;  %v12114_v47 = vmax.f32 %v12112_v27, %v12113_v3  ;;  %v19041_v27 = vld [vmem:[#allocation9 + $0x30] sm:$0xff]   ;;  %v19042_v7 = vld [vmem:[#allocation9 + $0x28] sm:$0xff]  }
 0xcff   : > { %v12121_v62 = vmax.f32 %v12119_v8, %v12120_v30  ;;  %v12127_v49 = vrot.slane %v12126_v15, 4  ;;  %v12135_v12 = vmax.f32 %v12133_v56, %v12134_v50  ;;  %v12141_v55 = vrot.slane %v12140_v58, 4  ;;  %v19046_v30 = vld [vmem:[#allocation9 + $0x40] sm:$0xff]   ;;  %v19047_v50 = vld [vmem:[#allocation9 + $0x50] sm:$0xff]  }
 0xd00   : > { %v12102_v51 = vmax.f32 %v12100_v61, %v12101_v34  ;;  %v12109_v21 = vmax.f32 %v12107_v28, %v12108_v39  ;;  %v12115_v2 = vrot.slane %v12114_v47, 2  ;;  %v12096_v4 = vrot.slane %v12095_v40, 1  ;;  %v19043_v61 = vld [vmem:[#allocation9 + $0x38] sm:$0xff]   ;;  %v19048_v39 = vld [vmem:[#allocation9 + $0x48] sm:$0xff]  }
 0xd01   : > { %v12122_v13 = vrot.slane %v12121_v62, 2  ;;  %v12128_v29 = vmax.f32 %v12126_v15, %v12127_v49  ;;  %v12136_v9 = vrot.slane %v12135_v12, 2  ;;  %v12142_v10 = vmax.f32 %v12140_v58, %v12141_v55 }
 0xd02   : > { %v12103_v16 = vrot.slane %v12102_v51, 1  ;;  %v12110_v60 = vrot.slane %v12109_v21, 1  ;;  %v12116_v63 = vmax.f32 %v12114_v47, %v12115_v2  ;;  %v12097_v46 = vmax.f32 %v12095_v40, %v12096_v4  ;;  %v19049_v47 = vld [vmem:[#allocation9 + $0x58] sm:$0xff]  }
 0xd03   : > { %v12123_v38 = vmax.f32 %v12121_v62, %v12122_v13  ;;  %v12129_v24 = vrot.slane %v12128_v29, 2  ;;  %v12137_v25 = vmax.f32 %v12135_v12, %v12136_v9  ;;  %v12143_v32 = vrot.slane %v12142_v10, 2  ;;  %v19052_v12 = vld [vmem:[#allocation9 + $0x60] sm:$0xff]   ;;  %v19055_v9 = vld [vmem:[#allocation9 + $0x78] sm:$0xff]  }
 0xd04   : > { %v12111_v48 = vmax.f32 %v12109_v21, %v12110_v60  ;;  %v12117_v36 = vrot.slane %v12116_v63, 1  ;;  %v12104_v42 = vmax.f32 %v12102_v51, %v12103_v16  ;;  %v19053_v51 = vld [vmem:[#allocation9 + $0x70] sm:$0xff]   ;;  %v19058_v16 = vld [vmem:[#allocation9 + $0x80] sm:$0xff]  }
 0xd05   : > { %v12124_v59 = vrot.slane %v12123_v38, 1  ;;  %v12130_v6 = vmax.f32 %v12128_v29, %v12129_v24  ;;  %v12138_v43 = vrot.slane %v12137_v25, 1  ;;  %v12144_v5 = vmax.f32 %v12142_v10, %v12143_v32  ;;  %v19054_v29 = vld [vmem:[#allocation9 + $0x68] sm:$0xff]  }
 0xd06   : > { %v12118_v20 = vmax.f32 %v12116_v63, %v12117_v36  ;;  %v12147_v23 = vmax.f32 %v12097_v46, %v12111_v48  ;;  %v19059_v24 = vld [vmem:[#allocation9 + $0x88] sm:$0xff]   ;;  %v19061_v48 = vld [vmem:[%s22930_s15 + $0x20] sm:$0xff]   ;;  %v19067_v46 = vld [vmem:[%s22930_s15 + $0x38] sm:$0xff]  }
 0xd07   : > { %v12131_v35 = vrot.slane %v12130_v6, 1  ;;  %v12139_v17 = vmax.f32 %v12137_v25, %v12138_v43  ;;  %v12145_v45 = vrot.slane %v12144_v5, 1  ;;  %v12125_v33 = vmax.f32 %v12123_v38, %v12124_v59  ;;  %v19062_v36 = vld [vmem:[%s22930_s15] sm:$0xff]   ;;  %v19063_v59 = vld [vmem:[%s22930_s15 + $0x28] sm:$0xff]   ;;  %v19065_v43 = vld [vmem:[%s22930_s15 + $0x30] sm:$0xff]  }
 0xd08   : > { %v12148_v57 = vmax.f32 %v12104_v42, %v12118_v20  ;;  %v19068_v42 = vld [vmem:[%s22930_s15 + $0x18] sm:$0xff]  }
 0xd09   : > { %v12132_v19 = vmax.f32 %v12130_v6, %v12131_v35  ;;  %v12146_v11 = vmax.f32 %v12144_v5, %v12145_v45  ;;  %v12149_v44 = vmax.f32 %v12125_v33, %v12139_v17  ;;  %v19064_v6 = vld [vmem:[%s22930_s15 + $0x8] sm:$0xff]   ;;  %v19066_v5 = vld [vmem:[%s22930_s15 + $0x10] sm:$0xff]  }
 0xd0a   : > { %v12164_v54 = vsel %vm8235_vm7, %v12148_v57, %v12147_v23 }
 0xd0b   : > { %12168 = vst.msk [vmem:[#allocation2 + $0x19] sm:$0x3] %vm12090_vm0, %v12164_v54  ;;  %v12150_v1 = vmax.f32 %v12132_v19, %v12146_v11 }
 0xd0d   : > { %v12165_v26 = vsel %vm8235_vm7, %v12150_v1, %v12149_v44 }
 0xd0e   : > { %12169 = vst.msk [vmem:[#allocation2 + $0x31] sm:$0x3] %vm12090_vm0, %v12165_v26 }
 0xd12   : > { %v19038_v53 = vld [vmem:[#allocation2 + $0x1] ss:$24 sps:$4 sm:$0x33]  }
 0xd13   : > { %v19039_v18 = vld [vmem:[#allocation2] ss:$24 sps:$4 sm:$0x33]   ;;  %v12199_v14 = vrot.slane %v19038_v53, %v20990_v37  ;;  %v19044_v41 = vld [vmem:[#allocation2 + $0x2] ss:$24 sps:$4 sm:$0x33]  }
 0xd14   : > { %v12181_v31 = vrot.slane %v19039_v18, %v20990_v37  ;;  %v12328_v28 = vrot.slane %v19044_v41, %v20990_v37 }
 0xd15   : > { %v12201_v52 = vpack.c.bf16 %v12199_v14, %v12199_v14  ;;  %v19045_v56 = vld [vmem:[#allocation2 + $0x18] ss:$24 sps:$4 sm:$0x33]   ;;  %v19051_v34 = vld [vmem:[#allocation2 + $0x1a] ss:$24 sps:$4 sm:$0x33]  }
 0xd16   : > { %v12183_v8 = vpack.c.bf16 %v12181_v31, %v12181_v31  ;;  %v12403_v3 = vrot.slane %v19045_v56, %v20990_v37  ;;  %v12330_v15 = vpack.c.bf16 %v12328_v28, %v12328_v28  ;;  %v19050_v58 = vld [vmem:[#allocation2 + $0x19] ss:$24 sps:$4 sm:$0x33]   ;;  %v12553_v49 = vrot.slane %v19051_v34, %v20990_v37 }
 0xd17   : > { %17788 = vmatmul.mubr.msk.bf16.vlgmr.msra.gmra.mrb[76].mxu0 %vm11392_vm15, %v12201_v52  ;;  %v12478_v62 = vrot.slane %v19050_v58, %v20990_v37  ;;  %v19056_v21 = vld [vmem:[#allocation2 + $0x30] ss:$24 sps:$4 sm:$0x33]   ;;  %v19060_v63 = vld [vmem:[#allocation2 + $0x32] ss:$24 sps:$4 sm:$0x33]  }
 0xd18   : > { %17796 = vmatmul.mubr.msk.bf16.vlgmr.msra.gmra.mrb[76].mxu1 %vm11392_vm15, %v12183_v8  ;;  %17800 = vmatpush3.bf16.msra.mxu0 %v19040_v22  ;;  %v12405_v40 = vpack.c.bf16 %v12403_v3, %v12403_v3  ;;  %v12555_v2 = vpack.c.bf16 %v12553_v49, %v12553_v49  ;;  %v19057_v13 = vld [vmem:[#allocation2 + $0x31] ss:$24 sps:$4 sm:$0x33]   ;;  %v12628_v10 = vrot.slane %v19056_v21, %v20990_v37  ;;  %v15980_v21 = vld [vmem:[%s22929_s14] ss:$0 sm:$0xff] }
 0xd19   : > { %17808 = vmatpush3.bf16.msra.mxu1 %v19041_v27  ;;  %17801 = vmatprep.subr.bf16.mxu0 %v19495_v0  ;;  %v12480_v55 = vpack.c.bf16 %v12478_v62, %v12478_v62  ;;  %v12703_v4 = vrot.slane %v19057_v13, %v20990_v37  ;;  %v12778_v25 = vrot.slane %v19060_v63, %v20990_v37 }
 0xd1a   : > { %17809 = vmatprep.subr.bf16.mxu1 %v19495_v0  ;;  %17803 = vmatprep.mubr.msk.bf16.mxu0 %vm19497_vm6, %v19495_v0  ;;  %v12630_v60 = vpack.c.bf16 %v12628_v10, %v12628_v10 }
 0xd1b   : > { %17811 = vmatprep.mubr.msk.bf16.mxu1 %vm19497_vm6, %v19495_v0  ;;  %v12705_v38 = vpack.c.bf16 %v12703_v4, %v12703_v4  ;;  %v12780_v32 = vpack.c.bf16 %v12778_v25, %v12778_v25 }
 0xd1c   : > { %17802 = vmatpush3.bf16.msra.mxu0 %v19042_v7 }
 0xd1d   : > { %17810 = vmatpush3.bf16.msra.mxu1 %v19043_v61  ;;  %17815 = vmatprep.subr.bf16.mxu0 %v19495_v0 }
 0xd1e   : > { %17823 = vmatprep.subr.bf16.mxu1 %v19495_v0 }
 0xd1f   : > { %17804 = vmatmul.mubr.msk.bf16.vlgmr.msra.gmra.mrb[80].mxu0 %vm11392_vm15, %v12330_v15 }
 0xd20   : > { %17812 = vmatmul.mubr.msk.bf16.vlgmr.msra.gmra.mrb[80].mxu1 %vm11392_vm15, %v12405_v40  ;;  %17816 = vmatpush3.bf16.msra.mxu0 %v19046_v30 }
 0xd21   : > { %17824 = vmatpush3.bf16.msra.mxu1 %v19047_v50  ;;  %17817 = vmatprep.subr.bf16.mxu0 %v19495_v0 }
 0xd22   : > { %17825 = vmatprep.subr.bf16.mxu1 %v19495_v0  ;;  %17819 = vmatprep.mubr.msk.bf16.mxu0 %vm19497_vm6, %v19495_v0 }
 0xd23   : > { %17827 = vmatprep.mubr.msk.bf16.mxu1 %vm19497_vm6, %v19495_v0 }
 0xd24   : > { %17818 = vmatpush3.bf16.msra.mxu0 %v19048_v39 }
 0xd25   : > { %17826 = vmatpush3.bf16.msra.mxu1 %v19049_v47  ;;  %17831 = vmatprep.subr.bf16.mxu0 %v19495_v0 }
 0xd26   : > { %17839 = vmatprep.subr.bf16.mxu1 %v19495_v0 }
 0xd27   : > { %17820 = vmatmul.mubr.msk.bf16.vlgmr.msra.gmra.mrb[84].mxu0 %vm11392_vm15, %v12480_v55 }
 0xd28   : > { %17828 = vmatmul.mubr.msk.bf16.vlgmr.msra.gmra.mrb[84].mxu1 %vm11392_vm15, %v12555_v2  ;;  %17832 = vmatpush3.bf16.msra.mxu0 %v19052_v12 }
 0xd29   : > { %17840 = vmatpush3.bf16.msra.mxu1 %v19053_v51  ;;  %17833 = vmatprep.subr.bf16.mxu0 %v19495_v0 }
 0xd2a   : > { %17841 = vmatprep.subr.bf16.mxu1 %v19495_v0  ;;  %17835 = vmatprep.mubr.msk.bf16.mxu0 %vm19497_vm6, %v19495_v0 }
 0xd2b   : > { %17843 = vmatprep.mubr.msk.bf16.mxu1 %vm19497_vm6, %v19495_v0 }
 0xd2c   : > { %17834 = vmatpush3.bf16.msra.mxu0 %v19054_v29 }
 0xd2d   : > { %17842 = vmatpush3.bf16.msra.mxu1 %v19055_v9  ;;  %17847 = vmatprep.subr.bf16.mxu0 %v19495_v0 }
 0xd2e   : > { %17855 = vmatprep.subr.bf16.mxu1 %v19495_v0 }
 0xd2f   : > { %17836 = vmatmul.mubr.msk.bf16.vlgmr.msra.gmra.mrb[88].mxu0 %vm11392_vm15, %v12630_v60 }
 0xd30   : > { %17844 = vmatmul.mubr.msk.bf16.vlgmr.msra.gmra.mrb[88].mxu1 %vm11392_vm15, %v12705_v38  ;;  %17848 = vmatpush3.bf16.msra.mxu0 %v19058_v16 }
 0xd31   : > { %17849 = vmatprep.subr.bf16.mxu0 %v19495_v0  ;;  %17851 = vmatprep.mubr.msk.bf16.mxu0 %vm19497_vm6, %v19495_v0 }
 0xd32   : > { %17863 = vmatprep.mubr.msk.bf16.mxu1 %vm19497_vm6, %v19495_v0  ;;  %17856 = vmatpush3.bf16.msra.mxu1 %v19061_v48 }
 0xd33   : > { %17857 = vmatprep.subr.bf16.mxu1 %v19495_v0 }
 0xd34   : > { %17850 = vmatpush3.bf16.msra.mxu0 %v19059_v24 }
 0xd35   : > { %17867 = vmatprep.subr.bf16.mxu0 %v19495_v0 }
 0xd36   : > { %17858 = vmatpush3.bf16.msra.mxu1 %v19063_v59  ;;  %v19072_v59 = vld [vmem:[%s22930_s15 + $0x60] sm:$0xff]  }
 0xd37   : > { %17852 = vmatmul.mubr.msk.bf16.vlgmr.msra.gmra.mrb[92].mxu0 %vm11392_vm15, %v12780_v32  ;;  %17859 = vmatprep.subr.bf16.mxu1 %v19495_v0  ;;  %v19071_v32 = vld [vmem:[%s22930_s15 + $0x40] sm:$0xff]  }
 0xd38   : > { %17875 = vmatprep.mubr.msk.bf16.mxu0 %vm19497_vm6, %v19495_v0  ;;  %17868 = vmatpush3.bf16.msra.mxu0 %v19062_v36 }
 0xd39   : > { %17869 = vmatprep.subr.bf16.mxu0 %v19495_v0 }
 0xd3a   : > { %17860 = vmatpush3.bf16.msra.mxu1 %v19065_v43 }
 0xd3b   : > { %17861 = vmatprep.subr.bf16.mxu1 %v19495_v0 }
 0xd3c   : > { %17870 = vmatpush3.bf16.msra.mxu0 %v19064_v6 }
 0xd3d   : > { %17871 = vmatprep.subr.bf16.mxu0 %v19495_v0 }
 0xd3e   : > { %17862 = vmatpush3.bf16.msra.mxu1 %v19067_v46 }
 0xd3f   : > { %17879 = vmatprep.subr.bf16.mxu1 %v19495_v0 }
 0xd40   : > { %17872 = vmatpush3.bf16.msra.mxu0 %v19066_v5 }
 0xd41   : > { %17873 = vmatprep.subr.bf16.mxu0 %v19495_v0 }
 0xd44   : > { %17874 = vmatpush3.bf16.msra.mxu0 %v19068_v42 }
 0xd45   : > { %17891 = vmatprep.subr.bf16.mxu0 %v19495_v0 }
 0xdea   : > { %v12256_v20 = vpop.f32.mrb[76].mxu0 }
 0xdeb   : > { %v12311_v35 = vpop.f32.mrb[76].mxu1  ;;  %v17789_v17 = vpop.f32.mrb[77].mxu0 }
 0xdec   : > { %v12312_v45 = vadd.f32 %v12311_v35, %v12256_v20  ;;  %v17797_v23 = vpop.f32.mrb[77].mxu1  ;;  %v12259_v57 = vpop.f32.mrb[78].mxu0  ;;  %v19073_v20 = vld [vmem:[%s22930_s15 + $0x48] sm:$0xff]   ;;  %v19075_v17 = vld [vmem:[%s22930_s15 + $0x50] sm:$0xff]  }
 0xded   : > { %v12314_v33 = vpop.f32.mrb[78].mxu1  ;;  %v17790_v19 = vpop.f32.mrb[79].mxu0  ;;  %v19074_v35 = vld [vmem:[%s22930_s15 + $0x68] sm:$0xff]   ;;  %v19077_v23 = vld [vmem:[%s22930_s15 + $0x58] sm:$0xff]  }
 0xdee   : > { %v17798_v11 = vpop.f32.mrb[79].mxu1  ;;  %v19078_v57 = vld [vmem:[%s22930_s15 + $0x78] sm:$0xff]  }
 0xdef   : > { %v19081_v11 = vld [vmem:[%s22930_s15 + $0x80] sm:$0xff]  }
 0xdf2   : > { %v12385_v54 = vpop.f32.mrb[80].mxu0 }
 0xdf3   : > { %v12391_v44 = vadd.f32 %v12385_v54, %v12312_v45  ;;  %v12460_v1 = vpop.f32.mrb[80].mxu1  ;;  %v17805_v26 = vpop.f32.mrb[81].mxu0  ;;  %v19076_v45 = vld [vmem:[%s22930_s15 + $0x70] sm:$0xff]  }
 0xdf4   : > { %v17813_v53 = vpop.f32.mrb[81].mxu1  ;;  %v12388_v18 = vpop.f32.mrb[82].mxu0  ;;  %v19083_v26 = vld [vmem:[%s22930_s15 + $0x88] sm:$0xff]  }
 0xdf5   : > { %v12466_v14 = vadd.f32 %v12460_v1, %v12391_v44  ;;  %v12463_v22 = vpop.f32.mrb[82].mxu1  ;;  %v17806_v31 = vpop.f32.mrb[83].mxu0  ;;  %v19082_v44 = vld [vmem:[%s22930_s15 + $0xa0] sm:$0xff]   ;;  %v19084_v53 = vld [vmem:[%s22930_s15 + $0xa8] sm:$0xff]   ;;  %v19085_v18 = vld [vmem:[%s22930_s15 + $0x90] sm:$0xff]  }
 0xdf6   : > { %v17814_v52 = vpop.f32.mrb[83].mxu1  ;;  %v19087_v22 = vld [vmem:[%s22930_s15 + $0x98] sm:$0xff]  }
 0xdf7   : > { %v19088_v31 = vld [vmem:[%s22930_s15 + $0xb8] sm:$0xff]  }
 0xdfa   : > { %v12535_v27 = vpop.f32.mrb[84].mxu0 }
 0xdfb   : > { %v12541_v41 = vadd.f32 %v12535_v27, %v12466_v14  ;;  %v12610_v8 = vpop.f32.mrb[84].mxu1  ;;  %v17821_v56 = vpop.f32.mrb[85].mxu0  ;;  %v19086_v14 = vld [vmem:[%s22930_s15 + $0xb0] sm:$0xff]  }
 0xdfc   : > { %v17829_v7 = vpop.f32.mrb[85].mxu1  ;;  %v12538_v61 = vpop.f32.mrb[86].mxu0  ;;  %v19092_v56 = vld [vmem:[%s22930_s15 + $0xe0] sm:$0xff]  }
 0xdfd   : > { %v12616_v28 = vadd.f32 %v12610_v8, %v12541_v41  ;;  %v12613_v3 = vpop.f32.mrb[86].mxu1  ;;  %v17822_v30 = vpop.f32.mrb[87].mxu0  ;;  %v19091_v41 = vld [vmem:[%s22930_s15 + $0xc0] sm:$0xff]   ;;  %v19093_v61 = vld [vmem:[%s22930_s15 + $0xc8] sm:$0xff]  }
 0xdfe   : > { %v17830_v15 = vpop.f32.mrb[87].mxu1  ;;  %v19095_v3 = vld [vmem:[%s22930_s15 + $0xd0] sm:$0xff]  }
 0xdff   : > { %v19096_v30 = vld [vmem:[%s22930_s15 + $0xf0] sm:$0xff]  }
 0xe02   : > { %v12685_v50 = vpop.f32.mrb[88].mxu0 }
 0xe03   : > { %v12691_v58 = vadd.f32 %v12685_v50, %v12616_v28  ;;  %v12760_v40 = vpop.f32.mrb[88].mxu1  ;;  %v17837_v34 = vpop.f32.mrb[89].mxu0  ;;  %v19094_v28 = vld [vmem:[%s22930_s15 + $0xe8] sm:$0xff]  }
 0xe04   : > { %v17845_v39 = vpop.f32.mrb[89].mxu1  ;;  %v12688_v47 = vpop.f32.mrb[90].mxu0 }
 0xe05   : > { %v12766_v62 = vadd.f32 %v12760_v40, %v12691_v58  ;;  %v12763_v49 = vpop.f32.mrb[90].mxu1  ;;  %v17838_v12 = vpop.f32.mrb[91].mxu0  ;;  %v19097_v58 = vld [vmem:[%s22930_s15 + $0xd8] sm:$0xff]   ;;  %v19101_v47 = vld [vmem:[%s22930_s15 + $0x100] sm:$0xff]  }
 0xe06   : > { %v17846_v55 = vpop.f32.mrb[91].mxu1  ;;  %v19098_v40 = vld [vmem:[%s22930_s15 + $0xf8] sm:$0xff]   ;;  %v19102_v12 = vld [vmem:[%s22930_s15 + $0x108] sm:$0xff]  }
 0xe07   : > { %v19103_v55 = vld [vmem:[%s22930_s15 + $0x110] sm:$0xff]  }
 0xe0a   : > { %v12835_v51 = vpop.f32.mrb[92].mxu0 }
 0xe0b   : > { %v12841_v2 = vadd.f32 %v12835_v51, %v12766_v62  ;;  %v17853_v13 = vpop.f32.mrb[93].mxu0 }
 0xe0c   : > { %v12838_v29 = vpop.f32.mrb[94].mxu0 }
 0xe0d   : > { %v12849_v9 = vadd.f32 %v15980_v21, %v12841_v2  ;;  %v17854_v10 = vpop.f32.mrb[95].mxu0  ;;  %v19104_v21 = vld [vmem:[%s22930_s15 + $0x118] sm:$0xff]   ;;  %v19106_v29 = vld [vmem:[%s22932_s17 + $0x20] sm:$0xff]  }
 0xe0e   : > { %v19108_v10 = vld [vmem:[%s22932_s17 + $0x28] sm:$0xff]  }
 0xe0f   : > { %vm12850_vm7 = vcmp.gt.f32.partialorder %v12849_v9, 0.0  ;;  %v12851_v4 = vmul.f32 0.01, %v12849_v9 }
 0xe11   : > { %v12852_v16 = vsel %vm12850_vm7, %v12849_v9, %v12851_v4  ;;  %v19107_v9 = vld [vmem:[%s22932_s17] sm:$0xff]   ;;  %v19109_v4 = vld [vmem:[%s22932_s17 + $0x8] sm:$0xff]  }
 0xe12   : > { %v12860_v60 = vrot.slane %v12852_v16, %v20990_v37  ;;  %v19110_v16 = vld [vmem:[%s22932_s17 + $0x30] sm:$0xff]  }
 0xe14   : > { %v12861_v63 = vcombine.high %v12860_v60, %v12860_v60  ;;  %12865 = vst.msk [vmem:[#allocation2 + $0x19] sm:$0x3] %vm12864_vm11, %v12860_v60  ;;  %v19111_v60 = vld [vmem:[%s22932_s17 + $0x10] sm:$0xff]  }
 0xe16   : > { %12866 = vst.msk [vmem:[#allocation2 + $0x31] sm:$0x3] %vm12864_vm11, %v12861_v63  ;;  %v19112_v63 = vld [vmem:[%s22932_s17 + $0x38] sm:$0xff]  }
 0xe1b   : > { %v19069_v38 = vld [vmem:[#allocation2 + $0x1] ss:$24 sps:$4 sm:$0x33]  }
 0xe1c   : > { %v19070_v24 = vld [vmem:[#allocation2] ss:$24 sps:$4 sm:$0x33]   ;;  %v12900_v25 = vrot.slane %v19069_v38, %v20990_v37  ;;  %v19079_v6 = vld [vmem:[#allocation2 + $0x2] ss:$24 sps:$4 sm:$0x33]  }
 0xe1d   : > { %v12878_v48 = vrot.slane %v19070_v24, %v20990_v37  ;;  %v19080_v43 = vld [vmem:[#allocation2 + $0x18] ss:$24 sps:$4 sm:$0x33]   ;;  %v19090_v42 = vld [vmem:[#allocation2 + $0x1a] ss:$24 sps:$4 sm:$0x33]   ;;  %v13058_v33 = vrot.slane %v19079_v6, %v20990_v37 }
 0xe1e   : > { %v12902_v36 = vpack.c.bf16 %v12900_v25, %v12900_v25  ;;  %13726 = vst.msk [vmem:[#allocation2 + $0x18] sm:$0x1] %vm12155_vm1, %v19495_v0  ;;  %v19089_v46 = vld [vmem:[#allocation2 + $0x19] ss:$24 sps:$4 sm:$0x33]   ;;  %v13149_v19 = vrot.slane %v19080_v43, %v20990_v37  ;;  %v13331_v27 = vrot.slane %v19090_v42, %v20990_v37  ;;  %v19114_v24 = vld [vmem:[%s22932_s17 + $0x40] sm:$0xff]  }
 0xe1f   : > { %v12880_v5 = vpack.c.bf16 %v12878_v48, %v12878_v48  ;;  %13727 = vst.msk [vmem:[#allocation2 + $0x1a] sm:$0x1] %vm12155_vm1, %v19495_v0  ;;  %v13060_v54 = vpack.c.bf16 %v13058_v33, %v13058_v33  ;;  %v13240_v52 = vrot.slane %v19089_v46, %v20990_v37  ;;  %v19099_v15 = vld [vmem:[#allocation2 + $0x30] ss:$24 sps:$4 sm:$0x33]   ;;  %v19113_v38 = vld [vmem:[%s22932_s17 + $0x18] sm:$0xff]  }
 0xe20   : > { %17864 = vmatmul.mubr.msk.bf16.vlgmr.msra.gmra.mrb[92].mxu1 %vm12936_vm12, %v12902_v36  ;;  %v13151_v1 = vpack.c.bf16 %v13149_v19, %v13149_v19  ;;  %v13333_v7 = vpack.c.bf16 %v13331_v27, %v13331_v27  ;;  %v19100_v50 = vld [vmem:[#allocation2 + $0x31] ss:$24 sps:$4 sm:$0x33]   ;;  %v13422_v34 = vrot.slane %v19099_v15, %v20990_v37  ;;  %13724 = vst.msk [vmem:[#allocation2] sm:$0x7] %vm13723_vm14, %v19495_v0  ;;  %v19115_v48 = vld [vmem:[%s22932_s17 + $0x60] sm:$0xff]  }
 0xe21   : > { %17876 = vmatmul.mubr.msk.bf16.vlgmr.msra.gmra.mrb[96].mxu0 %vm12936_vm12, %v12880_v5  ;;  %17880 = vmatpush3.bf16.msra.mxu1 %v19071_v32  ;;  %v13242_v8 = vpack.c.bf16 %v13240_v52, %v13240_v52  ;;  %v13513_v39 = vrot.slane %v19100_v50, %v20990_v37  ;;  %v19105_v51 = vld [vmem:[#allocation2 + $0x32] ss:$24 sps:$4 sm:$0x33]   ;;  %v19120_v42 = vld [vmem:[%s22932_s17 + $0x58] sm:$0xff]   ;;  %v19123_v33 = vld [vmem:[%s22932_s17 + $0xa0] sm:$0xff]  }
 0xe22   : > { %17892 = vmatpush3.bf16.msra.mxu0 %v19072_v59  ;;  %17881 = vmatprep.subr.bf16.mxu1 %v19495_v0  ;;  %v13424_v62 = vpack.c.bf16 %v13422_v34, %v13422_v34  ;;  %v13604_v2 = vrot.slane %v19105_v51, %v20990_v37  ;;  %13725 = vst.msk [vmem:[#allocation2 + $0x30] sm:$0x7] %vm13723_vm14, %v19495_v0  ;;  %v19116_v6 = vld [vmem:[%s22932_s17 + $0x48] sm:$0xff]   ;;  %v19118_v5 = vld [vmem:[%s22932_s17 + $0x50] sm:$0xff]   ;;  %v19137_v52 = vld [vmem:[%s22932_s17 + $0xf8] sm:$0xff]  }
 0xe23   : > { %17893 = vmatprep.subr.bf16.mxu0 %v19495_v0  ;;  %17887 = vmatprep.mubr.msk.bf16.mxu1 %vm19497_vm6, %v19495_v0  ;;  %v13515_v49 = vpack.c.bf16 %v13513_v39, %v13513_v39  ;;  %v19117_v43 = vld [vmem:[%s22932_s17 + $0x68] sm:$0xff]   ;;  %v19119_v46 = vld [vmem:[%s22932_s17 + $0x70] sm:$0xff]  }
 0xe24   : > { %17899 = vmatprep.mubr.msk.bf16.mxu0 %vm19497_vm6, %v19495_v0  ;;  %v13606_v13 = vpack.c.bf16 %v13604_v2, %v13604_v2  ;;  %v19124_v19 = vld [vmem:[%s22932_s17 + $0x88] sm:$0xff]  }
 0xe25   : > { %17882 = vmatpush3.bf16.msra.mxu1 %v19073_v20  ;;  %v19121_v20 = vld [vmem:[%s22932_s17 + $0x78] sm:$0xff]  }
 0xe26   : > { %17894 = vmatpush3.bf16.msra.mxu0 %v19074_v35  ;;  %17883 = vmatprep.subr.bf16.mxu1 %v19495_v0 }
 0xe27   : > { %17895 = vmatprep.subr.bf16.mxu0 %v19495_v0  ;;  %v13739_v25 = vld [vmem:[#allocation2 + $0x1] sm:$0x1]  ;;  %v13729_v32 = vld [vmem:[#allocation2] sm:$0x1]  ;;  %v13884_v35 = vld [vmem:[#allocation2 + $0x2] sm:$0x1] }
 0xe28   : > { %v13740_v36 = vpack.c.bf16 %v13739_v25, %v13739_v25  ;;  %v13730_v59 = vpack.c.bf16 %v13729_v32, %v13729_v32  ;;  %v19146_v25 = vld [vmem:[#allocation11 + $0x30] sm:$0xff]  }
 0xe29   : > { %17884 = vmatpush3.bf16.msra.mxu1 %v19075_v17  ;;  %v13885_v17 = vpack.c.bf16 %v13884_v35, %v13884_v35  ;;  %v14279_v27 = vld [vmem:[#allocation2 + $0x31] sm:$0x1] }
 0xe2a   : > { %17896 = vmatpush3.bf16.msra.mxu0 %v19076_v45  ;;  %17885 = vmatprep.subr.bf16.mxu1 %v19495_v0  ;;  %v13963_v45 = vld [vmem:[#allocation2 + $0x18] sm:$0x1] }
 0xe2b   : > { %17897 = vmatprep.subr.bf16.mxu0 %v19495_v0 }
 0xe2d   : > { %17886 = vmatpush3.bf16.msra.mxu1 %v19077_v23  ;;  %v13964_v23 = vpack.c.bf16 %v13963_v45, %v13963_v45 }
 0xe2e   : > { %17898 = vmatpush3.bf16.msra.mxu0 %v19078_v57  ;;  %17903 = vmatprep.subr.bf16.mxu1 %v19495_v0  ;;  %v19122_v57 = vld [vmem:[%s22932_s17 + $0x80] sm:$0xff]  }
 0xe2f   : > { %17915 = vmatprep.subr.bf16.mxu0 %v19495_v0 }
 0xe30   : > { %17888 = vmatmul.mubr.msk.bf16.vlgmr.msra.gmra.mrb[96].mxu1 %vm12936_vm12, %v13060_v54  ;;  %v19126_v54 = vld [vmem:[%s22932_s17 + $0x90] sm:$0xff]  }
 0xe31   : > { %17900 = vmatmul.mubr.msk.bf16.vlgmr.msra.gmra.mrb[100].mxu0 %vm12936_vm12, %v13151_v1  ;;  %17904 = vmatpush3.bf16.msra.mxu1 %v19081_v11  ;;  %v19125_v11 = vld [vmem:[%s22932_s17 + $0xa8] sm:$0xff]   ;;  %v19128_v1 = vld [vmem:[%s22932_s17 + $0x98] sm:$0xff]  }
 0xe32   : > { %17916 = vmatpush3.bf16.msra.mxu0 %v19082_v44  ;;  %17905 = vmatprep.subr.bf16.mxu1 %v19495_v0  ;;  %v19127_v44 = vld [vmem:[%s22932_s17 + $0xb0] sm:$0xff]  }
 0xe33   : > { %17917 = vmatprep.subr.bf16.mxu0 %v19495_v0  ;;  %17911 = vmatprep.mubr.msk.bf16.mxu1 %vm19497_vm6, %v19495_v0 }
 0xe34   : > { %17923 = vmatprep.mubr.msk.bf16.mxu0 %vm19497_vm6, %v19495_v0 }
 0xe35   : > { %17906 = vmatpush3.bf16.msra.mxu1 %v19083_v26  ;;  %v19129_v26 = vld [vmem:[%s22932_s17 + $0xb8] sm:$0xff]  }
 0xe36   : > { %17918 = vmatpush3.bf16.msra.mxu0 %v19084_v53  ;;  %17907 = vmatprep.subr.bf16.mxu1 %v19495_v0  ;;  %v14121_v53 = vld [vmem:[#allocation2 + $0x1a] sm:$0x1] }
 0xe37   : > { %17919 = vmatprep.subr.bf16.mxu0 %v19495_v0 }
 0xe39   : > { %17908 = vmatpush3.bf16.msra.mxu1 %v19085_v18  ;;  %v14122_v18 = vpack.c.bf16 %v14121_v53, %v14121_v53 }
 0xe3a   : > { %17920 = vmatpush3.bf16.msra.mxu0 %v19086_v14  ;;  %17909 = vmatprep.subr.bf16.mxu1 %v19495_v0  ;;  %v19131_v14 = vld [vmem:[%s22932_s17 + $0xe0] sm:$0xff]  }
 0xe3b   : > { %17921 = vmatprep.subr.bf16.mxu0 %v19495_v0 }
 0xe3d   : > { %17910 = vmatpush3.bf16.msra.mxu1 %v19087_v22  ;;  %v19133_v22 = vld [vmem:[%s22932_s17 + $0xe8] sm:$0xff]  }
 0xe3e   : > { %17922 = vmatpush3.bf16.msra.mxu0 %v19088_v31  ;;  %17927 = vmatprep.subr.bf16.mxu1 %v19495_v0  ;;  %v19135_v31 = vld [vmem:[%s22932_s17 + $0xf0] sm:$0xff]  }
 0xe3f   : > { %17939 = vmatprep.subr.bf16.mxu0 %v19495_v0 }
 0xe40   : > { %17912 = vmatmul.mubr.msk.bf16.vlgmr.msra.gmra.mrb[100].mxu1 %vm12936_vm12, %v13242_v8 }
 0xe41   : > { %17924 = vmatmul.mubr.msk.bf16.vlgmr.msra.gmra.mrb[104].mxu0 %vm12936_vm12, %v13333_v7  ;;  %17928 = vmatpush3.bf16.msra.mxu1 %v19091_v41  ;;  %v14280_v41 = vpack.c.bf16 %v14279_v27, %v14279_v27 }
 0xe42   : > { %17940 = vmatpush3.bf16.msra.mxu0 %v19092_v56  ;;  %17929 = vmatprep.subr.bf16.mxu1 %v19495_v0 }
 0xe43   : > { %17941 = vmatprep.subr.bf16.mxu0 %v19495_v0  ;;  %17935 = vmatprep.mubr.msk.bf16.mxu1 %vm19497_vm6, %v19495_v0 }
 0xe44   : > { %17947 = vmatprep.mubr.msk.bf16.mxu0 %vm19497_vm6, %v19495_v0 }
 0xe45   : > { %17930 = vmatpush3.bf16.msra.mxu1 %v19093_v61 }
 0xe46   : > { %17942 = vmatpush3.bf16.msra.mxu0 %v19094_v28  ;;  %17931 = vmatprep.subr.bf16.mxu1 %v19495_v0 }
 0xe47   : > { %17943 = vmatprep.subr.bf16.mxu0 %v19495_v0 }
 0xe49   : > { %17932 = vmatpush3.bf16.msra.mxu1 %v19095_v3 }
 0xe4a   : > { %17944 = vmatpush3.bf16.msra.mxu0 %v19096_v30  ;;  %17933 = vmatprep.subr.bf16.mxu1 %v19495_v0 }
 0xe4b   : > { %17945 = vmatprep.subr.bf16.mxu0 %v19495_v0 }
 0xe4d   : > { %17934 = vmatpush3.bf16.msra.mxu1 %v19097_v58 }
 0xe4e   : > { %17946 = vmatpush3.bf16.msra.mxu0 %v19098_v40  ;;  %17951 = vmatprep.subr.bf16.mxu1 %v19495_v0 }
 0xe4f   : > { %17963 = vmatprep.subr.bf16.mxu0 %v19495_v0 }
 0xe50   : > { %17936 = vmatmul.mubr.msk.bf16.vlgmr.msra.gmra.mrb[104].mxu1 %vm12936_vm12, %v13424_v62 }
 0xe51   : > { %17948 = vmatmul.mubr.msk.bf16.vlgmr.msra.gmra.mrb[108].mxu0 %vm12936_vm12, %v13515_v49  ;;  %17952 = vmatpush3.bf16.msra.mxu1 %v19101_v47 }
 0xe52   : > { %17953 = vmatprep.subr.bf16.mxu1 %v19495_v0  ;;  %17959 = vmatprep.mubr.msk.bf16.mxu1 %vm19497_vm6, %v19495_v0 }
 0xe53   : > { %17971 = vmatprep.mubr.msk.bf16.mxu0 %vm19497_vm6, %v19495_v0  ;;  %17964 = vmatpush3.bf16.msra.mxu0 %v19106_v29 }
 0xe54   : > { %17965 = vmatprep.subr.bf16.mxu0 %v19495_v0 }
 0xe55   : > { %17954 = vmatpush3.bf16.msra.mxu1 %v19102_v12 }
 0xe56   : > { %17955 = vmatprep.subr.bf16.mxu1 %v19495_v0 }
 0xe57   : > { %17966 = vmatpush3.bf16.msra.mxu0 %v19108_v10 }
 0xe58   : > { %17967 = vmatprep.subr.bf16.mxu0 %v19495_v0 }
 0xe59   : > { %17956 = vmatpush3.bf16.msra.mxu1 %v19103_v55 }
 0xe5a   : > { %17957 = vmatprep.subr.bf16.mxu1 %v19495_v0 }
 0xe5b   : > { %17968 = vmatpush3.bf16.msra.mxu0 %v19110_v16 }
 0xe5c   : > { %17969 = vmatprep.subr.bf16.mxu0 %v19495_v0 }
 0xe5d   : > { %17958 = vmatpush3.bf16.msra.mxu1 %v19104_v21 }
 0xe5e   : > { %17975 = vmatprep.subr.bf16.mxu1 %v19495_v0 }
 0xe5f   : > { %17970 = vmatpush3.bf16.msra.mxu0 %v19112_v63 }
 0xe60   : > { %17960 = vmatmul.mubr.msk.bf16.vlgmr.msra.gmra.mrb[108].mxu1 %vm12936_vm12, %v13606_v13  ;;  %17987 = vmatprep.subr.bf16.mxu0 %v19495_v0 }
 0xe61   : > { %17983 = vmatprep.mubr.msk.bf16.mxu1 %vm19497_vm6, %v19495_v0  ;;  %17976 = vmatpush3.bf16.msra.mxu1 %v19107_v9 }
 0xe62   : > { %17977 = vmatprep.subr.bf16.mxu1 %v19495_v0  ;;  %17972 = vmatmul.mubr.msk.bf16.vlgmr.msra.gmra.mrb[112].mxu0 %vm12936_vm12, %v13740_v36 }
 0xe63   : > { %17988 = vmatpush3.bf16.msra.mxu0 %v19114_v24  ;;  %17995 = vmatprep.mubr.msk.bf16.mxu0 %vm19497_vm6, %v19495_v0  ;;  %v19144_v24 = vld [vmem:[#allocation11 + $0x28] sm:$0xff]  }
 0xe64   : > { %17989 = vmatprep.subr.bf16.mxu0 %v19495_v0 }
 0xe65   : > { %17978 = vmatpush3.bf16.msra.mxu1 %v19109_v4 }
 0xe66   : > { %17979 = vmatprep.subr.bf16.mxu1 %v19495_v0 }
 0xe67   : > { %17990 = vmatpush3.bf16.msra.mxu0 %v19116_v6 }
 0xe68   : > { %17991 = vmatprep.subr.bf16.mxu0 %v19495_v0 }
 0xe69   : > { %17980 = vmatpush3.bf16.msra.mxu1 %v19111_v60 }
 0xe6a   : > { %17981 = vmatprep.subr.bf16.mxu1 %v19495_v0 }
 0xe6b   : > { %17992 = vmatpush3.bf16.msra.mxu0 %v19118_v5 }
 0xe6c   : > { %17993 = vmatprep.subr.bf16.mxu0 %v19495_v0 }
 0xe6d   : > { %17982 = vmatpush3.bf16.msra.mxu1 %v19113_v38  ;;  %v19142_v38 = vld [vmem:[#allocation11 + $0x20] sm:$0xff]  }
 0xe6e   : > { %17999 = vmatprep.subr.bf16.mxu1 %v19495_v0 }
 0xe6f   : > { %17994 = vmatpush3.bf16.msra.mxu0 %v19120_v42 }
 0xe70   : > { %17984 = vmatmul.mubr.msk.bf16.vlgmr.msra.gmra.mrb[112].mxu1 %vm12936_vm12, %v13730_v59  ;;  %18011 = vmatprep.subr.bf16.mxu0 %v19495_v0 }
 0xe71   : > { %18000 = vmatpush3.bf16.msra.mxu1 %v19115_v48  ;;  %18007 = vmatprep.mubr.msk.bf16.mxu1 %vm19497_vm6, %v19495_v0 }
 0xe72   : > { %18001 = vmatprep.subr.bf16.mxu1 %v19495_v0  ;;  %17996 = vmatmul.mubr.msk.bf16.vlgmr.msra.gmra.mrb[116].mxu0 %vm12936_vm12, %v13885_v17  ;;  %v16090_v17 = vld [vmem:[%s22931_s16] ss:$0 sm:$0xff] }
 0xe73   : > { %18019 = vmatprep.mubr.msk.bf16.mxu0 %vm19497_vm6, %v19495_v0  ;;  %18012 = vmatpush3.bf16.msra.mxu0 %v19122_v57 }
 0xe74   : > { %18013 = vmatprep.subr.bf16.mxu0 %v19495_v0 }
 0xe75   : > { %18002 = vmatpush3.bf16.msra.mxu1 %v19117_v43 }
 0xe76   : > { %18003 = vmatprep.subr.bf16.mxu1 %v19495_v0 }
 0xe77   : > { %18014 = vmatpush3.bf16.msra.mxu0 %v19124_v19 }
 0xe78   : > { %18015 = vmatprep.subr.bf16.mxu0 %v19495_v0 }
 0xe79   : > { %18004 = vmatpush3.bf16.msra.mxu1 %v19119_v46 }
 0xe7a   : > { %18005 = vmatprep.subr.bf16.mxu1 %v19495_v0 }
 0xe7b   : > { %18016 = vmatpush3.bf16.msra.mxu0 %v19126_v54 }
 0xe7c   : > { %18017 = vmatprep.subr.bf16.mxu0 %v19495_v0 }
 0xe7d   : > { %18006 = vmatpush3.bf16.msra.mxu1 %v19121_v20 }
 0xe7e   : > { %18023 = vmatprep.subr.bf16.mxu1 %v19495_v0 }
 0xe7f   : > { %18018 = vmatpush3.bf16.msra.mxu0 %v19128_v1 }
 0xe80   : > { %18008 = vmatmul.mubr.msk.bf16.vlgmr.msra.gmra.mrb[116].mxu1 %vm12936_vm12, %v13964_v23  ;;  %18035 = vmatprep.subr.bf16.mxu0 %v19495_v0 }
 0xe81   : > { %18031 = vmatprep.mubr.msk.bf16.mxu1 %vm19497_vm6, %v19495_v0  ;;  %18024 = vmatpush3.bf16.msra.mxu1 %v19123_v33 }
 0xe82   : > { %18025 = vmatprep.subr.bf16.mxu1 %v19495_v0 }
 0xe85   : > { %18026 = vmatpush3.bf16.msra.mxu1 %v19125_v11 }
 0xe86   : > { %18027 = vmatprep.subr.bf16.mxu1 %v19495_v0 }
 0xe89   : > { %18028 = vmatpush3.bf16.msra.mxu1 %v19127_v44 }
 0xe8a   : > { %18029 = vmatprep.subr.bf16.mxu1 %v19495_v0 }
 0xe8d   : > { %18030 = vmatpush3.bf16.msra.mxu1 %v19129_v26 }
 0xe8e   : > { %18047 = vmatprep.subr.bf16.mxu1 %v19495_v0 }
 0xe90   : > { %18032 = vmatmul.mubr.msk.bf16.vlgmr.msra.gmra.mrb[120].mxu1 %vm12936_vm12, %v14122_v18 }
 0xe91   : > { %18048 = vmatpush3.bf16.msra.mxu1 %v19131_v14  ;;  %18055 = vmatprep.mubr.msk.bf16.mxu1 %vm19497_vm6, %v19495_v0 }
 0xe92   : > { %18049 = vmatprep.subr.bf16.mxu1 %v19495_v0 }
 0xe95   : > { %18050 = vmatpush3.bf16.msra.mxu1 %v19133_v22 }
 0xe96   : > { %18051 = vmatprep.subr.bf16.mxu1 %v19495_v0 }
 0xe99   : > { %18052 = vmatpush3.bf16.msra.mxu1 %v19135_v31 }
 0xe9a   : > { %18053 = vmatprep.subr.bf16.mxu1 %v19495_v0 }
 0xe9d   : > { %18054 = vmatpush3.bf16.msra.mxu1 %v19137_v52 }
 0xe9e   : > { %18071 = vmatprep.subr.bf16.mxu1 %v19495_v0 }
 0xea0   : > { %18056 = vmatmul.mubr.msk.bf16.vlgmr.msra.gmra.mrb[124].mxu1 %vm12936_vm12, %v14280_v41 }
 0xea1   : > { %18079 = vmatprep.mubr.msk.bf16.mxu1 %vm19497_vm6, %v19495_v0  ;;  %18072 = vmatpush3.bf16.msra.mxu1 %v19142_v38 }
 0xea2   : > { %18073 = vmatprep.subr.bf16.mxu1 %v19495_v0 }
 0xea5   : > { %18074 = vmatpush3.bf16.msra.mxu1 %v19144_v24 }
 0xea6   : > { %18075 = vmatprep.subr.bf16.mxu1 %v19495_v0 }
 0xea9   : > { %18076 = vmatpush3.bf16.msra.mxu1 %v19146_v25 }
 0xeaa   : > { %18077 = vmatprep.subr.bf16.mxu1 %v19495_v0 }
 0xef3   : > { %v12974_v8 = vpop.f32.mrb[92].mxu1 }
 0xef4   : > { %v13041_v56 = vpop.f32.mrb[96].mxu0  ;;  %v17865_v7 = vpop.f32.mrb[93].mxu1 }
 0xef5   : > { %v13042_v61 = vadd.f32 %v13041_v56, %v12974_v8  ;;  %v17877_v28 = vpop.f32.mrb[97].mxu0  ;;  %v12977_v3 = vpop.f32.mrb[94].mxu1 }
 0xef6   : > { %v13044_v30 = vpop.f32.mrb[98].mxu0  ;;  %v17866_v15 = vpop.f32.mrb[95].mxu1 }
 0xef7   : > { %v17878_v50 = vpop.f32.mrb[99].mxu0  ;;  %v19130_v30 = vld [vmem:[%s22932_s17 + $0xc0] sm:$0xff]  }
 0xef8   : > { %v19132_v50 = vld [vmem:[%s22932_s17 + $0xc8] sm:$0xff]  }
 0xf03   : > { %v13131_v58 = vpop.f32.mrb[96].mxu1 }
 0xf04   : > { %v13137_v40 = vadd.f32 %v13131_v58, %v13042_v61  ;;  %v13222_v34 = vpop.f32.mrb[100].mxu0  ;;  %v17889_v39 = vpop.f32.mrb[97].mxu1  ;;  %v19134_v58 = vld [vmem:[%s22932_s17 + $0xd0] sm:$0xff]  }
 0xf05   : > { %v17901_v47 = vpop.f32.mrb[101].mxu0  ;;  %v13134_v62 = vpop.f32.mrb[98].mxu1 }
 0xf06   : > { %v13228_v49 = vadd.f32 %v13222_v34, %v13137_v40  ;;  %v13225_v12 = vpop.f32.mrb[102].mxu0  ;;  %v17890_v55 = vpop.f32.mrb[99].mxu1  ;;  %v19136_v40 = vld [vmem:[%s22932_s17 + $0xd8] sm:$0xff]   ;;  %v14200_v34 = vld [vmem:[#allocation2 + $0x30] sm:$0x1]  ;;  %v19138_v47 = vld [vmem:[%s22932_s17 + $0x100] sm:$0xff]  }
 0xf07   : > { %v17902_v51 = vpop.f32.mrb[103].mxu0  ;;  %v14201_v39 = vpack.c.bf16 %v14200_v34, %v14200_v34  ;;  %v19139_v62 = vld [vmem:[%s22932_s17 + $0x108] sm:$0xff]   ;;  %v19141_v12 = vld [vmem:[%s22932_s17 + $0x118] sm:$0xff]   ;;  %v14358_v55 = vld [vmem:[#allocation2 + $0x32] sm:$0x1] }
 0xf08   : > { %v14359_v51 = vpack.c.bf16 %v14358_v55, %v14358_v55  ;;  %v19165_v34 = vld [vmem:[#allocation11 + $0xb8] sm:$0xff]  }
 0xf09   : > { %v19173_v55 = vld [vmem:[#allocation11 + $0xf8] sm:$0xff]  }
 0xf13   : > { %v13313_v21 = vpop.f32.mrb[100].mxu1 }
 0xf14   : > { %v13319_v2 = vadd.f32 %v13313_v21, %v13228_v49  ;;  %v13404_v13 = vpop.f32.mrb[104].mxu0  ;;  %v17913_v29 = vpop.f32.mrb[101].mxu1  ;;  %v19140_v49 = vld [vmem:[%s22932_s17 + $0x110] sm:$0xff]  }
 0xf15   : > { %v17925_v9 = vpop.f32.mrb[105].mxu0  ;;  %v13316_v10 = vpop.f32.mrb[102].mxu1  ;;  %v19143_v21 = vld [vmem:[#allocation11] sm:$0xff]  }
 0xf16   : > { %v13410_v4 = vadd.f32 %v13404_v13, %v13319_v2  ;;  %v13407_v16 = vpop.f32.mrb[106].mxu0  ;;  %v17914_v60 = vpop.f32.mrb[103].mxu1  ;;  %v19145_v2 = vld [vmem:[#allocation11 + $0x8] sm:$0xff]   ;;  %v19147_v13 = vld [vmem:[#allocation11 + $0x10] sm:$0xff]  }
 0xf17   : > { %v17926_v63 = vpop.f32.mrb[107].mxu0 }
 0xf23   : > { %v13495_v32 = vpop.f32.mrb[104].mxu1 }
 0xf24   : > { %v13501_v48 = vadd.f32 %v13495_v32, %v13410_v4  ;;  %v13586_v36 = vpop.f32.mrb[108].mxu0  ;;  %v17937_v59 = vpop.f32.mrb[105].mxu1 }
 0xf25   : > { %v17949_v6 = vpop.f32.mrb[109].mxu0  ;;  %v13498_v43 = vpop.f32.mrb[106].mxu1 }
 0xf26   : > { %v13592_v5 = vadd.f32 %v13586_v36, %v13501_v48  ;;  %v13589_v46 = vpop.f32.mrb[110].mxu0  ;;  %v17938_v42 = vpop.f32.mrb[107].mxu1 }
 0xf27   : > { %v17950_v20 = vpop.f32.mrb[111].mxu0 }
 0xf28   : > { %v19148_v20 = vld [vmem:[#allocation11 + $0x38] sm:$0xff]  }
 0xf29   : > { %18078 = vmatpush3.bf16.msra.mxu1 %v19148_v20 }
 0xf2a   : > { %18095 = vmatprep.subr.bf16.mxu1 %v19495_v0 }
 0xf33   : > { %v13677_v35 = vpop.f32.mrb[108].mxu1 }
 0xf34   : > { %v13683_v45 = vadd.f32 %v13677_v35, %v13592_v5  ;;  %v17961_v23 = vpop.f32.mrb[109].mxu1  ;;  %v19149_v35 = vld [vmem:[#allocation11 + $0x18] sm:$0xff]  }
 0xf35   : > { %v13680_v57 = vpop.f32.mrb[110].mxu1  ;;  %v13811_v29 = vpop.f32.mrb[112].mxu0 }
 0xf36   : > { %v13691_v33 = vadd.f32 %v16090_v17, %v13683_v45  ;;  %v17962_v19 = vpop.f32.mrb[111].mxu1  ;;  %v17973_v10 = vpop.f32.mrb[113].mxu0  ;;  %v14453_v17 = vld [vmem:[#allocation2 + $0x1] sm:$0x1]  ;;  %v19150_v45 = vld [vmem:[#allocation11 + $0x40] sm:$0xff]  }
 0xf37   : > { %v13814_v60 = vpop.f32.mrb[114].mxu0  ;;  %v14454_v23 = vpack.c.bf16 %v14453_v17, %v14453_v17  ;;  %v14443_v57 = vld [vmem:[#allocation2] sm:$0x1]  ;;  %v19151_v19 = vld [vmem:[#allocation11 + $0x60] sm:$0xff]  }
 0xf38   : > { %vm13692_vm2 = vcmp.gt.f32.partialorder %v13691_v33, 0.0  ;;  %v13693_v11 = vmul.f32 0.01, %v13691_v33  ;;  %v17974_v38 = vpop.f32.mrb[115].mxu0 }
 0xf39   : > { %18080 = vmatmul.mubr.msk.bf16.vlgmr.msra.gmra.mrb[128].mxu1 %vm12936_vm12, %v14454_v23  ;;  %v19170_v23 = vld [vmem:[#allocation11 + $0xd0] sm:$0xff]  }
 0xf3a   : > { %v13694_v54 = vsel %vm13692_vm2, %v13691_v33, %v13693_v11  ;;  %v14444_v33 = vpack.c.bf16 %v14443_v57, %v14443_v57  ;;  %18096 = vmatpush3.bf16.msra.mxu1 %v19150_v45  ;;  %18103 = vmatprep.mubr.msk.bf16.mxu1 %vm19497_vm6, %v19495_v0  ;;  %v19168_v45 = vld [vmem:[#allocation11 + $0xc8] sm:$0xff]   ;;  %v19172_v57 = vld [vmem:[#allocation11 + $0xd8] sm:$0xff]  }
 0xf3b   : > { %v13702_v44 = vrot.slane %v13694_v54, %v20990_v37  ;;  %v19152_v54 = vld [vmem:[#allocation11 + $0x48] sm:$0xff]   ;;  %18097 = vmatprep.subr.bf16.mxu1 %v19495_v0 }
 0xf3d   : > { %v13703_v1 = vcombine.high %v13702_v44, %v13702_v44  ;;  %13706 = vst.msk [vmem:[%s22640_s4] sm:$0x3] %vm12864_vm11, %v13702_v44  ;;  %v13708_v26 = vsel %vm12864_vm11, %v13702_v44, -inf }
 0xf3e   : > { %v13709_v53 = vrot.slane %v13708_v26, 4  ;;  %18098 = vmatpush3.bf16.msra.mxu1 %v19152_v54  ;;  %v19175_v54 = vld [vmem:[#allocation11 + $0x108] sm:$0xff]  }
 0xf3f   : > { %v13715_v18 = vsel %vm12864_vm11, %v13703_v1, -inf  ;;  %13707 = vst.msk [vmem:[%s22640_s4 + $0x2] sm:$0x3] %vm12864_vm11, %v13703_v1  ;;  %v19153_v1 = vld [vmem:[#allocation11 + $0x68] sm:$0xff]   ;;  %18099 = vmatprep.subr.bf16.mxu1 %v19495_v0 }
 0xf40   : > { %v13710_v14 = vmax.f32 %v13708_v26, %v13709_v53  ;;  %v13716_v22 = vrot.slane %v13715_v18, 4 }
 0xf42   : > { %v13711_v31 = vrot.slane %v13710_v14, 2  ;;  %v13717_v52 = vmax.f32 %v13715_v18, %v13716_v22  ;;  %v19154_v18 = vld [vmem:[#allocation11 + $0x50] sm:$0xff]   ;;  %v19156_v22 = vld [vmem:[#allocation11 + $0x58] sm:$0xff]  }
 0xf43   : > { %v13878_v9 = vpop.f32.mrb[112].mxu1  ;;  %18100 = vmatpush3.bf16.msra.mxu1 %v19154_v18 }
 0xf44   : > { %v13712_v27 = vmax.f32 %v13710_v14, %v13711_v31  ;;  %v13718_v37 = vrot.slane %v13717_v52, 2  ;;  %v13879_v4 = vadd.f32 %v13878_v9, %v13811_v29  ;;  %v17985_v16 = vpop.f32.mrb[113].mxu1  ;;  %v19155_v14 = vld [vmem:[#allocation11 + $0x70] sm:$0xff]   ;;  %18101 = vmatprep.subr.bf16.mxu1 %v19495_v0  ;;  %v19157_v31 = vld [vmem:[#allocation11 + $0x78] sm:$0xff]  }
 0xf45   : > { %v13881_v63 = vpop.f32.mrb[114].mxu1  ;;  %v13956_v25 = vpop.f32.mrb[116].mxu0 }
 0xf46   : > { %v13713_v41 = vrot.slane %v13712_v27, 1  ;;  %v13719_v8 = vmax.f32 %v13717_v52, %v13718_v37  ;;  %v17986_v24 = vpop.f32.mrb[115].mxu1  ;;  %v13962_v32 = vadd.f32 %v13956_v25, %v13879_v4  ;;  %v17997_v48 = vpop.f32.mrb[117].mxu0  ;;  %v14598_v52 = vld [vmem:[#allocation2 + $0x2] sm:$0x1] }
 0xf47   : > { %v13959_v59 = vpop.f32.mrb[118].mxu0  ;;  %18102 = vmatpush3.bf16.msra.mxu1 %v19156_v22  ;;  %v14599_v37 = vpack.c.bf16 %v14598_v52, %v14598_v52  ;;  %v14437_v48 = vld [vmem:[%s23022_s30] sm:$0x1]  ;;  %s19324_s30 = sshll.u32 %s19498_s24, 4  ;;  %s19325_s30 = int_to_ptr.vmem [resolvable:$false] %s19324_s30 }
 0xf48   : > { %v13720_v56 = vrot.slane %v13719_v8, 1  ;;  %v13714_v7 = vmax.f32 %v13712_v27, %v13713_v41  ;;  %v17998_v43 = vpop.f32.mrb[119].mxu0  ;;  %v14677_v27 = vld [vmem:[#allocation2 + $0x18] sm:$0x1]  ;;  %18119 = vmatprep.subr.bf16.mxu1 %v19495_v0  ;;  %s19326_s0 = scalar_lea.vmem %s19325_s30, 512  ;;  %p19327_p6 = scmp.lt.s32.totalorder %s22761_s23, %s19325_s30 }
 0xf49   : > { %v14678_v41 = vpack.c.bf16 %v14677_v27, %v14677_v27  ;;  %p19328_p9 = scmp.lt.s32.totalorder %s19326_s0, %s19320_s29 }
 0xf4a   : > { %v13721_v61 = vmax.f32 %v13719_v8, %v13720_v56  ;;  %18104 = vmatmul.mubr.msk.bf16.vlgmr.msra.gmra.mrb[132].mxu1 %vm12936_vm12, %v14599_v37 }
 0xf4b   : > { %18127 = vmatprep.mubr.msk.bf16.mxu1 %vm19497_vm6, %v19495_v0  ;;  %p19329_p5 = por %p19328_p9, %p19327_p6 }
 0xf4c   : > { %v13722_v28 = vmax.f32 %v13714_v7, %v13721_v61 }
 0xf4d   : > { %p19330_p0 = pnand %p19329_p5, %p19323_p1 }
 0xf4e   : > { %13728 = vst.msk [vmem:[#allocation2 + $0x19] sm:$0x1] %vm12155_vm1, %v13722_v28  ;;  %v19158_v28 = vld [vmem:[#allocation11 + $0x80] sm:$0xff]  }
 0xf4f   : > { %18120 = vmatpush3.bf16.msra.mxu1 %v19158_v28 }
 0xf50   : > { %18121 = vmatprep.subr.bf16.mxu1 %v19495_v0 }
 0xf53   : > { %v14035_v36 = vpop.f32.mrb[116].mxu1 }
 0xf54   : > { %v22693_v6 = vadd.f32 %v14035_v36, %v13962_v32  ;;  %v18009_v5 = vpop.f32.mrb[117].mxu1 }
 0xf55   : > { %v14042_v3 = vld [vmem:[#allocation2 + $0x19] sm:$0x1]  ;;  %v14038_v46 = vpop.f32.mrb[118].mxu1 }
 0xf56   : > { %v14043_v15 = vpack.c.bf16 %v14042_v3, %v14042_v3  ;;  %v18010_v42 = vpop.f32.mrb[119].mxu1  ;;  %v19159_v3 = vld [vmem:[#allocation11 + $0xa0] sm:$0xff]  }
 0xf58   : > { %18020 = vmatmul.mubr.msk.bf16.vlgmr.msra.gmra.mrb[120].mxu0 %vm12936_vm12, %v14043_v15  ;;  %v19161_v15 = vld [vmem:[#allocation11 + $0xa8] sm:$0xff]  }
 0xf59   : > { %18036 = vmatpush3.bf16.msra.mxu0 %v19130_v30  ;;  %18043 = vmatprep.mubr.msk.bf16.mxu0 %vm19497_vm6, %v19495_v0  ;;  %v19160_v30 = vld [vmem:[#allocation11 + $0x88] sm:$0xff]  }
 0xf5a   : > { %18037 = vmatprep.subr.bf16.mxu0 %v19495_v0  ;;  %18122 = vmatpush3.bf16.msra.mxu1 %v19160_v30 }
 0xf5b   : > { %18123 = vmatprep.subr.bf16.mxu1 %v19495_v0 }
 0xf5d   : > { %18038 = vmatpush3.bf16.msra.mxu0 %v19132_v50  ;;  %v19162_v50 = vld [vmem:[#allocation11 + $0x90] sm:$0xff]  }
 0xf5e   : > { %18039 = vmatprep.subr.bf16.mxu0 %v19495_v0  ;;  %18124 = vmatpush3.bf16.msra.mxu1 %v19162_v50 }
 0xf5f   : > { %18125 = vmatprep.subr.bf16.mxu1 %v19495_v0 }
 0xf61   : > { %18040 = vmatpush3.bf16.msra.mxu0 %v19134_v58  ;;  %v19163_v58 = vld [vmem:[#allocation11 + $0xb0] sm:$0xff]  }
 0xf62   : > { %18041 = vmatprep.subr.bf16.mxu0 %v19495_v0 }
 0xf63   : > { %v22698_v11 = vpop.f32.mrb[120].mxu1 }
 0xf64   : > { %v18033_v44 = vpop.f32.mrb[121].mxu1 }
 0xf65   : > { %18042 = vmatpush3.bf16.msra.mxu0 %v19136_v40  ;;  %v14196_v26 = vpop.f32.mrb[122].mxu1  ;;  %v19164_v40 = vld [vmem:[#allocation11 + $0x98] sm:$0xff]   ;;  %v19176_v44 = vld [vmem:[#allocation11 + $0x110] sm:$0xff]  }
 0xf66   : > { %18059 = vmatprep.subr.bf16.mxu0 %v19495_v0  ;;  %v18034_v53 = vpop.f32.mrb[123].mxu1  ;;  %18126 = vmatpush3.bf16.msra.mxu1 %v19164_v40  ;;  %v15072_v26 = vld [vmem:[#allocation2 + $0x32] sm:$0x1] }
 0xf67   : > { %18143 = vmatprep.subr.bf16.mxu1 %v19495_v0  ;;  %v15073_v53 = vpack.c.bf16 %v15072_v26, %v15072_v26 }
 0xf68   : > { %18044 = vmatmul.mubr.msk.bf16.vlgmr.msra.gmra.mrb[124].mxu0 %vm12936_vm12, %v14201_v39  ;;  %v14835_v39 = vld [vmem:[#allocation2 + $0x1a] sm:$0x1] }
 0xf69   : > { %18060 = vmatpush3.bf16.msra.mxu0 %v19138_v47  ;;  %18067 = vmatprep.mubr.msk.bf16.mxu0 %vm19497_vm6, %v19495_v0  ;;  %v14836_v47 = vpack.c.bf16 %v14835_v39, %v14835_v39 }
 0xf6a   : > { %18061 = vmatprep.subr.bf16.mxu0 %v19495_v0 }
 0xf6d   : > { %18062 = vmatpush3.bf16.msra.mxu0 %v19139_v62  ;;  %v19167_v62 = vld [vmem:[#allocation11 + $0xe0] sm:$0xff]  }
 0xf6e   : > { %18063 = vmatprep.subr.bf16.mxu0 %v19495_v0 }
 0xf71   : > { %18064 = vmatpush3.bf16.msra.mxu0 %v19140_v49  ;;  %v19169_v49 = vld [vmem:[#allocation11 + $0xe8] sm:$0xff]  }
 0xf72   : > { %18065 = vmatprep.subr.bf16.mxu0 %v19495_v0 }
 0xf73   : > { %v14351_v8 = vpop.f32.mrb[124].mxu1 }
 0xf74   : > { %v18057_v56 = vpop.f32.mrb[125].mxu1 }
 0xf75   : > { %18066 = vmatpush3.bf16.msra.mxu0 %v19141_v12  ;;  %v14354_v7 = vpop.f32.mrb[126].mxu1  ;;  %v19171_v12 = vld [vmem:[#allocation11 + $0xf0] sm:$0xff]  }
 0xf76   : > { %18083 = vmatprep.subr.bf16.mxu0 %v19495_v0  ;;  %v18058_v61 = vpop.f32.mrb[127].mxu1 }
 0xf78   : > { %18068 = vmatmul.mubr.msk.bf16.vlgmr.msra.gmra.mrb[128].mxu0 %vm12936_vm12, %v14359_v51  ;;  %v14993_v51 = vld [vmem:[#allocation2 + $0x31] sm:$0x1] }
 0xf79   : > { %18084 = vmatpush3.bf16.msra.mxu0 %v19143_v21  ;;  %18091 = vmatprep.mubr.msk.bf16.mxu0 %vm19497_vm6, %v19495_v0  ;;  %v14994_v21 = vpack.c.bf16 %v14993_v51, %v14993_v51 }
 0xf7a   : > { %18085 = vmatprep.subr.bf16.mxu0 %v19495_v0 }
 0xf7d   : > { %18086 = vmatpush3.bf16.msra.mxu0 %v19145_v2 }
 0xf7e   : > { %18087 = vmatprep.subr.bf16.mxu0 %v19495_v0 }
 0xf81   : > { %18088 = vmatpush3.bf16.msra.mxu0 %v19147_v13 }
 0xf82   : > { %18089 = vmatprep.subr.bf16.mxu0 %v19495_v0 }
 0xf85   : > { %18090 = vmatpush3.bf16.msra.mxu0 %v19149_v35  ;;  %v19166_v35 = vld [vmem:[#allocation11 + $0xc0] sm:$0xff]  }
 0xf86   : > { %18107 = vmatprep.subr.bf16.mxu0 %v19495_v0 }
 0xf88   : > { %18092 = vmatmul.mubr.msk.bf16.vlgmr.msra.gmra.mrb[132].mxu0 %vm12936_vm12, %v14444_v33  ;;  %v14914_v33 = vld [vmem:[#allocation2 + $0x30] sm:$0x1] }
 0xf89   : > { %18108 = vmatpush3.bf16.msra.mxu0 %v19151_v19  ;;  %18115 = vmatprep.mubr.msk.bf16.mxu0 %vm19497_vm6, %v19495_v0  ;;  %v14915_v19 = vpack.c.bf16 %v14914_v33, %v14914_v33 }
 0xf8a   : > { %18109 = vmatprep.subr.bf16.mxu0 %v19495_v0 }
 0xf8d   : > { %18110 = vmatpush3.bf16.msra.mxu0 %v19153_v1  ;;  %v19177_v1 = vld [vmem:[#allocation11 + $0x118] sm:$0xff]  }
 0xf8e   : > { %18111 = vmatprep.subr.bf16.mxu0 %v19495_v0 }
 0xf91   : > { %18112 = vmatpush3.bf16.msra.mxu0 %v19155_v14 }
 0xf92   : > { %18113 = vmatprep.subr.bf16.mxu0 %v19495_v0 }
 0xf95   : > { %18114 = vmatpush3.bf16.msra.mxu0 %v19157_v31 }
 0xf96   : > { %18131 = vmatprep.subr.bf16.mxu0 %v19495_v0 }
 0xf98   : > { %18116 = vmatmul.mubr.msk.bf16.vlgmr.msra.gmra.mrb[136].mxu0 %vm12936_vm12, %v14678_v41 }
 0xf99   : > { %18139 = vmatprep.mubr.msk.bf16.mxu0 %vm19497_vm6, %v19495_v0  ;;  %18132 = vmatpush3.bf16.msra.mxu0 %v19159_v3 }
 0xf9a   : > { %18133 = vmatprep.subr.bf16.mxu0 %v19495_v0 }
 0xf9d   : > { %18134 = vmatpush3.bf16.msra.mxu0 %v19161_v15 }
 0xf9e   : > { %18135 = vmatprep.subr.bf16.mxu0 %v19495_v0 }
 0xfa1   : > { %18136 = vmatpush3.bf16.msra.mxu0 %v19163_v58 }
 0xfa2   : > { %18137 = vmatprep.subr.bf16.mxu0 %v19495_v0 }
 0xfa5   : > { %18138 = vmatpush3.bf16.msra.mxu0 %v19165_v34 }
 0xfa6   : > { %18155 = vmatprep.subr.bf16.mxu0 %v19495_v0 }
 0xfa8   : > { %18140 = vmatmul.mubr.msk.bf16.vlgmr.msra.gmra.mrb[140].mxu0 %vm12936_vm12, %v14836_v47 }
 0xfa9   : > { %18156 = vmatpush3.bf16.msra.mxu0 %v19167_v62  ;;  %18163 = vmatprep.mubr.msk.bf16.mxu0 %vm19497_vm6, %v19495_v0 }
 0xfaa   : > { %18157 = vmatprep.subr.bf16.mxu0 %v19495_v0 }
 0xfad   : > { %18158 = vmatpush3.bf16.msra.mxu0 %v19169_v49 }
 0xfae   : > { %18159 = vmatprep.subr.bf16.mxu0 %v19495_v0 }
 0xfb1   : > { %18160 = vmatpush3.bf16.msra.mxu0 %v19171_v12 }
 0xfb2   : > { %18161 = vmatprep.subr.bf16.mxu0 %v19495_v0 }
 0xfb5   : > { %18162 = vmatpush3.bf16.msra.mxu0 %v19173_v55 }
 0xfb8   : > { %18164 = vmatmul.mubr.msk.bf16.vlgmr.msra.gmra.mrb[144].mxu0 %vm12936_vm12, %v14994_v21 }
0x100c   : > { %v14525_v18 = vpop.f32.mrb[128].mxu1 }
0x100d   : > { %v18081_v14 = vpop.f32.mrb[129].mxu1 }
0x100e   : > { %v14528_v22 = vpop.f32.mrb[130].mxu1 }
0x100f   : > { %v18082_v52 = vpop.f32.mrb[131].mxu1 }
0x101d   : > { %v14670_v56 = vpop.f32.mrb[132].mxu1 }
0x101e   : > { %v18105_v61 = vpop.f32.mrb[133].mxu1 }
0x101f   : > { %v14673_v3 = vpop.f32.mrb[134].mxu1 }
0x1020   : > { %v18106_v30 = vpop.f32.mrb[135].mxu1 }
0x102b   : > { %v14114_v2 = vpop.f32.mrb[120].mxu0 }
0x102c   : > { %v14120_v13 = vadd.f32 %v14114_v2, %v22693_v6  ;;  %v18021_v29 = vpop.f32.mrb[121].mxu0 }
0x102d   : > { %v14117_v9 = vpop.f32.mrb[122].mxu0 }
0x102e   : > { %v14199_v10 = vadd.f32 %v22698_v11, %v14120_v13  ;;  %v18022_v4 = vpop.f32.mrb[123].mxu0  ;;  %v19174_v11 = vld [vmem:[#allocation11 + $0x100] sm:$0xff]  }
0x103b   : > { %v14272_v16 = vpop.f32.mrb[124].mxu0 }
0x103c   : > { %v14278_v60 = vadd.f32 %v14272_v16, %v14199_v10  ;;  %v18045_v63 = vpop.f32.mrb[125].mxu0 }
0x103d   : > { %v14275_v38 = vpop.f32.mrb[126].mxu0 }
0x103e   : > { %v14357_v24 = vadd.f32 %v14351_v8, %v14278_v60  ;;  %v18046_v25 = vpop.f32.mrb[127].mxu0 }
0x104b   : > { %v14430_v32 = vpop.f32.mrb[128].mxu0 }
0x104c   : > { %v14436_v36 = vadd.f32 %v14430_v32, %v14357_v24  ;;  %v18069_v59 = vpop.f32.mrb[129].mxu0 }
0x104d   : > { %v14433_v43 = vpop.f32.mrb[130].mxu0 }
0x104e   : > { %v14438_v6 = vadd.f32 %v14437_v48, %v14436_v36  ;;  %v18070_v5 = vpop.f32.mrb[131].mxu0 }
0x1050   : > { %vm14439_vm3 = vcmp.gt.f32.partialorder %v14438_v6, 0.0  ;;  %v14440_v46 = vmul.f32 0.01, %v14438_v6 }
0x1052   : > { %v14441_v42 = vsel %vm14439_vm3, %v14438_v6, %v14440_v46 }
0x1053   : > { %14442 = vst.msk [vmem:[#allocation2 + $0x19] sm:$0x1] %vm12155_vm1, %v14441_v42 }
0x105a   : > { %v14756_v20 = vld [vmem:[#allocation2 + $0x19] sm:$0x1] }
0x105b   : > { %v14757_v17 = vpack.c.bf16 %v14756_v20, %v14756_v20  ;;  %v14592_v31 = vpop.f32.mrb[132].mxu0 }
0x105c   : > { %v14593_v27 = vadd.f32 %v14592_v31, %v14525_v18  ;;  %v18093_v37 = vpop.f32.mrb[133].mxu0 }
0x105d   : > { %18128 = vmatmul.mubr.msk.bf16.vlgmr.msra.gmra.mrb[136].mxu1 %vm12936_vm12, %v14757_v17  ;;  %v14595_v41 = vpop.f32.mrb[134].mxu0 }
0x105e   : > { %18144 = vmatpush3.bf16.msra.mxu1 %v19166_v35  ;;  %18151 = vmatprep.mubr.msk.bf16.mxu1 %vm19497_vm6, %v19495_v0  ;;  %v18094_v8 = vpop.f32.mrb[135].mxu0  ;;  %v14676_v7 = vadd.f32 %v14670_v56, %v14593_v27 }
0x105f   : > { %18145 = vmatprep.subr.bf16.mxu1 %v19495_v0 }
0x1062   : > { %18146 = vmatpush3.bf16.msra.mxu1 %v19168_v45 }
0x1063   : > { %18147 = vmatprep.subr.bf16.mxu1 %v19495_v0 }
0x1066   : > { %18148 = vmatpush3.bf16.msra.mxu1 %v19170_v23 }
0x1067   : > { %18149 = vmatprep.subr.bf16.mxu1 %v19495_v0 }
0x106a   : > { %18150 = vmatpush3.bf16.msra.mxu1 %v19172_v57 }
0x106b   : > { %18167 = vmatprep.subr.bf16.mxu1 %v19495_v0  ;;  %v14749_v28 = vpop.f32.mrb[136].mxu0 }
0x106c   : > { %v18117_v15 = vpop.f32.mrb[137].mxu0 }
0x106d   : > { %18152 = vmatmul.mubr.msk.bf16.vlgmr.msra.gmra.mrb[140].mxu1 %vm12936_vm12, %v14915_v19  ;;  %v14752_v50 = vpop.f32.mrb[138].mxu0 }
0x106e   : > { %18168 = vmatpush3.bf16.msra.mxu1 %v19174_v11  ;;  %18175 = vmatprep.mubr.msk.bf16.mxu1 %vm19497_vm6, %v19495_v0  ;;  %v18118_v58 = vpop.f32.mrb[139].mxu0 }
0x106f   : > { %18169 = vmatprep.subr.bf16.mxu1 %v19495_v0 }
0x1072   : > { %18170 = vmatpush3.bf16.msra.mxu1 %v19175_v54 }
0x1073   : > { %18171 = vmatprep.subr.bf16.mxu1 %v19495_v0 }
0x1076   : > { %18172 = vmatpush3.bf16.msra.mxu1 %v19176_v44 }
0x1077   : > { %18173 = vmatprep.subr.bf16.mxu1 %v19495_v0  ;;  %v22754_v0 = vadd.f32 %v14749_v28, %v14676_v7 }
0x107a   : > { %18174 = vmatpush3.bf16.msra.mxu1 %v19177_v1 }
0x107b   : > { %v22756_v40 = vpop.f32.mrb[140].mxu0 }
0x107c   : > { %v18141_v34 = vpop.f32.mrb[141].mxu0 }
0x107d   : > { %18176 = vmatmul.mubr.msk.bf16.vlgmr.msra.gmra.mrb[144].mxu1 %vm12936_vm12, %v15073_v53  ;;  %v14910_v39 = vpop.f32.mrb[142].mxu0 }
0x107e   : > { %v18142_v47 = vpop.f32.mrb[143].mxu0 }
0x108b   : > { %v22758_v62 = vpop.f32.mrb[144].mxu0 }
0x108c   : > { %v18165_v49 = vpop.f32.mrb[145].mxu0 }
0x108d   : > { %v15068_v12 = vpop.f32.mrb[146].mxu0 }
0x108e   : > { %v18166_v55 = vpop.f32.mrb[147].mxu0 }
0x108f   : > { %19333 = shalt.err (!%p19330_p0)
}
0x1090   : > { %s19334_s9 = scalar_lea.hbm %s22768_s6, 256  ;;  %s19338_s22 = scalar_lea.hbm %s23024_s3, 512 }
0x1091   : > { %p19335_p10 = scmp.ne.s32.totalorder %s22768_s6, %s19334_s9  ;;  %p19339_p4 = scmp.lt.u32.totalorder %s22768_s6, %s23024_s3 }
0x1092   : > { %p19340_p12 = scmp.lt.u32.totalorder %s19338_s22, %s19334_s9  ;;  %p19342_p8 = scmp.lt.u32.totalorder %s19334_s9, %s22768_s6 }
0x1093   : > { %p19336_p2 = pnand %p19335_p10, %p23025_p11 }
0x1094   : > { %p19341_p7 = por %p19340_p12, %p19339_p4 }
0x1095   : > { %p19337_p3 = pneg %p19336_p2 }
0x1096   : > { %p19343_p13 = por %p19342_p8, %p19341_p7 }
0x1098   : > { %p19344_p1 = pnand %p19343_p13, %p19337_p3 }
0x109a   : > { %19347 = shalt.err (!%p19344_p1)
}
0x109b   : > { %s19499_s0 = smov 64   ;;  %s19500_s29 = smov 4  }
0x109c   : > { %18867 = dma.vmem_to_hbm [thread:$0]  (%p23025_p11), %s22761_s23, 256, %s22768_s6, %s22770_s1, %s19499_s0, %s19499_s0, %s19500_s29  }
0x109d   : > { %s16259_s5 = sshll.u32 %s19659_s7, 10  ;;  %s15193_s20 = sshll.u32 %s21917_s13, 4  ;;  %s22801_s20 = int_to_ptr.vmem [resolvable:$true] %s15193_s20 }
0x109e   : > { %s23026_s9 = sld [smem:[#allocation46_spill]]  ;;  %s15163_s3 = scalar_lea.sflag [#allocation5], %s21906_s26 }
0x109f   : > { %s19348_s8 = scalar_lea.vmem %s22801_s20, 1024  ;;  %s19501_s10 = smov [#allocation12]  }
0x10a0   : > { %p19349_p6 = scmp.ne.s32.totalorder %s22801_s20, %s19348_s8  ;;  %s19352_s23 = sshll.u32 %s19501_s10, 4  ;;  %s19353_s23 = int_to_ptr.vmem [resolvable:$false] %s19352_s23 }
0x10a1   : > { %s19354_s13 = scalar_lea.vmem %s19353_s23, 2048  ;;  %p19355_p0 = scmp.lt.s32.totalorder %s22801_s20, %s19353_s23 }
0x10a2   : > { %p19350_p9 = pnand %p19349_p6, %p23025_p11  ;;  %p19356_p10 = scmp.lt.s32.totalorder %s19354_s13, %s19348_s8 }
0x10a4   : > { %s22799_s30 = scalar_lea.hbm %s23026_s9, %s16259_s5  ;;  %p19351_p5 = pneg %p19350_p9 }
0x10a5   : > { %p19357_p2 = por %p19356_p10, %p19355_p0 }
0x10a7   : > { %p19358_p3 = pnand %p19357_p2, %p19351_p5 }
0x10a9   : > { %19361 = shalt.err (!%p19358_p3)
}
0x10aa   : > { %s19362_s6 = scalar_lea.hbm %s22799_s30, 1024  ;;  %s19366_s10 = scalar_lea.hbm %s23026_s9, 2048 }
0x10ab   : > { %p19363_p4 = scmp.ne.s32.totalorder %s22799_s30, %s19362_s6  ;;  %p19367_p8 = scmp.lt.u32.totalorder %s22799_s30, %s23026_s9 }
0x10ac   : > { %p19368_p13 = scmp.lt.u32.totalorder %s19366_s10, %s19362_s6  ;;  %p19370_p6 = scmp.lt.u32.totalorder %s19362_s6, %s22799_s30 }
0x10ad   : > { %p19364_p12 = pnand %p19363_p4, %p23025_p11 }
0x10ae   : > { %p19369_p1 = por %p19368_p13, %p19367_p8 }
0x10af   : > { %p19365_p7 = pneg %p19364_p12 }
0x10b0   : > { %p19371_p9 = por %p19370_p6, %p19369_p1 }
0x10b2   : > { %p19372_p5 = pnand %p19371_p9, %p19365_p7 }
0x10b4   : > { %19375 = shalt.err (!%p19372_p5)
}
0x10b5   : > { %s19502_s8 = smov 128   ;;  %s19503_s24 = smov 8  }
0x10b6   : > { %18866 = dma.vmem_to_hbm [thread:$0]  (%p23025_p11), %s22801_s20, 1024, %s22799_s30, %s15163_s3, %s19502_s8, %s19502_s8, %s19503_s24  }
0x10b7   : > { %s16261_s23 = sshll.u32 %s19659_s7, 6  ;;  %s15225_s13 = sshll.u32 %s22640_s4, 4  ;;  %s22834_s13 = int_to_ptr.vmem [resolvable:$true] %s15225_s13 }
0x10b8   : > { %s23027_s6 = sld [smem:[#allocation48_spill]]  ;;  %s19376_s22 = scalar_lea.vmem %s22834_s13, 64 }
0x10b9   : > { %p19377_p0 = scmp.ne.s32.totalorder %s22834_s13, %s19376_s22  ;;  %s19504_s9 = smov [#allocation15]  }
0x10ba   : > { %s19380_s11 = sshll.u32 %s19504_s9, 4  ;;  %s19381_s11 = int_to_ptr.vmem [resolvable:$false] %s19380_s11 }
0x10bb   : > { %p19378_p10 = pnand %p19377_p0, %p23025_p11  ;;  %s19382_s3 = scalar_lea.vmem %s19381_s11, 128 }
0x10bc   : > { %p19383_p3 = scmp.lt.s32.totalorder %s22834_s13, %s19381_s11  ;;  %p19384_p4 = scmp.lt.s32.totalorder %s19382_s3, %s19376_s22 }
0x10bd   : > { %p19379_p2 = pneg %p19378_p10 }
0x10be   : > { %s23028_s10 = smov %s23027_s6  ;;  %s22832_s5 = scalar_lea.hbm %s23027_s6, %s16261_s23 }
0x10bf   : > { %p19385_p12 = por %p19384_p4, %p19383_p3 }
0x10c1   : > { %p19386_p7 = pnand %p19385_p12, %p19379_p2 }
0x10c3   : > { %19389 = shalt.err (!%p19386_p7)
}
0x10c4   : > { %s19390_s4 = scalar_lea.hbm %s22832_s5, 64  ;;  %s19394_s9 = scalar_lea.hbm %s23028_s10, 128 }
0x10c5   : > { %p19391_p8 = scmp.ne.s32.totalorder %s22832_s5, %s19390_s4  ;;  %p19395_p6 = scmp.lt.u32.totalorder %s22832_s5, %s23028_s10 }
0x10c6   : > { %p19396_p9 = scmp.lt.u32.totalorder %s19394_s9, %s19390_s4  ;;  %p19398_p0 = scmp.lt.u32.totalorder %s19390_s4, %s22832_s5 }
0x10c7   : > { %p19392_p13 = pnand %p19391_p8, %p23025_p11 }
0x10c8   : > { %p19397_p5 = por %p19396_p9, %p19395_p6 }
0x10c9   : > { %p19393_p1 = pneg %p19392_p13 }
0x10ca   : > { %p19399_p10 = por %p19398_p0, %p19397_p5 }
0x10cc   : > { %p19400_p2 = pnand %p19399_p10, %p19393_p1 }
0x10ce   : > { %19403 = shalt.err (!%p19400_p2)
}
0x10cf   : > { %s19505_s24 = smov 32   ;;  %s19506_s23 = smov 2  }
0x10d0   : > { %18868 = dma.vmem_to_hbm [thread:$0]  (%p23025_p11), %s22834_s13, 64, %s22832_s5, %s22770_s1, %s19505_s24, %s19505_s24, %s19506_s23  }
0x10d1   : > { %s23029_s13 = sld [smem:[#allocation45_spill]]  ;;  %s16254_s29 = sshll.u32 %s19659_s7, 4 }
0x10d2   : > { %s864_s6 = scalar_lea.vmem [#allocation16], %s21906_s26  ;;  %s23030_s4 = sld [smem:[#allocation49_spill]] }
0x10d3   : > { %s15241_s5 = sshll.u32 %s864_s6, 4  ;;  %s15178_s30 = scalar_lea.sflag [#allocation17], %s21906_s26  ;;  %s22871_s5 = int_to_ptr.vmem [resolvable:$true] %s15241_s5 }
0x10d4   : > { %s19404_s9 = scalar_lea.vmem %s22871_s5, 16  ;;  %s19507_s7 = smov [#allocation16]  }
0x10d5   : > { %p19405_p3 = scmp.ne.s32.totalorder %s22871_s5, %s19404_s9  ;;  %s19408_s8 = sshll.u32 %s19507_s7, 4  ;;  %s19409_s8 = int_to_ptr.vmem [resolvable:$false] %s19408_s8 }
0x10d6   : > { %s19410_s11 = scalar_lea.vmem %s19409_s8, 32  ;;  %p19411_p7 = scmp.lt.s32.totalorder %s22871_s5, %s19409_s8 }
0x10d7   : > { %v15151_v25 = vld [vmem:[%s23029_s13] sm:$0x1]  ;;  %p19406_p4 = pnand %p19405_p3, %p23025_p11  ;;  %p19412_p8 = scmp.lt.s32.totalorder %s19410_s11, %s19404_s9 }
0x10d8   : > { %s22869_s20 = scalar_lea.hbm %s23030_s4, %s16254_s29 }
0x10d9   : > { %p19407_p12 = pneg %p19406_p4  ;;  %p19413_p13 = por %p19412_p8, %p19411_p7 }
0x10db   : > { %p19414_p1 = pnand %p19413_p13, %p19407_p12 }
0x1130   : > { %v14828_v51 = vpop.f32.mrb[136].mxu1 }
0x1131   : > { %v14834_v21 = vadd.f32 %v14828_v51, %v22754_v0  ;;  %v18129_v2 = vpop.f32.mrb[137].mxu1 }
0x1132   : > { %v14831_v13 = vpop.f32.mrb[138].mxu1 }
0x1133   : > { %v14913_v29 = vadd.f32 %v22756_v40, %v14834_v21  ;;  %v18130_v9 = vpop.f32.mrb[139].mxu1 }
0x1140   : > { %v14986_v10 = vpop.f32.mrb[140].mxu1 }
0x1141   : > { %v14992_v4 = vadd.f32 %v14986_v10, %v14913_v29  ;;  %v18153_v16 = vpop.f32.mrb[141].mxu1 }
0x1142   : > { %v14989_v60 = vpop.f32.mrb[142].mxu1 }
0x1143   : > { %v15071_v63 = vadd.f32 %v22758_v62, %v14992_v4  ;;  %v18154_v38 = vpop.f32.mrb[143].mxu1 }
0x1150   : > { %v15144_v24 = vpop.f32.mrb[144].mxu1 }
0x1151   : > { %v15150_v32 = vadd.f32 %v15144_v24, %v15071_v63  ;;  %v18177_v48 = vpop.f32.mrb[145].mxu1 }
0x1152   : > { %v15147_v36 = vpop.f32.mrb[146].mxu1 }
0x1153   : > { %v15152_v59 = vadd.f32 %v15151_v25, %v15150_v32  ;;  %v18178_v43 = vpop.f32.mrb[147].mxu1 }
0x1155   : > { %vm15153_vm6 = vcmp.gt.f32.partialorder %v15152_v59, 0.0  ;;  %v15154_v6 = vmul.f32 0.01, %v15152_v59 }
0x1157   : > { %v15155_v5 = vsel %vm15153_vm6, %v15152_v59, %v15154_v6 }
0x1158   : > { %15156 = vst.msk [vmem:[%s864_s6] sm:$0x1] %vm12155_vm1, %v15155_v5 }
0x1159   : > { %19417 = shalt.err (!%p19414_p1)
}
0x115a   : > { %s19418_s26 = scalar_lea.hbm %s22869_s20, 16  ;;  %s19422_s0 = scalar_lea.hbm %s23030_s4, 32 }
0x115b   : > { %p19419_p6 = scmp.ne.s32.totalorder %s22869_s20, %s19418_s26  ;;  %p19423_p0 = scmp.lt.u32.totalorder %s22869_s20, %s23030_s4 }
0x115c   : > { %p19424_p10 = scmp.lt.u32.totalorder %s19422_s0, %s19418_s26  ;;  %p19426_p3 = scmp.lt.u32.totalorder %s19418_s26, %s22869_s20 }
0x115d   : > { %p19420_p9 = pnand %p19419_p6, %p23025_p11 }
0x115e   : > { %p19425_p2 = por %p19424_p10, %p19423_p0 }
0x115f   : > { %p19421_p5 = pneg %p19420_p9 }
0x1160   : > { %p19427_p4 = por %p19426_p3, %p19425_p2 }
0x1162   : > { %p19428_p12 = pnand %p19427_p4, %p19421_p5 }
0x1164   : > { %19431 = shalt.err (!%p19428_p12)
}
0x1165   : > { %18869 = dma.vmem_to_hbm [thread:$0]  (%p23025_p11), %s22871_s5, 16, %s22869_s20, %s15178_s30  }
0x1166 PF: > { %s23031_s29 = sld [smem:[#allocation26_spill]]  ;;  %s23032_s6 = sld [smem:[#allocation24_spill]] }
0x1167   : > { %s23033_s22 = sld [smem:[#allocation30_spill]] }
0x116c   : > { %p18913_p7 = scmp.ge.s32.totalorder %s23031_s29, 2  ;;  %s15261_s3 = sand.u32 1, %s23032_s6  }
0x116d   : > { %p23034_p8 = scmp.ne.s32.totalorder %s23033_s22, 0  ;;  %s15262_s9 = scalar_lea.sflag [#allocation5], %s15261_s3 }
0x116f   : > { %p18891_p13 = pnand %p18913_p7, %p23034_p8 }
0x1171   : > { %19461 = dma.done.wait (!%p18891_p13), %s15262_s9, 1024  }
0x1172   : > { %19463 = vsyncadd (!%p18891_p13), %s15262_s9, 4294966272  ;;  %s23035_s7 = sadd.s32 4294967294, %s23031_s29  }
0x1173   : > { %s15270_s8 = sand.u32 1, %s23035_s7  }
0x1174   : > { %s15271_s11 = scalar_lea.sflag [#allocation14], %s15270_s8 }
0x1175   : > { %19465 = dma.done.wait (!%p18891_p13), %s15271_s11, 320  }
0x1176   : > { %19467 = vsyncadd (!%p18891_p13), %s15271_s11, 4294966976  ;;  %s15289_s18 = scalar_lea.sflag [#allocation17], %s15261_s3 }
0x1177   : > { %19469 = dma.done.wait (!%p18891_p13), %s15289_s18, 16  }
0x1178   : > { %19471 = vsyncadd (!%p18891_p13), %s15289_s18, 4294967280  ;;  %s23036_s30 = sld [smem:[#allocation27_spill]]  ;;  %s23037_s5 = sld [smem:[#allocation25_spill]] }
0x1179   : > { %s23038_s6 = sld [smem:[#allocation28_spill]]  ;;  %s23039_s29 = smov %s19478_s2 }
0x117e   : > { %p45_p11 = scmp.ge.s32.totalorder %s23036_s30, 4   ;;  %s23040_s2 = smov %s23037_s5 }
0x1180   :  { %47 = sbr.rel (!%p45_p11) target bundleno = 30 (0x1e), region = 307 }
0x1187   :  { %15293 = vsyncpa [#allocation4], 1 }
0x1188   :  { %15295 = vsyncpa [#allocation4 + $0x1], 1 }
0x1189   :  { %15296 = vsyncpa [#allocation7], 1 }
0x118a   :  { %15297 = vsyncpa [#allocation10], 1 }
0x118b   :  { %15298 = vsyncpa [#allocation5], 1 }
0x118c   :  { %15300 = vsyncpa [#allocation5 + $0x1], 1 }
0x118d   :  { %15301 = vsyncpa [#allocation14], 1 }
0x118e   :  { %15303 = vsyncpa [#allocation14 + $0x1], 1 }
0x118f   :  { %15304 = vsyncpa [#allocation17], 1 }
0x1190   :  { %15306 = vsyncpa [#allocation17 + $0x1], 1 }

</bundles_post_ra>
